<compile_context>
chip_gen: v7x
topology: tpu7x:2x2x1
jax: 0.10.0
libtpu: 0.0.40
codegen_flags: <defaults>
</compile_context>

<pallas_src>
import functools

import jax
import jax.numpy as jnp
from jax.experimental import pallas as pl
from jax.experimental.pallas import tpu as pltpu

TROW = 512    # point-axis tile for the HBM-bound per-point kernels
TA = 256      # query/key tile for the attention kernels (TROW % TA == 0)
BN_EPS = 1e-5


def _lrelu(x):
    return jnp.where(x > 0, x, 0.1 * x)


# ----------------------------------------------------------------------------
# Kernel 1: unary1 linear (pre-BN) + fused BN partial statistics
# ----------------------------------------------------------------------------
def _linear_stats_kernel(f_ref, w_ref, x_ref, stat_ref):
    x = jnp.dot(f_ref[...].astype(jnp.bfloat16), w_ref[...],
                preferred_element_type=jnp.float32)          # [TROW, C] f32
    x_ref[...] = x.astype(jnp.bfloat16)                      # bf16 storage (consumer is MXU)
    # BN partials from the f32 values (padded rows are exactly zero -> contribute nothing)
    stat_ref[0, 0:1, :] = jnp.sum(x, axis=0, keepdims=True)
    stat_ref[0, 1:2, :] = jnp.sum(x * x, axis=0, keepdims=True)


def linear_with_stats(f, w):
    n, cin = f.shape
    cout = w.shape[1]
    nt = n // TROW
    return pl.pallas_call(
        _linear_stats_kernel,
        out_shape=(jax.ShapeDtypeStruct((n, cout), jnp.bfloat16),
                   jax.ShapeDtypeStruct((nt, 2, cout), jnp.float32)),
        grid=(nt,),
        in_specs=[pl.BlockSpec((TROW, cin), lambda i: (i, 0)),
                  pl.BlockSpec((cin, cout), lambda i: (0, 0))],
        out_specs=(pl.BlockSpec((TROW, cout), lambda i: (i, 0)),
                   pl.BlockSpec((1, 2, cout), lambda i: (i, 0, 0))),
        compiler_params=pltpu.CompilerParams(dimension_semantics=("parallel",)),
    )(f, w)


# ----------------------------------------------------------------------------
# Kernel 2: BN-affine + LeakyReLU epilogue fused with one packed Q/K/V matmul
# ----------------------------------------------------------------------------
def _qkv_kernel(x_ref, sc_ref, sh_ref, w_ref, q_ref, k_ref, v_ref):
    c = q_ref.shape[1]
    x1 = _lrelu(x_ref[...].astype(jnp.float32) * sc_ref[...] + sh_ref[...])
    qkv = jnp.dot(x1.astype(jnp.bfloat16), w_ref[...],
                  preferred_element_type=jnp.float32)        # [TROW, 3C]
    q_ref[...] = qkv[:, :c].astype(jnp.bfloat16)
    k_ref[...] = qkv[:, c:2 * c].astype(jnp.bfloat16)
    v_ref[...] = qkv[:, 2 * c:].astype(jnp.bfloat16)


def qkv_proj(x1pre, sc, sh, w_qkv):
    n, c = x1pre.shape
    shp = jax.ShapeDtypeStruct((n, c), jnp.bfloat16)
    spec_o = pl.BlockSpec((TROW, c), lambda i: (i, 0))
    return pl.pallas_call(
        _qkv_kernel,
        out_shape=(shp, shp, shp),
        grid=(n // TROW,),
        in_specs=[pl.BlockSpec((TROW, c), lambda i: (i, 0)),
                  pl.BlockSpec((1, c), lambda i: (0, 0)),
                  pl.BlockSpec((1, c), lambda i: (0, 0)),
                  pl.BlockSpec((c, 3 * c), lambda i: (0, 0))],
        out_specs=(spec_o, spec_o, spec_o),
        compiler_params=pltpu.CompilerParams(dimension_semantics=("parallel",)),
    )(x1pre, sc.reshape(1, c), sh.reshape(1, c), w_qkv)


# ----------------------------------------------------------------------------
# Kernel 3a: attention pass A - per-query-row logsumexp over keys (online, key-tiled)
# ----------------------------------------------------------------------------
def _attn_lse_kernel(q_ref, k_ref, lse_ref, m_sc, l_sc, *, n_valid, n_pad, ta):
    ki = pl.program_id(1)

    @pl.when(ki == 0)
    def _():
        m_sc[...] = jnp.full_like(m_sc, -jnp.inf)
        l_sc[...] = jnp.zeros_like(l_sc)

    e = jax.lax.dot_general(q_ref[...], k_ref[...], (((1,), (1,)), ((), ())),
                            preferred_element_type=jnp.float32)       # [ta, ta]
    if n_valid < n_pad:  # static: mask padded key columns out of the softmax stats
        col = ki * ta + jax.lax.broadcasted_iota(jnp.int32, e.shape, 1)
        e = jnp.where(col < n_valid, e, -1e30)

    m_prev = m_sc[...]
    m_new = jnp.maximum(m_prev, jnp.max(e, axis=-1, keepdims=True))
    p = jnp.exp(e - m_new)
    l_sc[...] = jnp.exp(m_prev - m_new) * l_sc[...] + jnp.sum(p, axis=-1, keepdims=True)
    m_sc[...] = m_new

    @pl.when(ki == pl.num_programs(1) - 1)
    def _():
        lse_ref[...] = m_sc[...] + jnp.log(l_sc[...])


def attn_lse(q, k, n_valid):
    n_pad, c = q.shape
    nt = n_pad // TA
    return pl.pallas_call(
        functools.partial(_attn_lse_kernel, n_valid=n_valid, n_pad=n_pad, ta=TA),
        out_shape=jax.ShapeDtypeStruct((n_pad, 1), jnp.float32),
        grid=(nt, nt),
        in_specs=[pl.BlockSpec((TA, c), lambda qi, ki: (qi, 0)),
                  pl.BlockSpec((TA, c), lambda qi, ki: (ki, 0))],
        out_specs=pl.BlockSpec((TA, 1), lambda qi, ki: (qi, 0)),
        scratch_shapes=[pltpu.VMEM((TA, 1), jnp.float32),
                        pltpu.VMEM((TA, 1), jnp.float32)],
        compiler_params=pltpu.CompilerParams(
            dimension_semantics=("parallel", "arbitrary")),
    )(q, k)


# ----------------------------------------------------------------------------
# Kernel 3b: attention pass B - per key tile (parallel) accumulate S^T @ [V | 1]
#            over query tiles (arbitrary); normalize in the last-step epilogue.
# ----------------------------------------------------------------------------
def _attn_out_kernel(q_ref, k_ref, v_ref, lse_ref, z_ref, acc_sc, vext_sc,
                     *, n_valid, n_pad, ta):
    ki = pl.program_id(0)
    qi = pl.program_id(1)
    c = v_ref.shape[1]

    @pl.when(qi == 0)
    def _():
        acc_sc[...] = jnp.zeros_like(acc_sc)
        vext_sc[:, c:] = jnp.ones((ta, 128), jnp.bfloat16)   # ones block -> free column sums

    vext_sc[:, :c] = v_ref[...]

    e = jax.lax.dot_general(q_ref[...], k_ref[...], (((1,), (1,)), ((), ())),
                            preferred_element_type=jnp.float32)       # [ta(q), ta(k)]
    s = jnp.exp(e - lse_ref[...])                                      # exact softmax rows
    if n_valid < n_pad:  # static: padded query rows and padded key columns contribute zero
        row = qi * ta + jax.lax.broadcasted_iota(jnp.int32, s.shape, 0)
        col = ki * ta + jax.lax.broadcasted_iota(jnp.int32, s.shape, 1)
        s = jnp.where((row < n_valid) & (col < n_valid), s, 0.0)

    # one MXU pass: numerator (S^T V) and denominator (column sums) together
    acc_sc[...] += jax.lax.dot_general(s.astype(jnp.bfloat16), vext_sc[...],
                                       (((0,), (0,)), ((), ())),
                                       preferred_element_type=jnp.float32)

    @pl.when(qi == pl.num_programs(1) - 1)
    def _():
        acc = acc_sc[...]
        inv = pl.reciprocal(1e-9 + acc[:, c:c + 1], approx=False)      # [ta, 1]
        z_ref[...] = acc[:, :c] * inv


def attn_out(q, k, v, lse, n_valid):
    n_pad, c = q.shape
    nt = n_pad // TA
    return pl.pallas_call(
        functools.partial(_attn_out_kernel, n_valid=n_valid, n_pad=n_pad, ta=TA),
        out_shape=jax.ShapeDtypeStruct((n_pad, c), jnp.float32),
        grid=(nt, nt),
        in_specs=[pl.BlockSpec((TA, c), lambda ki, qi: (qi, 0)),    # Q  (query tile)
                  pl.BlockSpec((TA, c), lambda ki, qi: (ki, 0)),    # K  (key tile)
                  pl.BlockSpec((TA, c), lambda ki, qi: (qi, 0)),    # V  (query tile)
                  pl.BlockSpec((TA, 1), lambda ki, qi: (qi, 0))],   # lse
        out_specs=pl.BlockSpec((TA, c), lambda ki, qi: (ki, 0)),
        scratch_shapes=[pltpu.VMEM((TA, c + 128), jnp.float32),     # [num | den] accumulator
                        pltpu.VMEM((TA, c + 128), jnp.bfloat16)],   # [V | 1] staging
        compiler_params=pltpu.CompilerParams(
            dimension_semantics=("parallel", "arbitrary")),
    )(q, k, v, lse)


# ----------------------------------------------------------------------------
# Kernel 4: (features - Z) fused with trans_conv1, trans_conv2 + BN partial statistics
# ----------------------------------------------------------------------------
def _resid_trans_kernel(f_ref, z_ref, w1_ref, w2_ref, t_ref, stat_ref):
    r = f_ref[...] - z_ref[...]
    t1 = jnp.dot(r.astype(jnp.bfloat16), w1_ref[...], preferred_element_type=jnp.float32)
    t2 = jnp.dot(t1.astype(jnp.bfloat16), w2_ref[...], preferred_element_type=jnp.float32)
    t_ref[...] = t2
    stat_ref[0, 0:1, :] = jnp.sum(t2, axis=0, keepdims=True)
    stat_ref[0, 1:2, :] = jnp.sum(t2 * t2, axis=0, keepdims=True)


def resid_trans(f, z, w1, w2):
    n, c = f.shape
    nt = n // TROW
    return pl.pallas_call(
        _resid_trans_kernel,
        out_shape=(jax.ShapeDtypeStruct((n, c), jnp.float32),
                   jax.ShapeDtypeStruct((nt, 2, c), jnp.float32)),
        grid=(nt,),
        in_specs=[pl.BlockSpec((TROW, c), lambda i: (i, 0)),
                  pl.BlockSpec((TROW, c), lambda i: (i, 0)),
                  pl.BlockSpec((c, c), lambda i: (0, 0)),
                  pl.BlockSpec((c, c), lambda i: (0, 0))],
        out_specs=(pl.BlockSpec((TROW, c), lambda i: (i, 0)),
                   pl.BlockSpec((1, 2, c), lambda i: (i, 0, 0))),
        compiler_params=pltpu.CompilerParams(dimension_semantics=("parallel",)),
    )(f, z, w1, w2)


# ----------------------------------------------------------------------------
# Kernel 5: after_norm (BN affine) + LeakyReLU + identity shortcut + LeakyReLU
# ----------------------------------------------------------------------------
def _bn_act_res_kernel(t_ref, f_ref, sc_ref, sh_ref, o_ref):
    y = _lrelu(t_ref[...] * sc_ref[...] + sh_ref[...])
    o_ref[...] = _lrelu(y + f_ref[...])


def bn_act_residual(t, f, sc, sh):
    n, c = t.shape
    return pl.pallas_call(
        _bn_act_res_kernel,
        out_shape=jax.ShapeDtypeStruct((n, c), jnp.float32),
        grid=(n // TROW,),
        in_specs=[pl.BlockSpec((TROW, c), lambda i: (i, 0)),
                  pl.BlockSpec((TROW, c), lambda i: (i, 0)),
                  pl.BlockSpec((1, c), lambda i: (0, 0)),
                  pl.BlockSpec((1, c), lambda i: (0, 0))],
        out_specs=pl.BlockSpec((TROW, c), lambda i: (i, 0)),
        compiler_params=pltpu.CompilerParams(dimension_semantics=("parallel",)),
    )(t, f, sc.reshape(1, c), sh.reshape(1, c))


# ----------------------------------------------------------------------------
# Glue: training-mode BatchNorm1d folded into scale/shift from fused per-tile partial sums.
# ----------------------------------------------------------------------------
def _affine_from_stats(stats, n_valid, gamma, beta, eps=BN_EPS):
    tot = jnp.sum(stats, axis=0)                    # (2, C): [sum, sum of squares]
    mean = tot[0] / n_valid
    var = jnp.maximum(tot[1] / n_valid - mean * mean, 0.0)   # biased var (BN training)
    sc = gamma / jnp.sqrt(var + eps)
    return sc, beta - mean * sc


# ----------------------------------------------------------------------------
# Full forward pass
# ----------------------------------------------------------------------------
def sa_module_pct_forward(features, params):
    n, c_in = features.shape          # n is static (comes from the array shape)
    c = params["w_unary1"].shape[1]
    # `features - x` in the module only broadcasts when in_dim == out_dim.
    assert c_in == c, "SAmodule_pct forward requires in_dim == out_dim"

    n_pad = ((n + TROW - 1) // TROW) * TROW
    f = jnp.pad(features, ((0, n_pad - n), (0, 0))) if n_pad != n else features

    # unary1: Linear(no bias) -> BN1 (training stats, fused partials) -> LeakyReLU(0.1)
    x1pre, stat1 = linear_with_stats(f, params["w_unary1"])          # bf16 [n_pad, C]
    sc1, sh1 = _affine_from_stats(stat1, n, params["g_bn1"], params["b_bn1"])

    # q/k/v 1x1 convs, packed into one matmul, with BN affine + LeakyReLU fused in
    w_qkv = jnp.concatenate([params["w_q"], params["w_k"], params["w_v"]], axis=1)
    q, k, v = qkv_proj(x1pre, sc1, sh1, w_qkv)                       # bf16 [n_pad, C] each

    # offset attention: softmax over keys, L1 renormalization over queries, Z = A^T V
    lse = attn_lse(q, k, n)                                          # [n_pad, 1] f32
    z = attn_out(q, k, v, lse, n)                                    # [n_pad, C] f32

    # (features - Z) -> trans_conv1 -> trans_conv2, with BN2 partials fused
    t2, stat2 = resid_trans(f, z, params["w_t1"], params["w_t2"])    # [n_pad, C] f32
    sc2, sh2 = _affine_from_stats(stat2, n, params["g_bn2"], params["b_bn2"])

    # after_norm + LeakyReLU + identity shortcut + LeakyReLU
    out = bn_act_residual(t2, f, sc2, sh2)                           # [n_pad, C] f32
    return out[:n]


# ----------------------------------------------------------------------------
# Pure-JAX reference (transliteration of the PyTorch forward, with the same bf16
# rounding points as the kernels: bf16 matmul operands, bf16-stored x1pre / q / k / v / S).
# ----------------------------------------------------------------------------
def reference_forward(features, params):
    f32, bf16 = jnp.float32, jnp.bfloat16

    def lrelu(v):
        return jnp.where(v > 0, v, 0.1 * v)

    def mm(a, b):
        return jnp.dot(a.astype(bf16), b.astype(bf16), preferred_element_type=f32)

    def bn_affine(x, g, b):
        mu = x.mean(axis=0)
        var = x.var(axis=0)                       # biased, matches BN training normalization
        sc = g / jnp.sqrt(var + BN_EPS)
        return sc, b - mu * sc

    # unary1 (stats from the f32 matmul output; affine applied to the bf16-stored value)
    x1pre = mm(features, params["w_unary1"])
    sc1, sh1 = bn_affine(x1pre, params["g_bn1"], params["b_bn1"])
    x1 = lrelu(x1pre.astype(bf16).astype(f32) * sc1 + sh1)
    # q/k/v
    q = mm(x1, params["w_q"]).astype(bf16)
    k = mm(x1, params["w_k"]).astype(bf16)
    v = mm(x1, params["w_v"]).astype(bf16)
    # energy, softmax over keys, renormalize over queries (division re-associated after the
    # matmul, exactly as the kernel does: Z = (S^T V) / (1e-9 + colsum(S)))
    e = jnp.dot(q, k.T, preferred_element_type=f32)
    s = jax.nn.softmax(e, axis=-1)
    sb = s.astype(bf16)
    num = jnp.dot(sb.T, v, preferred_element_type=f32)
    den = jnp.sum(sb.astype(f32), axis=0)
    z = num / (1e-9 + den)[:, None]
    # offset + trans convs + after_norm + LeakyReLU + shortcut + LeakyReLU
    r = features - z
    t2 = mm(mm(r, params["w_t1"]), params["w_t2"])
    sc2, sh2 = bn_affine(t2, params["g_bn2"], params["b_bn2"])
    out = lrelu(t2 * sc2 + sh2)
    return lrelu(out + features)


# ----------------------------------------------------------------------------
# Deterministic parameter init (shapes from the module __init__; weights stored bf16,
# in matmul-ready [C_in, C_out] layout == torch weight.T / conv weight[:, :, 0].T)
# ----------------------------------------------------------------------------
def init_params(key, dim):
    ks = jax.random.split(key, 6)

    def kaiming_uniform(k, shape, fan_in):
        bound = 1.0 / jnp.sqrt(jnp.float32(fan_in))
        return jax.random.uniform(k, shape, jnp.float32, -bound, bound)

    def w(k):
        return kaiming_uniform(k, (dim, dim), dim).astype(jnp.bfloat16)

    return {
        "w_unary1": w(ks[0]),
        "g_bn1": jnp.ones((dim,), jnp.float32),
        "b_bn1": jnp.zeros((dim,), jnp.float32),
        "w_q": w(ks[1]),
        "w_k": w(ks[2]),
        "w_v": w(ks[3]),
        "w_t1": w(ks[4]),
        "w_t2": w(ks[5]),
        "g_bn2": jnp.ones((dim,), jnp.float32),
        "b_bn2": jnp.zeros((dim,), jnp.float32),
    }


if __name__ == "__main__":
    # Small shapes consistent with the module's forward: in_dim == out_dim (required by
    # `features - x`), C=128 keeps every tile lane-dense, N=200 exercises the pad+mask path.
    N, C = 200, 128
    key = jax.random.PRNGKey(0)
    k_feat, k_par = jax.random.split(key)
    features = jax.random.normal(k_feat, (N, C), jnp.float32)
    params = init_params(k_par, C)

    out = jax.jit(sa_module_pct_forward)(features, params)
    out = jax.block_until_ready(out)

    ref = reference_forward(features, params)
    assert out.shape == (N, C) and out.dtype == jnp.float32
    max_err = float(jnp.max(jnp.abs(out - ref)))
    # Both paths share the same bf16 rounding points; residual mismatch comes only from
    # accumulation order / rare 1-ULP bf16 rounding flips, far below 1e-2.
    assert jnp.allclose(out, ref, rtol=1e-2, atol=1e-2), max_err

    print("KERNEL_OK")
</pallas_src>

<mosaic_0001>
module attributes {stable_mosaic.version = 11 : i64} {
  func.func @_linear_stats_kernel(%arg0: i32, %arg1: memref<512x128xf32, #tpu.memory_space<vmem>>, %arg2: memref<128x128xbf16, #tpu.memory_space<vmem>>, %arg3: memref<512x128xbf16, #tpu.memory_space<vmem>>, %arg4: memref<1x2x128xf32, #tpu.memory_space<vmem>>) attributes {dimension_semantics = [#tpu.dimension_semantics<parallel>], iteration_bounds = array<i64: 1>, scalar_prefetch = 0 : i64, scratch_operands = 0 : i64, tpu.core_type = #tpu.core_type<tc>, window_params = [{transform_indices = @transform_0, window_bounds = array<i64: 512, 128>}, {pipeline_mode = #tpu.pipeline_mode<synchronous>, transform_indices = @transform_1, window_bounds = array<i64: 128, 128>}, {transform_indices = @transform_2, window_bounds = array<i64: 512, 128>}, {transform_indices = @transform_3, window_bounds = array<i64: 1, 2, 128>}]} {
    %c0 = arith.constant 0 : index
    %c0_0 = arith.constant 0 : index
    %0 = vector.load %arg1[%c0, %c0_0] : memref<512x128xf32, #tpu.memory_space<vmem>>, vector<512x128xf32>
    %1 = arith.truncf %0 : vector<512x128xf32> to vector<512x128xbf16>
    %c0_1 = arith.constant 0 : index
    %c0_2 = arith.constant 0 : index
    %2 = vector.load %arg2[%c0_1, %c0_2] : memref<128x128xbf16, #tpu.memory_space<vmem>>, vector<128x128xbf16>
    %cst = arith.constant dense<0.000000e+00> : vector<512x128xf32>
    %3 = tpu.matmul %1, %2, %cst {dimension_numbers = #tpu.dot_dimension_numbers<[1], [0], [0], [1], [0, 0, 1, 1], [], []>} : vector<512x128xbf16>, vector<128x128xbf16>, vector<512x128xf32> -> vector<512x128xf32>
    %4 = arith.truncf %3 : vector<512x128xf32> to vector<512x128xbf16>
    %c0_3 = arith.constant 0 : index
    %c0_4 = arith.constant 0 : index
    %5 = vector.load %arg3[%c0_3, %c0_4] : memref<512x128xbf16, #tpu.memory_space<vmem>>, vector<512x128xbf16>
    tpu.vector_store %arg3[%c0_3, %c0_4], %4 {strides = array<i32>} : memref<512x128xbf16, #tpu.memory_space<vmem>>, vector<512x128xbf16>,
    %cst_5 = arith.constant dense<0.000000e+00> : vector<128xf32>
    %6 = vector.multi_reduction <add>, %3, %cst_5 [0] : vector<512x128xf32> to vector<128xf32>
    %7 = vector.shape_cast %6 : vector<128xf32> to vector<1x128xf32>
    %c0_6 = arith.constant 0 : index
    %c0_7 = arith.constant 0 : index
    %c0_8 = arith.constant 0 : index
    %8 = vector.load %arg4[%c0_6, %c0_7, %c0_8] : memref<1x2x128xf32, #tpu.memory_space<vmem>>, vector<1x1x128xf32>
    %9 = vector.shape_cast %8 : vector<1x1x128xf32> to vector<1x128xf32>
    %10 = vector.shape_cast %7 : vector<1x128xf32> to vector<1x1x128xf32>
    tpu.vector_store %arg4[%c0_6, %c0_7, %c0_8], %10 {strides = array<i32>} : memref<1x2x128xf32, #tpu.memory_space<vmem>>, vector<1x1x128xf32>,
    %11 = arith.mulf %3, %3 : vector<512x128xf32>
    %cst_9 = arith.constant dense<0.000000e+00> : vector<128xf32>
    %12 = vector.multi_reduction <add>, %11, %cst_9 [0] : vector<512x128xf32> to vector<128xf32>
    %13 = vector.shape_cast %12 : vector<128xf32> to vector<1x128xf32>
    %c0_10 = arith.constant 0 : index
    %c1 = arith.constant 1 : index
    %c0_11 = arith.constant 0 : index
    %14 = vector.load %arg4[%c0_10, %c1, %c0_11] : memref<1x2x128xf32, #tpu.memory_space<vmem>>, vector<1x1x128xf32>
    %15 = vector.shape_cast %14 : vector<1x1x128xf32> to vector<1x128xf32>
    %16 = vector.shape_cast %13 : vector<1x128xf32> to vector<1x1x128xf32>
    tpu.vector_store %arg4[%c0_10, %c1, %c0_11], %16 {strides = array<i32>} : memref<1x2x128xf32, #tpu.memory_space<vmem>>, vector<1x1x128xf32>,
    return
  }
  func.func @transform_0(%arg0: i32) -> (i32, i32) {
    %c0_i32 = arith.constant 0 : i32
    %c0_i32_0 = arith.constant 0 : i32
    return %arg0, %c0_i32 : i32, i32
  }
  func.func @transform_1(%arg0: i32) -> (i32, i32) {
    %c0_i32 = arith.constant 0 : i32
    %c0_i32_0 = arith.constant 0 : i32
    %c0_i32_1 = arith.constant 0 : i32
    return %c0_i32, %c0_i32_0 : i32, i32
  }
  func.func @transform_2(%arg0: i32) -> (i32, i32) {
    %c0_i32 = arith.constant 0 : i32
    %c0_i32_0 = arith.constant 0 : i32
    return %arg0, %c0_i32 : i32, i32
  }
  func.func @transform_3(%arg0: i32) -> (i32, i32, i32) {
    %c0_i32 = arith.constant 0 : i32
    %c0_i32_0 = arith.constant 0 : i32
    %c0_i32_1 = arith.constant 0 : i32
    return %arg0, %c0_i32, %c0_i32_0 : i32, i32, i32
  }
}

module attributes {stable_mosaic.version = 11 : i64} {
  func.func @_qkv_kernel(%arg0: i32, %arg1: memref<512x128xbf16, #tpu.memory_space<vmem>>, %arg2: memref<1x128xf32, #tpu.memory_space<vmem>>, %arg3: memref<1x128xf32, #tpu.memory_space<vmem>>, %arg4: memref<128x384xbf16, #tpu.memory_space<vmem>>, %arg5: memref<512x128xbf16, #tpu.memory_space<vmem>>, %arg6: memref<512x128xbf16, #tpu.memory_space<vmem>>, %arg7: memref<512x128xbf16, #tpu.memory_space<vmem>>) attributes {dimension_semantics = [#tpu.dimension_semantics<parallel>], iteration_bounds = array<i64: 1>, scalar_prefetch = 0 : i64, scratch_operands = 0 : i64, tpu.core_type = #tpu.core_type<tc>, window_params = [{transform_indices = @transform_0, window_bounds = array<i64: 512, 128>}, {pipeline_mode = #tpu.pipeline_mode<synchronous>, transform_indices = @transform_1, window_bounds = array<i64: 1, 128>}, {pipeline_mode = #tpu.pipeline_mode<synchronous>, transform_indices = @transform_2, window_bounds = array<i64: 1, 128>}, {pipeline_mode = #tpu.pipeline_mode<synchronous>, transform_indices = @transform_3, window_bounds = array<i64: 128, 384>}, {transform_indices = @transform_4, window_bounds = array<i64: 512, 128>}, {transform_indices = @transform_5, window_bounds = array<i64: 512, 128>}, {transform_indices = @transform_6, window_bounds = array<i64: 512, 128>}]} {
    %c0 = arith.constant 0 : index
    %c0_0 = arith.constant 0 : index
    %0 = vector.load %arg1[%c0, %c0_0] : memref<512x128xbf16, #tpu.memory_space<vmem>>, vector<512x128xbf16>
    %1 = arith.extf %0 : vector<512x128xbf16> to vector<512x128xf32>
    %c0_1 = arith.constant 0 : index
    %c0_2 = arith.constant 0 : index
    %2 = vector.load %arg2[%c0_1, %c0_2] : memref<1x128xf32, #tpu.memory_space<vmem>>, vector<1x128xf32>
    %3 = vector.broadcast %2 : vector<1x128xf32> to vector<512x128xf32>
    %4 = arith.mulf %1, %3 : vector<512x128xf32>
    %c0_3 = arith.constant 0 : index
    %c0_4 = arith.constant 0 : index
    %5 = vector.load %arg3[%c0_3, %c0_4] : memref<1x128xf32, #tpu.memory_space<vmem>>, vector<1x128xf32>
    %6 = vector.broadcast %5 : vector<1x128xf32> to vector<512x128xf32>
    %7 = arith.addf %4, %6 : vector<512x128xf32>
    %cst = arith.constant 0.000000e+00 : f32
    %8 = vector.broadcast %cst : f32 to vector<512x128xf32>
    %9 = arith.cmpf ogt, %7, %8 : vector<512x128xf32>
    %cst_5 = arith.constant 1.000000e-01 : f32
    %10 = vector.broadcast %cst_5 : f32 to vector<512x128xf32>
    %11 = arith.mulf %10, %7 : vector<512x128xf32>
    %12 = arith.select %9, %7, %11 : vector<512x128xi1>, vector<512x128xf32>
    %13 = arith.truncf %12 : vector<512x128xf32> to vector<512x128xbf16>
    %c0_6 = arith.constant 0 : index
    %c0_7 = arith.constant 0 : index
    %14 = vector.load %arg4[%c0_6, %c0_7] : memref<128x384xbf16, #tpu.memory_space<vmem>>, vector<128x384xbf16>
    %cst_8 = arith.constant dense<0.000000e+00> : vector<512x384xf32>
    %15 = tpu.matmul %13, %14, %cst_8 {dimension_numbers = #tpu.dot_dimension_numbers<[1], [0], [0], [1], [0, 0, 1, 1], [], []>} : vector<512x128xbf16>, vector<128x384xbf16>, vector<512x384xf32> -> vector<512x384xf32>
    %16 = vector.extract_strided_slice %15 {offsets = [0, 0], sizes = [512, 128], strides = [1, 1]} : vector<512x384xf32> to vector<512x128xf32>
    %17 = arith.truncf %16 : vector<512x128xf32> to vector<512x128xbf16>
    %c0_9 = arith.constant 0 : index
    %c0_10 = arith.constant 0 : index
    %18 = vector.load %arg5[%c0_9, %c0_10] : memref<512x128xbf16, #tpu.memory_space<vmem>>, vector<512x128xbf16>
    tpu.vector_store %arg5[%c0_9, %c0_10], %17 {strides = array<i32>} : memref<512x128xbf16, #tpu.memory_space<vmem>>, vector<512x128xbf16>,
    %19 = vector.extract_strided_slice %15 {offsets = [0, 128], sizes = [512, 128], strides = [1, 1]} : vector<512x384xf32> to vector<512x128xf32>
    %20 = arith.truncf %19 : vector<512x128xf32> to vector<512x128xbf16>
    %c0_11 = arith.constant 0 : index
    %c0_12 = arith.constant 0 : index
    %21 = vector.load %arg6[%c0_11, %c0_12] : memref<512x128xbf16, #tpu.memory_space<vmem>>, vector<512x128xbf16>
    tpu.vector_store %arg6[%c0_11, %c0_12], %20 {strides = array<i32>} : memref<512x128xbf16, #tpu.memory_space<vmem>>, vector<512x128xbf16>,
    %22 = vector.extract_strided_slice %15 {offsets = [0, 256], sizes = [512, 128], strides = [1, 1]} : vector<512x384xf32> to vector<512x128xf32>
    %23 = arith.truncf %22 : vector<512x128xf32> to vector<512x128xbf16>
    %c0_13 = arith.constant 0 : index
    %c0_14 = arith.constant 0 : index
    %24 = vector.load %arg7[%c0_13, %c0_14] : memref<512x128xbf16, #tpu.memory_space<vmem>>, vector<512x128xbf16>
    tpu.vector_store %arg7[%c0_13, %c0_14], %23 {strides = array<i32>} : memref<512x128xbf16, #tpu.memory_space<vmem>>, vector<512x128xbf16>,
    return
  }
  func.func @transform_0(%arg0: i32) -> (i32, i32) {
    %c0_i32 = arith.constant 0 : i32
    %c0_i32_0 = arith.constant 0 : i32
    return %arg0, %c0_i32 : i32, i32
  }
  func.func @transform_1(%arg0: i32) -> (i32, i32) {
    %c0_i32 = arith.constant 0 : i32
    %c0_i32_0 = arith.constant 0 : i32
    %c0_i32_1 = arith.constant 0 : i32
    return %c0_i32, %c0_i32_0 : i32, i32
  }
  func.func @transform_2(%arg0: i32) -> (i32, i32) {
    %c0_i32 = arith.constant 0 : i32
    %c0_i32_0 = arith.constant 0 : i32
    %c0_i32_1 = arith.constant 0 : i32
    return %c0_i32, %c0_i32_0 : i32, i32
  }
  func.func @transform_3(%arg0: i32) -> (i32, i32) {
    %c0_i32 = arith.constant 0 : i32
    %c0_i32_0 = arith.constant 0 : i32
    %c0_i32_1 = arith.constant 0 : i32
    return %c0_i32, %c0_i32_0 : i32, i32
  }
  func.func @transform_4(%arg0: i32) -> (i32, i32) {
    %c0_i32 = arith.constant 0 : i32
    %c0_i32_0 = arith.constant 0 : i32
    return %arg0, %c0_i32 : i32, i32
  }
  func.func @transform_5(%arg0: i32) -> (i32, i32) {
    %c0_i32 = arith.constant 0 : i32
    %c0_i32_0 = arith.constant 0 : i32
    return %arg0, %c0_i32 : i32, i32
  }
  func.func @transform_6(%arg0: i32) -> (i32, i32) {
    %c0_i32 = arith.constant 0 : i32
    %c0_i32_0 = arith.constant 0 : i32
    return %arg0, %c0_i32 : i32, i32
  }
}

module attributes {stable_mosaic.version = 11 : i64} {
  func.func @_attn_lse_kernel(%arg0: i32, %arg1: i32, %arg2: memref<256x128xbf16, #tpu.memory_space<vmem>>, %arg3: memref<256x128xbf16, #tpu.memory_space<vmem>>, %arg4: memref<256x1xf32, #tpu.memory_space<vmem>>, %arg5: memref<256x1xf32, #tpu.memory_space<vmem>>, %arg6: memref<256x1xf32, #tpu.memory_space<vmem>>) attributes {dimension_semantics = [#tpu.dimension_semantics<parallel>, #tpu.dimension_semantics<arbitrary>], iteration_bounds = array<i64: 2, 2>, scalar_prefetch = 0 : i64, scratch_operands = 2 : i64, tpu.core_type = #tpu.core_type<tc>, window_params = [{transform_indices = @transform_0, window_bounds = array<i64: 256, 128>}, {transform_indices = @transform_1, window_bounds = array<i64: 256, 128>}, {transform_indices = @transform_2, window_bounds = array<i64: 256, 1>}]} {
    %c0_i32 = arith.constant 0 : i32
    %0 = arith.cmpi eq, %arg1, %c0_i32 : i32
    %1 = arith.extui %0 : i1 to i32
    %c0_i32_0 = arith.constant 0 : i32
    %2 = arith.cmpi ne, %1, %c0_i32_0 : i32
    scf.if %2 {
      %cst_16 = arith.constant 0xFF800000 : f32
      %33 = vector.broadcast %cst_16 : f32 to vector<256x1xf32>
      %c0_17 = arith.constant 0 : index
      %c0_18 = arith.constant 0 : index
      %34 = vector.load %arg5[%c0_17, %c0_18] : memref<256x1xf32, #tpu.memory_space<vmem>>, vector<256x1xf32>
      tpu.vector_store %arg5[%c0_17, %c0_18], %33 {strides = array<i32>} : memref<256x1xf32, #tpu.memory_space<vmem>>, vector<256x1xf32>,
      %cst_19 = arith.constant 0.000000e+00 : f32
      %35 = vector.broadcast %cst_19 : f32 to vector<256x1xf32>
      %c0_20 = arith.constant 0 : index
      %c0_21 = arith.constant 0 : index
      %36 = vector.load %arg6[%c0_20, %c0_21] : memref<256x1xf32, #tpu.memory_space<vmem>>, vector<256x1xf32>
      tpu.vector_store %arg6[%c0_20, %c0_21], %35 {strides = array<i32>} : memref<256x1xf32, #tpu.memory_space<vmem>>, vector<256x1xf32>,
    } else {
    }
    %c0 = arith.constant 0 : index
    %c0_1 = arith.constant 0 : index
    %3 = vector.load %arg2[%c0, %c0_1] : memref<256x128xbf16, #tpu.memory_space<vmem>>, vector<256x128xbf16>
    %c0_2 = arith.constant 0 : index
    %c0_3 = arith.constant 0 : index
    %4 = vector.load %arg3[%c0_2, %c0_3] : memref<256x128xbf16, #tpu.memory_space<vmem>>, vector<256x128xbf16>
    %cst = arith.constant dense<0.000000e+00> : vector<256x256xf32>
    %5 = tpu.matmul %3, %4, %cst {dimension_numbers = #tpu.dot_dimension_numbers<[1], [1], [0], [0], [0, 0, 1, 0], [], []>} : vector<256x128xbf16>, vector<256x128xbf16>, vector<256x256xf32> -> vector<256x256xf32>
    %c256_i32 = arith.constant 256 : i32
    %6 = arith.muli %arg1, %c256_i32 : i32
    %7 = tpu.iota {dimensions = array<i32: 1>} : vector<256x256xi32>
    %8 = vector.broadcast %6 : i32 to vector<256x256xi32>
    %9 = arith.addi %8, %7 : vector<256x256xi32>
    %c200_i32 = arith.constant 200 : i32
    %10 = vector.broadcast %c200_i32 : i32 to vector<256x256xi32>
    %11 = arith.cmpi slt, %9, %10 : vector<256x256xi32>
    %cst_4 = arith.constant -1.000000e+30 : f32
    %12 = vector.broadcast %cst_4 : f32 to vector<256x256xf32>
    %13 = arith.select %11, %5, %12 : vector<256x256xi1>, vector<256x256xf32>
    %c0_5 = arith.constant 0 : index
    %c0_6 = arith.constant 0 : index
    %14 = vector.load %arg5[%c0_5, %c0_6] : memref<256x1xf32, #tpu.memory_space<vmem>>, vector<256x1xf32>
    %cst_7 = arith.constant dense<0xFF800000> : vector<256xf32>
    %15 = vector.multi_reduction <maximumf>, %13, %cst_7 [1] : vector<256x256xf32> to vector<256xf32>
    %16 = vector.shape_cast %15 : vector<256xf32> to vector<256x1xf32>
    %17 = arith.maximumf %14, %16 : vector<256x1xf32>
    %18 = vector.broadcast %17 : vector<256x1xf32> to vector<256x256xf32>
    %19 = arith.subf %13, %18 : vector<256x256xf32>
    %20 = math.exp %19 : vector<256x256xf32>
    %21 = arith.subf %14, %17 : vector<256x1xf32>
    %22 = math.exp %21 : vector<256x1xf32>
    %c0_8 = arith.constant 0 : index
    %c0_9 = arith.constant 0 : index
    %23 = vector.load %arg6[%c0_8, %c0_9] : memref<256x1xf32, #tpu.memory_space<vmem>>, vector<256x1xf32>
    %24 = arith.mulf %22, %23 : vector<256x1xf32>
    %cst_10 = arith.constant dense<0.000000e+00> : vector<256xf32>
    %25 = vector.multi_reduction <add>, %20, %cst_10 [1] : vector<256x256xf32> to vector<256xf32>
    %26 = vector.shape_cast %25 : vector<256xf32> to vector<256x1xf32>
    %27 = arith.addf %24, %26 : vector<256x1xf32>
    %c0_11 = arith.constant 0 : index
    %c0_12 = arith.constant 0 : index
    %28 = vector.load %arg6[%c0_11, %c0_12] : memref<256x1xf32, #tpu.memory_space<vmem>>, vector<256x1xf32>
    tpu.vector_store %arg6[%c0_11, %c0_12], %27 {strides = array<i32>} : memref<256x1xf32, #tpu.memory_space<vmem>>, vector<256x1xf32>,
    %c0_13 = arith.constant 0 : index
    %c0_14 = arith.constant 0 : index
    %29 = vector.load %arg5[%c0_13, %c0_14] : memref<256x1xf32, #tpu.memory_space<vmem>>, vector<256x1xf32>
    tpu.vector_store %arg5[%c0_13, %c0_14], %17 {strides = array<i32>} : memref<256x1xf32, #tpu.memory_space<vmem>>, vector<256x1xf32>,
    %c1_i32 = arith.constant 1 : i32
    %30 = arith.cmpi eq, %arg1, %c1_i32 : i32
    %31 = arith.extui %30 : i1 to i32
    %c0_i32_15 = arith.constant 0 : i32
    %32 = arith.cmpi ne, %31, %c0_i32_15 : i32
    scf.if %32 {
      %c0_16 = arith.constant 0 : index
      %c0_17 = arith.constant 0 : index
      %33 = vector.load %arg5[%c0_16, %c0_17] : memref<256x1xf32, #tpu.memory_space<vmem>>, vector<256x1xf32>
      %c0_18 = arith.constant 0 : index
      %c0_19 = arith.constant 0 : index
      %34 = vector.load %arg6[%c0_18, %c0_19] : memref<256x1xf32, #tpu.memory_space<vmem>>, vector<256x1xf32>
      %35 = math.log %34 : vector<256x1xf32>
      %36 = arith.addf %33, %35 : vector<256x1xf32>
      %c0_20 = arith.constant 0 : index
      %c0_21 = arith.constant 0 : index
      %37 = vector.load %arg4[%c0_20, %c0_21] : memref<256x1xf32, #tpu.memory_space<vmem>>, vector<256x1xf32>
      tpu.vector_store %arg4[%c0_20, %c0_21], %36 {strides = array<i32>} : memref<256x1xf32, #tpu.memory_space<vmem>>, vector<256x1xf32>,
    } else {
    }
    return
  }
  func.func @transform_0(%arg0: i32, %arg1: i32) -> (i32, i32) {
    %c0_i32 = arith.constant 0 : i32
    %c0_i32_0 = arith.constant 0 : i32
    return %arg0, %c0_i32 : i32, i32
  }
  func.func @transform_1(%arg0: i32, %arg1: i32) -> (i32, i32) {
    %c0_i32 = arith.constant 0 : i32
    %c0_i32_0 = arith.constant 0 : i32
    return %arg1, %c0_i32 : i32, i32
  }
  func.func @transform_2(%arg0: i32, %arg1: i32) -> (i32, i32) {
    %c0_i32 = arith.constant 0 : i32
    %c0_i32_0 = arith.constant 0 : i32
    return %arg0, %c0_i32 : i32, i32
  }
}

module attributes {stable_mosaic.version = 11 : i64} {
  func.func @_attn_out_kernel(%arg0: i32, %arg1: i32, %arg2: memref<256x128xbf16, #tpu.memory_space<vmem>>, %arg3: memref<256x128xbf16, #tpu.memory_space<vmem>>, %arg4: memref<256x128xbf16, #tpu.memory_space<vmem>>, %arg5: memref<256x1xf32, #tpu.memory_space<vmem>>, %arg6: memref<256x128xf32, #tpu.memory_space<vmem>>, %arg7: memref<256x256xf32, #tpu.memory_space<vmem>>, %arg8: memref<256x256xbf16, #tpu.memory_space<vmem>>) attributes {dimension_semantics = [#tpu.dimension_semantics<parallel>, #tpu.dimension_semantics<arbitrary>], iteration_bounds = array<i64: 2, 2>, scalar_prefetch = 0 : i64, scratch_operands = 2 : i64, tpu.core_type = #tpu.core_type<tc>, window_params = [{transform_indices = @transform_0, window_bounds = array<i64: 256, 128>}, {transform_indices = @transform_1, window_bounds = array<i64: 256, 128>}, {transform_indices = @transform_2, window_bounds = array<i64: 256, 128>}, {transform_indices = @transform_3, window_bounds = array<i64: 256, 1>}, {transform_indices = @transform_4, window_bounds = array<i64: 256, 128>}]} {
    %c0_i32 = arith.constant 0 : i32
    %0 = arith.cmpi eq, %arg1, %c0_i32 : i32
    %1 = arith.extui %0 : i1 to i32
    %c0_i32_0 = arith.constant 0 : i32
    %2 = arith.cmpi ne, %1, %c0_i32_0 : i32
    scf.if %2 {
      %cst_21 = arith.constant 0.000000e+00 : f32
      %36 = vector.broadcast %cst_21 : f32 to vector<256x256xf32>
      %c0_22 = arith.constant 0 : index
      %c0_23 = arith.constant 0 : index
      %37 = vector.load %arg7[%c0_22, %c0_23] : memref<256x256xf32, #tpu.memory_space<vmem>>, vector<256x256xf32>
      tpu.vector_store %arg7[%c0_22, %c0_23], %36 {strides = array<i32>} : memref<256x256xf32, #tpu.memory_space<vmem>>, vector<256x256xf32>,
      %cst_24 = arith.constant 1.000000e+00 : bf16
      %38 = vector.broadcast %cst_24 : bf16 to vector<256x128xbf16>
      %c0_25 = arith.constant 0 : index
      %c128 = arith.constant 128 : index
      %39 = vector.load %arg8[%c0_25, %c128] : memref<256x256xbf16, #tpu.memory_space<vmem>>, vector<256x128xbf16>
      tpu.vector_store %arg8[%c0_25, %c128], %38 {strides = array<i32>} : memref<256x256xbf16, #tpu.memory_space<vmem>>, vector<256x128xbf16>,
    } else {
    }
    %c0 = arith.constant 0 : index
    %c0_1 = arith.constant 0 : index
    %3 = vector.load %arg4[%c0, %c0_1] : memref<256x128xbf16, #tpu.memory_space<vmem>>, vector<256x128xbf16>
    %c0_2 = arith.constant 0 : index
    %c0_3 = arith.constant 0 : index
    %4 = vector.load %arg8[%c0_2, %c0_3] : memref<256x256xbf16, #tpu.memory_space<vmem>>, vector<256x128xbf16>
    tpu.vector_store %arg8[%c0_2, %c0_3], %3 {strides = array<i32>} : memref<256x256xbf16, #tpu.memory_space<vmem>>, vector<256x128xbf16>,
    %c0_4 = arith.constant 0 : index
    %c0_5 = arith.constant 0 : index
    %5 = vector.load %arg2[%c0_4, %c0_5] : memref<256x128xbf16, #tpu.memory_space<vmem>>, vector<256x128xbf16>
    %c0_6 = arith.constant 0 : index
    %c0_7 = arith.constant 0 : index
    %6 = vector.load %arg3[%c0_6, %c0_7] : memref<256x128xbf16, #tpu.memory_space<vmem>>, vector<256x128xbf16>
    %cst = arith.constant dense<0.000000e+00> : vector<256x256xf32>
    %7 = tpu.matmul %5, %6, %cst {dimension_numbers = #tpu.dot_dimension_numbers<[1], [1], [0], [0], [0, 0, 1, 0], [], []>} : vector<256x128xbf16>, vector<256x128xbf16>, vector<256x256xf32> -> vector<256x256xf32>
    %c0_8 = arith.constant 0 : index
    %c0_9 = arith.constant 0 : index
    %8 = vector.load %arg5[%c0_8, %c0_9] : memref<256x1xf32, #tpu.memory_space<vmem>>, vector<256x1xf32>
    %9 = vector.broadcast %8 : vector<256x1xf32> to vector<256x256xf32>
    %10 = arith.subf %7, %9 : vector<256x256xf32>
    %11 = math.exp %10 : vector<256x256xf32>
    %c256_i32 = arith.constant 256 : i32
    %12 = arith.muli %arg1, %c256_i32 : i32
    %13 = tpu.iota {dimensions = array<i32: 0>} : vector<256x256xi32>
    %14 = vector.broadcast %12 : i32 to vector<256x256xi32>
    %15 = arith.addi %14, %13 : vector<256x256xi32>
    %c256_i32_10 = arith.constant 256 : i32
    %16 = arith.muli %arg0, %c256_i32_10 : i32
    %17 = tpu.iota {dimensions = array<i32: 1>} : vector<256x256xi32>
    %18 = vector.broadcast %16 : i32 to vector<256x256xi32>
    %19 = arith.addi %18, %17 : vector<256x256xi32>
    %c200_i32 = arith.constant 200 : i32
    %20 = vector.broadcast %c200_i32 : i32 to vector<256x256xi32>
    %21 = arith.cmpi slt, %15, %20 : vector<256x256xi32>
    %c200_i32_11 = arith.constant 200 : i32
    %22 = vector.broadcast %c200_i32_11 : i32 to vector<256x256xi32>
    %23 = arith.cmpi slt, %19, %22 : vector<256x256xi32>
    %24 = arith.andi %21, %23 : vector<256x256xi1>
    %cst_12 = arith.constant 0.000000e+00 : f32
    %25 = vector.broadcast %cst_12 : f32 to vector<256x256xf32>
    %26 = arith.select %24, %11, %25 : vector<256x256xi1>, vector<256x256xf32>
    %c0_13 = arith.constant 0 : index
    %c0_14 = arith.constant 0 : index
    %27 = vector.load %arg7[%c0_13, %c0_14] : memref<256x256xf32, #tpu.memory_space<vmem>>, vector<256x256xf32>
    %28 = arith.truncf %26 : vector<256x256xf32> to vector<256x256xbf16>
    %c0_15 = arith.constant 0 : index
    %c0_16 = arith.constant 0 : index
    %29 = vector.load %arg8[%c0_15, %c0_16] : memref<256x256xbf16, #tpu.memory_space<vmem>>, vector<256x256xbf16>
    %cst_17 = arith.constant dense<0.000000e+00> : vector<256x256xf32>
    %30 = tpu.matmul %28, %29, %cst_17 {dimension_numbers = #tpu.dot_dimension_numbers<[0], [0], [1], [1], [0, 1, 1, 1], [], []>} : vector<256x256xbf16>, vector<256x256xbf16>, vector<256x256xf32> -> vector<256x256xf32>
    %31 = arith.addf %27, %30 : vector<256x256xf32>
    %c0_18 = arith.constant 0 : index
    %c0_19 = arith.constant 0 : index
    %32 = vector.load %arg7[%c0_18, %c0_19] : memref<256x256xf32, #tpu.memory_space<vmem>>, vector<256x256xf32>
    tpu.vector_store %arg7[%c0_18, %c0_19], %31 {strides = array<i32>} : memref<256x256xf32, #tpu.memory_space<vmem>>, vector<256x256xf32>,
    %c1_i32 = arith.constant 1 : i32
    %33 = arith.cmpi eq, %arg1, %c1_i32 : i32
    %34 = arith.extui %33 : i1 to i32
    %c0_i32_20 = arith.constant 0 : i32
    %35 = arith.cmpi ne, %34, %c0_i32_20 : i32
    scf.if %35 {
      %c0_21 = arith.constant 0 : index
      %c0_22 = arith.constant 0 : index
      %36 = vector.load %arg7[%c0_21, %c0_22] : memref<256x256xf32, #tpu.memory_space<vmem>>, vector<256x256xf32>
      %37 = vector.extract_strided_slice %36 {offsets = [0, 128], sizes = [256, 1], strides = [1, 1]} : vector<256x256xf32> to vector<256x1xf32>
      %cst_23 = arith.constant 9.99999971E-10 : f32
      %38 = vector.broadcast %cst_23 : f32 to vector<256x1xf32>
      %39 = arith.addf %38, %37 : vector<256x1xf32>
      %40 = tpu.reciprocal %39 : vector<256x1xf32> -> vector<256x1xf32>
      %41 = vector.extract_strided_slice %36 {offsets = [0, 0], sizes = [256, 128], strides = [1, 1]} : vector<256x256xf32> to vector<256x128xf32>
      %42 = vector.broadcast %40 : vector<256x1xf32> to vector<256x128xf32>
      %43 = arith.mulf %41, %42 : vector<256x128xf32>
      %c0_24 = arith.constant 0 : index
      %c0_25 = arith.constant 0 : index
      %44 = vector.load %arg6[%c0_24, %c0_25] : memref<256x128xf32, #tpu.memory_space<vmem>>, vector<256x128xf32>
      tpu.vector_store %arg6[%c0_24, %c0_25], %43 {strides = array<i32>} : memref<256x128xf32, #tpu.memory_space<vmem>>, vector<256x128xf32>,
    } else {
    }
    return
  }
  func.func @transform_0(%arg0: i32, %arg1: i32) -> (i32, i32) {
    %c0_i32 = arith.constant 0 : i32
    %c0_i32_0 = arith.constant 0 : i32
    return %arg1, %c0_i32 : i32, i32
  }
  func.func @transform_1(%arg0: i32, %arg1: i32) -> (i32, i32) {
    %c0_i32 = arith.constant 0 : i32
    %c0_i32_0 = arith.constant 0 : i32
    return %arg0, %c0_i32 : i32, i32
  }
  func.func @transform_2(%arg0: i32, %arg1: i32) -> (i32, i32) {
    %c0_i32 = arith.constant 0 : i32
    %c0_i32_0 = arith.constant 0 : i32
    return %arg1, %c0_i32 : i32, i32
  }
  func.func @transform_3(%arg0: i32, %arg1: i32) -> (i32, i32) {
    %c0_i32 = arith.constant 0 : i32
    %c0_i32_0 = arith.constant 0 : i32
    return %arg1, %c0_i32 : i32, i32
  }
  func.func @transform_4(%arg0: i32, %arg1: i32) -> (i32, i32) {
    %c0_i32 = arith.constant 0 : i32
    %c0_i32_0 = arith.constant 0 : i32
    return %arg0, %c0_i32 : i32, i32
  }
}

module attributes {stable_mosaic.version = 11 : i64} {
  func.func @_resid_trans_kernel(%arg0: i32, %arg1: memref<512x128xf32, #tpu.memory_space<vmem>>, %arg2: memref<512x128xf32, #tpu.memory_space<vmem>>, %arg3: memref<128x128xbf16, #tpu.memory_space<vmem>>, %arg4: memref<128x128xbf16, #tpu.memory_space<vmem>>, %arg5: memref<512x128xf32, #tpu.memory_space<vmem>>, %arg6: memref<1x2x128xf32, #tpu.memory_space<vmem>>) attributes {dimension_semantics = [#tpu.dimension_semantics<parallel>], iteration_bounds = array<i64: 1>, scalar_prefetch = 0 : i64, scratch_operands = 0 : i64, tpu.core_type = #tpu.core_type<tc>, window_params = [{transform_indices = @transform_0, window_bounds = array<i64: 512, 128>}, {transform_indices = @transform_1, window_bounds = array<i64: 512, 128>}, {pipeline_mode = #tpu.pipeline_mode<synchronous>, transform_indices = @transform_2, window_bounds = array<i64: 128, 128>}, {pipeline_mode = #tpu.pipeline_mode<synchronous>, transform_indices = @transform_3, window_bounds = array<i64: 128, 128>}, {transform_indices = @transform_4, window_bounds = array<i64: 512, 128>}, {transform_indices = @transform_5, window_bounds = array<i64: 1, 2, 128>}]} {
    %c0 = arith.constant 0 : index
    %c0_0 = arith.constant 0 : index
    %0 = vector.load %arg1[%c0, %c0_0] : memref<512x128xf32, #tpu.memory_space<vmem>>, vector<512x128xf32>
    %c0_1 = arith.constant 0 : index
    %c0_2 = arith.constant 0 : index
    %1 = vector.load %arg2[%c0_1, %c0_2] : memref<512x128xf32, #tpu.memory_space<vmem>>, vector<512x128xf32>
    %2 = arith.subf %0, %1 : vector<512x128xf32>
    %3 = arith.truncf %2 : vector<512x128xf32> to vector<512x128xbf16>
    %c0_3 = arith.constant 0 : index
    %c0_4 = arith.constant 0 : index
    %4 = vector.load %arg3[%c0_3, %c0_4] : memref<128x128xbf16, #tpu.memory_space<vmem>>, vector<128x128xbf16>
    %cst = arith.constant dense<0.000000e+00> : vector<512x128xf32>
    %5 = tpu.matmul %3, %4, %cst {dimension_numbers = #tpu.dot_dimension_numbers<[1], [0], [0], [1], [0, 0, 1, 1], [], []>} : vector<512x128xbf16>, vector<128x128xbf16>, vector<512x128xf32> -> vector<512x128xf32>
    %6 = arith.truncf %5 : vector<512x128xf32> to vector<512x128xbf16>
    %c0_5 = arith.constant 0 : index
    %c0_6 = arith.constant 0 : index
    %7 = vector.load %arg4[%c0_5, %c0_6] : memref<128x128xbf16, #tpu.memory_space<vmem>>, vector<128x128xbf16>
    %cst_7 = arith.constant dense<0.000000e+00> : vector<512x128xf32>
    %8 = tpu.matmul %6, %7, %cst_7 {dimension_numbers = #tpu.dot_dimension_numbers<[1], [0], [0], [1], [0, 0, 1, 1], [], []>} : vector<512x128xbf16>, vector<128x128xbf16>, vector<512x128xf32> -> vector<512x128xf32>
    %c0_8 = arith.constant 0 : index
    %c0_9 = arith.constant 0 : index
    %9 = vector.load %arg5[%c0_8, %c0_9] : memref<512x128xf32, #tpu.memory_space<vmem>>, vector<512x128xf32>
    tpu.vector_store %arg5[%c0_8, %c0_9], %8 {strides = array<i32>} : memref<512x128xf32, #tpu.memory_space<vmem>>, vector<512x128xf32>,
    %cst_10 = arith.constant dense<0.000000e+00> : vector<128xf32>
    %10 = vector.multi_reduction <add>, %8, %cst_10 [0] : vector<512x128xf32> to vector<128xf32>
    %11 = vector.shape_cast %10 : vector<128xf32> to vector<1x128xf32>
    %c0_11 = arith.constant 0 : index
    %c0_12 = arith.constant 0 : index
    %c0_13 = arith.constant 0 : index
    %12 = vector.load %arg6[%c0_11, %c0_12, %c0_13] : memref<1x2x128xf32, #tpu.memory_space<vmem>>, vector<1x1x128xf32>
    %13 = vector.shape_cast %12 : vector<1x1x128xf32> to vector<1x128xf32>
    %14 = vector.shape_cast %11 : vector<1x128xf32> to vector<1x1x128xf32>
    tpu.vector_store %arg6[%c0_11, %c0_12, %c0_13], %14 {strides = array<i32>} : memref<1x2x128xf32, #tpu.memory_space<vmem>>, vector<1x1x128xf32>,
    %15 = arith.mulf %8, %8 : vector<512x128xf32>
    %cst_14 = arith.constant dense<0.000000e+00> : vector<128xf32>
    %16 = vector.multi_reduction <add>, %15, %cst_14 [0] : vector<512x128xf32> to vector<128xf32>
    %17 = vector.shape_cast %16 : vector<128xf32> to vector<1x128xf32>
    %c0_15 = arith.constant 0 : index
    %c1 = arith.constant 1 : index
    %c0_16 = arith.constant 0 : index
    %18 = vector.load %arg6[%c0_15, %c1, %c0_16] : memref<1x2x128xf32, #tpu.memory_space<vmem>>, vector<1x1x128xf32>
    %19 = vector.shape_cast %18 : vector<1x1x128xf32> to vector<1x128xf32>
    %20 = vector.shape_cast %17 : vector<1x128xf32> to vector<1x1x128xf32>
    tpu.vector_store %arg6[%c0_15, %c1, %c0_16], %20 {strides = array<i32>} : memref<1x2x128xf32, #tpu.memory_space<vmem>>, vector<1x1x128xf32>,
    return
  }
  func.func @transform_0(%arg0: i32) -> (i32, i32) {
    %c0_i32 = arith.constant 0 : i32
    %c0_i32_0 = arith.constant 0 : i32
    return %arg0, %c0_i32 : i32, i32
  }
  func.func @transform_1(%arg0: i32) -> (i32, i32) {
    %c0_i32 = arith.constant 0 : i32
    %c0_i32_0 = arith.constant 0 : i32
    return %arg0, %c0_i32 : i32, i32
  }
  func.func @transform_2(%arg0: i32) -> (i32, i32) {
    %c0_i32 = arith.constant 0 : i32
    %c0_i32_0 = arith.constant 0 : i32
    %c0_i32_1 = arith.constant 0 : i32
    return %c0_i32, %c0_i32_0 : i32, i32
  }
  func.func @transform_3(%arg0: i32) -> (i32, i32) {
    %c0_i32 = arith.constant 0 : i32
    %c0_i32_0 = arith.constant 0 : i32
    %c0_i32_1 = arith.constant 0 : i32
    return %c0_i32, %c0_i32_0 : i32, i32
  }
  func.func @transform_4(%arg0: i32) -> (i32, i32) {
    %c0_i32 = arith.constant 0 : i32
    %c0_i32_0 = arith.constant 0 : i32
    return %arg0, %c0_i32 : i32, i32
  }
  func.func @transform_5(%arg0: i32) -> (i32, i32, i32) {
    %c0_i32 = arith.constant 0 : i32
    %c0_i32_0 = arith.constant 0 : i32
    %c0_i32_1 = arith.constant 0 : i32
    return %arg0, %c0_i32, %c0_i32_0 : i32, i32, i32
  }
}

module attributes {stable_mosaic.version = 11 : i64} {
  func.func @_bn_act_res_kernel(%arg0: i32, %arg1: memref<512x128xf32, #tpu.memory_space<vmem>>, %arg2: memref<512x128xf32, #tpu.memory_space<vmem>>, %arg3: memref<1x128xf32, #tpu.memory_space<vmem>>, %arg4: memref<1x128xf32, #tpu.memory_space<vmem>>, %arg5: memref<512x128xf32, #tpu.memory_space<vmem>>) attributes {dimension_semantics = [#tpu.dimension_semantics<parallel>], iteration_bounds = array<i64: 1>, scalar_prefetch = 0 : i64, scratch_operands = 0 : i64, tpu.core_type = #tpu.core_type<tc>, window_params = [{transform_indices = @transform_0, window_bounds = array<i64: 512, 128>}, {transform_indices = @transform_1, window_bounds = array<i64: 512, 128>}, {pipeline_mode = #tpu.pipeline_mode<synchronous>, transform_indices = @transform_2, window_bounds = array<i64: 1, 128>}, {pipeline_mode = #tpu.pipeline_mode<synchronous>, transform_indices = @transform_3, window_bounds = array<i64: 1, 128>}, {transform_indices = @transform_4, window_bounds = array<i64: 512, 128>}]} {
    %c0 = arith.constant 0 : index
    %c0_0 = arith.constant 0 : index
    %0 = vector.load %arg1[%c0, %c0_0] : memref<512x128xf32, #tpu.memory_space<vmem>>, vector<512x128xf32>
    %c0_1 = arith.constant 0 : index
    %c0_2 = arith.constant 0 : index
    %1 = vector.load %arg3[%c0_1, %c0_2] : memref<1x128xf32, #tpu.memory_space<vmem>>, vector<1x128xf32>
    %2 = vector.broadcast %1 : vector<1x128xf32> to vector<512x128xf32>
    %3 = arith.mulf %0, %2 : vector<512x128xf32>
    %c0_3 = arith.constant 0 : index
    %c0_4 = arith.constant 0 : index
    %4 = vector.load %arg4[%c0_3, %c0_4] : memref<1x128xf32, #tpu.memory_space<vmem>>, vector<1x128xf32>
    %5 = vector.broadcast %4 : vector<1x128xf32> to vector<512x128xf32>
    %6 = arith.addf %3, %5 : vector<512x128xf32>
    %cst = arith.constant 0.000000e+00 : f32
    %7 = vector.broadcast %cst : f32 to vector<512x128xf32>
    %8 = arith.cmpf ogt, %6, %7 : vector<512x128xf32>
    %cst_5 = arith.constant 1.000000e-01 : f32
    %9 = vector.broadcast %cst_5 : f32 to vector<512x128xf32>
    %10 = arith.mulf %9, %6 : vector<512x128xf32>
    %11 = arith.select %8, %6, %10 : vector<512x128xi1>, vector<512x128xf32>
    %c0_6 = arith.constant 0 : index
    %c0_7 = arith.constant 0 : index
    %12 = vector.load %arg2[%c0_6, %c0_7] : memref<512x128xf32, #tpu.memory_space<vmem>>, vector<512x128xf32>
    %13 = arith.addf %11, %12 : vector<512x128xf32>
    %cst_8 = arith.constant 0.000000e+00 : f32
    %14 = vector.broadcast %cst_8 : f32 to vector<512x128xf32>
    %15 = arith.cmpf ogt, %13, %14 : vector<512x128xf32>
    %cst_9 = arith.constant 1.000000e-01 : f32
    %16 = vector.broadcast %cst_9 : f32 to vector<512x128xf32>
    %17 = arith.mulf %16, %13 : vector<512x128xf32>
    %18 = arith.select %15, %13, %17 : vector<512x128xi1>, vector<512x128xf32>
    %c0_10 = arith.constant 0 : index
    %c0_11 = arith.constant 0 : index
    %19 = vector.load %arg5[%c0_10, %c0_11] : memref<512x128xf32, #tpu.memory_space<vmem>>, vector<512x128xf32>
    tpu.vector_store %arg5[%c0_10, %c0_11], %18 {strides = array<i32>} : memref<512x128xf32, #tpu.memory_space<vmem>>, vector<512x128xf32>,
    return
  }
  func.func @transform_0(%arg0: i32) -> (i32, i32) {
    %c0_i32 = arith.constant 0 : i32
    %c0_i32_0 = arith.constant 0 : i32
    return %arg0, %c0_i32 : i32, i32
  }
  func.func @transform_1(%arg0: i32) -> (i32, i32) {
    %c0_i32 = arith.constant 0 : i32
    %c0_i32_0 = arith.constant 0 : i32
    return %arg0, %c0_i32 : i32, i32
  }
  func.func @transform_2(%arg0: i32) -> (i32, i32) {
    %c0_i32 = arith.constant 0 : i32
    %c0_i32_0 = arith.constant 0 : i32
    %c0_i32_1 = arith.constant 0 : i32
    return %c0_i32, %c0_i32_0 : i32, i32
  }
  func.func @transform_3(%arg0: i32) -> (i32, i32) {
    %c0_i32 = arith.constant 0 : i32
    %c0_i32_0 = arith.constant 0 : i32
    %c0_i32_1 = arith.constant 0 : i32
    return %c0_i32, %c0_i32_0 : i32, i32
  }
  func.func @transform_4(%arg0: i32) -> (i32, i32) {
    %c0_i32 = arith.constant 0 : i32
    %c0_i32_0 = arith.constant 0 : i32
    return %arg0, %c0_i32 : i32, i32
  }
}

</mosaic_0001>

<bundles_post_ra>
// kernel: sa_module_pct_forward.6
= control target key start
LH: loop header
LB: loop body
LE: loop exit
PB: predicated region body
PF: predicated region fallthrough
CT: control target
= control target key end

     0   :  { %s1996_s1 = inlined_call_operand.vmem [shape: bf16[128,128], index: 1, kind: input, shape index: {}]   ;;  %s1997_s0 = inlined_call_operand.vmem [shape: f32[512,128], index: 0, kind: input, shape index: {}]   ;;  %s1998_s2 = inlined_call_operand.vmem [shape: bf16[512,128], index: 2, kind: output, shape index: {0}]   ;;  %s1999_s3 = inlined_call_operand.vmem [shape: f32[1,2,128], index: 3, kind: output, shape index: {1}]  }
   0x1   :  { %v1458_v0 = vld [vmem:[%s1996_s1] sm:$0xff]   ;;  %v1459_v1 = vld [vmem:[%s1996_s1 + $0x8] sm:$0xff]   ;;  %v1460_v2 = vld [vmem:[%s1996_s1 + $0x10] sm:$0xff]  }
   0x2   :  { %1362 = vmatprep.subr.bf16.mxu0 %v1458_v0  ;;  %1442 = vmatprep.subr.bf16.mxu1 %v1458_v0  ;;  %v1461_v3 = vld [vmem:[%s1996_s1 + $0x18] sm:$0xff]   ;;  %v14_v4 = vld [vmem:[%s1997_s0] sm:$0xff]  ;;  %v15_v5 = vld [vmem:[%s1997_s0 + $0x8] sm:$0xff] }
   0x3   :  { %1363 = vmatpush3.bf16.msra.mxu0 %v1458_v0  ;;  %1450 = vmatpush3.bf16.msra.mxu1 %v1458_v0  ;;  %v78_v6 = vpack.c.bf16 %v15_v5, %v14_v4  ;;  %v1462_v7 = vld [vmem:[%s1996_s1 + $0x20] sm:$0xff]   ;;  %v1463_v8 = vld [vmem:[%s1996_s1 + $0x28] sm:$0xff]   ;;  %v1464_v11 = vld [vmem:[%s1996_s1 + $0x30] sm:$0xff]  }
   0x4   :  { %1364 = vmatprep.subr.bf16.mxu0 %v1459_v1  ;;  %1443 = vmatprep.subr.bf16.mxu1 %v1459_v1  ;;  %v46_v9 = vld [vmem:[%s1997_s0 + $0x100] sm:$0xff]  ;;  %v47_v10 = vld [vmem:[%s1997_s0 + $0x108] sm:$0xff]  ;;  %v1465_v13 = vld [vmem:[%s1996_s1 + $0x38] sm:$0xff]  }
   0x5   :  { %1378 = vmatprep.mubr.bf16.mxu0 %v78_v6  ;;  %v94_v12 = vpack.c.bf16 %v47_v10, %v46_v9  ;;  %v16_v14 = vld [vmem:[%s1997_s0 + $0x10] sm:$0xff]  ;;  %v17_v15 = vld [vmem:[%s1997_s0 + $0x18] sm:$0xff]  ;;  %v18_v16 = vld [vmem:[%s1997_s0 + $0x20] sm:$0xff] }
   0x6   :  { %v19_v17 = vld [vmem:[%s1997_s0 + $0x28] sm:$0xff]  ;;  %v48_v18 = vld [vmem:[%s1997_s0 + $0x110] sm:$0xff]  ;;  %v49_v19 = vld [vmem:[%s1997_s0 + $0x118] sm:$0xff]  ;;  %v79_v22 = vpack.c.bf16 %v17_v15, %v16_v14 }
   0x7   :  { %1365 = vmatpush3.bf16.msra.mxu0 %v1459_v1  ;;  %1451 = vmatpush3.bf16.msra.mxu1 %v1459_v1  ;;  %v50_v20 = vld [vmem:[%s1997_s0 + $0x120] sm:$0xff]  ;;  %v51_v21 = vld [vmem:[%s1997_s0 + $0x128] sm:$0xff]  ;;  %v80_v23 = vpack.c.bf16 %v19_v17, %v18_v16  ;;  %v95_v24 = vpack.c.bf16 %v49_v19, %v48_v18  ;;  %v20_v26 = vld [vmem:[%s1997_s0 + $0x30] sm:$0xff] }
   0x8   :  { %1366 = vmatprep.subr.bf16.mxu0 %v1460_v2  ;;  %1444 = vmatprep.subr.bf16.mxu1 %v1460_v2  ;;  %v96_v25 = vpack.c.bf16 %v51_v21, %v50_v20  ;;  %v21_v27 = vld [vmem:[%s1997_s0 + $0x38] sm:$0xff]  ;;  %v22_v28 = vld [vmem:[%s1997_s0 + $0x40] sm:$0xff]  ;;  %v23_v29 = vld [vmem:[%s1997_s0 + $0x48] sm:$0xff] }
   0x9   :  { %1410 = vmatprep.mubr.bf16.mxu1 %v94_v12  ;;  %v52_v30 = vld [vmem:[%s1997_s0 + $0x130] sm:$0xff]  ;;  %v53_v31 = vld [vmem:[%s1997_s0 + $0x138] sm:$0xff]  ;;  %v54_v32 = vld [vmem:[%s1997_s0 + $0x140] sm:$0xff]  ;;  %v81_v34 = vpack.c.bf16 %v21_v27, %v20_v26  ;;  %v82_v35 = vpack.c.bf16 %v23_v29, %v22_v28 }
   0xa   :  { %v55_v33 = vld [vmem:[%s1997_s0 + $0x148] sm:$0xff]  ;;  %v97_v36 = vpack.c.bf16 %v53_v31, %v52_v30  ;;  %v24_v38 = vld [vmem:[%s1997_s0 + $0x50] sm:$0xff]  ;;  %v25_v39 = vld [vmem:[%s1997_s0 + $0x58] sm:$0xff] }
   0xb   :  { %1367 = vmatpush3.bf16.msra.mxu0 %v1460_v2  ;;  %1452 = vmatpush3.bf16.msra.mxu1 %v1460_v2  ;;  %v98_v37 = vpack.c.bf16 %v55_v33, %v54_v32  ;;  %v26_v40 = vld [vmem:[%s1997_s0 + $0x60] sm:$0xff]  ;;  %v27_v41 = vld [vmem:[%s1997_s0 + $0x68] sm:$0xff]  ;;  %v56_v42 = vld [vmem:[%s1997_s0 + $0x150] sm:$0xff]  ;;  %v83_v46 = vpack.c.bf16 %v25_v39, %v24_v38 }
   0xc   :  { %1368 = vmatprep.subr.bf16.mxu0 %v1461_v3  ;;  %1445 = vmatprep.subr.bf16.mxu1 %v1461_v3  ;;  %v57_v43 = vld [vmem:[%s1997_s0 + $0x158] sm:$0xff]  ;;  %v58_v44 = vld [vmem:[%s1997_s0 + $0x160] sm:$0xff]  ;;  %v59_v45 = vld [vmem:[%s1997_s0 + $0x168] sm:$0xff]  ;;  %v84_v47 = vpack.c.bf16 %v27_v41, %v26_v40 }
   0xd   :  { %v99_v48 = vpack.c.bf16 %v57_v43, %v56_v42  ;;  %v100_v49 = vpack.c.bf16 %v59_v45, %v58_v44  ;;  %v28_v50 = vld [vmem:[%s1997_s0 + $0x70] sm:$0xff]  ;;  %v29_v51 = vld [vmem:[%s1997_s0 + $0x78] sm:$0xff]  ;;  %v30_v52 = vld [vmem:[%s1997_s0 + $0x80] sm:$0xff] }
   0xe   :  { %v31_v53 = vld [vmem:[%s1997_s0 + $0x88] sm:$0xff]  ;;  %v60_v54 = vld [vmem:[%s1997_s0 + $0x170] sm:$0xff]  ;;  %v61_v55 = vld [vmem:[%s1997_s0 + $0x178] sm:$0xff]  ;;  %v85_v58 = vpack.c.bf16 %v29_v51, %v28_v50 }
   0xf   :  { %1369 = vmatpush3.bf16.msra.mxu0 %v1461_v3  ;;  %1453 = vmatpush3.bf16.msra.mxu1 %v1461_v3  ;;  %v62_v56 = vld [vmem:[%s1997_s0 + $0x180] sm:$0xff]  ;;  %v63_v57 = vld [vmem:[%s1997_s0 + $0x188] sm:$0xff]  ;;  %v86_v59 = vpack.c.bf16 %v31_v53, %v30_v52  ;;  %v101_v60 = vpack.c.bf16 %v61_v55, %v60_v54  ;;  %v32_v62 = vld [vmem:[%s1997_s0 + $0x90] sm:$0xff] }
  0x10   :  { %1370 = vmatprep.subr.bf16.mxu0 %v1462_v7  ;;  %1446 = vmatprep.subr.bf16.mxu1 %v1462_v7  ;;  %v102_v61 = vpack.c.bf16 %v63_v57, %v62_v56  ;;  %v33_v63 = vld [vmem:[%s1997_s0 + $0x98] sm:$0xff]  ;;  %v34_v0 = vld [vmem:[%s1997_s0 + $0xa0] sm:$0xff]  ;;  %v35_v1 = vld [vmem:[%s1997_s0 + $0xa8] sm:$0xff] }
  0x11   :  { %v64_v2 = vld [vmem:[%s1997_s0 + $0x190] sm:$0xff]  ;;  %v65_v3 = vld [vmem:[%s1997_s0 + $0x198] sm:$0xff]  ;;  %v66_v4 = vld [vmem:[%s1997_s0 + $0x1a0] sm:$0xff]  ;;  %v87_v6 = vpack.c.bf16 %v33_v63, %v32_v62 }
  0x12   :  { %v67_v5 = vld [vmem:[%s1997_s0 + $0x1a8] sm:$0xff]  ;;  %v36_v10 = vld [vmem:[%s1997_s0 + $0xb0] sm:$0xff]  ;;  %v38_v12 = vld [vmem:[%s1997_s0 + $0xc0] sm:$0xff] }
  0x13   :  { %1371 = vmatpush3.bf16.msra.mxu0 %v1462_v7  ;;  %1454 = vmatpush3.bf16.msra.mxu1 %v1462_v7  ;;  %v88_v7 = vpack.c.bf16 %v35_v1, %v34_v0  ;;  %v104_v9 = vpack.c.bf16 %v67_v5, %v66_v4  ;;  %v68_v14 = vld [vmem:[%s1997_s0 + $0x1b0] sm:$0xff]  ;;  %v69_v15 = vld [vmem:[%s1997_s0 + $0x1b8] sm:$0xff]  ;;  %v70_v16 = vld [vmem:[%s1997_s0 + $0x1c0] sm:$0xff] }
  0x14   :  { %1372 = vmatprep.subr.bf16.mxu0 %v1463_v8  ;;  %1447 = vmatprep.subr.bf16.mxu1 %v1463_v8  ;;  %v71_v17 = vld [vmem:[%s1997_s0 + $0x1c8] sm:$0xff]  ;;  %v105_v20 = vpack.c.bf16 %v69_v15, %v68_v14  ;;  %v72_v26 = vld [vmem:[%s1997_s0 + $0x1d0] sm:$0xff]  ;;  %v73_v27 = vld [vmem:[%s1997_s0 + $0x1d8] sm:$0xff] }
  0x15   :  { %v106_v21 = vpack.c.bf16 %v71_v17, %v70_v16  ;;  %v74_v28 = vld [vmem:[%s1997_s0 + $0x1e0] sm:$0xff]  ;;  %v75_v29 = vld [vmem:[%s1997_s0 + $0x1e8] sm:$0xff]  ;;  %v107_v32 = vpack.c.bf16 %v73_v27, %v72_v26 }
  0x16   :  { %v108_v33 = vpack.c.bf16 %v75_v29, %v74_v28 }
  0x17   :  { %1373 = vmatpush3.bf16.msra.mxu0 %v1463_v8  ;;  %1455 = vmatpush3.bf16.msra.mxu1 %v1463_v8  ;;  %v103_v8 = vpack.c.bf16 %v65_v3, %v64_v2 }
  0x18   :  { %1374 = vmatprep.subr.bf16.mxu0 %v1464_v11  ;;  %1448 = vmatprep.subr.bf16.mxu1 %v1464_v11 }
  0x1b   :  { %1375 = vmatpush3.bf16.msra.mxu0 %v1464_v11  ;;  %1456 = vmatpush3.bf16.msra.mxu1 %v1464_v11  ;;  %v37_v11 = vld [vmem:[%s1997_s0 + $0xb8] sm:$0xff] }
  0x1c   :  { %1376 = vmatprep.subr.bf16.mxu0 %v1465_v13  ;;  %1449 = vmatprep.subr.bf16.mxu1 %v1465_v13  ;;  %v89_v18 = vpack.c.bf16 %v37_v11, %v36_v10 }
  0x1f   :  { %1377 = vmatpush3.bf16.msra.mxu0 %v1465_v13  ;;  %1457 = vmatpush3.bf16.msra.mxu1 %v1465_v13  ;;  %v39_v13 = vld [vmem:[%s1997_s0 + $0xc8] sm:$0xff] }
  0x20   :  { %v90_v19 = vpack.c.bf16 %v39_v13, %v38_v12 }
  0x22   :  { %1379 = vmatmul.mubr.bf16.vlgmr.msra.gmra.mrb[0].mxu0 %v79_v22  ;;  %1411 = vmatmul.mubr.bf16.vlgmr.msra.gmra.mrb[0].mxu1 %v95_v24  ;;  %v40_v22 = vld [vmem:[%s1997_s0 + $0xd0] sm:$0xff]  ;;  %v42_v24 = vld [vmem:[%s1997_s0 + $0xe0] sm:$0xff] }
  0x23   :  { %1382 = vmatprep.mubr.bf16.mxu0 %v80_v23  ;;  %1414 = vmatprep.mubr.bf16.mxu1 %v96_v25  ;;  %v41_v23 = vld [vmem:[%s1997_s0 + $0xd8] sm:$0xff]  ;;  %v43_v25 = vld [vmem:[%s1997_s0 + $0xe8] sm:$0xff] }
  0x24   :  { %v91_v30 = vpack.c.bf16 %v41_v23, %v40_v22  ;;  %v92_v31 = vpack.c.bf16 %v43_v25, %v42_v24 }
  0x2a   :  { %1383 = vmatmul.mubr.bf16.gmra.mrb[4].mxu0 %v81_v34  ;;  %1415 = vmatmul.mubr.bf16.gmra.mrb[4].mxu1 %v97_v36  ;;  %v44_v34 = vld [vmem:[%s1997_s0 + $0xf0] sm:$0xff] }
  0x2b   :  { %1386 = vmatprep.mubr.bf16.mxu0 %v82_v35  ;;  %1418 = vmatprep.mubr.bf16.mxu1 %v98_v37  ;;  %v45_v35 = vld [vmem:[%s1997_s0 + $0xf8] sm:$0xff]  ;;  %v76_v36 = vld [vmem:[%s1997_s0 + $0x1f0] sm:$0xff] }
  0x2c   :  { %v77_v37 = vld [vmem:[%s1997_s0 + $0x1f8] sm:$0xff]  ;;  %v93_v38 = vpack.c.bf16 %v45_v35, %v44_v34 }
  0x2d   :  { %v109_v39 = vpack.c.bf16 %v77_v37, %v76_v36 }
  0x32   :  { %1387 = vmatmul.mubr.bf16.gmra.mrb[8].mxu0 %v83_v46  ;;  %1419 = vmatmul.mubr.bf16.gmra.mrb[8].mxu1 %v99_v48 }
  0x33   :  { %1390 = vmatprep.mubr.bf16.mxu0 %v84_v47  ;;  %1422 = vmatprep.mubr.bf16.mxu1 %v100_v49 }
  0x3a   :  { %1391 = vmatmul.mubr.bf16.gmra.mrb[12].mxu0 %v85_v58  ;;  %1423 = vmatmul.mubr.bf16.gmra.mrb[12].mxu1 %v101_v60 }
  0x3b   :  { %1394 = vmatprep.mubr.bf16.mxu0 %v86_v59  ;;  %1426 = vmatprep.mubr.bf16.mxu1 %v102_v61 }
  0x42   :  { %1395 = vmatmul.mubr.bf16.gmra.mrb[16].mxu0 %v87_v6  ;;  %1427 = vmatmul.mubr.bf16.gmra.mrb[16].mxu1 %v103_v8 }
  0x43   :  { %1398 = vmatprep.mubr.bf16.mxu0 %v88_v7  ;;  %1430 = vmatprep.mubr.bf16.mxu1 %v104_v9 }
  0x4a   :  { %1399 = vmatmul.mubr.bf16.gmra.mrb[20].mxu0 %v89_v18  ;;  %1431 = vmatmul.mubr.bf16.gmra.mrb[20].mxu1 %v105_v20 }
  0x4b   :  { %1402 = vmatprep.mubr.bf16.mxu0 %v90_v19  ;;  %1434 = vmatprep.mubr.bf16.mxu1 %v106_v21 }
  0x52   :  { %1403 = vmatmul.mubr.bf16.gmra.mrb[24].mxu0 %v91_v30  ;;  %1435 = vmatmul.mubr.bf16.gmra.mrb[24].mxu1 %v107_v32 }
  0x53   :  { %1406 = vmatprep.mubr.bf16.mxu0 %v92_v31  ;;  %1438 = vmatprep.mubr.bf16.mxu1 %v108_v33 }
  0x5a   :  { %1407 = vmatmul.mubr.bf16.gmra.mrb[28].mxu0 %v93_v38  ;;  %1439 = vmatmul.mubr.bf16.gmra.mrb[28].mxu1 %v109_v39 }
  0xf5   :  { %v1380_v40 = vpop.f32.mrb[0].mxu0  ;;  %v1702_v42 = vpop.f32.mrb[0].mxu1 }
  0xf6   :  { %v208_v41 = vpop.f32.mrb[1].mxu0  ;;  %v1704_v44 = vpop.f32.mrb[1].mxu1  ;;  %v855_v55 = vmul.f32 %v1380_v40, %v1380_v40 }
  0xf7   :  { %v1381_v43 = vpop.f32.mrb[2].mxu0  ;;  %v853_v45 = vmul.f32 %v208_v41, %v208_v41  ;;  %v1706_v48 = vpop.f32.mrb[2].mxu1 }
  0xf8   :  { %v1139_v46 = vpack.c.bf16 %v1381_v43, %v1380_v40  ;;  %v211_v47 = vpop.f32.mrb[3].mxu0  ;;  %v1219_v52 = vpack.c.bf16 %v1706_v48, %v1702_v42  ;;  %v1710_v53 = vpop.f32.mrb[3].mxu1  ;;  %v856_v58 = vmul.f32 %v1381_v43, %v1381_v43 }
  0xf9   :  { %v1134_v49 = vpack.c.bf16 %v211_v47, %v208_v41  ;;  %v783_v50 = vadd.f32 %v211_v47, %v208_v41  ;;  %v854_v51 = vmul.f32 %v211_v47, %v211_v47  ;;  %v1214_v54 = vpack.c.bf16 %v1710_v53, %v1704_v44 }
  0xfa   :  { %1291 = vst [vmem:[%s1998_s2 + $0x8] sm:$0xff] %v1139_v46   ;;  %1307 = vst [vmem:[%s1998_s2 + $0x88] sm:$0xff] %v1219_v52  }
  0xfb   :  { %1135 = vst [vmem:[%s1998_s2] sm:$0xff] %v1134_v49   ;;  %v784_v56 = vadd.f32 %v1380_v40, %v783_v50  ;;  %v917_v57 = vadd.f32 %v854_v51, %v853_v45  ;;  %1306 = vst [vmem:[%s1998_s2 + $0x80] sm:$0xff] %v1214_v54  }
  0xfd   :  { %v918_v59 = vadd.f32 %v917_v57, %v855_v55  ;;  %v1384_v60 = vpop.f32.mrb[4].mxu0  ;;  %v785_v61 = vadd.f32 %v1381_v43, %v784_v56  ;;  %v1726_v63 = vpop.f32.mrb[4].mxu1 }
  0xfe   :  { %v224_v62 = vpop.f32.mrb[5].mxu0  ;;  %v1728_v4 = vpop.f32.mrb[5].mxu1  ;;  %v859_v15 = vmul.f32 %v1384_v60, %v1384_v60 }
  0xff   :  { %v786_v0 = vadd.f32 %v785_v61, %v224_v62  ;;  %v857_v1 = vmul.f32 %v224_v62, %v224_v62  ;;  %v919_v2 = vadd.f32 %v918_v59, %v856_v58  ;;  %v1385_v3 = vpop.f32.mrb[6].mxu0  ;;  %v1730_v7 = vpop.f32.mrb[6].mxu1 }
 0x100   :  { %v1149_v5 = vpack.c.bf16 %v1385_v3, %v1384_v60  ;;  %v227_v6 = vpop.f32.mrb[7].mxu0  ;;  %v1732_v12 = vpop.f32.mrb[7].mxu1  ;;  %v1229_v13 = vpack.c.bf16 %v1730_v7, %v1726_v63  ;;  %v860_v18 = vmul.f32 %v1385_v3, %v1385_v3 }
 0x101   :  { %v920_v8 = vadd.f32 %v919_v2, %v857_v1  ;;  %v1144_v9 = vpack.c.bf16 %v227_v6, %v224_v62  ;;  %v787_v10 = vadd.f32 %v786_v0, %v227_v6  ;;  %v858_v11 = vmul.f32 %v227_v6, %v227_v6 }
 0x102   :  { %1293 = vst [vmem:[%s1998_s2 + $0x18] sm:$0xff] %v1149_v5   ;;  %v1224_v14 = vpack.c.bf16 %v1732_v12, %v1728_v4  ;;  %1309 = vst [vmem:[%s1998_s2 + $0x98] sm:$0xff] %v1229_v13  }
 0x103   :  { %1292 = vst [vmem:[%s1998_s2 + $0x10] sm:$0xff] %v1144_v9   ;;  %v788_v16 = vadd.f32 %v1384_v60, %v787_v10  ;;  %v921_v17 = vadd.f32 %v920_v8, %v858_v11 }
 0x104   :  { %1308 = vst [vmem:[%s1998_s2 + $0x90] sm:$0xff] %v1224_v14  }
 0x105   :  { %v922_v19 = vadd.f32 %v921_v17, %v859_v15  ;;  %v1388_v20 = vpop.f32.mrb[8].mxu0  ;;  %v789_v21 = vadd.f32 %v1385_v3, %v788_v16  ;;  %v1750_v23 = vpop.f32.mrb[8].mxu1 }
 0x106   :  { %v240_v22 = vpop.f32.mrb[9].mxu0  ;;  %v1752_v28 = vpop.f32.mrb[9].mxu1  ;;  %v863_v39 = vmul.f32 %v1388_v20, %v1388_v20 }
 0x107   :  { %v790_v24 = vadd.f32 %v789_v21, %v240_v22  ;;  %v861_v25 = vmul.f32 %v240_v22, %v240_v22  ;;  %v923_v26 = vadd.f32 %v922_v19, %v860_v18  ;;  %v1389_v27 = vpop.f32.mrb[10].mxu0  ;;  %v1754_v31 = vpop.f32.mrb[10].mxu1 }
 0x108   :  { %v1159_v29 = vpack.c.bf16 %v1389_v27, %v1388_v20  ;;  %v243_v30 = vpop.f32.mrb[11].mxu0  ;;  %v1756_v36 = vpop.f32.mrb[11].mxu1  ;;  %v1239_v37 = vpack.c.bf16 %v1754_v31, %v1750_v23  ;;  %v864_v43 = vmul.f32 %v1389_v27, %v1389_v27 }
 0x109   :  { %v924_v32 = vadd.f32 %v923_v26, %v861_v25  ;;  %v1154_v33 = vpack.c.bf16 %v243_v30, %v240_v22  ;;  %v791_v34 = vadd.f32 %v790_v24, %v243_v30  ;;  %v862_v35 = vmul.f32 %v243_v30, %v243_v30 }
 0x10a   :  { %1295 = vst [vmem:[%s1998_s2 + $0x28] sm:$0xff] %v1159_v29   ;;  %v1234_v38 = vpack.c.bf16 %v1756_v36, %v1752_v28  ;;  %1311 = vst [vmem:[%s1998_s2 + $0xa8] sm:$0xff] %v1239_v37  }
 0x10b   :  { %1294 = vst [vmem:[%s1998_s2 + $0x20] sm:$0xff] %v1154_v33   ;;  %v792_v40 = vadd.f32 %v1388_v20, %v791_v34  ;;  %v925_v41 = vadd.f32 %v924_v32, %v862_v35 }
 0x10c   :  { %1310 = vst [vmem:[%s1998_s2 + $0xa0] sm:$0xff] %v1234_v38  }
 0x10d   :  { %v926_v45 = vadd.f32 %v925_v41, %v863_v39  ;;  %v1392_v46 = vpop.f32.mrb[12].mxu0  ;;  %v793_v47 = vadd.f32 %v1389_v27, %v792_v40  ;;  %v1774_v50 = vpop.f32.mrb[12].mxu1 }
 0x10e   :  { %v256_v49 = vpop.f32.mrb[13].mxu0  ;;  %v1776_v56 = vpop.f32.mrb[13].mxu1  ;;  %v867_v5 = vmul.f32 %v1392_v46, %v1392_v46 }
 0x10f   :  { %v794_v51 = vadd.f32 %v793_v47, %v256_v49  ;;  %v865_v52 = vmul.f32 %v256_v49, %v256_v49  ;;  %v927_v54 = vadd.f32 %v926_v45, %v864_v43  ;;  %v1393_v55 = vpop.f32.mrb[14].mxu0  ;;  %v1778_v59 = vpop.f32.mrb[14].mxu1 }
 0x110   :  { %v1169_v57 = vpack.c.bf16 %v1393_v55, %v1392_v46  ;;  %v259_v58 = vpop.f32.mrb[15].mxu0  ;;  %v1780_v1 = vpop.f32.mrb[15].mxu1  ;;  %v1249_v2 = vpack.c.bf16 %v1778_v59, %v1774_v50  ;;  %v868_v9 = vmul.f32 %v1393_v55, %v1393_v55 }
 0x111   :  { %v928_v60 = vadd.f32 %v927_v54, %v865_v52  ;;  %v1164_v61 = vpack.c.bf16 %v259_v58, %v256_v49  ;;  %v795_v62 = vadd.f32 %v794_v51, %v259_v58  ;;  %v866_v0 = vmul.f32 %v259_v58, %v259_v58 }
 0x112   :  { %1297 = vst [vmem:[%s1998_s2 + $0x38] sm:$0xff] %v1169_v57   ;;  %v1244_v3 = vpack.c.bf16 %v1780_v1, %v1776_v56  ;;  %1313 = vst [vmem:[%s1998_s2 + $0xb8] sm:$0xff] %v1249_v2  }
 0x113   :  { %1296 = vst [vmem:[%s1998_s2 + $0x30] sm:$0xff] %v1164_v61   ;;  %v796_v6 = vadd.f32 %v1392_v46, %v795_v62  ;;  %v929_v8 = vadd.f32 %v928_v60, %v866_v0 }
 0x114   :  { %1312 = vst [vmem:[%s1998_s2 + $0xb0] sm:$0xff] %v1244_v3  }
 0x115   :  { %v930_v10 = vadd.f32 %v929_v8, %v867_v5  ;;  %v1396_v11 = vpop.f32.mrb[16].mxu0  ;;  %v797_v13 = vadd.f32 %v1393_v55, %v796_v6  ;;  %v1798_v15 = vpop.f32.mrb[16].mxu1 }
 0x116   :  { %v272_v14 = vpop.f32.mrb[17].mxu0  ;;  %v1800_v20 = vpop.f32.mrb[17].mxu1  ;;  %v871_v34 = vmul.f32 %v1396_v11, %v1396_v11 }
 0x117   :  { %v798_v16 = vadd.f32 %v797_v13, %v272_v14  ;;  %v869_v17 = vmul.f32 %v272_v14, %v272_v14  ;;  %v931_v18 = vadd.f32 %v930_v10, %v868_v9  ;;  %v1397_v19 = vpop.f32.mrb[18].mxu0  ;;  %v1802_v24 = vpop.f32.mrb[18].mxu1 }
 0x118   :  { %v1179_v21 = vpack.c.bf16 %v1397_v19, %v1396_v11  ;;  %v275_v22 = vpop.f32.mrb[19].mxu0  ;;  %v1804_v30 = vpop.f32.mrb[19].mxu1  ;;  %v1259_v32 = vpack.c.bf16 %v1802_v24, %v1798_v15  ;;  %v872_v38 = vmul.f32 %v1397_v19, %v1397_v19 }
 0x119   :  { %v932_v25 = vadd.f32 %v931_v18, %v869_v17  ;;  %v1174_v26 = vpack.c.bf16 %v275_v22, %v272_v14  ;;  %v799_v27 = vadd.f32 %v798_v16, %v275_v22  ;;  %v870_v29 = vmul.f32 %v275_v22, %v275_v22 }
 0x11a   :  { %1299 = vst [vmem:[%s1998_s2 + $0x48] sm:$0xff] %v1179_v21   ;;  %v1254_v33 = vpack.c.bf16 %v1804_v30, %v1800_v20  ;;  %1315 = vst [vmem:[%s1998_s2 + $0xc8] sm:$0xff] %v1259_v32  }
 0x11b   :  { %1298 = vst [vmem:[%s1998_s2 + $0x40] sm:$0xff] %v1174_v26   ;;  %v800_v35 = vadd.f32 %v1396_v11, %v799_v27  ;;  %v933_v37 = vadd.f32 %v932_v25, %v870_v29 }
 0x11c   :  { %1314 = vst [vmem:[%s1998_s2 + $0xc0] sm:$0xff] %v1254_v33  }
 0x11d   :  { %v934_v39 = vadd.f32 %v933_v37, %v871_v34  ;;  %v1400_v40 = vpop.f32.mrb[20].mxu0  ;;  %v801_v41 = vadd.f32 %v1397_v19, %v800_v35  ;;  %v1822_v45 = vpop.f32.mrb[20].mxu1 }
 0x11e   :  { %v288_v43 = vpop.f32.mrb[21].mxu0  ;;  %v1824_v52 = vpop.f32.mrb[21].mxu1  ;;  %v875_v5 = vmul.f32 %v1400_v40, %v1400_v40 }
 0x11f   :  { %v802_v46 = vadd.f32 %v801_v41, %v288_v43  ;;  %v873_v47 = vmul.f32 %v288_v43, %v288_v43  ;;  %v935_v49 = vadd.f32 %v934_v39, %v872_v38  ;;  %v1401_v51 = vpop.f32.mrb[22].mxu0  ;;  %v1826_v57 = vpop.f32.mrb[22].mxu1 }
 0x120   :  { %v1189_v54 = vpack.c.bf16 %v1401_v51, %v1400_v40  ;;  %v291_v55 = vpop.f32.mrb[23].mxu0  ;;  %v1828_v0 = vpop.f32.mrb[23].mxu1  ;;  %v1269_v2 = vpack.c.bf16 %v1826_v57, %v1822_v45  ;;  %v876_v9 = vmul.f32 %v1401_v51, %v1401_v51 }
 0x121   :  { %v936_v58 = vadd.f32 %v935_v49, %v873_v47  ;;  %v1184_v60 = vpack.c.bf16 %v291_v55, %v288_v43  ;;  %v803_v61 = vadd.f32 %v802_v46, %v291_v55  ;;  %v874_v62 = vmul.f32 %v291_v55, %v291_v55 }
 0x122   :  { %1301 = vst [vmem:[%s1998_s2 + $0x58] sm:$0xff] %v1189_v54   ;;  %v1264_v3 = vpack.c.bf16 %v1828_v0, %v1824_v52  ;;  %1317 = vst [vmem:[%s1998_s2 + $0xd8] sm:$0xff] %v1269_v2  }
 0x123   :  { %1300 = vst [vmem:[%s1998_s2 + $0x50] sm:$0xff] %v1184_v60   ;;  %v804_v6 = vadd.f32 %v1400_v40, %v803_v61  ;;  %v937_v8 = vadd.f32 %v936_v58, %v874_v62 }
 0x124   :  { %1316 = vst [vmem:[%s1998_s2 + $0xd0] sm:$0xff] %v1264_v3  }
 0x125   :  { %v938_v10 = vadd.f32 %v937_v8, %v875_v5  ;;  %v1404_v11 = vpop.f32.mrb[24].mxu0  ;;  %v805_v13 = vadd.f32 %v1401_v51, %v804_v6  ;;  %v1846_v16 = vpop.f32.mrb[24].mxu1 }
 0x126   :  { %v304_v14 = vpop.f32.mrb[25].mxu0  ;;  %v1848_v22 = vpop.f32.mrb[25].mxu1  ;;  %v879_v39 = vmul.f32 %v1404_v11, %v1404_v11 }
 0x127   :  { %v806_v17 = vadd.f32 %v805_v13, %v304_v14  ;;  %v877_v18 = vmul.f32 %v304_v14, %v304_v14  ;;  %v939_v19 = vadd.f32 %v938_v10, %v876_v9  ;;  %v1405_v21 = vpop.f32.mrb[26].mxu0  ;;  %v1850_v27 = vpop.f32.mrb[26].mxu1 }
 0x128   :  { %v1199_v25 = vpack.c.bf16 %v1405_v21, %v1404_v11  ;;  %v307_v26 = vpop.f32.mrb[27].mxu0  ;;  %v1852_v35 = vpop.f32.mrb[27].mxu1  ;;  %v1279_v37 = vpack.c.bf16 %v1850_v27, %v1846_v16  ;;  %v880_v43 = vmul.f32 %v1405_v21, %v1405_v21 }
 0x129   :  { %v940_v29 = vadd.f32 %v939_v19, %v877_v18  ;;  %v1194_v32 = vpack.c.bf16 %v307_v26, %v304_v14  ;;  %v807_v33 = vadd.f32 %v806_v17, %v307_v26  ;;  %v878_v34 = vmul.f32 %v307_v26, %v307_v26 }
 0x12a   :  { %1303 = vst [vmem:[%s1998_s2 + $0x68] sm:$0xff] %v1199_v25   ;;  %v1274_v38 = vpack.c.bf16 %v1852_v35, %v1848_v22  ;;  %1319 = vst [vmem:[%s1998_s2 + $0xe8] sm:$0xff] %v1279_v37  }
 0x12b   :  { %1302 = vst [vmem:[%s1998_s2 + $0x60] sm:$0xff] %v1194_v32   ;;  %v808_v40 = vadd.f32 %v1404_v11, %v807_v33  ;;  %v941_v41 = vadd.f32 %v940_v29, %v878_v34  ;;  %v885_v29 = vmul.f32 %v1704_v44, %v1704_v44 }
 0x12c   :  { %1318 = vst [vmem:[%s1998_s2 + $0xe0] sm:$0xff] %v1274_v38   ;;  %v886_v38 = vmul.f32 %v1710_v53, %v1710_v53 }
 0x12d   :  { %v942_v46 = vadd.f32 %v941_v41, %v879_v39  ;;  %v1408_v47 = vpop.f32.mrb[28].mxu0  ;;  %v809_v49 = vadd.f32 %v1405_v21, %v808_v40  ;;  %v1870_v54 = vpop.f32.mrb[28].mxu1  ;;  %v887_v39 = vmul.f32 %v1702_v42, %v1702_v42 }
 0x12e   :  { %v320_v51 = vpop.f32.mrb[29].mxu0  ;;  %v1872_v62 = vpop.f32.mrb[29].mxu1  ;;  %v883_v17 = vmul.f32 %v1408_v47, %v1408_v47 }
 0x12f   :  { %v810_v55 = vadd.f32 %v809_v49, %v320_v51  ;;  %v881_v58 = vmul.f32 %v320_v51, %v320_v51  ;;  %v943_v60 = vadd.f32 %v942_v46, %v880_v43  ;;  %v1409_v61 = vpop.f32.mrb[30].mxu0  ;;  %v1874_v5 = vpop.f32.mrb[30].mxu1  ;;  %v888_v43 = vmul.f32 %v1706_v48, %v1706_v48 }
 0x130   :  { %v1209_v2 = vpack.c.bf16 %v1409_v61, %v1408_v47  ;;  %v323_v3 = vpop.f32.mrb[31].mxu0  ;;  %v1876_v11 = vpop.f32.mrb[31].mxu1  ;;  %v1289_v13 = vpack.c.bf16 %v1874_v5, %v1870_v54  ;;  %v884_v21 = vmul.f32 %v1409_v61, %v1409_v61 }
 0x131   :  { %v944_v6 = vadd.f32 %v943_v60, %v881_v58  ;;  %v1204_v8 = vpack.c.bf16 %v323_v3, %v320_v51  ;;  %v811_v9 = vadd.f32 %v810_v55, %v323_v3  ;;  %v882_v10 = vmul.f32 %v323_v3, %v323_v3 }
 0x132   :  { %1305 = vst [vmem:[%s1998_s2 + $0x78] sm:$0xff] %v1209_v2   ;;  %v1284_v14 = vpack.c.bf16 %v1876_v11, %v1872_v62  ;;  %1321 = vst [vmem:[%s1998_s2 + $0xf8] sm:$0xff] %v1289_v13   ;;  %v890_v58 = vmul.f32 %v1732_v12, %v1732_v12 }
 0x133   :  { %1304 = vst [vmem:[%s1998_s2 + $0x70] sm:$0xff] %v1204_v8   ;;  %v812_v18 = vadd.f32 %v1408_v47, %v811_v9  ;;  %v945_v19 = vadd.f32 %v944_v6, %v882_v10  ;;  %v894_v10 = vmul.f32 %v1756_v36, %v1756_v36 }
 0x134   :  { %1320 = vst [vmem:[%s1998_s2 + $0xf0] sm:$0xff] %v1284_v14  }
 0x135   :  { %v946_v25 = vadd.f32 %v945_v19, %v883_v17  ;;  %v813_v26 = vadd.f32 %v1409_v61, %v812_v18 }
 0x137   :  { %v814_v32 = vadd.f32 %v813_v26, %v1704_v44  ;;  %v947_v33 = vadd.f32 %v946_v25, %v884_v21  ;;  %v889_v44 = vmul.f32 %v1728_v4, %v1728_v4  ;;  %v898_v26 = vmul.f32 %v1780_v1, %v1780_v1 }
 0x139   :  { %v948_v34 = vadd.f32 %v947_v33, %v885_v29  ;;  %v815_v37 = vadd.f32 %v814_v32, %v1710_v53 }
 0x13b   :  { %v816_v40 = vadd.f32 %v1702_v42, %v815_v37  ;;  %v949_v41 = vadd.f32 %v948_v34, %v886_v38  ;;  %v891_v42 = vmul.f32 %v1726_v63, %v1726_v63 }
 0x13d   :  { %v950_v46 = vadd.f32 %v949_v41, %v887_v39  ;;  %v817_v47 = vadd.f32 %v1706_v48, %v816_v40  ;;  %v892_v48 = vmul.f32 %v1730_v7, %v1730_v7  ;;  %v902_v40 = vmul.f32 %v1804_v30, %v1804_v30 }
 0x13f   :  { %v818_v49 = vadd.f32 %v817_v47, %v1728_v4  ;;  %v951_v51 = vadd.f32 %v950_v46, %v888_v43  ;;  %v893_v4 = vmul.f32 %v1752_v28, %v1752_v28 }
 0x141   :  { %v952_v55 = vadd.f32 %v951_v51, %v889_v44  ;;  %v819_v53 = vadd.f32 %v818_v49, %v1732_v12 }
 0x143   :  { %v820_v60 = vadd.f32 %v1726_v63, %v819_v53  ;;  %v953_v61 = vadd.f32 %v952_v55, %v890_v58  ;;  %v895_v63 = vmul.f32 %v1750_v23, %v1750_v23  ;;  %v906_v55 = vmul.f32 %v1828_v0, %v1828_v0 }
 0x145   :  { %v954_v2 = vadd.f32 %v953_v61, %v891_v42  ;;  %v821_v3 = vadd.f32 %v1730_v7, %v820_v60  ;;  %v896_v7 = vmul.f32 %v1754_v31, %v1754_v31 }
 0x147   :  { %v822_v6 = vadd.f32 %v821_v3, %v1752_v28  ;;  %v955_v8 = vadd.f32 %v954_v2, %v892_v48  ;;  %v897_v28 = vmul.f32 %v1776_v56, %v1776_v56  ;;  %v910_v3 = vmul.f32 %v1852_v35, %v1852_v35 }
 0x149   :  { %v956_v9 = vadd.f32 %v955_v8, %v893_v4  ;;  %v823_v12 = vadd.f32 %v822_v6, %v1756_v36 }
 0x14b   :  { %v824_v13 = vadd.f32 %v1750_v23, %v823_v12  ;;  %v957_v14 = vadd.f32 %v956_v9, %v894_v10  ;;  %v899_v23 = vmul.f32 %v1774_v50, %v1774_v50 }
 0x14d   :  { %v958_v17 = vadd.f32 %v957_v14, %v895_v63  ;;  %v825_v18 = vadd.f32 %v1754_v31, %v824_v13  ;;  %v900_v31 = vmul.f32 %v1778_v59, %v1778_v59  ;;  %v914_v13 = vmul.f32 %v1876_v11, %v1876_v11 }
 0x14f   :  { %v826_v19 = vadd.f32 %v825_v18, %v1776_v56  ;;  %v959_v21 = vadd.f32 %v958_v17, %v896_v7  ;;  %v901_v56 = vmul.f32 %v1800_v20, %v1800_v20 }
 0x151   :  { %v960_v25 = vadd.f32 %v959_v21, %v897_v28  ;;  %v827_v36 = vadd.f32 %v826_v19, %v1780_v1 }
 0x153   :  { %v828_v29 = vadd.f32 %v1774_v50, %v827_v36  ;;  %v961_v32 = vadd.f32 %v960_v25, %v898_v26  ;;  %v903_v50 = vmul.f32 %v1798_v15, %v1798_v15 }
 0x155   :  { %v962_v33 = vadd.f32 %v961_v32, %v899_v23  ;;  %v829_v34 = vadd.f32 %v1778_v59, %v828_v29  ;;  %v904_v59 = vmul.f32 %v1802_v24, %v1802_v24 }
 0x157   :  { %v830_v37 = vadd.f32 %v829_v34, %v1800_v20  ;;  %v963_v38 = vadd.f32 %v962_v33, %v900_v31  ;;  %v905_v20 = vmul.f32 %v1824_v52, %v1824_v52 }
 0x159   :  { %v964_v39 = vadd.f32 %v963_v38, %v901_v56  ;;  %v831_v1 = vadd.f32 %v830_v37, %v1804_v30 }
 0x15b   :  { %v832_v41 = vadd.f32 %v1798_v15, %v831_v1  ;;  %v965_v43 = vadd.f32 %v964_v39, %v902_v40  ;;  %v907_v15 = vmul.f32 %v1822_v45, %v1822_v45 }
 0x15d   :  { %v966_v46 = vadd.f32 %v965_v43, %v903_v50  ;;  %v833_v47 = vadd.f32 %v1802_v24, %v832_v41  ;;  %v908_v24 = vmul.f32 %v1826_v57, %v1826_v57 }
 0x15f   :  { %v834_v44 = vadd.f32 %v833_v47, %v1824_v52  ;;  %v967_v49 = vadd.f32 %v966_v46, %v904_v59  ;;  %v909_v52 = vmul.f32 %v1848_v22, %v1848_v22 }
 0x161   :  { %v968_v51 = vadd.f32 %v967_v49, %v905_v20  ;;  %v835_v30 = vadd.f32 %v834_v44, %v1828_v0 }
 0x163   :  { %v836_v53 = vadd.f32 %v1822_v45, %v835_v30  ;;  %v969_v58 = vadd.f32 %v968_v51, %v906_v55  ;;  %v911_v45 = vmul.f32 %v1846_v16, %v1846_v16 }
 0x165   :  { %v970_v42 = vadd.f32 %v969_v58, %v907_v15  ;;  %v837_v60 = vadd.f32 %v1826_v57, %v836_v53  ;;  %v912_v57 = vmul.f32 %v1850_v27, %v1850_v27 }
 0x167   :  { %v838_v61 = vadd.f32 %v837_v60, %v1848_v22  ;;  %v971_v48 = vadd.f32 %v970_v42, %v908_v24  ;;  %v913_v22 = vmul.f32 %v1872_v62, %v1872_v62 }
 0x169   :  { %v972_v2 = vadd.f32 %v971_v48, %v909_v52  ;;  %v839_v0 = vadd.f32 %v838_v61, %v1852_v35 }
 0x16b   :  { %v840_v4 = vadd.f32 %v1846_v16, %v839_v0  ;;  %v973_v6 = vadd.f32 %v972_v2, %v910_v3  ;;  %v915_v16 = vmul.f32 %v1870_v54, %v1870_v54 }
 0x16d   :  { %v974_v8 = vadd.f32 %v973_v6, %v911_v45  ;;  %v841_v9 = vadd.f32 %v1850_v27, %v840_v4  ;;  %v916_v27 = vmul.f32 %v1874_v5, %v1874_v5 }
 0x16f   :  { %v842_v12 = vadd.f32 %v841_v9, %v1872_v62  ;;  %v975_v10 = vadd.f32 %v974_v8, %v912_v57 }
 0x171   :  { %v976_v63 = vadd.f32 %v975_v10, %v913_v22  ;;  %v843_v35 = vadd.f32 %v842_v12, %v1876_v11 }
 0x173   :  { %v844_v14 = vadd.f32 %v1870_v54, %v843_v35  ;;  %v977_v7 = vadd.f32 %v976_v63, %v914_v13 }
 0x175   :  { %v845_v17 = vadd.f32 %v1874_v5, %v844_v14  ;;  %v978_v18 = vadd.f32 %v977_v7, %v915_v16 }
 0x177   :  { %v846_v62 = vrot.slane %v845_v17, 4  ;;  %v979_v28 = vadd.f32 %v978_v18, %v916_v27 }
 0x179   :  { %v847_v19 = vadd.f32 %v846_v62, %v845_v17  ;;  %v980_v21 = vrot.slane %v979_v28, 4 }
 0x17b   :  { %v848_v25 = vrot.slane %v847_v19, 2  ;;  %v981_v36 = vadd.f32 %v980_v21, %v979_v28 }
 0x17d   :  { %v849_v26 = vadd.f32 %v848_v25, %v847_v19  ;;  %v982_v11 = vrot.slane %v981_v36, 2 }
 0x17f   :  { %v850_v23 = vrot.slane %v849_v26, 1  ;;  %v983_v29 = vadd.f32 %v982_v11, %v981_v36 }
 0x181   :  { %v851_v32 = vadd.f32 %v850_v23, %v849_v26  ;;  %v984_v31 = vrot.slane %v983_v29, 1 }
 0x183   :  { %852 = vst [vmem:[%s1999_s3] sm:$0x1] %v851_v32  ;;  %v985_v54 = vadd.f32 %v984_v31, %v983_v29 }
 0x185   :  { %986 = vst [vmem:[%s1999_s3 + $0x1] sm:$0x1] %v985_v54 }

// kernel: sa_module_pct_forward.8
= control target key start
LH: loop header
LB: loop body
LE: loop exit
PB: predicated region body
PF: predicated region fallthrough
CT: control target
= control target key end

     0   :  { %s2417_s9 = smov 0   ;;  %s2419_s10 = smov 0   ;;  %s3481_s0 = inlined_call_operand.vmem [shape: bf16[512,128], index: 0, kind: input, shape index: {}]   ;;  %s3482_s1 = inlined_call_operand.vmem [shape: bf16[512,128], index: 1, kind: input, shape index: {}]   ;;  %s3483_s2 = inlined_call_operand.vmem [shape: f32[512,1], index: 2, kind: output, shape index: {}]  }
   0x1   :  { %s2421_s11 = smov 0   ;;  %s2423_s12 = smov 0  }
   0x2   :  { %s2425_s13 = smov 0  }
   0x3 LB: > { %s21_s14 = sadd.s32 1, %s2389_s11  ;;  %s24_s15 = sadd.s32 1, %s2393_s12  ;;  %s2397_s13 = sphi %s2425_s13, %s12_s13   ;;  %s2393_s12 = sphi %s2423_s12, %s3756_s12   ;;  %s2389_s11 = sphi %s2421_s11, %s3755_s11   ;;  %s2385_s10 = sphi %s2419_s10, %s3754_s10   ;;  %s2381_s9 = sphi %s2417_s9, %s3753_s9  }
   0x4   : > { %p22_p0 = scmp.ge.s32.totalorder %s21_s14, 2  ;;  %p1918_p1 = scmp.ge.s32.totalorder %s2397_s13, 1 }
   0x5   : > { %p136_p2 = scmp.lt.s32.totalorder %s2397_s13, 5 }
   0x6   : > { %s3758_s14 = smov (%p22_p0, %s21_s14), 0  ;;  %s3760_s15 = smov (!%p22_p0, %s24_s15), %s2393_s12 }
   0x7   : > { %p137_p3 = pnand %p1918_p1, %p136_p2  ;;  %p26_p4 = scmp.ge.s32.totalorder %s3760_s15, 2 }
   0x9   : > { %s3762_s15 = smov (%p26_p4, %s3760_s15), 0  ;;  %140 = sbr.rel (%p137_p3) target bundleno = 886 (0x376), region = 28 }
  0x10   : > { %s1919_s16 = sshll.u32 %s2385_s10, 5  ;;  %s1921_s17 = sshll.u32 %s2381_s9, 5 }
  0x11   : > { %p164_p5 = scmp.lt.s32.totalorder %s1919_s16, 63  ;;  %p170_p6 = scmp.lt.s32.totalorder %s1921_s17, 63 }
  0x12   : > { %p1925_p7 = scmp.ne.s32.totalorder %s2381_s9, 0 }
  0x13   : > { %s3764_s16 = smov (!%p164_p5, %s1919_s16), 63  ;;  %s3766_s17 = smov (!%p170_p6, %s1921_s17), 63 }
  0x14   : > { %s1920_s18 = sshll.u32 %s3764_s16, 2  ;;  %s1924_s19 = sshll.u32 %s3764_s16, 3  ;;  %vm186_vm0 = vcmask (!%p1925_p7), 7168   ;;  %v2399_v0 = vmov (!%p1925_p7), -inf   ;;  %v2400_v1 = vmov (!%p1925_p7), 0.0  }
  0x15   : > { %s2453_s22 = scalar_lea.vmem %s3481_s0, %s1920_s18  ;;  %s1922_s23 = sshll.u32 %s3766_s17, 2  ;;  %187 = vst.msk [vmem:[#allocation2] sm:$0xff] (!%p1925_p7), %vm186_vm0, %v2399_v0  ;;  %188 = vst.msk [vmem:[#allocation2 + $0x8] sm:$0xff] (!%p1925_p7), %vm186_vm0, %v2399_v0 }
  0x16   : > { %s2458_s26 = scalar_lea.vmem %s3482_s1, %s1922_s23  ;;  %s2463_s29 = scalar_lea.vmem %s3483_s2, %s1924_s19  ;;  %189 = vst.msk [vmem:[#allocation2 + $0x10] sm:$0xff] (!%p1925_p7), %vm186_vm0, %v2399_v0  ;;  %190 = vst.msk [vmem:[#allocation2 + $0x18] sm:$0xff] (!%p1925_p7), %vm186_vm0, %v2399_v0 }
  0x17   : > { %185 = sbr.rel (%p1925_p7) target bundleno = 53 (0x35), region = 32  ;;  %191 = vst.msk [vmem:[#allocation2 + $0x20] sm:$0xff] (!%p1925_p7), %vm186_vm0, %v2399_v0  ;;  %192 = vst.msk [vmem:[#allocation2 + $0x28] sm:$0xff] (!%p1925_p7), %vm186_vm0, %v2399_v0 }
  0x18   : > { %193 = vst.msk [vmem:[#allocation2 + $0x30] sm:$0xff] (!%p1925_p7), %vm186_vm0, %v2399_v0  ;;  %194 = vst.msk [vmem:[#allocation2 + $0x38] sm:$0xff] (!%p1925_p7), %vm186_vm0, %v2399_v0 }
  0x19   : > { %195 = vst.msk [vmem:[#allocation2 + $0x40] sm:$0xff] (!%p1925_p7), %vm186_vm0, %v2399_v0  ;;  %196 = vst.msk [vmem:[#allocation2 + $0x48] sm:$0xff] (!%p1925_p7), %vm186_vm0, %v2399_v0 }
  0x1a   : > { %197 = vst.msk [vmem:[#allocation2 + $0x50] sm:$0xff] (!%p1925_p7), %vm186_vm0, %v2399_v0  ;;  %198 = vst.msk [vmem:[#allocation2 + $0x58] sm:$0xff] (!%p1925_p7), %vm186_vm0, %v2399_v0 }
  0x1b   : > { %199 = vst.msk [vmem:[#allocation2 + $0x60] sm:$0xff] (!%p1925_p7), %vm186_vm0, %v2399_v0  ;;  %200 = vst.msk [vmem:[#allocation2 + $0x68] sm:$0xff] (!%p1925_p7), %vm186_vm0, %v2399_v0 }
  0x1c   : > { %201 = vst.msk [vmem:[#allocation2 + $0x70] sm:$0xff] (!%p1925_p7), %vm186_vm0, %v2399_v0  ;;  %202 = vst.msk [vmem:[#allocation2 + $0x78] sm:$0xff] (!%p1925_p7), %vm186_vm0, %v2399_v0 }
  0x1d   : > { %203 = vst.msk [vmem:[#allocation2 + $0x80] sm:$0xff] (!%p1925_p7), %vm186_vm0, %v2399_v0  ;;  %204 = vst.msk [vmem:[#allocation2 + $0x88] sm:$0xff] (!%p1925_p7), %vm186_vm0, %v2399_v0 }
  0x1e   : > { %205 = vst.msk [vmem:[#allocation2 + $0x90] sm:$0xff] %vm186_vm0, %v2399_v0  ;;  %206 = vst.msk [vmem:[#allocation2 + $0x98] sm:$0xff] %vm186_vm0, %v2399_v0 }
  0x1f   : > { %207 = vst.msk [vmem:[#allocation2 + $0xa0] sm:$0xff] %vm186_vm0, %v2399_v0  ;;  %208 = vst.msk [vmem:[#allocation2 + $0xa8] sm:$0xff] %vm186_vm0, %v2399_v0 }
  0x20   : > { %209 = vst.msk [vmem:[#allocation2 + $0xb0] sm:$0xff] %vm186_vm0, %v2399_v0  ;;  %210 = vst.msk [vmem:[#allocation2 + $0xb8] sm:$0xff] %vm186_vm0, %v2399_v0 }
  0x21   : > { %211 = vst.msk [vmem:[#allocation2 + $0xc0] sm:$0xff] %vm186_vm0, %v2399_v0  ;;  %212 = vst.msk [vmem:[#allocation2 + $0xc8] sm:$0xff] %vm186_vm0, %v2399_v0 }
  0x22   : > { %213 = vst.msk [vmem:[#allocation2 + $0xd0] sm:$0xff] %vm186_vm0, %v2399_v0  ;;  %214 = vst.msk [vmem:[#allocation2 + $0xd8] sm:$0xff] %vm186_vm0, %v2399_v0 }
  0x23   : > { %215 = vst.msk [vmem:[#allocation2 + $0xe0] sm:$0xff] %vm186_vm0, %v2399_v0  ;;  %216 = vst.msk [vmem:[#allocation2 + $0xe8] sm:$0xff] %vm186_vm0, %v2399_v0 }
  0x24   : > { %217 = vst.msk [vmem:[#allocation2 + $0xf0] sm:$0xff] %vm186_vm0, %v2399_v0  ;;  %218 = vst.msk [vmem:[#allocation2 + $0xf8] sm:$0xff] %vm186_vm0, %v2399_v0 }
  0x25   : > { %219 = vst.msk [vmem:[#allocation3] sm:$0xff] %vm186_vm0, %v2400_v1  ;;  %220 = vst.msk [vmem:[#allocation3 + $0x8] sm:$0xff] %vm186_vm0, %v2400_v1 }
  0x26   : > { %221 = vst.msk [vmem:[#allocation3 + $0x10] sm:$0xff] %vm186_vm0, %v2400_v1  ;;  %222 = vst.msk [vmem:[#allocation3 + $0x18] sm:$0xff] %vm186_vm0, %v2400_v1 }
  0x27   : > { %223 = vst.msk [vmem:[#allocation3 + $0x20] sm:$0xff] %vm186_vm0, %v2400_v1  ;;  %224 = vst.msk [vmem:[#allocation3 + $0x28] sm:$0xff] %vm186_vm0, %v2400_v1 }
  0x28   : > { %225 = vst.msk [vmem:[#allocation3 + $0x30] sm:$0xff] %vm186_vm0, %v2400_v1  ;;  %226 = vst.msk [vmem:[#allocation3 + $0x38] sm:$0xff] %vm186_vm0, %v2400_v1 }
  0x29   : > { %227 = vst.msk [vmem:[#allocation3 + $0x40] sm:$0xff] %vm186_vm0, %v2400_v1  ;;  %228 = vst.msk [vmem:[#allocation3 + $0x48] sm:$0xff] %vm186_vm0, %v2400_v1 }
  0x2a   : > { %229 = vst.msk [vmem:[#allocation3 + $0x50] sm:$0xff] %vm186_vm0, %v2400_v1  ;;  %230 = vst.msk [vmem:[#allocation3 + $0x58] sm:$0xff] %vm186_vm0, %v2400_v1 }
  0x2b   : > { %231 = vst.msk [vmem:[#allocation3 + $0x60] sm:$0xff] %vm186_vm0, %v2400_v1  ;;  %232 = vst.msk [vmem:[#allocation3 + $0x68] sm:$0xff] %vm186_vm0, %v2400_v1 }
  0x2c   : > { %233 = vst.msk [vmem:[#allocation3 + $0x70] sm:$0xff] %vm186_vm0, %v2400_v1  ;;  %234 = vst.msk [vmem:[#allocation3 + $0x78] sm:$0xff] %vm186_vm0, %v2400_v1 }
  0x2d   : > { %235 = vst.msk [vmem:[#allocation3 + $0x80] sm:$0xff] %vm186_vm0, %v2400_v1  ;;  %236 = vst.msk [vmem:[#allocation3 + $0x88] sm:$0xff] %vm186_vm0, %v2400_v1 }
  0x2e   : > { %237 = vst.msk [vmem:[#allocation3 + $0x90] sm:$0xff] %vm186_vm0, %v2400_v1  ;;  %238 = vst.msk [vmem:[#allocation3 + $0x98] sm:$0xff] %vm186_vm0, %v2400_v1 }
  0x2f   : > { %239 = vst.msk [vmem:[#allocation3 + $0xa0] sm:$0xff] %vm186_vm0, %v2400_v1  ;;  %240 = vst.msk [vmem:[#allocation3 + $0xa8] sm:$0xff] %vm186_vm0, %v2400_v1 }
  0x30   : > { %241 = vst.msk [vmem:[#allocation3 + $0xb0] sm:$0xff] %vm186_vm0, %v2400_v1  ;;  %242 = vst.msk [vmem:[#allocation3 + $0xb8] sm:$0xff] %vm186_vm0, %v2400_v1 }
  0x31   : > { %243 = vst.msk [vmem:[#allocation3 + $0xc0] sm:$0xff] %vm186_vm0, %v2400_v1  ;;  %244 = vst.msk [vmem:[#allocation3 + $0xc8] sm:$0xff] %vm186_vm0, %v2400_v1 }
  0x32   : > { %245 = vst.msk [vmem:[#allocation3 + $0xd0] sm:$0xff] %vm186_vm0, %v2400_v1  ;;  %246 = vst.msk [vmem:[#allocation3 + $0xd8] sm:$0xff] %vm186_vm0, %v2400_v1 }
  0x33   : > { %247 = vst.msk [vmem:[#allocation3 + $0xe0] sm:$0xff] %vm186_vm0, %v2400_v1  ;;  %248 = vst.msk [vmem:[#allocation3 + $0xe8] sm:$0xff] %vm186_vm0, %v2400_v1 }
  0x34   : > { %249 = vst.msk [vmem:[#allocation3 + $0xf0] sm:$0xff] %vm186_vm0, %v2400_v1  ;;  %250 = vst.msk [vmem:[#allocation3 + $0xf8] sm:$0xff] %vm186_vm0, %v2400_v1 }
  0x35 PF: > { %v2071_v2 = vld [vmem:[%s2458_s26 + $0x40] sm:$0xff]   ;;  %v2073_v4 = vld [vmem:[%s2458_s26 + $0x48] sm:$0xff]   ;;  %v2075_v6 = vld [vmem:[%s2458_s26 + $0x50] sm:$0xff]   ;;  %v701_v34 = vlaneseq  ;;  %s1958_s30 = sshll.u32 %s2381_s9, 8  ;;  %vm1573_vm3 = vcmask 7168   ;;  %p1959_p8 = scmp.ne.s32.totalorder %s2381_s9, 1 }
  0x36   : > { %v2072_v3 = vld [vmem:[%s2458_s26] sm:$0xff]   ;;  %1962 = vmatprep.subr.bf16.mxu0 %v2071_v2  ;;  %2010 = vmatprep.subr.bf16.mxu1 %v2071_v2  ;;  %v2074_v5 = vld [vmem:[%s2458_s26 + $0x8] sm:$0xff]   ;;  %v2076_v7 = vld [vmem:[%s2458_s26 + $0x10] sm:$0xff]   ;;  %v704_v36 = vstv %s1958_s30 }
  0x37   : > { %1963 = vmatpush3.bf16.xpose.msra.mxu0 %v2072_v3  ;;  %2018 = vmatpush3.bf16.xpose.msra.mxu1 %v2072_v3  ;;  %v2077_v8 = vld [vmem:[%s2458_s26 + $0x58] sm:$0xff]   ;;  %v2087_v9 = vld [vmem:[%s2453_s22] sm:$0xff]   ;;  %v2081_v14 = vld [vmem:[%s2458_s26 + $0x68] sm:$0xff]   ;;  %v702_v35 = vand.u32 127, %v701_v34 }
  0x38   : > { %1964 = vmatprep.subr.bf16.mxu0 %v2073_v4  ;;  %2011 = vmatprep.subr.bf16.mxu1 %v2073_v4  ;;  %v2088_v10 = vld [vmem:[%s2453_s22 + $0x40] sm:$0xff]   ;;  %v2078_v11 = vld [vmem:[%s2458_s26 + $0x18] sm:$0xff]   ;;  %v2082_v15 = vld [vmem:[%s2458_s26 + $0x28] sm:$0xff]  }
  0x39   : > { %1978 = vmatprep.mubr.bf16.mxu0 %v2087_v9  ;;  %1994 = vmatprep.mubr.bf16.mxu1 %v2088_v10  ;;  %v2079_v12 = vld [vmem:[%s2458_s26 + $0x60] sm:$0xff]   ;;  %v2083_v16 = vld [vmem:[%s2458_s26 + $0x70] sm:$0xff]   ;;  %v2085_v18 = vld [vmem:[%s2458_s26 + $0x78] sm:$0xff]   ;;  %v703_v37 = vadd.s32 128, %v702_v35  ;;  %v2563_v38 = vadd.s32 %v704_v36, %v702_v35  ;;  %v2401_v35 = vmov 0  }
  0x3a   : > { %v2080_v13 = vld [vmem:[%s2458_s26 + $0x20] sm:$0xff]   ;;  %v2084_v17 = vld [vmem:[%s2458_s26 + $0x30] sm:$0xff]   ;;  %v2086_v19 = vld [vmem:[%s2458_s26 + $0x38] sm:$0xff]   ;;  %2069 = vset.pattern.permute.xlu0 %v2401_v35  ;;  %2070 = vset.pattern.permute.xlu1 %v2401_v35 }
  0x3b   : > { %v2089_v20 = vld [vmem:[%s2453_s22 + $0x8] sm:$0xff]   ;;  %v2091_v22 = vld [vmem:[%s2453_s22 + $0x10] sm:$0xff]   ;;  %v2093_v24 = vld [vmem:[%s2453_s22 + $0x18] sm:$0xff]   ;;  %v2565_v39 = vadd.s32 %v704_v36, %v703_v37  ;;  %vm707_vm1 = vcmp.lt.s32.totalorder %v2563_v38, 200 }
  0x3c   : > { %v2090_v21 = vld [vmem:[%s2453_s22 + $0x48] sm:$0xff]   ;;  %v2092_v23 = vld [vmem:[%s2453_s22 + $0x50] sm:$0xff]   ;;  %v2094_v25 = vld [vmem:[%s2453_s22 + $0x58] sm:$0xff]  }
  0x3d   : > { %v2095_v26 = vld [vmem:[%s2453_s22 + $0x20] sm:$0xff]   ;;  %v2097_v28 = vld [vmem:[%s2453_s22 + $0x28] sm:$0xff]   ;;  %v2099_v30 = vld [vmem:[%s2453_s22 + $0x30] sm:$0xff]   ;;  %vm708_vm2 = vcmp.lt.s32.totalorder %v2565_v39, 200 }
  0x3e   : > { %v2096_v27 = vld [vmem:[%s2453_s22 + $0x60] sm:$0xff]   ;;  %v2098_v29 = vld [vmem:[%s2453_s22 + $0x68] sm:$0xff]   ;;  %v2100_v31 = vld [vmem:[%s2453_s22 + $0x70] sm:$0xff]  }
  0x3f   : > { %1965 = vmatpush3.bf16.xpose.msra.mxu0 %v2074_v5  ;;  %2019 = vmatpush3.bf16.xpose.msra.mxu1 %v2074_v5  ;;  %v2101_v32 = vld [vmem:[%s2453_s22 + $0x38] sm:$0xff]  }
  0x40   : > { %1966 = vmatprep.subr.bf16.mxu0 %v2075_v6  ;;  %2012 = vmatprep.subr.bf16.mxu1 %v2075_v6  ;;  %v2102_v33 = vld [vmem:[%s2453_s22 + $0x78] sm:$0xff]  }
  0x47   : > { %1967 = vmatpush3.bf16.xpose.msra.mxu0 %v2076_v7  ;;  %2020 = vmatpush3.bf16.xpose.msra.mxu1 %v2076_v7 }
  0x48   : > { %1968 = vmatprep.subr.bf16.mxu0 %v2077_v8  ;;  %2013 = vmatprep.subr.bf16.mxu1 %v2077_v8 }
  0x4f   : > { %1969 = vmatpush3.bf16.xpose.msra.mxu0 %v2078_v11  ;;  %2021 = vmatpush3.bf16.xpose.msra.mxu1 %v2078_v11 }
  0x50   : > { %1970 = vmatprep.subr.bf16.mxu0 %v2079_v12  ;;  %2014 = vmatprep.subr.bf16.mxu1 %v2079_v12 }
  0x57   : > { %1971 = vmatpush3.bf16.xpose.msra.mxu0 %v2080_v13  ;;  %2022 = vmatpush3.bf16.xpose.msra.mxu1 %v2080_v13 }
  0x58   : > { %1972 = vmatprep.subr.bf16.mxu0 %v2081_v14  ;;  %2015 = vmatprep.subr.bf16.mxu1 %v2081_v14 }
  0x5f   : > { %1973 = vmatpush3.bf16.xpose.msra.mxu0 %v2082_v15  ;;  %2023 = vmatpush3.bf16.xpose.msra.mxu1 %v2082_v15 }
  0x60   : > { %1974 = vmatprep.subr.bf16.mxu0 %v2083_v16  ;;  %2016 = vmatprep.subr.bf16.mxu1 %v2083_v16 }
  0x67   : > { %1975 = vmatpush3.bf16.xpose.msra.mxu0 %v2084_v17  ;;  %2024 = vmatpush3.bf16.xpose.msra.mxu1 %v2084_v17 }
  0x68   : > { %1976 = vmatprep.subr.bf16.mxu0 %v2085_v18  ;;  %2017 = vmatprep.subr.bf16.mxu1 %v2085_v18 }
  0x6f   : > { %1977 = vmatpush3.bf16.xpose.msra.mxu0 %v2086_v19  ;;  %2025 = vmatpush3.bf16.xpose.msra.mxu1 %v2086_v19 }
  0x76   : > { %1979 = vmatmul.mubr.bf16.vlgmr.msra.gmra.mrb[0].mxu0 %v2087_v9  ;;  %1995 = vmatmul.mubr.bf16.vlgmr.msra.gmra.mrb[0].mxu1 %v2088_v10 }
  0x77   : > { %1980 = vmatprep.mubr.bf16.mxu0 %v2089_v20  ;;  %1996 = vmatprep.mubr.bf16.mxu1 %v2090_v21 }
  0x7e   : > { %1981 = vmatmul.mubr.bf16.gmra.mrb[4].mxu0 %v2089_v20  ;;  %1997 = vmatmul.mubr.bf16.gmra.mrb[4].mxu1 %v2090_v21 }
  0x7f   : > { %1982 = vmatprep.mubr.bf16.mxu0 %v2091_v22  ;;  %1998 = vmatprep.mubr.bf16.mxu1 %v2092_v23 }
  0x86   : > { %1983 = vmatmul.mubr.bf16.gmra.mrb[8].mxu0 %v2091_v22  ;;  %1999 = vmatmul.mubr.bf16.gmra.mrb[8].mxu1 %v2092_v23 }
  0x87   : > { %1984 = vmatprep.mubr.bf16.mxu0 %v2093_v24  ;;  %2000 = vmatprep.mubr.bf16.mxu1 %v2094_v25 }
  0x8e   : > { %1985 = vmatmul.mubr.bf16.gmra.mrb[12].mxu0 %v2093_v24  ;;  %2001 = vmatmul.mubr.bf16.gmra.mrb[12].mxu1 %v2094_v25 }
  0x8f   : > { %1986 = vmatprep.mubr.bf16.mxu0 %v2095_v26  ;;  %2002 = vmatprep.mubr.bf16.mxu1 %v2096_v27 }
  0x96   : > { %1987 = vmatmul.mubr.bf16.gmra.mrb[16].mxu0 %v2095_v26  ;;  %2003 = vmatmul.mubr.bf16.gmra.mrb[16].mxu1 %v2096_v27 }
  0x97   : > { %1988 = vmatprep.mubr.bf16.mxu0 %v2097_v28  ;;  %2004 = vmatprep.mubr.bf16.mxu1 %v2098_v29 }
  0x9e   : > { %1989 = vmatmul.mubr.bf16.gmra.mrb[20].mxu0 %v2097_v28  ;;  %2005 = vmatmul.mubr.bf16.gmra.mrb[20].mxu1 %v2098_v29 }
  0x9f   : > { %1990 = vmatprep.mubr.bf16.mxu0 %v2099_v30  ;;  %2006 = vmatprep.mubr.bf16.mxu1 %v2100_v31 }
  0xa6   : > { %1991 = vmatmul.mubr.bf16.gmra.mrb[24].mxu0 %v2099_v30  ;;  %2007 = vmatmul.mubr.bf16.gmra.mrb[24].mxu1 %v2100_v31 }
  0xa7   : > { %1992 = vmatprep.mubr.bf16.mxu0 %v2101_v32  ;;  %2008 = vmatprep.mubr.bf16.mxu1 %v2102_v33 }
  0xae   : > { %1993 = vmatmul.mubr.bf16.gmra.mrb[28].mxu0 %v2101_v32  ;;  %2009 = vmatmul.mubr.bf16.gmra.mrb[28].mxu1 %v2102_v33 }
 0x149   : > { %v541_v40 = vpop.f32.mrb[0].mxu0  ;;  %v621_v41 = vpop.f32.mrb[0].mxu1 }
 0x14a   : > { %v2571_v42 = vsel %vm707_vm1, %v541_v40, -1e+30  ;;  %v543_v43 = vpop.f32.mrb[1].mxu0  ;;  %v2575_v44 = vsel %vm707_vm1, %v621_v41, -1e+30  ;;  %v623_v45 = vpop.f32.mrb[1].mxu1 }
 0x14b   : > { %v2579_v46 = vsel %vm708_vm2, %v543_v43, -1e+30  ;;  %v545_v47 = vpop.f32.mrb[2].mxu0  ;;  %v2583_v48 = vsel %vm708_vm2, %v623_v45, -1e+30  ;;  %v625_v49 = vpop.f32.mrb[2].mxu1 }
 0x14c   : > { %v547_v50 = vpop.f32.mrb[3].mxu0  ;;  %v2587_v51 = vsel %vm707_vm1, %v625_v49, -1e+30  ;;  %v627_v52 = vpop.f32.mrb[3].mxu1  ;;  %v805_v53 = vmax.f32 %v2571_v42, %v2579_v46  ;;  %v853_v56 = vmax.f32 %v2575_v44, %v2583_v48  ;;  %v2601_v57 = vsel %vm707_vm1, %v545_v47, -1e+30 }
 0x14d   : > { %v2593_v54 = vsel %vm708_vm2, %v627_v52, -1e+30  ;;  %v2605_v58 = vsel %vm708_vm2, %v547_v50, -1e+30 }
 0x14e   : > { %806 = vmax.xlane.f32.xlu0 %v805_v53  ;;  %v856_v55 = vmax.f32 %v2587_v51, %v2593_v54  ;;  %v808_v7 = vmax.f32 %v2601_v57, %v2605_v58 }
 0x150   : > { %857 = vmax.xlane.f32.xlu1 %v856_v55 }
 0x151   : > { %v551_v59 = vpop.f32.mrb[4].mxu0  ;;  %v631_v60 = vpop.f32.mrb[4].mxu1 }
 0x152   : > { %v2609_v61 = vsel %vm707_vm1, %v551_v59, -1e+30  ;;  %854 = vmax.xlane.f32.xlu0 %v853_v56  ;;  %v553_v62 = vpop.f32.mrb[5].mxu0  ;;  %v2613_v63 = vsel %vm707_vm1, %v631_v60, -1e+30  ;;  %v633_v0 = vpop.f32.mrb[5].mxu1 }
 0x153   : > { %v2617_v1 = vsel %vm708_vm2, %v553_v62, -1e+30  ;;  %v555_v2 = vpop.f32.mrb[6].mxu0  ;;  %v2621_v3 = vsel %vm708_vm2, %v633_v0, -1e+30  ;;  %v635_v4 = vpop.f32.mrb[6].mxu1 }
 0x154   : > { %v2625_v5 = vsel %vm707_vm1, %v555_v2, -1e+30  ;;  %v557_v6 = vpop.f32.mrb[7].mxu0  ;;  %v811_v8 = vmax.f32 %v2609_v61, %v2617_v1  ;;  %v637_v9 = vpop.f32.mrb[7].mxu1  ;;  %v859_v12 = vmax.f32 %v2613_v63, %v2621_v3  ;;  %v2641_v13 = vsel %vm707_vm1, %v635_v4, -1e+30 }
 0x155   : > { %v2633_v10 = vsel %vm708_vm2, %v557_v6, -1e+30  ;;  %v2645_v14 = vsel %vm708_vm2, %v637_v9, -1e+30 }
 0x156   : > { %809 = vmax.xlane.f32.xlu0 %v808_v7  ;;  %812 = vmax.xlane.f32.xlu1 %v811_v8  ;;  %v814_v11 = vmax.f32 %v2625_v5, %v2633_v10  ;;  %v862_v19 = vmax.f32 %v2641_v13, %v2645_v14 }
 0x159   : > { %v561_v15 = vpop.f32.mrb[8].mxu0  ;;  %v641_v16 = vpop.f32.mrb[8].mxu1 }
 0x15a   : > { %815 = vmax.xlane.f32.xlu1 %v814_v11  ;;  %v2649_v17 = vsel %vm707_vm1, %v561_v15, -1e+30  ;;  %v563_v18 = vpop.f32.mrb[9].mxu0  ;;  %860 = vmax.xlane.f32.xlu0 %v859_v12  ;;  %v2655_v20 = vsel %vm707_vm1, %v641_v16, -1e+30  ;;  %v643_v21 = vpop.f32.mrb[9].mxu1 }
 0x15b   : > { %v2659_v22 = vsel %vm708_vm2, %v563_v18, -1e+30  ;;  %v565_v23 = vpop.f32.mrb[10].mxu0  ;;  %v2663_v24 = vsel %vm708_vm2, %v643_v21, -1e+30  ;;  %v645_v25 = vpop.f32.mrb[10].mxu1 }
 0x15c   : > { %v2667_v26 = vsel %vm707_vm1, %v565_v23, -1e+30  ;;  %v567_v27 = vpop.f32.mrb[11].mxu0  ;;  %v647_v28 = vpop.f32.mrb[11].mxu1  ;;  %v817_v29 = vmax.f32 %v2649_v17, %v2659_v22  ;;  %v865_v32 = vmax.f32 %v2655_v20, %v2663_v24  ;;  %v2681_v33 = vsel %vm707_vm1, %v645_v25, -1e+30 }
 0x15d   : > { %v2673_v30 = vsel %vm708_vm2, %v567_v27, -1e+30  ;;  %v2685_v34 = vsel %vm708_vm2, %v647_v28, -1e+30 }
 0x15e   : > { %863 = vmax.xlane.f32.xlu1 %v862_v19  ;;  %v820_v31 = vmax.f32 %v2667_v26, %v2673_v30  ;;  %818 = vmax.xlane.f32.xlu0 %v817_v29  ;;  %v868_v43 = vmax.f32 %v2681_v33, %v2685_v34 }
 0x161   : > { %v571_v36 = vpop.f32.mrb[12].mxu0  ;;  %v651_v37 = vpop.f32.mrb[12].mxu1 }
 0x162   : > { %821 = vmax.xlane.f32.xlu1 %v820_v31  ;;  %v2689_v40 = vsel %vm707_vm1, %v571_v36, -1e+30  ;;  %v573_v41 = vpop.f32.mrb[13].mxu0  ;;  %v2695_v45 = vsel %vm707_vm1, %v651_v37, -1e+30  ;;  %v653_v47 = vpop.f32.mrb[13].mxu1  ;;  %866 = vmax.xlane.f32.xlu0 %v865_v32 }
 0x163   : > { %v2699_v49 = vsel %vm708_vm2, %v573_v41, -1e+30  ;;  %v575_v50 = vpop.f32.mrb[14].mxu0  ;;  %v2703_v52 = vsel %vm708_vm2, %v653_v47, -1e+30  ;;  %v655_v53 = vpop.f32.mrb[14].mxu1 }
 0x164   : > { %v2707_v55 = vsel %vm707_vm1, %v575_v50, -1e+30  ;;  %v577_v56 = vpop.f32.mrb[15].mxu0  ;;  %v657_v59 = vpop.f32.mrb[15].mxu1  ;;  %v823_v60 = vmax.f32 %v2689_v40, %v2699_v49  ;;  %v871_v2 = vmax.f32 %v2695_v45, %v2703_v52  ;;  %v2721_v4 = vsel %vm707_vm1, %v655_v53, -1e+30 }
 0x165   : > { %v2713_v62 = vsel %vm708_vm2, %v577_v56, -1e+30  ;;  %v2725_v6 = vsel %vm708_vm2, %v657_v59, -1e+30 }
 0x166   : > { %869 = vmax.xlane.f32.xlu1 %v868_v43  ;;  %v826_v0 = vmax.f32 %v2707_v55, %v2713_v62  ;;  %824 = vmax.xlane.f32.xlu0 %v823_v60  ;;  %v874_v12 = vmax.f32 %v2721_v4, %v2725_v6 }
 0x169   : > { %v581_v7 = vpop.f32.mrb[16].mxu0  ;;  %v661_v8 = vpop.f32.mrb[16].mxu1 }
 0x16a   : > { %827 = vmax.xlane.f32.xlu1 %v826_v0  ;;  %v2729_v9 = vsel %vm707_vm1, %v581_v7, -1e+30  ;;  %v583_v11 = vpop.f32.mrb[17].mxu0  ;;  %v2735_v15 = vsel %vm707_vm1, %v661_v8, -1e+30  ;;  %v663_v16 = vpop.f32.mrb[17].mxu1  ;;  %872 = vmax.xlane.f32.xlu0 %v871_v2 }
 0x16b   : > { %v2739_v18 = vsel %vm708_vm2, %v583_v11, -1e+30  ;;  %v585_v19 = vpop.f32.mrb[18].mxu0  ;;  %v2743_v21 = vsel %vm708_vm2, %v663_v16, -1e+30  ;;  %v665_v23 = vpop.f32.mrb[18].mxu1 }
 0x16c   : > { %v2747_v25 = vsel %vm707_vm1, %v585_v19, -1e+30  ;;  %v587_v27 = vpop.f32.mrb[19].mxu0  ;;  %v667_v28 = vpop.f32.mrb[19].mxu1  ;;  %v829_v29 = vmax.f32 %v2729_v9, %v2739_v18  ;;  %v877_v35 = vmax.f32 %v2735_v15, %v2743_v21  ;;  %v2761_v36 = vsel %vm707_vm1, %v665_v23, -1e+30 }
 0x16d   : > { %v2753_v31 = vsel %vm708_vm2, %v587_v27, -1e+30  ;;  %v2765_v37 = vsel %vm708_vm2, %v667_v28, -1e+30 }
 0x16e   : > { %875 = vmax.xlane.f32.xlu1 %v874_v12  ;;  %v832_v32 = vmax.f32 %v2747_v25, %v2753_v31  ;;  %830 = vmax.xlane.f32.xlu0 %v829_v29  ;;  %v880_v53 = vmax.f32 %v2761_v36, %v2765_v37 }
 0x171   : > { %v591_v41 = vpop.f32.mrb[20].mxu0  ;;  %v671_v43 = vpop.f32.mrb[20].mxu1 }
 0x172   : > { %833 = vmax.xlane.f32.xlu1 %v832_v32  ;;  %v2769_v47 = vsel %vm707_vm1, %v591_v41, -1e+30  ;;  %v593_v50 = vpop.f32.mrb[21].mxu0  ;;  %v2775_v56 = vsel %vm707_vm1, %v671_v43, -1e+30  ;;  %v673_v59 = vpop.f32.mrb[21].mxu1  ;;  %878 = vmax.xlane.f32.xlu0 %v877_v35 }
 0x173   : > { %v2779_v60 = vsel %vm708_vm2, %v593_v50, -1e+30  ;;  %v595_v0 = vpop.f32.mrb[22].mxu0  ;;  %v2783_v2 = vsel %vm708_vm2, %v673_v59, -1e+30  ;;  %v675_v7 = vpop.f32.mrb[22].mxu1 }
 0x174   : > { %3563 = vst [vmem:[#allocation4_spill] sm:$0xff] %v2783_v2  ;;  %v2787_v8 = vsel %vm707_vm1, %v595_v0, -1e+30  ;;  %v597_v11 = vpop.f32.mrb[23].mxu0  ;;  %v677_v12 = vpop.f32.mrb[23].mxu1  ;;  %v835_v16 = vmax.f32 %v2769_v47, %v2779_v60  ;;  %v883_v27 = vmax.f32 %v2775_v56, %v2783_v2 }
 0x175   : > { %v2793_v19 = vsel %vm708_vm2, %v597_v11, -1e+30  ;;  %v2801_v28 = vsel %vm707_vm1, %v675_v7, -1e+30  ;;  %v2805_v29 = vsel %vm708_vm2, %v677_v12, -1e+30 }
 0x176   : > { %881 = vmax.xlane.f32.xlu1 %v880_v53  ;;  %v838_v23 = vmax.f32 %v2787_v8, %v2793_v19  ;;  %836 = vmax.xlane.f32.xlu0 %v835_v16  ;;  %v886_v50 = vmax.f32 %v2801_v28, %v2805_v29 }
 0x179   : > { %v601_v32 = vpop.f32.mrb[24].mxu0  ;;  %v681_v35 = vpop.f32.mrb[24].mxu1 }
 0x17a   : > { %839 = vmax.xlane.f32.xlu1 %v838_v23  ;;  %v2809_v41 = vsel %vm707_vm1, %v601_v32, -1e+30  ;;  %v603_v43 = vpop.f32.mrb[25].mxu0  ;;  %v2815_v53 = vsel %vm707_vm1, %v681_v35, -1e+30  ;;  %v683_v59 = vpop.f32.mrb[25].mxu1  ;;  %884 = vmax.xlane.f32.xlu0 %v883_v27 }
 0x17b   : > { %3564 = vst [vmem:[#allocation5_spill] sm:$0xff] %v2809_v41  ;;  %3565 = vst [vmem:[#allocation6_spill] sm:$0xff] %v2815_v53  ;;  %v2819_v0 = vsel %vm708_vm2, %v603_v43, -1e+30  ;;  %v605_v7 = vpop.f32.mrb[26].mxu0  ;;  %v685_v12 = vpop.f32.mrb[26].mxu1 }
 0x17c   : > { %3566 = vst [vmem:[#allocation7_spill] sm:$0xff] %v2819_v0  ;;  %v2823_v11 = vsel %vm708_vm2, %v683_v59, -1e+30  ;;  %v2827_v16 = vsel %vm707_vm1, %v605_v7, -1e+30  ;;  %v607_v23 = vpop.f32.mrb[27].mxu0  ;;  %v841_v35 = vmax.f32 %v2809_v41, %v2819_v0 }
 0x17d   : > { %3567 = vst [vmem:[#allocation8_spill] sm:$0xff] %v2823_v11  ;;  %v687_v32 = vpop.f32.mrb[27].mxu1  ;;  %v2833_v27 = vsel %vm708_vm2, %v607_v23, -1e+30  ;;  %v889_v59 = vmax.f32 %v2815_v53, %v2823_v11  ;;  %v2841_v7 = vsel %vm707_vm1, %v685_v12, -1e+30 }
 0x17e   : > { %3568 = vst [vmem:[#allocation9_spill] sm:$0xff] %v2833_v27  ;;  %887 = vmax.xlane.f32.xlu1 %v886_v50  ;;  %v844_v43 = vmax.f32 %v2827_v16, %v2833_v27  ;;  %842 = vmax.xlane.f32.xlu0 %v841_v35  ;;  %3569 = vst [vmem:[#allocation10_spill] sm:$0xff] %v2841_v7  ;;  %v2845_v2 = vsel %vm708_vm2, %v687_v32, -1e+30 }
 0x17f   : > { %3570 = vst [vmem:[#allocation11_spill] sm:$0xff] %v2845_v2  ;;  %v892_v35 = vmax.f32 %v2841_v7, %v2845_v2 }
 0x181   : > { %v611_v0 = vpop.f32.mrb[28].mxu0  ;;  %v691_v41 = vpop.f32.mrb[28].mxu1 }
 0x182   : > { %845 = vmax.xlane.f32.xlu1 %v844_v43  ;;  %v2849_v50 = vsel %vm707_vm1, %v611_v0, -1e+30  ;;  %v613_v23 = vpop.f32.mrb[29].mxu0  ;;  %v2855_v11 = vsel %vm707_vm1, %v691_v41, -1e+30  ;;  %v693_v12 = vpop.f32.mrb[29].mxu1  ;;  %890 = vmax.xlane.f32.xlu0 %v889_v59 }
 0x183   : > { %3571 = vst [vmem:[#allocation12_spill] sm:$0xff] %v2849_v50  ;;  %3572 = vst [vmem:[#allocation13_spill] sm:$0xff] %v2855_v11  ;;  %v2859_v32 = vsel %vm708_vm2, %v613_v23, -1e+30  ;;  %v615_v53 = vpop.f32.mrb[30].mxu0  ;;  %v695_v0 = vpop.f32.mrb[30].mxu1 }
 0x184   : > { %3573 = vst [vmem:[#allocation14_spill] sm:$0xff] %v2859_v32  ;;  %v2863_v43 = vsel %vm708_vm2, %v693_v12, -1e+30  ;;  %v2867_v27 = vsel %vm707_vm1, %v615_v53, -1e+30  ;;  %v617_v2 = vpop.f32.mrb[31].mxu0  ;;  %v847_v23 = vmax.f32 %v2849_v50, %v2859_v32 }
 0x185   : > { %3574 = vst [vmem:[#allocation15_spill] sm:$0xff] %v2863_v43  ;;  %3575 = vst [vmem:[#allocation16_spill] sm:$0xff] %v2867_v27  ;;  %v2871_v41 = vsel %vm707_vm1, %v695_v0, -1e+30  ;;  %v697_v59 = vpop.f32.mrb[31].mxu1  ;;  %v895_v38 = vmax.f32 %v2855_v11, %v2863_v43  ;;  %v2931_v43 = vld [vmem:[#allocation2 + $0x90] sm:$0xff] }
 0x186   : > { %3576 = vst [vmem:[#allocation17_spill] sm:$0xff] %v2871_v41  ;;  %v2877_v7 = vsel %vm708_vm2, %v617_v2, -1e+30  ;;  %v2881_v12 = vsel %vm708_vm2, %v697_v59, -1e+30  ;;  %893 = vmax.xlane.f32.xlu1 %v892_v35  ;;  %848 = vmax.xlane.f32.xlu0 %v847_v23  ;;  %v2889_v2 = vld [vmem:[#allocation2] sm:$0xff] }
 0x187   : > { %3577 = vst [vmem:[#allocation18_spill] sm:$0xff] %v2877_v7  ;;  %3578 = vst [vmem:[#allocation19_spill] sm:$0xff] %v2881_v12  ;;  %v850_v53 = vmax.f32 %v2867_v27, %v2877_v7  ;;  %v898_v0 = vmax.f32 %v2871_v41, %v2881_v12  ;;  %v2891_v59 = vld [vmem:[#allocation2 + $0x88] sm:$0xff]  ;;  %v2896_v23 = vld [vmem:[#allocation2 + $0x80] sm:$0xff] }
 0x188   : > { %3579 = vst [vmem:[#allocation20_spill] sm:$0xff] %v2889_v2  ;;  %3580 = vst [vmem:[#allocation21_spill] sm:$0xff] %v2891_v59  ;;  %v2913_v41 = vld [vmem:[#allocation2 + $0x8] sm:$0xff]  ;;  %v2989_v32 = vld [vmem:[#allocation2 + $0x30] sm:$0xff] }
 0x189   : > { %3582 = vst [vmem:[#allocation23_spill] sm:$0xff] %v2896_v23  ;;  %3585 = vst [vmem:[#allocation26_spill] sm:$0xff] %v2913_v41  ;;  %v3028_v50 = vld [vmem:[#allocation2 + $0x40] sm:$0xff]  ;;  %v3067_v27 = vld [vmem:[#allocation2 + $0x50] sm:$0xff] }
 0x18a   : > { %851 = vmax.xlane.f32.xlu1 %v850_v53  ;;  %896 = vmax.xlane.f32.xlu0 %v895_v38  ;;  %v2915_v53 = vld [vmem:[#allocation2 + $0x10] sm:$0xff]  ;;  %3590 = vst [vmem:[#allocation31_spill] sm:$0xff] %v2931_v43  ;;  %3602 = vst [vmem:[#allocation43_spill] sm:$0xff] %v2989_v32 }
 0x18b   : > { %3586 = vst [vmem:[#allocation27_spill] sm:$0xff] %v2915_v53  ;;  %3610 = vst [vmem:[#allocation51_spill] sm:$0xff] %v3028_v50 }
 0x18c   : > { %3617 = vst [vmem:[#allocation58_spill] sm:$0xff] %v3067_v27 }
 0x18e   : > { %899 = vmax.xlane.f32.xlu1 %v898_v0 }
 0x1db   : > { %v807_v39 = vpop.xlane.xlu0 %806 }
 0x1dc   : > { %v2894_v35 = vmax.f32 %v2889_v2, %v807_v39  ;;  %v2929_v2 = vld [vmem:[#allocation2 + $0x18] sm:$0xff] }
 0x1dd   : > { %v858_v7 = vpop.xlane.xlu1 %857  ;;  %3589 = vst [vmem:[#allocation30_spill] sm:$0xff] %v2929_v2 }
 0x1de   : > { %3581 = vst [vmem:[#allocation22_spill] sm:$0xff] %v2894_v35  ;;  %1606 = vst.msk [vmem:[#allocation2] sm:$0xff] %vm1573_vm3, %v2894_v35  ;;  %v2903_v38 = vmax.f32 %v2891_v59, %v858_v7  ;;  %935 = vperm.xlu0 %2069, %v2894_v35   ;;  %v2948_v7 = vld [vmem:[#allocation2 + $0x98] sm:$0xff] }
 0x1df   : > { %v855_v0 = vpop.xlane.xlu0 %854  ;;  %3593 = vst [vmem:[#allocation34_spill] sm:$0xff] %v2948_v7 }
 0x1e0   : > { %3583 = vst [vmem:[#allocation24_spill] sm:$0xff] %v2903_v38  ;;  %1623 = vst.msk [vmem:[#allocation2 + $0x88] sm:$0xff] %vm1573_vm3, %v2903_v38  ;;  %v2911_v39 = vmax.f32 %v2896_v23, %v855_v0 }
 0x1e2   : > { %3584 = vst [vmem:[#allocation25_spill] sm:$0xff] %v2911_v39  ;;  %1622 = vst.msk [vmem:[#allocation2 + $0x80] sm:$0xff] %vm1573_vm3, %v2911_v39  ;;  %1020 = vperm.xlu0 %2069, %v2903_v38   ;;  %1015 = vperm.xlu1 %2070, %v2911_v39   ;;  %v2967_v39 = vld [vmem:[#allocation2 + $0x28] sm:$0xff] }
 0x1e3   : > { %v810_v12 = vpop.xlane.xlu0 %809  ;;  %v813_v59 = vpop.xlane.xlu1 %812  ;;  %3597 = vst [vmem:[#allocation38_spill] sm:$0xff] %v2967_v39 }
 0x1e4   : > { %v2924_v35 = vmax.f32 %v2913_v41, %v810_v12  ;;  %v2927_v0 = vmax.f32 %v2915_v53, %v813_v59  ;;  %v2950_v41 = vld [vmem:[#allocation2 + $0x20] sm:$0xff] }
 0x1e5   : > { %3594 = vst [vmem:[#allocation35_spill] sm:$0xff] %v2950_v41 }
 0x1e6   : > { %3587 = vst [vmem:[#allocation28_spill] sm:$0xff] %v2924_v35  ;;  %3588 = vst [vmem:[#allocation29_spill] sm:$0xff] %v2927_v0  ;;  %940 = vperm.xlu1 %2070, %v2924_v35  }
 0x1e7   : > { %1607 = vst.msk [vmem:[#allocation2 + $0x8] sm:$0xff] %vm1573_vm3, %v2924_v35  ;;  %1608 = vst.msk [vmem:[#allocation2 + $0x10] sm:$0xff] %vm1573_vm3, %v2927_v0  ;;  %v816_v12 = vpop.xlane.xlu1 %815  ;;  %v861_v59 = vpop.xlane.xlu0 %860 }
 0x1e8   : > { %v2943_v23 = vmax.f32 %v2929_v2, %v816_v12  ;;  %v2946_v38 = vmax.f32 %v2931_v43, %v861_v59  ;;  %v2969_v2 = vld [vmem:[#allocation2 + $0xa0] sm:$0xff] }
 0x1e9   : > { %3598 = vst [vmem:[#allocation39_spill] sm:$0xff] %v2969_v2 }
 0x1ea   : > { %3591 = vst [vmem:[#allocation32_spill] sm:$0xff] %v2943_v23  ;;  %3592 = vst [vmem:[#allocation33_spill] sm:$0xff] %v2946_v38  ;;  %945 = vperm.xlu1 %2070, %v2927_v0  }
 0x1eb   : > { %1609 = vst.msk [vmem:[#allocation2 + $0x18] sm:$0xff] %vm1573_vm3, %v2943_v23  ;;  %1624 = vst.msk [vmem:[#allocation2 + $0x90] sm:$0xff] %vm1573_vm3, %v2946_v38  ;;  %v864_v12 = vpop.xlane.xlu1 %863  ;;  %v819_v59 = vpop.xlane.xlu0 %818 }
 0x1ec   : > { %v2962_v35 = vmax.f32 %v2948_v7, %v864_v12  ;;  %v2965_v11 = vmax.f32 %v2950_v41, %v819_v59  ;;  %v2987_v7 = vld [vmem:[#allocation2 + $0xa8] sm:$0xff] }
 0x1ed   : > { %3601 = vst [vmem:[#allocation42_spill] sm:$0xff] %v2987_v7 }
 0x1ee   : > { %3595 = vst [vmem:[#allocation36_spill] sm:$0xff] %v2962_v35  ;;  %3596 = vst [vmem:[#allocation37_spill] sm:$0xff] %v2965_v11  ;;  %1030 = vperm.xlu0 %2069, %v2962_v35   ;;  %1025 = vperm.xlu1 %2070, %v2946_v38  }
 0x1ef   : > { %1625 = vst.msk [vmem:[#allocation2 + $0x98] sm:$0xff] %vm1573_vm3, %v2962_v35  ;;  %1610 = vst.msk [vmem:[#allocation2 + $0x20] sm:$0xff] %vm1573_vm3, %v2965_v11  ;;  %v822_v59 = vpop.xlane.xlu1 %821  ;;  %v867_v43 = vpop.xlane.xlu0 %866  ;;  %v3006_v35 = vld [vmem:[#allocation2 + $0x38] sm:$0xff] }
 0x1f0   : > { %v2982_v0 = vmax.f32 %v2967_v39, %v822_v59  ;;  %v2985_v53 = vmax.f32 %v2969_v2, %v867_v43  ;;  %3605 = vst [vmem:[#allocation46_spill] sm:$0xff] %v3006_v35  ;;  %v3008_v39 = vld [vmem:[#allocation2 + $0xb0] sm:$0xff] }
 0x1f1   : > { %3606 = vst [vmem:[#allocation47_spill] sm:$0xff] %v3008_v39 }
 0x1f2   : > { %3599 = vst [vmem:[#allocation40_spill] sm:$0xff] %v2982_v0  ;;  %3600 = vst [vmem:[#allocation41_spill] sm:$0xff] %v2985_v53  ;;  %950 = vperm.xlu1 %2070, %v2943_v23  }
 0x1f3   : > { %1611 = vst.msk [vmem:[#allocation2 + $0x28] sm:$0xff] %vm1573_vm3, %v2982_v0  ;;  %1626 = vst.msk [vmem:[#allocation2 + $0xa0] sm:$0xff] %vm1573_vm3, %v2985_v53  ;;  %v870_v43 = vpop.xlane.xlu1 %869  ;;  %v825_v59 = vpop.xlane.xlu0 %824 }
 0x1f4   : > { %v3001_v41 = vmax.f32 %v2987_v7, %v870_v43  ;;  %v3004_v38 = vmax.f32 %v2989_v32, %v825_v59  ;;  %v3026_v7 = vld [vmem:[#allocation2 + $0xb8] sm:$0xff] }
 0x1f5   : > { %3609 = vst [vmem:[#allocation50_spill] sm:$0xff] %v3026_v7 }
 0x1f6   : > { %3603 = vst [vmem:[#allocation44_spill] sm:$0xff] %v3001_v41  ;;  %3604 = vst [vmem:[#allocation45_spill] sm:$0xff] %v3004_v38  ;;  %1040 = vperm.xlu0 %2069, %v3001_v41   ;;  %955 = vperm.xlu1 %2070, %v2965_v11  }
 0x1f7   : > { %1627 = vst.msk [vmem:[#allocation2 + $0xa8] sm:$0xff] %vm1573_vm3, %v3001_v41  ;;  %1612 = vst.msk [vmem:[#allocation2 + $0x30] sm:$0xff] %vm1573_vm3, %v3004_v38  ;;  %v828_v59 = vpop.xlane.xlu1 %827  ;;  %v873_v12 = vpop.xlane.xlu0 %872  ;;  %v3045_v41 = vld [vmem:[#allocation2 + $0x48] sm:$0xff] }
 0x1f8   : > { %v3021_v2 = vmax.f32 %v3006_v35, %v828_v59  ;;  %v3024_v23 = vmax.f32 %v3008_v39, %v873_v12  ;;  %3613 = vst [vmem:[#allocation54_spill] sm:$0xff] %v3045_v41  ;;  %v3047_v35 = vld [vmem:[#allocation2 + $0xc0] sm:$0xff] }
 0x1f9   : > { %3614 = vst [vmem:[#allocation55_spill] sm:$0xff] %v3047_v35 }
 0x1fa   : > { %3607 = vst [vmem:[#allocation48_spill] sm:$0xff] %v3021_v2  ;;  %3608 = vst [vmem:[#allocation49_spill] sm:$0xff] %v3024_v23  ;;  %1035 = vperm.xlu1 %2070, %v2985_v53  }
 0x1fb   : > { %1613 = vst.msk [vmem:[#allocation2 + $0x38] sm:$0xff] %vm1573_vm3, %v3021_v2  ;;  %1628 = vst.msk [vmem:[#allocation2 + $0xb0] sm:$0xff] %vm1573_vm3, %v3024_v23  ;;  %v876_v12 = vpop.xlane.xlu1 %875  ;;  %v831_v59 = vpop.xlane.xlu0 %830 }
 0x1fc   : > { %v3040_v32 = vmax.f32 %v3026_v7, %v876_v12  ;;  %v3043_v11 = vmax.f32 %v3028_v50, %v831_v59  ;;  %v3065_v7 = vld [vmem:[#allocation2 + $0xc8] sm:$0xff] }
 0x1fd   : > { %3616 = vst [vmem:[#allocation57_spill] sm:$0xff] %v3065_v7 }
 0x1fe   : > { %3611 = vst [vmem:[#allocation52_spill] sm:$0xff] %v3040_v32  ;;  %3612 = vst [vmem:[#allocation53_spill] sm:$0xff] %v3043_v11  ;;  %1050 = vperm.xlu0 %2069, %v3040_v32   ;;  %960 = vperm.xlu1 %2070, %v2982_v0   ;;  %v3087_v0 = vld [vmem:[#allocation2 + $0xd0] sm:$0xff] }
 0x1ff   : > { %1629 = vst.msk [vmem:[#allocation2 + $0xb8] sm:$0xff] %vm1573_vm3, %v3040_v32  ;;  %1614 = vst.msk [vmem:[#allocation2 + $0x40] sm:$0xff] %vm1573_vm3, %v3043_v11  ;;  %v834_v59 = vpop.xlane.xlu1 %833  ;;  %v879_v43 = vpop.xlane.xlu0 %878 }
 0x200   : > { %v3060_v39 = vmax.f32 %v3045_v41, %v834_v59  ;;  %v3063_v53 = vmax.f32 %v3047_v35, %v879_v43  ;;  %v3085_v41 = vld [vmem:[#allocation2 + $0x58] sm:$0xff]  ;;  %3621 = vst [vmem:[#allocation62_spill] sm:$0xff] %v3087_v0 }
 0x201   : > { %3620 = vst [vmem:[#allocation61_spill] sm:$0xff] %v3085_v41 }
 0x202   : > { %3615 = vst [vmem:[#allocation56_spill] sm:$0xff] %v3060_v39  ;;  %1615 = vst.msk [vmem:[#allocation2 + $0x48] sm:$0xff] %vm1573_vm3, %v3060_v39  ;;  %980 = vperm.xlu0 %2069, %v3060_v39   ;;  %965 = vperm.xlu1 %2070, %v3004_v38   ;;  %v3107_v38 = vld [vmem:[#allocation2 + $0x60] sm:$0xff] }
 0x203   : > { %1630 = vst.msk [vmem:[#allocation2 + $0xc0] sm:$0xff] %vm1573_vm3, %v3063_v53  ;;  %v882_v43 = vpop.xlane.xlu1 %881  ;;  %v837_v12 = vpop.xlane.xlu0 %836  ;;  %3625 = vst [vmem:[#allocation66_spill] sm:$0xff] %v3107_v38 }
 0x204   : > { %v3080_v50 = vmax.f32 %v3065_v7, %v882_v43  ;;  %v3083_v32 = vmax.f32 %v3067_v27, %v837_v12  ;;  %v3105_v7 = vld [vmem:[#allocation2 + $0xd8] sm:$0xff] }
 0x205   : > { %3624 = vst [vmem:[#allocation65_spill] sm:$0xff] %v3105_v7 }
 0x206   : > { %3618 = vst [vmem:[#allocation59_spill] sm:$0xff] %v3080_v50  ;;  %3619 = vst [vmem:[#allocation60_spill] sm:$0xff] %v3083_v32  ;;  %1060 = vperm.xlu0 %2069, %v3080_v50   ;;  %1045 = vperm.xlu1 %2070, %v3024_v23   ;;  %v3127_v23 = vld [vmem:[#allocation2 + $0xe0] sm:$0xff] }
 0x207   : > { %1631 = vst.msk [vmem:[#allocation2 + $0xc8] sm:$0xff] %vm1573_vm3, %v3080_v50  ;;  %1616 = vst.msk [vmem:[#allocation2 + $0x50] sm:$0xff] %vm1573_vm3, %v3083_v32  ;;  %v840_v12 = vpop.xlane.xlu1 %839  ;;  %v885_v59 = vpop.xlane.xlu0 %884 }
 0x208   : > { %v3100_v35 = vmax.f32 %v3085_v41, %v840_v12  ;;  %v3103_v39 = vmax.f32 %v3087_v0, %v885_v59  ;;  %v3125_v41 = vld [vmem:[#allocation2 + $0x68] sm:$0xff]  ;;  %3629 = vst [vmem:[#allocation70_spill] sm:$0xff] %v3127_v23 }
 0x209   : > { %3628 = vst [vmem:[#allocation69_spill] sm:$0xff] %v3125_v41 }
 0x20a   : > { %3622 = vst [vmem:[#allocation63_spill] sm:$0xff] %v3100_v35  ;;  %3623 = vst [vmem:[#allocation64_spill] sm:$0xff] %v3103_v39  ;;  %990 = vperm.xlu0 %2069, %v3100_v35   ;;  %970 = vperm.xlu1 %2070, %v3021_v2   ;;  %v3147_v2 = vld [vmem:[#allocation2 + $0x70] sm:$0xff] }
 0x20b   : > { %1617 = vst.msk [vmem:[#allocation2 + $0x58] sm:$0xff] %vm1573_vm3, %v3100_v35  ;;  %1632 = vst.msk [vmem:[#allocation2 + $0xd0] sm:$0xff] %vm1573_vm3, %v3103_v39  ;;  %v888_v59 = vpop.xlane.xlu1 %887  ;;  %v843_v43 = vpop.xlane.xlu0 %842 }
 0x20c   : > { %v3120_v27 = vmax.f32 %v3105_v7, %v888_v59  ;;  %v3123_v50 = vmax.f32 %v3107_v38, %v843_v43  ;;  %v3145_v7 = vld [vmem:[#allocation2 + $0xe8] sm:$0xff]  ;;  %3633 = vst [vmem:[#allocation74_spill] sm:$0xff] %v3147_v2 }
 0x20d   : > { %3632 = vst [vmem:[#allocation73_spill] sm:$0xff] %v3145_v7 }
 0x20e   : > { %3626 = vst [vmem:[#allocation67_spill] sm:$0xff] %v3120_v27  ;;  %3627 = vst [vmem:[#allocation68_spill] sm:$0xff] %v3123_v50  ;;  %1070 = vperm.xlu0 %2069, %v3120_v27   ;;  %975 = vperm.xlu1 %2070, %v3043_v11   ;;  %v3167_v11 = vld [vmem:[#allocation2 + $0xf0] sm:$0xff] }
 0x20f   : > { %1633 = vst.msk [vmem:[#allocation2 + $0xd8] sm:$0xff] %vm1573_vm3, %v3120_v27  ;;  %1618 = vst.msk [vmem:[#allocation2 + $0x60] sm:$0xff] %vm1573_vm3, %v3123_v50  ;;  %v846_v43 = vpop.xlane.xlu1 %845  ;;  %v891_v12 = vpop.xlane.xlu0 %890 }
 0x210   : > { %v3140_v0 = vmax.f32 %v3125_v41, %v846_v43  ;;  %v3143_v35 = vmax.f32 %v3127_v23, %v891_v12  ;;  %v3165_v41 = vld [vmem:[#allocation2 + $0x78] sm:$0xff]  ;;  %3637 = vst [vmem:[#allocation78_spill] sm:$0xff] %v3167_v11 }
 0x211   : > { %3636 = vst [vmem:[#allocation77_spill] sm:$0xff] %v3165_v41 }
 0x212   : > { %3630 = vst [vmem:[#allocation71_spill] sm:$0xff] %v3140_v0  ;;  %3631 = vst [vmem:[#allocation72_spill] sm:$0xff] %v3143_v35  ;;  %1000 = vperm.xlu0 %2069, %v3140_v0   ;;  %1055 = vperm.xlu1 %2070, %v3063_v53  }
 0x213   : > { %1619 = vst.msk [vmem:[#allocation2 + $0x68] sm:$0xff] %vm1573_vm3, %v3140_v0  ;;  %1634 = vst.msk [vmem:[#allocation2 + $0xe0] sm:$0xff] %vm1573_vm3, %v3143_v35  ;;  %v894_v12 = vpop.xlane.xlu1 %893  ;;  %v849_v59 = vpop.xlane.xlu0 %848 }
 0x214   : > { %v3160_v38 = vmax.f32 %v3145_v7, %v894_v12  ;;  %v3163_v27 = vmax.f32 %v3147_v2, %v849_v59  ;;  %v3185_v7 = vld [vmem:[#allocation2 + $0xf8] sm:$0xff] }
 0x215   : > { %3640 = vst [vmem:[#allocation81_spill] sm:$0xff] %v3185_v7 }
 0x216   : > { %3634 = vst [vmem:[#allocation75_spill] sm:$0xff] %v3160_v38  ;;  %3635 = vst [vmem:[#allocation76_spill] sm:$0xff] %v3163_v27  ;;  %1080 = vperm.xlu0 %2069, %v3160_v38   ;;  %985 = vperm.xlu1 %2070, %v3083_v32  }
 0x217   : > { %1635 = vst.msk [vmem:[#allocation2 + $0xe8] sm:$0xff] %vm1573_vm3, %v3160_v38  ;;  %1620 = vst.msk [vmem:[#allocation2 + $0x70] sm:$0xff] %vm1573_vm3, %v3163_v27  ;;  %v852_v59 = vpop.xlane.xlu1 %851  ;;  %v897_v43 = vpop.xlane.xlu0 %896 }
 0x218   : > { %v3180_v23 = vmax.f32 %v3165_v41, %v852_v59  ;;  %v3183_v0 = vmax.f32 %v3167_v11, %v897_v43 }
 0x21a   : > { %3638 = vst [vmem:[#allocation79_spill] sm:$0xff] %v3180_v23  ;;  %3639 = vst [vmem:[#allocation80_spill] sm:$0xff] %v3183_v0  ;;  %1065 = vperm.xlu1 %2070, %v3103_v39   ;;  %1010 = vperm.xlu0 %2069, %v3180_v23  }
 0x21b   : > { %1621 = vst.msk [vmem:[#allocation2 + $0x78] sm:$0xff] %vm1573_vm3, %v3180_v23  ;;  %1636 = vst.msk [vmem:[#allocation2 + $0xf0] sm:$0xff] %vm1573_vm3, %v3183_v0  ;;  %v900_v43 = vpop.xlane.xlu1 %899 }
 0x21c   : > { %v3198_v59 = vmax.f32 %v3185_v7, %v900_v43 }
 0x21e   : > { %3641 = vst [vmem:[#allocation82_spill] sm:$0xff] %v3198_v59  ;;  %1637 = vst.msk [vmem:[#allocation2 + $0xf8] sm:$0xff] %vm1573_vm3, %v3198_v59  ;;  %995 = vperm.xlu1 %2070, %v3123_v50   ;;  %1090 = vperm.xlu0 %2069, %v3198_v59  }
 0x222   : > { %1075 = vperm.xlu1 %2070, %v3143_v35  }
 0x226   : > { %1005 = vperm.xlu1 %2070, %v3163_v27  }
 0x22a   : > { %1085 = vperm.xlu1 %2070, %v3183_v0  }
 0x25d   : > { %v936_v12 = vpop.permute.xlu0 %935 }
 0x25e   : > { %v1093_v43 = vsub.f32 %v2571_v42, %v936_v12  ;;  %v1094_v11 = vsub.f32 %v2579_v46, %v936_v12 }
 0x260   : > { %v1157_v23 = vmul.f32 1.442695, %v1093_v43  ;;  %v1159_v38 = vmul.f32 1.442695, %v1094_v11 }
 0x261   : > { %v1021_v7 = vpop.permute.xlu0 %1020  ;;  %v1016_v41 = vpop.permute.xlu1 %1015 }
 0x262   : > { %2103 = vpow2.f32 %v1157_v23  ;;  %v1127_v2 = vsub.f32 %v2587_v51, %v1021_v7  ;;  %v1128_v59 = vsub.f32 %v2593_v54, %v1021_v7  ;;  %v1125_v35 = vsub.f32 %v2575_v44, %v1016_v41 }
 0x263   : > { %2105 = vpow2.f32 %v1159_v38  ;;  %v1126_v27 = vsub.f32 %v2583_v48, %v1016_v41 }
 0x264   : > { %v1225_v0 = vmul.f32 1.442695, %v1127_v2  ;;  %v1227_v50 = vmul.f32 1.442695, %v1128_v59  ;;  %v1221_v39 = vmul.f32 1.442695, %v1125_v35 }
 0x265   : > { %v1223_v42 = vmul.f32 1.442695, %v1126_v27  ;;  %v941_v32 = vpop.permute.xlu1 %940 }
 0x266   : > { %2107 = vpow2.f32 %v1225_v0  ;;  %v1095_v46 = vsub.f32 %v2601_v57, %v941_v32  ;;  %v1096_v11 = vsub.f32 %v2605_v58, %v941_v32 }
 0x267   : > { %2109 = vpow2.f32 %v1227_v50 }
 0x268   : > { %2111 = vpow2.f32 %v1221_v39  ;;  %v1161_v51 = vmul.f32 1.442695, %v1095_v46  ;;  %v1163_v23 = vmul.f32 1.442695, %v1096_v11 }
 0x269   : > { %2113 = vpow2.f32 %v1223_v42  ;;  %v946_v54 = vpop.permute.xlu1 %945 }
 0x26a   : > { %2115 = vpow2.f32 %v1161_v51  ;;  %v1097_v44 = vsub.f32 %v2609_v61, %v946_v54  ;;  %v1098_v48 = vsub.f32 %v2617_v1, %v946_v54 }
 0x26b   : > { %2117 = vpow2.f32 %v1163_v23 }
 0x26c   : > { %v2104_v41 = vpop.eup %2103  ;;  %v1165_v27 = vmul.f32 1.442695, %v1097_v44  ;;  %v1167_v2 = vmul.f32 1.442695, %v1098_v48 }
 0x26d   : > { %v2106_v35 = vpop.eup %2105  ;;  %v1026_v38 = vpop.permute.xlu1 %1025 }
 0x26e   : > { %2119 = vpow2.f32 %v1165_v27  ;;  %v1031_v57 = vpop.permute.xlu0 %1030  ;;  %v1129_v58 = vsub.f32 %v2613_v63, %v1026_v38  ;;  %v1130_v50 = vsub.f32 %v2621_v3, %v1026_v38  ;;  %v1445_v32 = vadd.f32 %v2106_v35, %v2104_v41 }
 0x26f   : > { %2121 = vpow2.f32 %v1167_v2  ;;  %v1131_v61 = vsub.f32 %v2641_v13, %v1031_v57  ;;  %v1132_v43 = vsub.f32 %v2645_v14, %v1031_v57 }
 0x270   : > { %v2108_v39 = vpop.eup %2107  ;;  %v1229_v7 = vmul.f32 1.442695, %v1129_v58  ;;  %v1231_v1 = vmul.f32 1.442695, %v1130_v50  ;;  %1446 = vadd.xlane.f32.xlu1 %v1445_v32 }
 0x271   : > { %v2110_v0 = vpop.eup %2109  ;;  %v951_v12 = vpop.permute.xlu1 %950  ;;  %v1233_v48 = vmul.f32 1.442695, %v1131_v61  ;;  %v1235_v41 = vmul.f32 1.442695, %v1132_v43 }
 0x272   : > { %v2112_v59 = vpop.eup %2111  ;;  %v1099_v42 = vsub.f32 %v2625_v5, %v951_v12  ;;  %v1100_v46 = vsub.f32 %v2633_v10, %v951_v12  ;;  %v1496_v63 = vadd.f32 %v2110_v0, %v2108_v39  ;;  %2123 = vpow2.f32 %v1229_v7 }
 0x273   : > { %v2114_v11 = vpop.eup %2113  ;;  %2125 = vpow2.f32 %v1231_v1 }
 0x274   : > { %v2116_v51 = vpop.eup %2115  ;;  %v1169_v3 = vmul.f32 1.442695, %v1099_v42  ;;  %v1171_v23 = vmul.f32 1.442695, %v1100_v46  ;;  %v1493_v54 = vadd.f32 %v2114_v11, %v2112_v59  ;;  %1497 = vadd.xlane.f32.xlu1 %v1496_v63 }
 0x275   : > { %v2118_v44 = vpop.eup %2117  ;;  %v956_v13 = vpop.permute.xlu1 %955 }
 0x276   : > { %2127 = vpow2.f32 %v1169_v3  ;;  %1494 = vadd.xlane.f32.xlu0 %v1493_v54  ;;  %v1101_v14 = vsub.f32 %v2649_v17, %v956_v13  ;;  %v1102_v5 = vsub.f32 %v2659_v22, %v956_v13  ;;  %v1448_v10 = vadd.f32 %v2118_v44, %v2116_v51  ;;  %v1041_v38 = vpop.permute.xlu0 %1040 }
 0x277   : > { %2129 = vpow2.f32 %v1171_v23  ;;  %v1135_v1 = vsub.f32 %v2681_v33, %v1041_v38  ;;  %v1136_v43 = vsub.f32 %v2685_v34, %v1041_v38 }
 0x278   : > { %v2120_v27 = vpop.eup %2119  ;;  %v1173_v2 = vmul.f32 1.442695, %v1101_v14  ;;  %2131 = vpow2.f32 %v1233_v48  ;;  %v1175_v57 = vmul.f32 1.442695, %v1102_v5 }
 0x279   : > { %v2122_v35 = vpop.eup %2121  ;;  %v1036_v58 = vpop.permute.xlu1 %1035  ;;  %2133 = vpow2.f32 %v1235_v41  ;;  %v1241_v23 = vmul.f32 1.442695, %v1135_v1  ;;  %v1243_v44 = vmul.f32 1.442695, %v1136_v43 }
 0x27a   : > { %1449 = vadd.xlane.f32.xlu0 %v1448_v10  ;;  %v1133_v50 = vsub.f32 %v2655_v20, %v1036_v58  ;;  %v1134_v32 = vsub.f32 %v2663_v24, %v1036_v58  ;;  %v1451_v39 = vadd.f32 %v2122_v35, %v2120_v27  ;;  %2135 = vpow2.f32 %v1173_v2 }
 0x27b   : > { %2137 = vpow2.f32 %v1175_v57 }
 0x27c   : > { %v1237_v17 = vmul.f32 1.442695, %v1133_v50  ;;  %v1239_v7 = vmul.f32 1.442695, %v1134_v32  ;;  %v2124_v61 = vpop.eup %2123 }
 0x27d   : > { %v1051_v22 = vpop.permute.xlu0 %1050  ;;  %v961_v0 = vpop.permute.xlu1 %960 }
 0x27e   : > { %2139 = vpow2.f32 %v1237_v17  ;;  %1452 = vadd.xlane.f32.xlu0 %v1451_v39  ;;  %v1103_v12 = vsub.f32 %v2667_v26, %v961_v0  ;;  %v2126_v59 = vpop.eup %2125  ;;  %v1104_v20 = vsub.f32 %v2673_v30, %v961_v0  ;;  %v1139_v10 = vsub.f32 %v2721_v4, %v1051_v22 }
 0x27f   : > { %2141 = vpow2.f32 %v1239_v7  ;;  %v1499_v46 = vadd.f32 %v2126_v59, %v2124_v61  ;;  %v1140_v2 = vsub.f32 %v2725_v6, %v1051_v22 }
 0x280   : > { %v2128_v24 = vpop.eup %2127  ;;  %v1177_v42 = vmul.f32 1.442695, %v1103_v12  ;;  %v1179_v11 = vmul.f32 1.442695, %v1104_v20  ;;  %v1249_v17 = vmul.f32 1.442695, %v1139_v10 }
 0x281   : > { %v2130_v63 = vpop.eup %2129  ;;  %v981_v51 = vpop.permute.xlu0 %980  ;;  %v1251_v0 = vmul.f32 1.442695, %v1140_v2 }
 0x282   : > { %v966_v3 = vpop.permute.xlu1 %965  ;;  %1500 = vadd.xlane.f32.xlu0 %v1499_v46  ;;  %v2132_v54 = vpop.eup %2131  ;;  %v1454_v48 = vadd.f32 %v2130_v63, %v2128_v24  ;;  %2143 = vpow2.f32 %v1177_v42  ;;  %v1111_v4 = vsub.f32 %v2747_v25, %v981_v51  ;;  %v1112_v6 = vsub.f32 %v2753_v31, %v981_v51 }
 0x283   : > { %v1105_v33 = vsub.f32 %v2689_v40, %v966_v3  ;;  %v1106_v26 = vsub.f32 %v2699_v49, %v966_v3  ;;  %v2134_v34 = vpop.eup %2133  ;;  %2145 = vpow2.f32 %v1179_v11 }
 0x284   : > { %1455 = vadd.xlane.f32.xlu1 %v1454_v48  ;;  %v2136_v5 = vpop.eup %2135  ;;  %2147 = vpow2.f32 %v1241_v23  ;;  %v1502_v35 = vadd.f32 %v2134_v34, %v2132_v54  ;;  %v1193_v43 = vmul.f32 1.442695, %v1111_v4  ;;  %v1195_v24 = vmul.f32 1.442695, %v1112_v6  ;;  %v3643_v4 = vld [vmem:[#allocation4_spill] sm:$0xff] }
 0x285   : > { %v1181_v13 = vmul.f32 1.442695, %v1105_v33  ;;  %v1183_v30 = vmul.f32 1.442695, %v1106_v26  ;;  %v1061_v41 = vpop.permute.xlu0 %1060  ;;  %v2138_v40 = vpop.eup %2137  ;;  %2149 = vpow2.f32 %v1243_v44 }
 0x286   : > { %v1046_v14 = vpop.permute.xlu1 %1045  ;;  %v1457_v32 = vadd.f32 %v2138_v40, %v2136_v5  ;;  %v1143_v25 = vsub.f32 %v2761_v36, %v1061_v41  ;;  %v1144_v31 = vsub.f32 %v2765_v37, %v1061_v41 }
 0x287   : > { %v1137_v27 = vsub.f32 %v2695_v45, %v1046_v14  ;;  %v1138_v49 = vsub.f32 %v2703_v52, %v1046_v14  ;;  %2151 = vpow2.f32 %v1181_v13 }
 0x288   : > { %v2140_v38 = vpop.eup %2139  ;;  %2153 = vpow2.f32 %v1183_v30  ;;  %1503 = vadd.xlane.f32.xlu1 %v1502_v35  ;;  %1458 = vadd.xlane.f32.xlu0 %v1457_v32  ;;  %v1259_v44 = vmul.f32 1.442695, %v1144_v31 }
 0x289   : > { %v1245_v57 = vmul.f32 1.442695, %v1137_v27  ;;  %v2142_v58 = vpop.eup %2141  ;;  %v1247_v50 = vmul.f32 1.442695, %v1138_v49  ;;  %v991_v45 = vpop.permute.xlu0 %990 }
 0x28a   : > { %v971_v39 = vpop.permute.xlu1 %970  ;;  %v1505_v22 = vadd.f32 %v2142_v58, %v2140_v38  ;;  %v1115_v33 = vsub.f32 %v2787_v8, %v991_v45 }
 0x28b   : > { %v1107_v7 = vsub.f32 %v2707_v55, %v971_v39  ;;  %v1108_v52 = vsub.f32 %v2713_v62, %v971_v39  ;;  %2155 = vpow2.f32 %v1245_v57 }
 0x28c   : > { %2157 = vpow2.f32 %v1247_v50  ;;  %v2144_v59 = vpop.eup %2143  ;;  %1506 = vadd.xlane.f32.xlu0 %v1505_v22  ;;  %v1201_v8 = vmul.f32 1.442695, %v1115_v33 }
 0x28d   : > { %v1185_v61 = vmul.f32 1.442695, %v1107_v7  ;;  %v1187_v1 = vmul.f32 1.442695, %v1108_v52  ;;  %2159 = vpow2.f32 %v1249_v17  ;;  %v2146_v55 = vpop.eup %2145  ;;  %v1071_v46 = vpop.permute.xlu0 %1070  ;;  %v3642_v17 = vld [vmem:[#allocation9_spill] sm:$0xff] }
 0x28e   : > { %v976_v12 = vpop.permute.xlu1 %975  ;;  %2161 = vpow2.f32 %v1251_v0  ;;  %v2148_v42 = vpop.eup %2147  ;;  %v1460_v3 = vadd.f32 %v2146_v55, %v2144_v59 }
 0x28f   : > { %v1109_v20 = vsub.f32 %v2729_v9, %v976_v12  ;;  %v1110_v62 = vsub.f32 %v2739_v18, %v976_v12  ;;  %2163 = vpow2.f32 %v1185_v61  ;;  %v2150_v11 = vpop.eup %2149  ;;  %v1257_v9 = vmul.f32 1.442695, %v1143_v25  ;;  %v3644_v12 = vld [vmem:[#allocation5_spill] sm:$0xff] }
 0x290   : > { %2165 = vpow2.f32 %v1187_v1  ;;  %v1116_v18 = vsub.f32 %v2793_v19, %v991_v45  ;;  %1461 = vadd.xlane.f32.xlu1 %v1460_v3  ;;  %v1508_v13 = vadd.f32 %v2150_v11, %v2148_v42  ;;  %v3647_v11 = vld [vmem:[#allocation11_spill] sm:$0xff] }
 0x291   : > { %v1189_v63 = vmul.f32 1.442695, %v1109_v20  ;;  %v1191_v51 = vmul.f32 1.442695, %v1110_v62  ;;  %v2152_v36 = vpop.eup %2151  ;;  %2167 = vpow2.f32 %v1193_v43  ;;  %v1001_v5 = vpop.permute.xlu0 %1000  ;;  %v3645_v20 = vld [vmem:[#allocation10_spill] sm:$0xff] }
 0x292   : > { %v1056_v23 = vpop.permute.xlu1 %1055  ;;  %v2154_v37 = vpop.eup %2153  ;;  %2169 = vpow2.f32 %v1195_v24  ;;  %v1203_v19 = vmul.f32 1.442695, %v1116_v18  ;;  %v1119_v50 = vsub.f32 %v2827_v16, %v1001_v5  ;;  %v3646_v24 = vld [vmem:[#allocation7_spill] sm:$0xff] }
 0x293   : > { %v1141_v54 = vsub.f32 %v2735_v15, %v1056_v23  ;;  %v1142_v26 = vsub.f32 %v2743_v21, %v1056_v23  ;;  %2171 = vpow2.f32 %v1189_v63  ;;  %v1463_v30 = vadd.f32 %v2154_v37, %v2152_v36 }
 0x294   : > { %2173 = vpow2.f32 %v1191_v51  ;;  %v1147_v15 = vsub.f32 %v2801_v28, %v1071_v46  ;;  %v1148_v21 = vsub.f32 %v2805_v29, %v1071_v46  ;;  %1509 = vadd.xlane.f32.xlu1 %v1508_v13 }
 0x295   : > { %v1253_v48 = vmul.f32 1.442695, %v1141_v54  ;;  %v1255_v34 = vmul.f32 1.442695, %v1142_v26  ;;  %v2156_v14 = vpop.eup %2155  ;;  %2175 = vpow2.f32 %v1257_v9  ;;  %1464 = vadd.xlane.f32.xlu0 %v1463_v30  ;;  %v1081_v0 = vpop.permute.xlu0 %1080  ;;  %v3648_v54 = vld [vmem:[#allocation6_spill] sm:$0xff] }
 0x296   : > { %v986_v41 = vpop.permute.xlu1 %985  ;;  %v2158_v27 = vpop.eup %2157  ;;  %2177 = vpow2.f32 %v1259_v44  ;;  %v1267_v39 = vmul.f32 1.442695, %v1148_v21  ;;  %v1151_v55 = vsub.f32 %v3645_v20, %v1081_v0  ;;  %v1152_v51 = vsub.f32 %v3647_v11, %v1081_v0  ;;  %v3649_v44 = vld [vmem:[#allocation8_spill] sm:$0xff]  ;;  %v3655_v0 = vld [vmem:[#allocation15_spill] sm:$0xff] }
 0x297   : > { %v1113_v10 = vsub.f32 %v2769_v47, %v986_v41  ;;  %v1114_v40 = vsub.f32 %v2779_v60, %v986_v41  ;;  %v2160_v2 = vpop.eup %2159  ;;  %2179 = vpow2.f32 %v1253_v48  ;;  %v1511_v57 = vadd.f32 %v2158_v27, %v2156_v14  ;;  %v3651_v21 = vld [vmem:[#allocation12_spill] sm:$0xff] }
 0x298   : > { %v2162_v35 = vpop.eup %2161  ;;  %2181 = vpow2.f32 %v1255_v34  ;;  %v1265_v47 = vmul.f32 1.442695, %v1147_v15  ;;  %v1120_v60 = vsub.f32 %v3642_v17, %v1001_v5  ;;  %v1273_v48 = vmul.f32 1.442695, %v1151_v55  ;;  %v3650_v15 = vld [vmem:[#allocation16_spill] sm:$0xff] }
 0x299   : > { %v1197_v49 = vmul.f32 1.442695, %v1113_v10  ;;  %v1199_v38 = vmul.f32 1.442695, %v1114_v40  ;;  %v2164_v58 = vpop.eup %2163  ;;  %2183 = vpow2.f32 %v1201_v8  ;;  %1512 = vadd.xlane.f32.xlu0 %v1511_v57  ;;  %v1514_v46 = vadd.f32 %v2162_v35, %v2160_v2  ;;  %v1011_v33 = vpop.permute.xlu0 %1010  ;;  %v3652_v2 = vld [vmem:[#allocation14_spill] sm:$0xff] }
 0x29a   : > { %v1066_v28 = vpop.permute.xlu1 %1065  ;;  %v2166_v29 = vpop.eup %2165  ;;  %2185 = vpow2.f32 %v1203_v19  ;;  %v1211_v25 = vmul.f32 1.442695, %v1120_v60  ;;  %v1275_v8 = vmul.f32 1.442695, %v1152_v51  ;;  %v1123_v5 = vsub.f32 %v3650_v15, %v1011_v33  ;;  %v3658_v15 = vld [vmem:[#allocation20_spill] sm:$0xff] }
 0x29b   : > { %v1145_v32 = vsub.f32 %v2775_v56, %v1066_v28  ;;  %v1146_v45 = vsub.f32 %v3643_v4, %v1066_v28  ;;  %v2168_v7 = vpop.eup %2167  ;;  %2187 = vpow2.f32 %v1197_v49  ;;  %v1466_v61 = vadd.f32 %v2166_v29, %v2164_v58 }
 0x29c   : > { %v2170_v52 = vpop.eup %2169  ;;  %2189 = vpow2.f32 %v1199_v38  ;;  %v1209_v56 = vmul.f32 1.442695, %v1119_v50  ;;  %v3653_v38 = vld [vmem:[#allocation18_spill] sm:$0xff] }
 0x29d   : > { %v1261_v6 = vmul.f32 1.442695, %v1145_v32  ;;  %v1263_v22 = vmul.f32 1.442695, %v1146_v45  ;;  %v2172_v16 = vpop.eup %2171  ;;  %2191 = vpow2.f32 %v1265_v47  ;;  %1467 = vadd.xlane.f32.xlu1 %v1466_v61  ;;  %v1472_v10 = vadd.f32 %v2170_v52, %v2168_v7  ;;  %v1091_v58 = vpop.permute.xlu0 %1090  ;;  %v3654_v45 = vld [vmem:[#allocation13_spill] sm:$0xff] }
 0x29e   : > { %v996_v1 = vpop.permute.xlu1 %995  ;;  %v2174_v43 = vpop.eup %2173  ;;  %2193 = vpow2.f32 %v1267_v39  ;;  %v1124_v57 = vsub.f32 %v3653_v38, %v1011_v33  ;;  %v1217_v39 = vmul.f32 1.442695, %v1123_v5  ;;  %v3656_v61 = vld [vmem:[#allocation17_spill] sm:$0xff]  ;;  %v3659_v5 = vld [vmem:[#allocation22_spill] sm:$0xff] }
 0x29f   : > { %v1117_v59 = vsub.f32 %v3644_v12, %v996_v1  ;;  %v1118_v31 = vsub.f32 %v3646_v24, %v996_v1  ;;  %v2176_v62 = vpop.eup %2175  ;;  %2195 = vpow2.f32 %v1261_v6  ;;  %v1469_v23 = vadd.f32 %v2174_v43, %v2172_v16 }
 0x2a0   : > { %v2178_v63 = vpop.eup %2177  ;;  %2197 = vpow2.f32 %v1263_v22  ;;  %v1219_v22 = vmul.f32 1.442695, %v1124_v57  ;;  %v1155_v1 = vsub.f32 %v3656_v61, %v1091_v58 }
 0x2a1   : > { %v1205_v42 = vmul.f32 1.442695, %v1117_v59  ;;  %v1207_v3 = vmul.f32 1.442695, %v1118_v31  ;;  %v2180_v9 = vpop.eup %2179  ;;  %2199 = vpow2.f32 %v1209_v56  ;;  %1515 = vadd.xlane.f32.xlu1 %v1514_v46  ;;  %1470 = vadd.xlane.f32.xlu0 %v1469_v23  ;;  %v1520_v17 = vadd.f32 %v2178_v63, %v2176_v62  ;;  %v3657_v56 = vld [vmem:[#allocation19_spill] sm:$0xff] }
 0x2a2   : > { %v1076_v36 = vpop.permute.xlu1 %1075  ;;  %v2182_v26 = vpop.eup %2181  ;;  %2201 = vpow2.f32 %v1211_v25  ;;  %v1156_v12 = vsub.f32 %v3657_v56, %v1091_v58  ;;  %v1281_v62 = vmul.f32 1.442695, %v1155_v1  ;;  %v3668_v58 = vld [vmem:[#allocation28_spill] sm:$0xff]  ;;  %v1398_v1 = vld [vmem:[#allocation3 + $0x88] sm:$0xff] }
 0x2a3   : > { %v1149_v37 = vsub.f32 %v3648_v54, %v1076_v36  ;;  %v1150_v18 = vsub.f32 %v3649_v44, %v1076_v36  ;;  %v2184_v34 = vpop.eup %2183  ;;  %2203 = vpow2.f32 %v1205_v42  ;;  %v1517_v41 = vadd.f32 %v2182_v26, %v2180_v9 }
 0x2a4   : > { %v2186_v14 = vpop.eup %2185  ;;  %2205 = vpow2.f32 %v1207_v3  ;;  %v1283_v46 = vmul.f32 1.442695, %v1156_v12  ;;  %v1397_v12 = vld [vmem:[#allocation3 + $0x80] sm:$0xff] }
 0x2a5   : > { %v1269_v13 = vmul.f32 1.442695, %v1149_v37  ;;  %v1271_v30 = vmul.f32 1.442695, %v1150_v18  ;;  %v2188_v19 = vpop.eup %2187  ;;  %1473 = vadd.xlane.f32.xlu1 %v1472_v10  ;;  %1518 = vadd.xlane.f32.xlu0 %v1517_v41  ;;  %v1478_v55 = vadd.f32 %v2186_v14, %v2184_v34  ;;  %v3660_v10 = vsub.f32 %v3658_v15, %v3659_v5 }
 0x2a6   : > { %v1006_v27 = vpop.permute.xlu1 %1005  ;;  %v2190_v35 = vpop.eup %2189 }
 0x2a7   : > { %2207 = vpow2.f32 %v1269_v13  ;;  %v1121_v40 = vsub.f32 %v3651_v21, %v1006_v27  ;;  %v1122_v49 = vsub.f32 %v3652_v2, %v1006_v27  ;;  %v2192_v28 = vpop.eup %2191  ;;  %v1475_v32 = vadd.f32 %v2190_v35, %v2188_v19  ;;  %v3661_v19 = vld [vmem:[#allocation21_spill] sm:$0xff]  ;;  %v3662_v21 = vld [vmem:[#allocation24_spill] sm:$0xff] }
 0x2a8   : > { %2209 = vpow2.f32 %v1271_v30  ;;  %v2194_v29 = vpop.eup %2193  ;;  %v1317_v27 = vmul.f32 1.442695, %v3660_v10  ;;  %v3665_v35 = vld [vmem:[#allocation25_spill] sm:$0xff]  ;;  %v1399_v10 = vld [vmem:[#allocation3 + $0x90] sm:$0xff] }
 0x2a9   : > { %2211 = vpow2.f32 %v1273_v48  ;;  %v1213_v47 = vmul.f32 1.442695, %v1121_v40  ;;  %v1215_v50 = vmul.f32 1.442695, %v1122_v49  ;;  %v2196_v4 = vpop.eup %2195  ;;  %1521 = vadd.xlane.f32.xlu1 %v1520_v17  ;;  %1476 = vadd.xlane.f32.xlu0 %v1475_v32  ;;  %v1526_v51 = vadd.f32 %v2194_v29, %v2192_v28  ;;  %v3664_v49 = vld [vmem:[#allocation23_spill] sm:$0xff]  ;;  %v3667_v28 = vld [vmem:[#allocation26_spill] sm:$0xff] }
 0x2aa   : > { %2213 = vpow2.f32 %v1275_v8  ;;  %v1086_v60 = vpop.permute.xlu1 %1085  ;;  %v2198_v52 = vpop.eup %2197  ;;  %v3663_v40 = vsub.f32 %v3661_v19, %v3662_v21  ;;  %v3666_v38 = vsub.f32 %v3664_v49, %v3665_v35  ;;  %v3670_v32 = vld [vmem:[#allocation27_spill] sm:$0xff]  ;;  %v3671_v29 = vld [vmem:[#allocation29_spill] sm:$0xff]  ;;  %v3688_v21 = vld [vmem:[#allocation38_spill] sm:$0xff] }
 0x2ab   : > { %2215 = vpow2.f32 %v1213_v47  ;;  %v1153_v7 = vsub.f32 %v3654_v45, %v1086_v60  ;;  %v1154_v6 = vsub.f32 %v3655_v0, %v1086_v60  ;;  %v2200_v16 = vpop.eup %2199  ;;  %v1523_v25 = vadd.f32 %v2198_v52, %v2196_v4  ;;  %v1381_v4 = vld [vmem:[#allocation3] sm:$0xff]  ;;  %v3673_v45 = vld [vmem:[#allocation31_spill] sm:$0xff] }
 0x2ac   : > { %2217 = vpow2.f32 %v1215_v50  ;;  %v2202_v20 = vpop.eup %2201  ;;  %v1351_v2 = vmul.f32 1.442695, %v3663_v40  ;;  %v1349_v57 = vmul.f32 1.442695, %v3666_v38  ;;  %v3669_v47 = vsub.f32 %v3667_v28, %v3668_v58  ;;  %v3689_v40 = vld [vmem:[#allocation40_spill] sm:$0xff]  ;;  %v1384_v38 = vld [vmem:[#allocation3 + $0x18] sm:$0xff] }
 0x2ad   : > { %v1277_v59 = vmul.f32 1.442695, %v1153_v7  ;;  %v1279_v43 = vmul.f32 1.442695, %v1154_v6  ;;  %2219 = vpow2.f32 %v1217_v39  ;;  %v2204_v24 = vpop.eup %2203  ;;  %1479 = vadd.xlane.f32.xlu1 %v1478_v55  ;;  %1524 = vadd.xlane.f32.xlu0 %v1523_v25  ;;  %v1484_v54 = vadd.f32 %v2202_v20, %v2200_v16  ;;  %v3674_v7 = vld [vmem:[#allocation33_spill] sm:$0xff]  ;;  %v3691_v58 = vld [vmem:[#allocation42_spill] sm:$0xff] }
 0x2ae   : > { %v2206_v31 = vpop.eup %2205  ;;  %v1319_v50 = vmul.f32 1.442695, %v3669_v47  ;;  %v3672_v39 = vsub.f32 %v3670_v32, %v3671_v29  ;;  %v3675_v0 = vsub.f32 %v3673_v45, %v3674_v7  ;;  %v3692_v47 = vld [vmem:[#allocation44_spill] sm:$0xff] }
 0x2af   : > { %2221 = vpow2.f32 %v1277_v59  ;;  %v1481_v63 = vadd.f32 %v2206_v31, %v2204_v24  ;;  %v3676_v59 = vld [vmem:[#allocation30_spill] sm:$0xff] }
 0x2b0   : > { %2223 = vpow2.f32 %v1279_v43  ;;  %v1321_v17 = vmul.f32 1.442695, %v3672_v39  ;;  %v1353_v6 = vmul.f32 1.442695, %v3675_v0  ;;  %v3677_v43 = vld [vmem:[#allocation32_spill] sm:$0xff]  ;;  %v1400_v0 = vld [vmem:[#allocation3 + $0x98] sm:$0xff] }
 0x2b1   : > { %v2208_v42 = vpop.eup %2207  ;;  %2225 = vpow2.f32 %v1219_v22  ;;  %1527 = vadd.xlane.f32.xlu1 %v1526_v51  ;;  %1482 = vadd.xlane.f32.xlu0 %v1481_v63  ;;  %v3678_v25 = vsub.f32 %v3676_v59, %v3677_v43  ;;  %v1382_v63 = vld [vmem:[#allocation3 + $0x8] sm:$0xff]  ;;  %v3680_v51 = vld [vmem:[#allocation36_spill] sm:$0xff] }
 0x2b2   : > { %v2210_v11 = vpop.eup %2209  ;;  %2227 = vpow2.f32 %v1281_v62 }
 0x2b3   : > { %v2212_v3 = vpop.eup %2211  ;;  %v1529_v36 = vadd.f32 %v2210_v11, %v2208_v42  ;;  %2229 = vpow2.f32 %v1283_v46  ;;  %v1323_v20 = vmul.f32 1.442695, %v3678_v25  ;;  %v3679_v11 = vld [vmem:[#allocation34_spill] sm:$0xff] }
 0x2b4   : > { %v2214_v23 = vpop.eup %2213  ;;  %2231 = vpow2.f32 %v1317_v27 }
 0x2b5   : > { %v2216_v9 = vpop.eup %2215  ;;  %1485 = vadd.xlane.f32.xlu1 %v1484_v54  ;;  %1530 = vadd.xlane.f32.xlu0 %v1529_v36  ;;  %v1532_v48 = vadd.f32 %v2214_v23, %v2212_v3  ;;  %2233 = vpow2.f32 %v1351_v2  ;;  %v3681_v3 = vsub.f32 %v3679_v11, %v3680_v51  ;;  %v3690_v2 = vsub.f32 %v3688_v21, %v3689_v40  ;;  %v3712_v21 = vld [vmem:[#allocation55_spill] sm:$0xff] }
 0x2b6   : > { %v2218_v33 = vpop.eup %2217  ;;  %2235 = vpow2.f32 %v1349_v57  ;;  %v3713_v40 = vsub.f32 %v3712_v21, %v3063_v53 }
 0x2b7   : > { %v2220_v37 = vpop.eup %2219  ;;  %v1487_v44 = vadd.f32 %v2218_v33, %v2216_v9  ;;  %2237 = vpow2.f32 %v1319_v50  ;;  %v1355_v23 = vmul.f32 1.442695, %v3681_v3  ;;  %v3682_v9 = vld [vmem:[#allocation35_spill] sm:$0xff]  ;;  %v3683_v33 = vld [vmem:[#allocation37_spill] sm:$0xff]  ;;  %v1327_v49 = vmul.f32 1.442695, %v3690_v2 }
 0x2b8   : > { %2239 = vpow2.f32 %v1321_v17  ;;  %v3684_v54 = vsub.f32 %v3682_v9, %v3683_v33  ;;  %v3693_v50 = vsub.f32 %v3691_v58, %v3692_v47  ;;  %v3694_v17 = vld [vmem:[#allocation43_spill] sm:$0xff]  ;;  %v3704_v9 = vld [vmem:[#allocation52_spill] sm:$0xff]  ;;  %v1365_v2 = vmul.f32 1.442695, %v3713_v40  ;;  %v1403_v58 = vld [vmem:[#allocation3 + $0xb0] sm:$0xff] }
 0x2b9   : > { %v2222_v18 = vpop.eup %2221  ;;  %1533 = vadd.xlane.f32.xlu1 %v1532_v48  ;;  %1488 = vadd.xlane.f32.xlu0 %v1487_v44  ;;  %2241 = vpow2.f32 %v1353_v6  ;;  %v1383_v48 = vld [vmem:[#allocation3 + $0x10] sm:$0xff]  ;;  %v3714_v47 = vld [vmem:[#allocation57_spill] sm:$0xff] }
 0x2ba   : > { %v2224_v26 = vpop.eup %2223  ;;  %2243 = vpow2.f32 %v1323_v20  ;;  %v1359_v32 = vmul.f32 1.442695, %v3693_v50  ;;  %v3715_v50 = vld [vmem:[#allocation59_spill] sm:$0xff] }
 0x2bb   : > { %v2226_v34 = vpop.eup %2225  ;;  %v1535_v13 = vadd.f32 %v2224_v26, %v2222_v18  ;;  %2245 = vpow2.f32 %v1355_v23  ;;  %v1386_v23 = vld [vmem:[#allocation3 + $0x28] sm:$0xff] }
 0x2bc   : > { %v2228_v30 = vpop.eup %2227  ;;  %v1490_v41 = vadd.f32 %v2226_v34, %v2220_v37  ;;  %v1325_v37 = vmul.f32 1.442695, %v3684_v54 }
 0x2bd   : > { %v2230_v14 = vpop.eup %2229  ;;  %1536 = vadd.xlane.f32.xlu0 %v1535_v13  ;;  %v3685_v13 = vld [vmem:[#allocation39_spill] sm:$0xff] }
 0x2be   : > { %1491 = vadd.xlane.f32.xlu1 %v1490_v41  ;;  %v1538_v8 = vadd.f32 %v2230_v14, %v2228_v30  ;;  %v2232_v60 = vpop.eup %2231  ;;  %2247 = vpow2.f32 %v1325_v37  ;;  %v3686_v30 = vld [vmem:[#allocation41_spill] sm:$0xff] }
 0x2bf   : > { %v1413_v52 = vmul.f32 %v2232_v60, %v1381_v4  ;;  %v2234_v22 = vpop.eup %2233  ;;  %v3687_v41 = vsub.f32 %v3685_v13, %v3686_v30  ;;  %v3695_v60 = vld [vmem:[#allocation45_spill] sm:$0xff] }
 0x2c0   : > { %v2236_v16 = vpop.eup %2235  ;;  %v1430_v55 = vmul.f32 %v2234_v22, %v1398_v1  ;;  %v3696_v4 = vsub.f32 %v3694_v17, %v3695_v60  ;;  %v1385_v22 = vld [vmem:[#allocation3 + $0x20] sm:$0xff]  ;;  %v3697_v1 = vld [vmem:[#allocation47_spill] sm:$0xff]  ;;  %v3717_v60 = vld [vmem:[#allocation58_spill] sm:$0xff] }
 0x2c1   : > { %v1429_v24 = vmul.f32 %v2236_v16, %v1397_v12  ;;  %v2238_v62 = vpop.eup %2237  ;;  %v1357_v14 = vmul.f32 1.442695, %v3687_v41  ;;  %v3698_v16 = vld [vmem:[#allocation49_spill] sm:$0xff] }
 0x2c2   : > { %1539 = vadd.xlane.f32.xlu1 %v1538_v8  ;;  %v1414_v44 = vmul.f32 %v2238_v62, %v1382_v63  ;;  %v2240_v18 = vpop.eup %2239  ;;  %v1329_v45 = vmul.f32 1.442695, %v3696_v4  ;;  %v3700_v62 = vld [vmem:[#allocation46_spill] sm:$0xff]  ;;  %v3718_v4 = vld [vmem:[#allocation60_spill] sm:$0xff] }
 0x2c3   : > { %v1415_v8 = vmul.f32 %v2240_v18, %v1383_v48  ;;  %v2242_v15 = vpop.eup %2241  ;;  %2249 = vpow2.f32 %v1357_v14  ;;  %v3707_v18 = vld [vmem:[#allocation53_spill] sm:$0xff]  ;;  %v1387_v14 = vld [vmem:[#allocation3 + $0x30] sm:$0xff]  ;;  %v3719_v53 = vsub.f32 %v3717_v60, %v3718_v4  ;;  %v3742_v4 = vld [vmem:[#allocation76_spill] sm:$0xff] }
 0x2c4   : > { %v2244_v19 = vpop.eup %2243  ;;  %v1431_v35 = vmul.f32 %v2242_v15, %v1399_v10  ;;  %2251 = vpow2.f32 %v1327_v49  ;;  %v3709_v15 = vld [vmem:[#allocation54_spill] sm:$0xff] }
 0x2c5   : > { %v1416_v29 = vmul.f32 %v2244_v19, %v1384_v38  ;;  %v2246_v39 = vpop.eup %2245  ;;  %2253 = vpow2.f32 %v1359_v32  ;;  %v3716_v32 = vsub.f32 %v3714_v47, %v3715_v50  ;;  %v3738_v47 = vld [vmem:[#allocation73_spill] sm:$0xff]  ;;  %v3739_v50 = vld [vmem:[#allocation75_spill] sm:$0xff]  ;;  %v3741_v60 = vld [vmem:[#allocation74_spill] sm:$0xff] }
 0x2c6   : > { %2255 = vpow2.f32 %v1329_v45  ;;  %v1337_v45 = vmul.f32 1.442695, %v3719_v53  ;;  %v3743_v53 = vsub.f32 %v3741_v60, %v3742_v4 }
 0x2fd   : > { %v1447_v61 = vpop.xlane.xlu1 %1446 }
 0x2fe   : > { %v1541_v56 = vadd.f32 %v1447_v61, %v1413_v52  ;;  %v2248_v52 = vpop.eup %2247  ;;  %v1432_v61 = vmul.f32 %v2246_v39, %v1400_v0 }
 0x2ff   : > { %v1417_v43 = vmul.f32 %v2248_v52, %v1385_v22  ;;  %v2250_v20 = vpop.eup %2249  ;;  %v1388_v52 = vld [vmem:[#allocation3 + $0x38] sm:$0xff]  ;;  %v3720_v22 = vld [vmem:[#allocation61_spill] sm:$0xff] }
 0x300   : > { %1574 = vst.msk [vmem:[#allocation3] sm:$0xff] %vm1573_vm3, %v1541_v56  ;;  %v3699_v56 = vsub.f32 %v3697_v1, %v3698_v16  ;;  %v2252_v51 = vpop.eup %2251 }
 0x301   : > { %v1498_v31 = vpop.xlane.xlu1 %1497  ;;  %v1418_v13 = vmul.f32 %v2252_v51, %v1386_v23  ;;  %v3729_v23 = vld [vmem:[#allocation66_spill] sm:$0xff] }
 0x302   : > { %v1558_v46 = vadd.f32 %v1498_v31, %v1430_v55  ;;  %v1361_v12 = vmul.f32 1.442695, %v3699_v56 }
 0x303   : > { %v1495_v42 = vpop.xlane.xlu0 %1494 }
 0x304   : > { %v1557_v36 = vadd.f32 %v1495_v42, %v1429_v24  ;;  %1591 = vst.msk [vmem:[#allocation3 + $0x88] sm:$0xff] %vm1573_vm3, %v1558_v46  ;;  %v1401_v24 = vld [vmem:[#allocation3 + $0xa0] sm:$0xff]  ;;  %2257 = vpow2.f32 %v1361_v12  ;;  %v3723_v12 = vld [vmem:[#allocation62_spill] sm:$0xff] }
 0x305   : > { %v3701_v42 = vld [vmem:[#allocation48_spill] sm:$0xff]  ;;  %v1433_v11 = vmul.f32 %v2250_v20, %v1401_v24 }
 0x306   : > { %1590 = vst.msk [vmem:[#allocation3 + $0x80] sm:$0xff] %vm1573_vm3, %v1557_v36  ;;  %v3702_v46 = vsub.f32 %v3700_v62, %v3701_v42  ;;  %v3703_v36 = vld [vmem:[#allocation50_spill] sm:$0xff]  ;;  %v1389_v62 = vld [vmem:[#allocation3 + $0x40] sm:$0xff]  ;;  %v1404_v42 = vld [vmem:[#allocation3 + $0xb8] sm:$0xff] }
 0x307   : > { %v1450_v26 = vpop.xlane.xlu0 %1449  ;;  %v3705_v33 = vsub.f32 %v3703_v36, %v3704_v9  ;;  %v3730_v36 = vld [vmem:[#allocation68_spill] sm:$0xff] }
 0x308   : > { %v1542_v34 = vadd.f32 %v1450_v26, %v1414_v44  ;;  %v1331_v63 = vmul.f32 1.442695, %v3702_v46  ;;  %v3706_v44 = vld [vmem:[#allocation51_spill] sm:$0xff]  ;;  %v3726_v46 = vld [vmem:[#allocation65_spill] sm:$0xff]  ;;  %v3731_v9 = vsub.f32 %v3729_v23, %v3730_v36  ;;  %v1393_v23 = vld [vmem:[#allocation3 + $0x60] sm:$0xff] }
 0x309   : > { %v1363_v54 = vmul.f32 1.442695, %v3705_v33  ;;  %v3708_v26 = vsub.f32 %v3706_v44, %v3707_v18  ;;  %v1408_v36 = vld [vmem:[#allocation3 + $0xd8] sm:$0xff] }
 0x30a   : > { %1575 = vst.msk [vmem:[#allocation3 + $0x8] sm:$0xff] %vm1573_vm3, %v1542_v34  ;;  %2259 = vpow2.f32 %v1331_v63  ;;  %v2254_v34 = vpop.eup %2253  ;;  %v3727_v63 = vld [vmem:[#allocation67_spill] sm:$0xff]  ;;  %v1341_v33 = vmul.f32 1.442695, %v3731_v9 }
 0x30b   : > { %v1453_v5 = vpop.xlane.xlu0 %1452  ;;  %v1333_v48 = vmul.f32 1.442695, %v3708_v26  ;;  %v2256_v30 = vpop.eup %2255  ;;  %2261 = vpow2.f32 %v1363_v54 }
 0x30c   : > { %v1543_v27 = vadd.f32 %v1453_v5, %v1415_v8  ;;  %v1402_v8 = vld [vmem:[#allocation3 + $0xa8] sm:$0xff]  ;;  %v3710_v5 = vld [vmem:[#allocation56_spill] sm:$0xff]  ;;  %v1419_v49 = vmul.f32 %v2256_v30, %v1387_v14 }
 0x30d   : > { %v3711_v10 = vsub.f32 %v3709_v15, %v3710_v5  ;;  %2263 = vpow2.f32 %v1333_v48  ;;  %v3732_v30 = vld [vmem:[#allocation69_spill] sm:$0xff] }
 0x30e   : > { %1576 = vst.msk [vmem:[#allocation3 + $0x10] sm:$0xff] %vm1573_vm3, %v1543_v27  ;;  %v2258_v38 = vpop.eup %2257 }
 0x30f   : > { %v1501_v57 = vpop.xlane.xlu0 %1500  ;;  %v1335_v27 = vmul.f32 1.442695, %v3711_v10  ;;  %v3735_v10 = vld [vmem:[#allocation70_spill] sm:$0xff] }
 0x310   : > { %v1559_v28 = vadd.f32 %v1501_v57, %v1431_v35  ;;  %v1434_v35 = vmul.f32 %v2254_v34, %v1402_v8  ;;  %v1405_v34 = vld [vmem:[#allocation3 + $0xc0] sm:$0xff] }
 0x311   : > { %v1456_v7 = vpop.xlane.xlu1 %1455  ;;  %2265 = vpow2.f32 %v1335_v27  ;;  %v3736_v27 = vld [vmem:[#allocation72_spill] sm:$0xff] }
 0x312   : > { %1592 = vst.msk [vmem:[#allocation3 + $0x90] sm:$0xff] %vm1573_vm3, %v1559_v28  ;;  %v1544_v6 = vadd.f32 %v1456_v7, %v1416_v29  ;;  %v1367_v29 = vmul.f32 1.442695, %v3716_v32  ;;  %2267 = vpow2.f32 %v1365_v2  ;;  %v1435_v7 = vmul.f32 %v2258_v38, %v1403_v58  ;;  %v1406_v58 = vld [vmem:[#allocation3 + $0xc8] sm:$0xff] }
 0x313   : > { %v3740_v32 = vsub.f32 %v3738_v47, %v3739_v50 }
 0x314   : > { %1577 = vst.msk [vmem:[#allocation3 + $0x18] sm:$0xff] %vm1573_vm3, %v1544_v6  ;;  %v2260_v0 = vpop.eup %2259  ;;  %2269 = vpow2.f32 %v1367_v29 }
 0x315   : > { %v1504_v59 = vpop.xlane.xlu1 %1503  ;;  %v1459_v55 = vpop.xlane.xlu0 %1458  ;;  %2271 = vpow2.f32 %v1337_v45  ;;  %v1375_v29 = vmul.f32 1.442695, %v3740_v32  ;;  %v1345_v45 = vmul.f32 1.442695, %v3743_v53 }
 0x316   : > { %v1560_v25 = vadd.f32 %v1504_v59, %v1432_v61  ;;  %v1545_v31 = vadd.f32 %v1459_v55, %v1417_v43  ;;  %v3721_v61 = vld [vmem:[#allocation63_spill] sm:$0xff]  ;;  %v3724_v59 = vld [vmem:[#allocation64_spill] sm:$0xff]  ;;  %v2262_v20 = vpop.eup %2261  ;;  %v1420_v55 = vmul.f32 %v2260_v0, %v1388_v52 }
 0x317   : > { %v3722_v1 = vsub.f32 %v3720_v22, %v3721_v61  ;;  %v3725_v43 = vsub.f32 %v3723_v12, %v3724_v59  ;;  %v2264_v24 = vpop.eup %2263  ;;  %v1436_v44 = vmul.f32 %v2262_v20, %v1404_v42  ;;  %v3745_v12 = vld [vmem:[#allocation79_spill] sm:$0xff] }
 0x318   : > { %1593 = vst.msk [vmem:[#allocation3 + $0x98] sm:$0xff] %vm1573_vm3, %v1560_v25  ;;  %1578 = vst.msk [vmem:[#allocation3 + $0x20] sm:$0xff] %vm1573_vm3, %v1545_v31 }
 0x319   : > { %v1507_v3 = vpop.xlane.xlu0 %1506  ;;  %v1339_v16 = vmul.f32 1.442695, %v3722_v1  ;;  %v1369_v25 = vmul.f32 1.442695, %v3725_v43  ;;  %v1407_v1 = vld [vmem:[#allocation3 + $0xd0] sm:$0xff] }
 0x31a   : > { %v1561_v37 = vadd.f32 %v1507_v3, %v1433_v11  ;;  %v3728_v11 = vsub.f32 %v3726_v46, %v3727_v63 }
 0x31b   : > { %2273 = vpow2.f32 %v1339_v16  ;;  %v2266_v54 = vpop.eup %2265  ;;  %v1392_v16 = vld [vmem:[#allocation3 + $0x58] sm:$0xff] }
 0x31c   : > { %1594 = vst.msk [vmem:[#allocation3 + $0xa0] sm:$0xff] %vm1573_vm3, %v1561_v37  ;;  %v1371_v51 = vmul.f32 1.442695, %v3728_v11  ;;  %2275 = vpow2.f32 %v1369_v25  ;;  %v1421_v37 = vmul.f32 %v2264_v24, %v1389_v62  ;;  %v2268_v18 = vpop.eup %2267  ;;  %v3748_v24 = vld [vmem:[#allocation80_spill] sm:$0xff] }
 0x31d   : > { %v1462_v41 = vpop.xlane.xlu1 %1461  ;;  %v1437_v2 = vmul.f32 %v2268_v18, %v1405_v34 }
 0x31e   : > { %v1546_v19 = vadd.f32 %v1462_v41, %v1418_v13  ;;  %v1390_v13 = vld [vmem:[#allocation3 + $0x48] sm:$0xff]  ;;  %2277 = vpow2.f32 %v1371_v51  ;;  %v3733_v41 = vld [vmem:[#allocation71_spill] sm:$0xff]  ;;  %v2270_v40 = vpop.eup %2269 }
 0x31f   : > { %v3734_v14 = vsub.f32 %v3732_v30, %v3733_v41  ;;  %2279 = vpow2.f32 %v1341_v33 }
 0x320   : > { %1579 = vst.msk [vmem:[#allocation3 + $0x28] sm:$0xff] %vm1573_vm3, %v1546_v19  ;;  %v3737_v19 = vsub.f32 %v3735_v10, %v3736_v27 }
 0x321   : > { %v1510_v28 = vpop.xlane.xlu1 %1509  ;;  %v1343_v8 = vmul.f32 1.442695, %v3734_v14  ;;  %v1409_v14 = vld [vmem:[#allocation3 + $0xe0] sm:$0xff] }
 0x322   : > { %v1465_v57 = vpop.xlane.xlu0 %1464  ;;  %v1562_v17 = vadd.f32 %v1510_v28, %v1434_v35  ;;  %v1373_v21 = vmul.f32 1.442695, %v3737_v19  ;;  %v2272_v35 = vpop.eup %2271  ;;  %v1391_v28 = vld [vmem:[#allocation3 + $0x50] sm:$0xff] }
 0x323   : > { %v1547_v39 = vadd.f32 %v1465_v57, %v1419_v49  ;;  %v1422_v49 = vmul.f32 %v2266_v54, %v1390_v13  ;;  %2281 = vpow2.f32 %v1343_v8  ;;  %v1423_v0 = vmul.f32 %v2272_v35, %v1391_v28  ;;  %v3750_v54 = vld [vmem:[#allocation81_spill] sm:$0xff] }
 0x324   : > { %1595 = vst.msk [vmem:[#allocation3 + $0xa8] sm:$0xff] %vm1573_vm3, %v1562_v17  ;;  %2283 = vpow2.f32 %v1373_v21  ;;  %v1394_v8 = vld [vmem:[#allocation3 + $0x68] sm:$0xff] }
 0x325   : > { %1580 = vst.msk [vmem:[#allocation3 + $0x30] sm:$0xff] %vm1573_vm3, %v1547_v39  ;;  %2285 = vpow2.f32 %v1375_v29  ;;  %v1410_v35 = vld [vmem:[#allocation3 + $0xe8] sm:$0xff] }
 0x326   : > { %v1513_v6 = vpop.xlane.xlu0 %1512  ;;  %2287 = vpow2.f32 %v1345_v45 }
 0x327   : > { %v1563_v56 = vadd.f32 %v1513_v6, %v1435_v7  ;;  %v2274_v7 = vpop.eup %2273  ;;  %v1438_v6 = vmul.f32 %v2270_v40, %v1406_v58 }
 0x328   : > { %v2276_v52 = vpop.eup %2275  ;;  %v1424_v63 = vmul.f32 %v2274_v7, %v1392_v16 }
 0x329   : > { %1596 = vst.msk [vmem:[#allocation3 + $0xb0] sm:$0xff] %vm1573_vm3, %v1563_v56  ;;  %v3744_v56 = vld [vmem:[#allocation77_spill] sm:$0xff]  ;;  %v2278_v42 = vpop.eup %2277  ;;  %v1439_v46 = vmul.f32 %v2276_v52, %v1407_v1  ;;  %v1412_v52 = vld [vmem:[#allocation3 + $0xf8] sm:$0xff] }
 0x32a   : > { %v1468_v31 = vpop.xlane.xlu1 %1467  ;;  %v3746_v59 = vsub.f32 %v3744_v56, %v3745_v12  ;;  %v2280_v11 = vpop.eup %2279  ;;  %v1440_v34 = vmul.f32 %v2278_v42, %v1408_v36  ;;  %v1674_v12 = vld [vmem:[#allocation3] sm:$0xff] (!%p1959_p8) }
 0x32b   : > { %v1548_v3 = vadd.f32 %v1468_v31, %v1420_v55  ;;  %v3747_v55 = vld [vmem:[#allocation78_spill] sm:$0xff] }
 0x32c   : > { %v1347_v43 = vmul.f32 1.442695, %v3746_v59  ;;  %v3749_v31 = vsub.f32 %v3747_v55, %v3748_v24  ;;  %v1675_v59 = vld [vmem:[#allocation3 + $0x8] sm:$0xff] (!%p1959_p8)  ;;  %v1680_v24 = vld [vmem:[#allocation3 + $0x30] sm:$0xff] (!%p1959_p8) }
 0x32d   : > { %1581 = vst.msk [vmem:[#allocation3 + $0x38] sm:$0xff] %vm1573_vm3, %v1548_v3  ;;  %v1679_v55 = vld [vmem:[#allocation3 + $0x28] sm:$0xff] (!%p1959_p8) }
 0x32e   : > { %v1471_v26 = vpop.xlane.xlu0 %1470  ;;  %v1516_v48 = vpop.xlane.xlu1 %1515  ;;  %v1377_v62 = vmul.f32 1.442695, %v3749_v31  ;;  %2289 = vpow2.f32 %v1347_v43  ;;  %v1676_v43 = vld [vmem:[#allocation3 + $0x10] sm:$0xff] (!%p1959_p8) }
 0x32f   : > { %v1549_v15 = vadd.f32 %v1471_v26, %v1421_v37  ;;  %v1564_v5 = vadd.f32 %v1516_v48, %v1436_v44  ;;  %v3751_v37 = vld [vmem:[#allocation82_spill] sm:$0xff]  ;;  %v2282_v26 = vpop.eup %2281  ;;  %v1425_v48 = vmul.f32 %v2280_v11, %v1393_v23 }
 0x330   : > { %v3752_v44 = vsub.f32 %v3750_v54, %v3751_v37  ;;  %2291 = vpow2.f32 %v1377_v62  ;;  %v2284_v13 = vpop.eup %2283  ;;  %v1426_v19 = vmul.f32 %v2282_v26, %v1394_v8 }
 0x331   : > { %1582 = vst.msk [vmem:[#allocation3 + $0x40] sm:$0xff] %vm1573_vm3, %v1549_v15  ;;  %1597 = vst.msk [vmem:[#allocation3 + $0xb8] sm:$0xff] %vm1573_vm3, %v1564_v5  ;;  %v2286_v10 = vpop.eup %2285  ;;  %v1441_v27 = vmul.f32 %v2284_v13, %v1409_v14 }
 0x332   : > { %v1519_v38 = vpop.xlane.xlu0 %1518  ;;  %v1474_v57 = vpop.xlane.xlu1 %1473  ;;  %v1379_v18 = vmul.f32 1.442695, %v3752_v44  ;;  %v1442_v47 = vmul.f32 %v2286_v10, %v1410_v35  ;;  %v1691_v10 = vld [vmem:[#allocation3 + $0x88] sm:$0xff] (!%p1959_p8) }
 0x333   : > { %v1565_v39 = vadd.f32 %v1519_v38, %v1437_v2  ;;  %v1550_v17 = vadd.f32 %v1474_v57, %v1422_v49  ;;  %v2288_v21 = vpop.eup %2287  ;;  %v1395_v49 = vld [vmem:[#allocation3 + $0x70] sm:$0xff] }
 0x334   : > { %2293 = vpow2.f32 %v1379_v18  ;;  %v1427_v58 = vmul.f32 %v2288_v21, %v1395_v49  ;;  %v1681_v31 = vld [vmem:[#allocation3 + $0x38] sm:$0xff] (!%p1959_p8)  ;;  %v1644_v18 = vld [vmem:[#allocation2 + $0x10] sm:$0xff] (!%p1959_p8) }
 0x335   : > { %1598 = vst.msk [vmem:[#allocation3 + $0xc0] sm:$0xff] %vm1573_vm3, %v1565_v39  ;;  %1583 = vst.msk [vmem:[#allocation3 + $0x48] sm:$0xff] %vm1573_vm3, %v1550_v17  ;;  %v1411_v39 = vld [vmem:[#allocation3 + $0xf0] sm:$0xff]  ;;  %v1396_v17 = vld [vmem:[#allocation3 + $0x78] sm:$0xff]  ;;  %2295 = vlog2.f32 (!%p1959_p8), %v1674_v12 }
 0x336   : > { %v1477_v22 = vpop.xlane.xlu0 %1476  ;;  %v1522_v61 = vpop.xlane.xlu1 %1521  ;;  %2297 = vlog2.f32 (!%p1959_p8), %v1675_v59 }
 0x337   : > { %v1551_v25 = vadd.f32 %v1477_v22, %v1423_v0  ;;  %v1566_v20 = vadd.f32 %v1522_v61, %v1438_v6  ;;  %2299 = vlog2.f32 (!%p1959_p8), %v1676_v43 }
 0x338   : > { %v2290_v28 = vpop.eup %2289  ;;  %v1682_v62 = vld [vmem:[#allocation3 + $0x40] sm:$0xff] (!%p1959_p8) }
 0x339   : > { %1584 = vst.msk [vmem:[#allocation3 + $0x50] sm:$0xff] %vm1573_vm3, %v1551_v25  ;;  %1599 = vst.msk [vmem:[#allocation3 + $0xc8] sm:$0xff] %vm1573_vm3, %v1566_v20  ;;  %v1428_v45 = vmul.f32 %v2290_v28, %v1396_v17  ;;  %v1677_v25 = vld [vmem:[#allocation3 + $0x18] sm:$0xff] (!%p1959_p8)  ;;  %v1678_v20 = vld [vmem:[#allocation3 + $0x20] sm:$0xff] (!%p1959_p8) }
 0x33a   : > { %v1525_v51 = vpop.xlane.xlu0 %1524  ;;  %v1480_v3 = vpop.xlane.xlu1 %1479  ;;  %2301 = vlog2.f32 (!%p1959_p8), %v1677_v25  ;;  %v1693_v28 = vld [vmem:[#allocation3 + $0x98] sm:$0xff] (!%p1959_p8) }
 0x33b   : > { %v1567_v9 = vadd.f32 %v1525_v51, %v1439_v46  ;;  %v1552_v33 = vadd.f32 %v1480_v3, %v1424_v63  ;;  %v2292_v50 = vpop.eup %2291  ;;  %2303 = vlog2.f32 (!%p1959_p8), %v1678_v20  ;;  %v1642_v3 = vld [vmem:[#allocation2] sm:$0xff] (!%p1959_p8)  ;;  %v1653_v25 = vld [vmem:[#allocation2 + $0x58] sm:$0xff] (!%p1959_p8) }
 0x33c   : > { %v1443_v53 = vmul.f32 %v2292_v50, %v1411_v39  ;;  %2305 = vlog2.f32 (!%p1959_p8), %v1679_v55  ;;  %v1683_v42 = vld [vmem:[#allocation3 + $0x48] sm:$0xff] (!%p1959_p8)  ;;  %v1698_v20 = vld [vmem:[#allocation3 + $0xc0] sm:$0xff] (!%p1959_p8) }
 0x33d   : > { %1600 = vst.msk [vmem:[#allocation3 + $0xd0] sm:$0xff] %vm1573_vm3, %v1567_v9  ;;  %1585 = vst.msk [vmem:[#allocation3 + $0x58] sm:$0xff] %vm1573_vm3, %v1552_v33  ;;  %2307 = vlog2.f32 (!%p1959_p8), %v1680_v24  ;;  %v1643_v33 = vld [vmem:[#allocation2 + $0x8] sm:$0xff] (!%p1959_p8) }
 0x33e   : > { %v1483_v30 = vpop.xlane.xlu0 %1482  ;;  %v1528_v41 = vpop.xlane.xlu1 %1527  ;;  %2309 = vlog2.f32 (!%p1959_p8), %v1681_v31 }
 0x33f   : > { %v1553_v15 = vadd.f32 %v1483_v30, %v1425_v48  ;;  %v1568_v5 = vadd.f32 %v1528_v41, %v1440_v34  ;;  %v2294_v7 = vpop.eup %2293  ;;  %2311 = vlog2.f32 (!%p1959_p8), %v1682_v62  ;;  %v1645_v30 = vld [vmem:[#allocation2 + $0x18] sm:$0xff] (!%p1959_p8)  ;;  %v1690_v41 = vld [vmem:[#allocation3 + $0x80] sm:$0xff] (!%p1959_p8) }
 0x340   : > { %v1444_v1 = vmul.f32 %v2294_v7, %v1412_v52  ;;  %v1684_v46 = vld [vmem:[#allocation3 + $0x50] sm:$0xff] (!%p1959_p8)  ;;  %2313 = vlog2.f32 (!%p1959_p8), %v1683_v42  ;;  %v2296_v51 = vpop.eup (!%p1959_p8), %2295  ;;  %v1654_v62 = vld [vmem:[#allocation2 + $0x60] sm:$0xff] (!%p1959_p8)  ;;  %v1699_v42 = vld [vmem:[#allocation3 + $0xc8] sm:$0xff] (!%p1959_p8) }
 0x341   : > { %1586 = vst.msk [vmem:[#allocation3 + $0x60] sm:$0xff] %vm1573_vm3, %v1553_v15  ;;  %1601 = vst.msk [vmem:[#allocation3 + $0xd8] sm:$0xff] %vm1573_vm3, %v1568_v5  ;;  %2315 = vlog2.f32 (!%p1959_p8), %v1684_v46  ;;  %v2298_v36 = vpop.eup (!%p1959_p8), %2297  ;;  %v1707_v9 = vmul.f32 (!%p1959_p8), 0.6931472, %v2296_v51  ;;  %v1646_v5 = vld [vmem:[#allocation2 + $0x20] sm:$0xff] (!%p1959_p8)  ;;  %v1696_v52 = vld [vmem:[#allocation3 + $0xb0] sm:$0xff] (!%p1959_p8) }
 0x342   : > { %v1531_v40 = vpop.xlane.xlu0 %1530  ;;  %v1486_v2 = vpop.xlane.xlu1 %1485  ;;  %v1709_v44 = vmul.f32 (!%p1959_p8), 0.6931472, %v2298_v36  ;;  %v1655_v51 = vld [vmem:[#allocation2 + $0x68] sm:$0xff] (!%p1959_p8) }
 0x343   : > { %v1569_v38 = vadd.f32 %v1531_v40, %v1441_v27  ;;  %v1554_v57 = vadd.f32 %v1486_v2, %v1426_v19  ;;  %v2300_v37 = vpop.eup (!%p1959_p8), %2299  ;;  %v1770_v34 = vadd.f32 (!%p1959_p8), %v1707_v9, %v1642_v3  ;;  %v1647_v40 = vld [vmem:[#allocation2 + $0x28] sm:$0xff] (!%p1959_p8)  ;;  %v1692_v2 = vld [vmem:[#allocation3 + $0x90] sm:$0xff] (!%p1959_p8) }
 0x344   : > { %v1685_v63 = vld [vmem:[#allocation3 + $0x58] sm:$0xff] (!%p1959_p8)  ;;  %v2302_v48 = vpop.eup (!%p1959_p8), %2301  ;;  %v1711_v13 = vmul.f32 (!%p1959_p8), 0.6931472, %v2300_v37  ;;  %v1771_v8 = vadd.f32 (!%p1959_p8), %v1709_v44, %v1643_v33  ;;  %v1700_v3 = vld [vmem:[#allocation3 + $0xd0] sm:$0xff] (!%p1959_p8) }
 0x345   : > { %1602 = vst.msk [vmem:[#allocation3 + $0xe0] sm:$0xff] %vm1573_vm3, %v1569_v38  ;;  %1587 = vst.msk [vmem:[#allocation3 + $0x68] sm:$0xff] %vm1573_vm3, %v1554_v57  ;;  %2317 = vlog2.f32 (!%p1959_p8), %v1685_v63  ;;  %v2304_v14 = vpop.eup (!%p1959_p8), %2303  ;;  %v1713_v15 = vmul.f32 (!%p1959_p8), 0.6931472, %v2302_v48  ;;  %v1648_v57 = vld [vmem:[#allocation2 + $0x30] sm:$0xff] (!%p1959_p8) }
 0x346   : > { %v1489_v32 = vpop.xlane.xlu0 %1488  ;;  %v1534_v29 = vpop.xlane.xlu1 %1533  ;;  %1802 = vst.msk [vmem:[%s2463_s29] sm:$0xff] (!%p1959_p8), %vm1573_vm3, %v1770_v34  ;;  %v1772_v19 = vadd.f32 (!%p1959_p8), %v1711_v13, %v1644_v18  ;;  %v1715_v21 = vmul.f32 (!%p1959_p8), 0.6931472, %v2304_v14  ;;  %1803 = vst.msk [vmem:[%s2463_s29 + $0x8] sm:$0xff] (!%p1959_p8), %vm1573_vm3, %v1771_v8  ;;  %v1656_v33 = vld [vmem:[#allocation2 + $0x70] sm:$0xff] (!%p1959_p8) }
 0x347   : > { %v1555_v60 = vadd.f32 %v1489_v32, %v1427_v58  ;;  %v1570_v4 = vadd.f32 %v1534_v29, %v1442_v47  ;;  %v2306_v27 = vpop.eup (!%p1959_p8), %2305  ;;  %v1773_v35 = vadd.f32 (!%p1959_p8), %v1713_v15, %v1645_v30  ;;  %v1649_v32 = vld [vmem:[#allocation2 + $0x38] sm:$0xff] (!%p1959_p8)  ;;  %v1694_v29 = vld [vmem:[#allocation3 + $0xa0] sm:$0xff] (!%p1959_p8) }
 0x348   : > { %v1686_v11 = vld [vmem:[#allocation3 + $0x60] sm:$0xff] (!%p1959_p8)  ;;  %v2308_v49 = vpop.eup (!%p1959_p8), %2307  ;;  %v1717_v38 = vmul.f32 (!%p1959_p8), 0.6931472, %v2306_v27  ;;  %1804 = vst.msk [vmem:[%s2463_s29 + $0x10] sm:$0xff] (!%p1959_p8), %vm1573_vm3, %v1772_v19  ;;  %v1774_v47 = vadd.f32 (!%p1959_p8), %v1715_v21, %v1646_v5 }
 0x349   : > { %1588 = vst.msk [vmem:[#allocation3 + $0x70] sm:$0xff] %vm1573_vm3, %v1555_v60  ;;  %1603 = vst.msk [vmem:[#allocation3 + $0xe8] sm:$0xff] %vm1573_vm3, %v1570_v4  ;;  %2319 = vlog2.f32 (!%p1959_p8), %v1686_v11  ;;  %v2310_v58 = vpop.eup (!%p1959_p8), %2309  ;;  %v1719_v50 = vmul.f32 (!%p1959_p8), 0.6931472, %v2308_v49  ;;  %v1650_v4 = vld [vmem:[#allocation2 + $0x40] sm:$0xff] (!%p1959_p8) }
 0x34a   : > { %v1537_v0 = vpop.xlane.xlu0 %1536  ;;  %v2312_v39 = vpop.eup (!%p1959_p8), %2311  ;;  %1805 = vst.msk [vmem:[%s2463_s29 + $0x18] sm:$0xff] (!%p1959_p8), %vm1573_vm3, %v1773_v35  ;;  %v1775_v17 = vadd.f32 (!%p1959_p8), %v1717_v38, %v1647_v40  ;;  %v1721_v60 = vmul.f32 (!%p1959_p8), 0.6931472, %v2310_v58  ;;  %1806 = vst.msk [vmem:[%s2463_s29 + $0x20] sm:$0xff] (!%p1959_p8), %vm1573_vm3, %v1774_v47 }
 0x34b   : > { %v1492_v6 = vpop.xlane.xlu1 %1491  ;;  %v1571_v22 = vadd.f32 %v1537_v0, %v1443_v53  ;;  %v1695_v53 = vld [vmem:[#allocation3 + $0xa8] sm:$0xff] (!%p1959_p8)  ;;  %v1776_v7 = vadd.f32 (!%p1959_p8), %v1719_v50, %v1648_v57  ;;  %v1723_v0 = vmul.f32 (!%p1959_p8), 0.6931472, %v2312_v39 }
 0x34c   : > { %v1556_v61 = vadd.f32 %v1492_v6, %v1428_v45  ;;  %1641 = sbr.rel (%p1959_p8) target bundleno = 886 (0x376), region = 36  ;;  %v1687_v23 = vld [vmem:[#allocation3 + $0x68] sm:$0xff] (!%p1959_p8)  ;;  %v2314_v45 = vpop.eup (!%p1959_p8), %2313  ;;  %1807 = vst.msk [vmem:[%s2463_s29 + $0x28] sm:$0xff] (!%p1959_p8), %vm1573_vm3, %v1775_v17  ;;  %v1702_v48 = vld [vmem:[#allocation3 + $0xe0] sm:$0xff] (!%p1959_p8) }
 0x34d   : > { %1604 = vst.msk [vmem:[#allocation3 + $0xf0] sm:$0xff] %vm1573_vm3, %v1571_v22  ;;  %2321 = vlog2.f32 (!%p1959_p8), %v1687_v23  ;;  %v1651_v6 = vld [vmem:[#allocation2 + $0x48] sm:$0xff] (!%p1959_p8)  ;;  %v2316_v22 = vpop.eup (!%p1959_p8), %2315  ;;  %1808 = vst.msk [vmem:[%s2463_s29 + $0x30] sm:$0xff] (!%p1959_p8), %vm1573_vm3, %v1776_v7  ;;  %v1778_v59 = vadd.f32 (!%p1959_p8), %v1723_v0, %v1650_v4  ;;  %v1664_v7 = vld [vmem:[#allocation2 + $0xb0] sm:$0xff] (!%p1959_p8) }
 0x34e   : > { %1589 = vst.msk [vmem:[#allocation3 + $0x78] sm:$0xff] %vm1573_vm3, %v1556_v61  ;;  %v1777_v61 = vadd.f32 (!%p1959_p8), %v1721_v60, %v1649_v32  ;;  %v1727_v43 = vmul.f32 (!%p1959_p8), 0.6931472, %v2316_v22  ;;  %v1662_v32 = vld [vmem:[#allocation2 + $0xa0] sm:$0xff] (!%p1959_p8)  ;;  %v1663_v60 = vld [vmem:[#allocation2 + $0xa8] sm:$0xff] (!%p1959_p8)  ;;  %v1665_v22 = vld [vmem:[#allocation2 + $0xb8] sm:$0xff] (!%p1959_p8) }
 0x34f   : > { %v1540_v16 = vpop.xlane.xlu1 %1539  ;;  %v2318_v12 = vpop.eup (!%p1959_p8), %2317  ;;  %1810 = vst.msk [vmem:[%s2463_s29 + $0x40] sm:$0xff] (!%p1959_p8), %vm1573_vm3, %v1778_v59 }
 0x350   : > { %v1572_v56 = vadd.f32 %v1540_v16, %v1444_v1  ;;  %v1688_v54 = vld [vmem:[#allocation3 + $0x70] sm:$0xff] (!%p1959_p8)  ;;  %v1725_v1 = vmul.f32 (!%p1959_p8), 0.6931472, %v2314_v45  ;;  %1809 = vst.msk [vmem:[%s2463_s29 + $0x38] sm:$0xff] (!%p1959_p8), %vm1573_vm3, %v1777_v61  ;;  %v1729_v31 = vmul.f32 (!%p1959_p8), 0.6931472, %v2318_v12 }
 0x351   : > { %2323 = vlog2.f32 (!%p1959_p8), %v1688_v54  ;;  %v1652_v16 = vld [vmem:[#allocation2 + $0x50] sm:$0xff] (!%p1959_p8)  ;;  %v1701_v54 = vld [vmem:[#allocation3 + $0xd8] sm:$0xff] (!%p1959_p8)  ;;  %v1703_v14 = vld [vmem:[#allocation3 + $0xe8] sm:$0xff] (!%p1959_p8) }
 0x352   : > { %1605 = vst.msk [vmem:[#allocation3 + $0xf8] sm:$0xff] %vm1573_vm3, %v1572_v56  ;;  %v1697_v56 = vld [vmem:[#allocation3 + $0xb8] sm:$0xff] (!%p1959_p8)  ;;  %v1779_v24 = vadd.f32 (!%p1959_p8), %v1725_v1, %v1651_v6  ;;  %v1780_v63 = vadd.f32 (!%p1959_p8), %v1727_v43, %v1652_v16  ;;  %v1781_v36 = vadd.f32 (!%p1959_p8), %v1729_v31, %v1653_v25  ;;  %v1667_v25 = vld [vmem:[#allocation2 + $0xc8] sm:$0xff] (!%p1959_p8)  ;;  %v1668_v31 = vld [vmem:[#allocation2 + $0xd0] sm:$0xff] (!%p1959_p8) }
 0x353   : > { %v2320_v55 = vpop.eup %2319 }
 0x354   : > { %v1731_v11 = vmul.f32 0.6931472, %v2320_v55  ;;  %1811 = vst.msk [vmem:[%s2463_s29 + $0x48] sm:$0xff] %vm1573_vm3, %v1779_v24  ;;  %1812 = vst.msk [vmem:[%s2463_s29 + $0x50] sm:$0xff] %vm1573_vm3, %v1780_v63  ;;  %v1704_v27 = vld [vmem:[#allocation3 + $0xf0] sm:$0xff]  ;;  %v1669_v63 = vld [vmem:[#allocation2 + $0xd8] sm:$0xff] }
 0x355   : > { %v1689_v26 = vld [vmem:[#allocation3 + $0x78] sm:$0xff]  ;;  %1813 = vst.msk [vmem:[%s2463_s29 + $0x58] sm:$0xff] %vm1573_vm3, %v1781_v36 }
 0x356   : > { %2325 = vlog2.f32 %v1689_v26  ;;  %v1782_v44 = vadd.f32 %v1731_v11, %v1654_v62  ;;  %v1657_v26 = vld [vmem:[#allocation2 + $0x78] sm:$0xff] }
 0x357   : > { %2327 = vlog2.f32 %v1690_v41  ;;  %v2322_v46 = vpop.eup %2321  ;;  %v1658_v41 = vld [vmem:[#allocation2 + $0x80] sm:$0xff] }
 0x358   : > { %2329 = vlog2.f32 %v1691_v10  ;;  %v1733_v9 = vmul.f32 0.6931472, %v2322_v46  ;;  %1814 = vst.msk [vmem:[%s2463_s29 + $0x60] sm:$0xff] %vm1573_vm3, %v1782_v44  ;;  %v1659_v10 = vld [vmem:[#allocation2 + $0x88] sm:$0xff] }
 0x359   : > { %2331 = vlog2.f32 %v1692_v2  ;;  %v1660_v2 = vld [vmem:[#allocation2 + $0x90] sm:$0xff]  ;;  %v1705_v49 = vld [vmem:[#allocation3 + $0xf8] sm:$0xff] }
 0x35a   : > { %2333 = vlog2.f32 %v1693_v28  ;;  %v1783_v13 = vadd.f32 %v1733_v9, %v1655_v51  ;;  %v1661_v28 = vld [vmem:[#allocation2 + $0x98] sm:$0xff] }
 0x35b   : > { %2335 = vlog2.f32 %v1694_v29  ;;  %v2324_v23 = vpop.eup %2323 }
 0x35c   : > { %2337 = vlog2.f32 %v1695_v53  ;;  %v1735_v18 = vmul.f32 0.6931472, %v2324_v23  ;;  %1815 = vst.msk [vmem:[%s2463_s29 + $0x68] sm:$0xff] %vm1573_vm3, %v1783_v13  ;;  %v1670_v23 = vld [vmem:[#allocation2 + $0xe0] sm:$0xff] }
 0x35d   : > { %2339 = vlog2.f32 %v1696_v52 }
 0x35e   : > { %2341 = vlog2.f32 %v1697_v56  ;;  %v1784_v15 = vadd.f32 %v1735_v18, %v1656_v33  ;;  %v1666_v56 = vld [vmem:[#allocation2 + $0xc0] sm:$0xff] }
 0x35f   : > { %2343 = vlog2.f32 %v1698_v20 }
 0x360   : > { %v2326_v37 = vpop.eup %2325  ;;  %2345 = vlog2.f32 %v1699_v42  ;;  %1816 = vst.msk [vmem:[%s2463_s29 + $0x70] sm:$0xff] %vm1573_vm3, %v1784_v15 }
 0x361   : > { %v2328_v34 = vpop.eup %2327  ;;  %v1737_v30 = vmul.f32 0.6931472, %v2326_v37  ;;  %2347 = vlog2.f32 %v1700_v3 }
 0x362   : > { %v2330_v8 = vpop.eup %2329  ;;  %v1739_v5 = vmul.f32 0.6931472, %v2328_v34  ;;  %2349 = vlog2.f32 %v1701_v54  ;;  %v1671_v54 = vld [vmem:[#allocation2 + $0xe8] sm:$0xff] }
 0x363   : > { %v2332_v19 = vpop.eup %2331  ;;  %v1785_v21 = vadd.f32 %v1737_v30, %v1657_v26  ;;  %v1741_v40 = vmul.f32 0.6931472, %v2330_v8  ;;  %2351 = vlog2.f32 %v1702_v48  ;;  %v1672_v26 = vld [vmem:[#allocation2 + $0xf0] sm:$0xff]  ;;  %v1673_v30 = vld [vmem:[#allocation2 + $0xf8] sm:$0xff] }
 0x364   : > { %v2334_v35 = vpop.eup %2333  ;;  %v1786_v38 = vadd.f32 %v1739_v5, %v1658_v41  ;;  %v1743_v57 = vmul.f32 0.6931472, %v2332_v19  ;;  %2353 = vlog2.f32 %v1703_v14 }
 0x365   : > { %v2336_v58 = vpop.eup %2335  ;;  %1817 = vst.msk [vmem:[%s2463_s29 + $0x78] sm:$0xff] %vm1573_vm3, %v1785_v21  ;;  %v1787_v47 = vadd.f32 %v1741_v40, %v1659_v10  ;;  %v1745_v50 = vmul.f32 0.6931472, %v2334_v35  ;;  %2355 = vlog2.f32 %v1704_v27 }
 0x366   : > { %v2338_v29 = vpop.eup %2337  ;;  %1818 = vst.msk [vmem:[%s2463_s29 + $0x80] sm:$0xff] %vm1573_vm3, %v1786_v38  ;;  %v1788_v39 = vadd.f32 %v1743_v57, %v1660_v2  ;;  %v1747_v17 = vmul.f32 0.6931472, %v2336_v58  ;;  %2357 = vlog2.f32 %v1705_v49 }
 0x367   : > { %v2340_v4 = vpop.eup %2339  ;;  %1819 = vst.msk [vmem:[%s2463_s29 + $0x88] sm:$0xff] %vm1573_vm3, %v1787_v47  ;;  %v1789_v53 = vadd.f32 %v1745_v50, %v1661_v28  ;;  %v1749_v45 = vmul.f32 0.6931472, %v2338_v29 }
 0x368   : > { %v2342_v0 = vpop.eup %2341  ;;  %1820 = vst.msk [vmem:[%s2463_s29 + $0x90] sm:$0xff] %vm1573_vm3, %v1788_v39  ;;  %v1790_v6 = vadd.f32 %v1747_v17, %v1662_v32  ;;  %v1751_v52 = vmul.f32 0.6931472, %v2340_v4 }
 0x369   : > { %v2344_v61 = vpop.eup %2343  ;;  %1821 = vst.msk [vmem:[%s2463_s29 + $0x98] sm:$0xff] %vm1573_vm3, %v1789_v53  ;;  %v1791_v1 = vadd.f32 %v1749_v45, %v1663_v60  ;;  %v1753_v16 = vmul.f32 0.6931472, %v2342_v0 }
 0x36a   : > { %v2346_v12 = vpop.eup %2345  ;;  %1822 = vst.msk [vmem:[%s2463_s29 + $0xa0] sm:$0xff] %vm1573_vm3, %v1790_v6  ;;  %v1792_v59 = vadd.f32 %v1751_v52, %v1664_v7  ;;  %v1755_v43 = vmul.f32 0.6931472, %v2344_v61 }
 0x36b   : > { %v2348_v20 = vpop.eup %2347  ;;  %1823 = vst.msk [vmem:[%s2463_s29 + $0xa8] sm:$0xff] %vm1573_vm3, %v1791_v1  ;;  %v1793_v55 = vadd.f32 %v1753_v16, %v1665_v22  ;;  %v1757_v24 = vmul.f32 0.6931472, %v2346_v12 }
 0x36c   : > { %v2350_v62 = vpop.eup %2349  ;;  %1824 = vst.msk [vmem:[%s2463_s29 + $0xb0] sm:$0xff] %vm1573_vm3, %v1792_v59  ;;  %v1794_v42 = vadd.f32 %v1755_v43, %v1666_v56  ;;  %v1759_v46 = vmul.f32 0.6931472, %v2348_v20 }
 0x36d   : > { %v2352_v11 = vpop.eup %2351  ;;  %1825 = vst.msk [vmem:[%s2463_s29 + $0xb8] sm:$0xff] %vm1573_vm3, %v1793_v55  ;;  %v1795_v51 = vadd.f32 %v1757_v24, %v1667_v25  ;;  %v1761_v3 = vmul.f32 0.6931472, %v2350_v62 }
 0x36e   : > { %v2354_v36 = vpop.eup %2353  ;;  %1826 = vst.msk [vmem:[%s2463_s29 + $0xc0] sm:$0xff] %vm1573_vm3, %v1794_v42  ;;  %v1796_v9 = vadd.f32 %v1759_v46, %v1668_v31  ;;  %v1763_v33 = vmul.f32 0.6931472, %v2352_v11 }
 0x36f   : > { %v2356_v37 = vpop.eup %2355  ;;  %1827 = vst.msk [vmem:[%s2463_s29 + $0xc8] sm:$0xff] %vm1573_vm3, %v1795_v51  ;;  %v1797_v44 = vadd.f32 %v1761_v3, %v1669_v63  ;;  %v1765_v18 = vmul.f32 0.6931472, %v2354_v36 }
 0x370   : > { %v2358_v48 = vpop.eup %2357  ;;  %1828 = vst.msk [vmem:[%s2463_s29 + $0xd0] sm:$0xff] %vm1573_vm3, %v1796_v9  ;;  %v1798_v34 = vadd.f32 %v1763_v33, %v1670_v23  ;;  %v1767_v13 = vmul.f32 0.6931472, %v2356_v37 }
 0x371   : > { %1829 = vst.msk [vmem:[%s2463_s29 + $0xd8] sm:$0xff] %vm1573_vm3, %v1797_v44  ;;  %v1799_v41 = vadd.f32 %v1765_v18, %v1671_v54  ;;  %v1769_v14 = vmul.f32 0.6931472, %v2358_v48 }
 0x372   : > { %1830 = vst.msk [vmem:[%s2463_s29 + $0xe0] sm:$0xff] %vm1573_vm3, %v1798_v34  ;;  %v1800_v8 = vadd.f32 %v1767_v13, %v1672_v26 }
 0x373   : > { %1831 = vst.msk [vmem:[%s2463_s29 + $0xe8] sm:$0xff] %vm1573_vm3, %v1799_v41  ;;  %v1801_v15 = vadd.f32 %v1769_v14, %v1673_v30 }
 0x374   : > { %1832 = vst.msk [vmem:[%s2463_s29 + $0xf0] sm:$0xff] %vm1573_vm3, %v1800_v8 }
 0x375   : > { %1833 = vst.msk [vmem:[%s2463_s29 + $0xf8] sm:$0xff] %vm1573_vm3, %v1801_v15 }
 0x376 PF: > { %s12_s13 = sadd.s32 1, %s2397_s13   ;;  %s3753_s9 = smov %s2389_s11 }
 0x377   : > { %p9_p9 = scmp.ge.s32.totalorder %s12_s13, 6   ;;  %s3754_s10 = smov %s2393_s12 }
 0x378   : > { %s3755_s11 = smov %s3758_s14  ;;  %s3756_s12 = smov %s3762_s15 }
 0x379   :  { %11 = sbr.rel (!%p9_p9) target bundleno = 3 (0x3), region = 69 }

// kernel: sa_module_pct_forward.7
= control target key start
LH: loop header
LB: loop body
LE: loop exit
PB: predicated region body
PF: predicated region fallthrough
CT: control target
= control target key end

     0   :  { %v3602_v1 = vmov 0   ;;  %s4340_s3 = inlined_call_operand.vmem [shape: bf16[128,384], index: 3, kind: input, shape index: {}]   ;;  %s4341_s0 = inlined_call_operand.vmem [shape: bf16[512,128], index: 0, kind: input, shape index: {}]   ;;  %s4342_s1 = inlined_call_operand.vmem [shape: f32[1,128], index: 1, kind: input, shape index: {}]   ;;  %s4343_s2 = inlined_call_operand.vmem [shape: f32[1,128], index: 2, kind: input, shape index: {}]   ;;  %s4344_s4 = inlined_call_operand.vmem [shape: bf16[512,128], index: 4, kind: output, shape index: {0}]   ;;  %s4345_s5 = inlined_call_operand.vmem [shape: bf16[512,128], index: 5, kind: output, shape index: {1}]   ;;  %s4346_s6 = inlined_call_operand.vmem [shape: bf16[512,128], index: 6, kind: output, shape index: {2}]  }
   0x1   :  { %v3568_v0 = vld [vmem:[%s4340_s3 + $0x4] ss:$12 sps:$4 sm:$0xff]   ;;  %707 = vmatprep.mubr.bf16.mxu0 %v3602_v1  ;;  %947 = vmatprep.mubr.bf16.mxu1 %v3602_v1  ;;  %v3570_v2 = vld [vmem:[%s4340_s3] ss:$12 sps:$4 sm:$0xff]   ;;  %v3571_v3 = vld [vmem:[%s4340_s3 + $0x1c] ss:$12 sps:$4 sm:$0xff]  }
   0x2   :  { %675 = vmatprep.subr.bf16.mxu0 %v3568_v0  ;;  %3551 = vmatprep.subr.bf16.mxu1 %v3568_v0  ;;  %v3573_v4 = vld [vmem:[%s4340_s3 + $0x18] ss:$12 sps:$4 sm:$0xff]   ;;  %v3574_v5 = vld [vmem:[%s4340_s3 + $0x34] ss:$12 sps:$4 sm:$0xff]   ;;  %v3576_v6 = vld [vmem:[%s4340_s3 + $0x30] ss:$12 sps:$4 sm:$0xff]  }
   0x3   :  { %676 = vmatpush1.bf16.msra.mxu0 %v3570_v2  ;;  %3559 = vmatpush1.bf16.msra.mxu1 %v3570_v2  ;;  %v3577_v7 = vld [vmem:[%s4340_s3 + $0x4c] ss:$12 sps:$4 sm:$0xff]   ;;  %v3579_v8 = vld [vmem:[%s4340_s3 + $0x48] ss:$12 sps:$4 sm:$0xff]   ;;  %v2700_v9 = vld [vmem:[%s4341_s0] sm:$0xff]  }
   0x4   :  { %677 = vmatprep.subr.bf16.mxu0 %v3571_v3  ;;  %3552 = vmatprep.subr.bf16.mxu1 %v3571_v3  ;;  %v3580_v10 = vld [vmem:[%s4340_s3 + $0x64] ss:$12 sps:$4 sm:$0xff]   ;;  %v2701_v11 = vunpack.c.l.bf16 %v2700_v9  ;;  %v2702_v12 = vunpack.c.h.bf16 %v2700_v9  ;;  %v3673_v13 = vld [vmem:[%s4342_s1] ss:$0 sm:$0xff]  ;;  %v3307_v20 = vld [vmem:[%s4341_s0 + $0x8] sm:$0xff]  }
   0x5   :  { %v3330_v14 = vld [vmem:[%s4341_s0 + $0xc0] sm:$0xff]   ;;  %v3331_v23 = vld [vmem:[%s4341_s0 + $0xc8] sm:$0xff]   ;;  %v2705_v26 = vunpack.c.l.bf16 %v3307_v20  ;;  %v2706_v29 = vunpack.c.h.bf16 %v3307_v20  ;;  %v3308_v38 = vld [vmem:[%s4341_s0 + $0x10] sm:$0xff]  }
   0x6   :  { %v3681_v15 = vld [vmem:[%s4343_s2] ss:$0 sm:$0xff]  ;;  %v2797_v16 = vunpack.c.l.bf16 %v3330_v14  ;;  %v2798_v17 = vunpack.c.h.bf16 %v3330_v14  ;;  %v156_v18 = vmul.f32 %v2701_v11, %v3673_v13  ;;  %v157_v19 = vmul.f32 %v2702_v12, %v3673_v13  ;;  %v3583_v27 = vld [vmem:[%s4340_s3 + $0x7c] ss:$12 sps:$4 sm:$0xff]   ;;  %v3585_v33 = vld [vmem:[%s4340_s3 + $0x78] ss:$12 sps:$4 sm:$0xff]  }
   0x7   :  { %678 = vmatpush1.bf16.msra.mxu0 %v3573_v4  ;;  %3560 = vmatpush1.bf16.msra.mxu1 %v3573_v4  ;;  %v3582_v24 = vld [vmem:[%s4340_s3 + $0x60] ss:$12 sps:$4 sm:$0xff]   ;;  %v2801_v32 = vunpack.c.l.bf16 %v3331_v23  ;;  %v158_v36 = vmul.f32 %v2705_v26, %v3673_v13  ;;  %v2802_v37 = vunpack.c.h.bf16 %v3331_v23  ;;  %v159_v40 = vmul.f32 %v2706_v29, %v3673_v13  ;;  %v3588_v44 = vld [vmem:[%s4340_s3 + $0x90] ss:$12 sps:$4 sm:$0xff]   ;;  %v3591_v58 = vld [vmem:[%s4340_s3 + $0xa8] ss:$12 sps:$4 sm:$0xff]  }
   0x8   :  { %679 = vmatprep.subr.bf16.mxu0 %v3574_v5  ;;  %3553 = vmatprep.subr.bf16.mxu1 %v3574_v5  ;;  %v204_v21 = vmul.f32 %v2797_v16, %v3673_v13  ;;  %v205_v22 = vmul.f32 %v2798_v17, %v3673_v13  ;;  %v227_v25 = vadd.f32 %v3681_v15, %v156_v18  ;;  %v3586_v34 = vld [vmem:[%s4340_s3 + $0x94] ss:$12 sps:$4 sm:$0xff]   ;;  %v3589_v48 = vld [vmem:[%s4340_s3 + $0xac] ss:$12 sps:$4 sm:$0xff]   ;;  %v2709_v52 = vunpack.c.l.bf16 %v3308_v38 }
   0x9   :  { %v228_v28 = vadd.f32 %v3681_v15, %v157_v19  ;;  %v206_v43 = vmul.f32 %v2801_v32, %v3673_v13  ;;  %v207_v46 = vmul.f32 %v2802_v37, %v3673_v13  ;;  %v3332_v47 = vld [vmem:[%s4341_s0 + $0xd0] sm:$0xff]   ;;  %v229_v50 = vadd.f32 %v3681_v15, %v158_v36  ;;  %v3309_v63 = vld [vmem:[%s4341_s0 + $0x18] sm:$0xff]   ;;  %v3593_v12 = vld [vmem:[%s4340_s3 + $0x20] ss:$12 sps:$4 sm:$0xff]  }
   0xa   :  { %v275_v30 = vadd.f32 %v3681_v15, %v204_v21  ;;  %v276_v31 = vadd.f32 %v3681_v15, %v205_v22  ;;  %v355_v35 = vmul.f32 0.1, %v227_v25  ;;  %vm291_vm0 = vcmp.gt.f32.partialorder %v227_v25, 0.0  ;;  %v3592_v60 = vld [vmem:[%s4340_s3 + $0x8] ss:$12 sps:$4 sm:$0xff]   ;;  %v3333_v16 = vld [vmem:[%s4341_s0 + $0xd8] sm:$0xff]  }
   0xb   :  { %680 = vmatpush1.bf16.msra.mxu0 %v3576_v6  ;;  %3561 = vmatpush1.bf16.msra.mxu1 %v3576_v6  ;;  %vm292_vm1 = vcmp.gt.f32.partialorder %v228_v28, 0.0  ;;  %v356_v39 = vmul.f32 0.1, %v228_v28  ;;  %v230_v51 = vadd.f32 %v3681_v15, %v159_v40  ;;  %v277_v55 = vadd.f32 %v3681_v15, %v206_v43  ;;  %v3594_v29 = vld [vmem:[%s4340_s3 + $0x38] ss:$12 sps:$4 sm:$0xff]  }
   0xc   :  { %681 = vmatprep.subr.bf16.mxu0 %v3577_v7  ;;  %3554 = vmatprep.subr.bf16.mxu1 %v3577_v7  ;;  %v403_v41 = vmul.f32 0.1, %v275_v30  ;;  %v404_v42 = vmul.f32 0.1, %v276_v31  ;;  %vm339_vm2 = vcmp.gt.f32.partialorder %v275_v30, 0.0  ;;  %vm340_vm3 = vcmp.gt.f32.partialorder %v276_v31, 0.0 }
   0xd   :  { %v419_v45 = vsel %vm291_vm0, %v227_v25, %v355_v35  ;;  %v420_v49 = vsel %vm292_vm1, %v228_v28, %v356_v39  ;;  %v2710_v56 = vunpack.c.h.bf16 %v3308_v38  ;;  %v2805_v57 = vunpack.c.l.bf16 %v3332_v47  ;;  %v3334_v37 = vld [vmem:[%s4341_s0 + $0xe0] sm:$0xff]  }
   0xe   :  { %v467_v53 = vsel %vm339_vm2, %v275_v30, %v403_v41  ;;  %v468_v54 = vsel %vm340_vm3, %v276_v31, %v404_v42  ;;  %v3732_v59 = vpack.c.bf16 %v420_v49, %v419_v45  ;;  %v278_v61 = vadd.f32 %v3681_v15, %v207_v46  ;;  %v3310_v30 = vld [vmem:[%s4341_s0 + $0x20] sm:$0xff]   ;;  %v3595_v45 = vld [vmem:[%s4340_s3 + $0x50] ss:$12 sps:$4 sm:$0xff]  }
   0xf   :  { %682 = vmatpush1.bf16.msra.mxu0 %v3579_v8  ;;  %3562 = vmatpush1.bf16.msra.mxu1 %v3579_v8  ;;  %v2806_v62 = vunpack.c.h.bf16 %v3332_v47  ;;  %v3741_v0 = vpack.c.bf16 %v468_v54, %v467_v53  ;;  %vm293_vm4 = vcmp.gt.f32.partialorder %v229_v50, 0.0  ;;  %vm294_vm5 = vcmp.gt.f32.partialorder %v230_v51, 0.0 }
  0x10   :  { %683 = vmatprep.subr.bf16.mxu0 %v3580_v10  ;;  %3555 = vmatprep.subr.bf16.mxu1 %v3580_v10  ;;  %v160_v2 = vmul.f32 %v2709_v52, %v3673_v13  ;;  %v357_v3 = vmul.f32 0.1, %v229_v50  ;;  %v358_v4 = vmul.f32 0.1, %v230_v51  ;;  %v405_v5 = vmul.f32 0.1, %v277_v55 }
  0x11   :  { %v161_v6 = vmul.f32 %v2710_v56, %v3673_v13  ;;  %vm341_vm6 = vcmp.gt.f32.partialorder %v277_v55, 0.0  ;;  %v208_v7 = vmul.f32 %v2805_v57, %v3673_v13  ;;  %v2713_v8 = vunpack.c.l.bf16 %v3309_v63  ;;  %v3311_v56 = vld [vmem:[%s4341_s0 + $0x28] sm:$0xff]  }
  0x12   :  { %v2714_v9 = vunpack.c.h.bf16 %v3309_v63  ;;  %v406_v10 = vmul.f32 0.1, %v278_v61  ;;  %v209_v11 = vmul.f32 %v2806_v62, %v3673_v13  ;;  %vm342_vm7 = vcmp.gt.f32.partialorder %v278_v61, 0.0 }
  0x13   :  { %684 = vmatpush1.bf16.msra.mxu0 %v3582_v24  ;;  %3563 = vmatpush1.bf16.msra.mxu1 %v3582_v24  ;;  %v231_v14 = vadd.f32 %v3681_v15, %v160_v2  ;;  %v421_v17 = vsel %vm293_vm4, %v229_v50, %v357_v3  ;;  %v422_v18 = vsel %vm294_vm5, %v230_v51, %v358_v4  ;;  %v2809_v26 = vunpack.c.l.bf16 %v3333_v16  ;;  %v3335_v3 = vld [vmem:[%s4341_s0 + $0xe8] sm:$0xff]  }
  0x14   :  { %685 = vmatprep.subr.bf16.mxu0 %v3583_v27  ;;  %3556 = vmatprep.subr.bf16.mxu1 %v3583_v27  ;;  %v469_v19 = vsel %vm341_vm6, %v277_v55, %v405_v5  ;;  %v232_v20 = vadd.f32 %v3681_v15, %v161_v6  ;;  %v279_v21 = vadd.f32 %v3681_v15, %v208_v7  ;;  %v2810_v27 = vunpack.c.h.bf16 %v3333_v16 }
  0x15   :  { %v162_v22 = vmul.f32 %v2713_v8, %v3673_v13  ;;  %v163_v23 = vmul.f32 %v2714_v9, %v3673_v13  ;;  %v470_v24 = vsel %vm342_vm7, %v278_v61, %v406_v10  ;;  %v280_v25 = vadd.f32 %v3681_v15, %v209_v11 }
  0x16   :  { %v3765_v28 = vpack.c.bf16 %v422_v18, %v421_v17  ;;  %vm295_vm8 = vcmp.gt.f32.partialorder %v231_v14, 0.0  ;;  %vm296_vm9 = vcmp.gt.f32.partialorder %v232_v20, 0.0  ;;  %v359_v31 = vmul.f32 0.1, %v231_v14 }
  0x17   :  { %686 = vmatpush1.bf16.msra.mxu0 %v3585_v33  ;;  %3564 = vmatpush1.bf16.msra.mxu1 %v3585_v33  ;;  %v360_v32 = vmul.f32 0.1, %v232_v20  ;;  %v3773_v33 = vpack.c.bf16 %v470_v24, %v469_v19  ;;  %v233_v35 = vadd.f32 %v3681_v15, %v162_v22  ;;  %v234_v36 = vadd.f32 %v3681_v15, %v163_v23 }
  0x18   :  { %687 = vmatprep.subr.bf16.mxu0 %v3586_v34  ;;  %3557 = vmatprep.subr.bf16.mxu1 %v3586_v34  ;;  %v407_v34 = vmul.f32 0.1, %v279_v21  ;;  %vm343_vm10 = vcmp.gt.f32.partialorder %v279_v21, 0.0  ;;  %v408_v38 = vmul.f32 0.1, %v280_v25  ;;  %v210_v39 = vmul.f32 %v2809_v26, %v3673_v13 }
  0x19   :  { %v211_v40 = vmul.f32 %v2810_v27, %v3673_v13  ;;  %vm344_vm11 = vcmp.gt.f32.partialorder %v280_v25, 0.0  ;;  %v2717_v41 = vunpack.c.l.bf16 %v3310_v30  ;;  %v2718_v42 = vunpack.c.h.bf16 %v3310_v30 }
  0x1a   :  { %v423_v43 = vsel %vm295_vm8, %v231_v14, %v359_v31  ;;  %v2813_v46 = vunpack.c.l.bf16 %v3334_v37  ;;  %v2814_v47 = vunpack.c.h.bf16 %v3334_v37  ;;  %vm297_vm12 = vcmp.gt.f32.partialorder %v233_v35, 0.0  ;;  %v3597_v14 = vld [vmem:[%s4340_s3 + $0x80] ss:$12 sps:$4 sm:$0xff]   ;;  %v3312_v31 = vld [vmem:[%s4341_s0 + $0x30] sm:$0xff]  }
  0x1b   :  { %688 = vmatpush1.bf16.msra.mxu0 %v3588_v44  ;;  %3565 = vmatpush1.bf16.msra.mxu1 %v3588_v44  ;;  %v424_v44 = vsel %vm296_vm9, %v232_v20, %v360_v32  ;;  %v361_v49 = vmul.f32 0.1, %v233_v35  ;;  %v362_v50 = vmul.f32 0.1, %v234_v36  ;;  %v472_v51 = vsel %vm344_vm11, %v280_v25, %v408_v38  ;;  %v3336_v32 = vld [vmem:[%s4341_s0 + $0xf0] sm:$0xff]  }
  0x1c   :  { %689 = vmatprep.subr.bf16.mxu0 %v3589_v48  ;;  %3558 = vmatprep.subr.bf16.mxu1 %v3589_v48  ;;  %v471_v48 = vsel %vm343_vm10, %v279_v21, %v407_v34  ;;  %vm298_vm13 = vcmp.gt.f32.partialorder %v234_v36, 0.0  ;;  %v281_v52 = vadd.f32 %v3681_v15, %v210_v39  ;;  %v282_v53 = vadd.f32 %v3681_v15, %v211_v40  ;;  %v3598_v21 = vld [vmem:[%s4340_s3 + $0x98] ss:$12 sps:$4 sm:$0xff]  }
  0x1d   :  { %v164_v54 = vmul.f32 %v2717_v41, %v3673_v13  ;;  %v165_v55 = vmul.f32 %v2718_v42, %v3673_v13  ;;  %v212_v57 = vmul.f32 %v2813_v46, %v3673_v13  ;;  %v3804_v61 = vpack.c.bf16 %v424_v44, %v423_v43  ;;  %v3599_v42 = vld [vmem:[%s4340_s3 + $0xb0] ss:$12 sps:$4 sm:$0xff]  }
  0x1e   :  { %v3806_v62 = vpack.c.bf16 %v472_v51, %v471_v48  ;;  %v425_v63 = vsel %vm297_vm12, %v233_v35, %v361_v49  ;;  %v426_v2 = vsel %vm298_vm13, %v234_v36, %v362_v50  ;;  %vm345_vm14 = vcmp.gt.f32.partialorder %v281_v52, 0.0 }
  0x1f   :  { %690 = vmatpush1.bf16.msra.mxu0 %v3591_v58  ;;  %3566 = vmatpush1.bf16.msra.mxu1 %v3591_v58  ;;  %v213_v58 = vmul.f32 %v2814_v47, %v3673_v13  ;;  %v409_v4 = vmul.f32 0.1, %v281_v52  ;;  %v410_v5 = vmul.f32 0.1, %v282_v53  ;;  %v2721_v6 = vunpack.c.l.bf16 %v3311_v56 }
  0x20   :  { %3471 = vmatprep.subr.bf16.mxu1 %v3592_v60  ;;  %vm346_vm15 = vcmp.gt.f32.partialorder %v282_v53, 0.0  ;;  %v235_v7 = vadd.f32 %v3681_v15, %v164_v54  ;;  %v236_v8 = vadd.f32 %v3681_v15, %v165_v55  ;;  %v2722_v9 = vunpack.c.h.bf16 %v3311_v56  ;;  %v3313_v56 = vld [vmem:[%s4341_s0 + $0x38] sm:$0xff]  }
  0x21   :  { %v283_v10 = vadd.f32 %v3681_v15, %v212_v57  ;;  %v284_v11 = vadd.f32 %v3681_v15, %v213_v58  ;;  %v3821_v16 = vpack.c.bf16 %v426_v2, %v425_v63  ;;  %v2818_v17 = vunpack.c.h.bf16 %v3335_v3 }
  0x22   :  { %708 = vmatmul.mubr.bf16.vlgmr.msra.gmra.mrb[0].mxu0 %v3732_v59  ;;  %948 = vmatmul.mubr.bf16.vlgmr.msra.gmra.mrb[0].mxu1 %v3741_v0  ;;  %v473_v18 = vsel %vm345_vm14, %v281_v52, %v409_v4  ;;  %v474_v19 = vsel %vm346_vm15, %v282_v53, %v410_v5  ;;  %v166_v20 = vmul.f32 %v2721_v6, %v3673_v13  ;;  %vm299_vm0 = vcmp.gt.f32.partialorder %v235_v7, 0.0 }
  0x23   :  { %3472 = vmatpush3.bf16.msra.mxu1 %v3592_v60  ;;  %717 = vmatprep.mubr.bf16.mxu0 %v3602_v1  ;;  %v3596_v60 = vld [vmem:[%s4340_s3 + $0x68] ss:$12 sps:$4 sm:$0xff]   ;;  %v363_v22 = vmul.f32 0.1, %v235_v7  ;;  %v364_v23 = vmul.f32 0.1, %v236_v8  ;;  %v167_v24 = vmul.f32 %v2722_v9, %v3673_v13  ;;  %v215_v30 = vmul.f32 %v2818_v17, %v3673_v13 }
  0x24   :  { %957 = vmatprep.mubr.bf16.mxu1 %v3602_v1  ;;  %3473 = vmatprep.subr.bf16.mxu1 %v3593_v12  ;;  %vm300_vm1 = vcmp.gt.f32.partialorder %v236_v8, 0.0  ;;  %v411_v25 = vmul.f32 0.1, %v283_v10  ;;  %v412_v26 = vmul.f32 0.1, %v284_v11  ;;  %vm347_vm2 = vcmp.gt.f32.partialorder %v283_v10, 0.0 }
  0x25   :  { %vm348_vm3 = vcmp.gt.f32.partialorder %v284_v11, 0.0  ;;  %v427_v34 = vsel %vm299_vm0, %v235_v7, %v363_v22  ;;  %v428_v35 = vsel %vm300_vm1, %v236_v8, %v364_v23  ;;  %v237_v36 = vadd.f32 %v3681_v15, %v166_v20 }
  0x26   :  { %v238_v37 = vadd.f32 %v3681_v15, %v167_v24  ;;  %v475_v38 = vsel %vm347_vm2, %v283_v10, %v411_v25  ;;  %v476_v39 = vsel %vm348_vm3, %v284_v11, %v412_v26  ;;  %v2725_v41 = vunpack.c.l.bf16 %v3312_v31  ;;  %v3314_v25 = vld [vmem:[%s4341_s0 + $0x40] sm:$0xff]  }
  0x27   :  { %3474 = vmatpush3.bf16.msra.mxu1 %v3593_v12  ;;  %v2817_v12 = vunpack.c.l.bf16 %v3335_v3  ;;  %v286_v43 = vadd.f32 %v3681_v15, %v215_v30  ;;  %v2726_v44 = vunpack.c.h.bf16 %v3312_v31  ;;  %v2822_v46 = vunpack.c.h.bf16 %v3336_v32 }
  0x28   :  { %3475 = vmatprep.subr.bf16.mxu1 %v3594_v29  ;;  %v3854_v47 = vpack.c.bf16 %v428_v35, %v427_v34  ;;  %v3856_v48 = vpack.c.bf16 %v476_v39, %v475_v38  ;;  %vm301_vm4 = vcmp.gt.f32.partialorder %v237_v36, 0.0  ;;  %v365_v49 = vmul.f32 0.1, %v237_v36 }
  0x29   :  { %v214_v27 = vmul.f32 %v2817_v12, %v3673_v13  ;;  %vm302_vm5 = vcmp.gt.f32.partialorder %v238_v37, 0.0  ;;  %v366_v50 = vmul.f32 0.1, %v238_v37  ;;  %v168_v52 = vmul.f32 %v2725_v41, %v3673_v13 }
  0x2a   :  { %718 = vmatmul.mubr.bf16.gmra.mrb[4].mxu0 %v3765_v28  ;;  %958 = vmatmul.mubr.bf16.gmra.mrb[4].mxu1 %v3773_v33  ;;  %v414_v53 = vmul.f32 0.1, %v286_v43  ;;  %v169_v54 = vmul.f32 %v2726_v44, %v3673_v13  ;;  %vm350_vm7 = vcmp.gt.f32.partialorder %v286_v43, 0.0  ;;  %v217_v57 = vmul.f32 %v2822_v46, %v3673_v13 }
  0x2b   :  { %727 = vmatprep.mubr.bf16.mxu0 %v3602_v1  ;;  %967 = vmatprep.mubr.bf16.mxu1 %v3602_v1  ;;  %v285_v40 = vadd.f32 %v3681_v15, %v214_v27  ;;  %v429_v58 = vsel %vm301_vm4, %v237_v36, %v365_v49  ;;  %v430_v63 = vsel %vm302_vm5, %v238_v37, %v366_v50  ;;  %v2729_v4 = vunpack.c.l.bf16 %v3313_v56  ;;  %v3315_v49 = vld [vmem:[%s4341_s0 + $0x48] sm:$0xff]  }
  0x2c   :  { %3476 = vmatpush3.bf16.msra.mxu1 %v3594_v29  ;;  %v3833_v29 = vpack.c.bf16 %v474_v19, %v473_v18  ;;  %v239_v3 = vadd.f32 %v3681_v15, %v168_v52  ;;  %v478_v5 = vsel %vm350_vm7, %v286_v43, %v414_v53  ;;  %v240_v6 = vadd.f32 %v3681_v15, %v169_v54 }
  0x2d   :  { %3477 = vmatprep.subr.bf16.mxu1 %v3595_v45  ;;  %v413_v51 = vmul.f32 0.1, %v285_v40  ;;  %vm349_vm6 = vcmp.gt.f32.partialorder %v285_v40, 0.0  ;;  %v2730_v8 = vunpack.c.h.bf16 %v3313_v56  ;;  %v288_v9 = vadd.f32 %v3681_v15, %v217_v57 }
  0x2e   :  { %v3876_v12 = vpack.c.bf16 %v430_v63, %v429_v58  ;;  %vm303_vm8 = vcmp.gt.f32.partialorder %v239_v3, 0.0  ;;  %v367_v17 = vmul.f32 0.1, %v239_v3  ;;  %v170_v18 = vmul.f32 %v2729_v4, %v3673_v13 }
  0x2f   :  { %v477_v2 = vsel %vm349_vm6, %v285_v40, %v413_v51  ;;  %vm304_vm9 = vcmp.gt.f32.partialorder %v240_v6, 0.0  ;;  %v368_v19 = vmul.f32 0.1, %v240_v6  ;;  %v416_v22 = vmul.f32 0.1, %v288_v9 }
  0x30   :  { %3478 = vmatpush3.bf16.msra.mxu1 %v3595_v45  ;;  %v2821_v45 = vunpack.c.l.bf16 %v3336_v32  ;;  %vm352_vm11 = vcmp.gt.f32.partialorder %v288_v9, 0.0  ;;  %v431_v26 = vsel %vm303_vm8, %v239_v3, %v367_v17  ;;  %v241_v27 = vadd.f32 %v3681_v15, %v170_v18 }
  0x31   :  { %3479 = vmatprep.subr.bf16.mxu1 %v3596_v60  ;;  %v432_v30 = vsel %vm304_vm9, %v240_v6, %v368_v19  ;;  %v2733_v34 = vunpack.c.l.bf16 %v3314_v25  ;;  %v480_v35 = vsel %vm352_vm11, %v288_v9, %v416_v22  ;;  %v2734_v38 = vunpack.c.h.bf16 %v3314_v25  ;;  %v3317_v22 = vld [vmem:[%s4341_s0 + $0x58] sm:$0xff]  }
  0x32   :  { %728 = vmatmul.mubr.bf16.gmra.mrb[8].mxu0 %v3804_v61  ;;  %968 = vmatmul.mubr.bf16.gmra.mrb[8].mxu1 %v3806_v62  ;;  %v216_v55 = vmul.f32 %v2821_v45, %v3673_v13  ;;  %v3895_v39 = vpack.c.bf16 %v432_v30, %v431_v26  ;;  %vm305_vm12 = vcmp.gt.f32.partialorder %v241_v27, 0.0  ;;  %v369_v41 = vmul.f32 0.1, %v241_v27 }
  0x33   :  { %737 = vmatprep.mubr.bf16.mxu0 %v3602_v1  ;;  %977 = vmatprep.mubr.bf16.mxu1 %v3602_v1  ;;  %v172_v43 = vmul.f32 %v2733_v34, %v3673_v13  ;;  %v173_v46 = vmul.f32 %v2734_v38, %v3673_v13  ;;  %v2737_v53 = vunpack.c.l.bf16 %v3315_v49  ;;  %v2738_v57 = vunpack.c.h.bf16 %v3315_v49 }
  0x34   :  { %3480 = vmatpush3.bf16.msra.mxu1 %v3596_v60  ;;  %v3337_v60 = vld [vmem:[%s4341_s0 + $0xf8] sm:$0xff]   ;;  %v287_v7 = vadd.f32 %v3681_v15, %v216_v55  ;;  %v433_v50 = vsel %vm305_vm12, %v241_v27, %v369_v41  ;;  %v2745_v26 = vunpack.c.l.bf16 %v3317_v22  ;;  %v2746_v27 = vunpack.c.h.bf16 %v3317_v22 }
  0x35   :  { %3481 = vmatprep.subr.bf16.mxu1 %v3597_v14  ;;  %v2825_v10 = vunpack.c.l.bf16 %v3337_v60  ;;  %v2826_v11 = vunpack.c.h.bf16 %v3337_v60  ;;  %v243_v52 = vadd.f32 %v3681_v15, %v172_v43  ;;  %v244_v56 = vadd.f32 %v3681_v15, %v173_v46 }
  0x36   :  { %v415_v20 = vmul.f32 0.1, %v287_v7  ;;  %vm351_vm10 = vcmp.gt.f32.partialorder %v287_v7, 0.0  ;;  %v174_v63 = vmul.f32 %v2737_v53, %v3673_v13  ;;  %v175_v4 = vmul.f32 %v2738_v57, %v3673_v13 }
  0x37   :  { %v218_v23 = vmul.f32 %v2825_v10, %v3673_v13  ;;  %v219_v24 = vmul.f32 %v2826_v11, %v3673_v13  ;;  %v372_v3 = vmul.f32 0.1, %v244_v56  ;;  %vm307_vm0 = vcmp.gt.f32.partialorder %v243_v52, 0.0 }
  0x38   :  { %3482 = vmatpush3.bf16.msra.mxu1 %v3597_v14  ;;  %v3878_v14 = vpack.c.bf16 %v478_v5, %v477_v2  ;;  %v479_v31 = vsel %vm351_vm10, %v287_v7, %v415_v20  ;;  %v371_v2 = vmul.f32 0.1, %v243_v52  ;;  %v3316_v5 = vld [vmem:[%s4341_s0 + $0x50] sm:$0xff]   ;;  %vm308_vm1 = vcmp.gt.f32.partialorder %v244_v56, 0.0 }
  0x39   :  { %3483 = vmatprep.subr.bf16.mxu1 %v3598_v21  ;;  %v289_v36 = vadd.f32 %v3681_v15, %v218_v23  ;;  %v290_v37 = vadd.f32 %v3681_v15, %v219_v24  ;;  %v3897_v40 = vpack.c.bf16 %v480_v35, %v479_v31  ;;  %v245_v6 = vadd.f32 %v3681_v15, %v174_v63  ;;  %v3318_v35 = vld [vmem:[%s4341_s0 + $0x60] sm:$0xff]  }
  0x3a   :  { %738 = vmatmul.mubr.bf16.gmra.mrb[12].mxu0 %v3821_v16  ;;  %978 = vmatmul.mubr.bf16.gmra.mrb[12].mxu1 %v3833_v29  ;;  %v2741_v7 = vunpack.c.l.bf16 %v3316_v5  ;;  %v435_v9 = vsel %vm307_vm0, %v243_v52, %v371_v2  ;;  %v436_v10 = vsel %vm308_vm1, %v244_v56, %v372_v3  ;;  %v246_v11 = vadd.f32 %v3681_v15, %v175_v4 }
  0x3b   :  { %747 = vmatprep.mubr.bf16.mxu0 %v3602_v1  ;;  %987 = vmatprep.mubr.bf16.mxu1 %v3602_v1  ;;  %v417_v44 = vmul.f32 0.1, %v289_v36  ;;  %v418_v45 = vmul.f32 0.1, %v290_v37  ;;  %vm353_vm14 = vcmp.gt.f32.partialorder %v289_v36, 0.0  ;;  %vm354_vm15 = vcmp.gt.f32.partialorder %v290_v37, 0.0 }
  0x3c   :  { %3484 = vmatpush3.bf16.msra.mxu1 %v3598_v21  ;;  %v171_v21 = vmul.f32 %v2730_v8, %v3673_v13  ;;  %v2742_v8 = vunpack.c.h.bf16 %v3316_v5  ;;  %v3925_v17 = vpack.c.bf16 %v436_v10, %v435_v9  ;;  %v176_v18 = vmul.f32 %v2741_v7, %v3673_v13 }
  0x3d   :  { %3485 = vmatprep.subr.bf16.mxu1 %v3599_v42  ;;  %v481_v54 = vsel %vm353_vm14, %v289_v36, %v417_v44  ;;  %v482_v55 = vsel %vm354_vm15, %v290_v37, %v418_v45  ;;  %v373_v20 = vmul.f32 0.1, %v245_v6  ;;  %vm309_vm2 = vcmp.gt.f32.partialorder %v245_v6, 0.0 }
  0x3e   :  { %v242_v32 = vadd.f32 %v3681_v15, %v171_v21  ;;  %v3912_v60 = vpack.c.bf16 %v482_v55, %v481_v54  ;;  %v177_v19 = vmul.f32 %v2742_v8, %v3673_v13  ;;  %v374_v21 = vmul.f32 0.1, %v246_v11  ;;  %v3321_v8 = vld [vmem:[%s4341_s0 + $0x78] sm:$0xff]  }
  0x3f   :  { %vm310_vm3 = vcmp.gt.f32.partialorder %v246_v11, 0.0  ;;  %v437_v24 = vsel %vm309_vm2, %v245_v6, %v373_v20  ;;  %v178_v34 = vmul.f32 %v2745_v26, %v3673_v13  ;;  %v2749_v36 = vunpack.c.l.bf16 %v3318_v35 }
  0x40   :  { %3486 = vmatpush3.bf16.msra.mxu1 %v3599_v42  ;;  %v370_v42 = vmul.f32 0.1, %v242_v32  ;;  %vm306_vm13 = vcmp.gt.f32.partialorder %v242_v32, 0.0  ;;  %v248_v23 = vadd.f32 %v3681_v15, %v177_v19  ;;  %v438_v25 = vsel %vm310_vm3, %v246_v11, %v374_v21  ;;  %v3322_v11 = vld [vmem:[%s4341_s0 + $0x80] sm:$0xff]  }
  0x41   :  { %v3938_v30 = vpack.c.bf16 %v438_v25, %v437_v24  ;;  %v249_v38 = vadd.f32 %v3681_v15, %v178_v34  ;;  %v180_v44 = vmul.f32 %v2749_v36, %v3673_v13  ;;  %v2762_v20 = vunpack.c.h.bf16 %v3321_v8  ;;  %v3324_v36 = vld [vmem:[%s4341_s0 + $0x90] sm:$0xff]  }
  0x42   :  { %748 = vmatmul.mubr.bf16.gmra.mrb[16].mxu0 %v3854_v47  ;;  %988 = vmatmul.mubr.bf16.gmra.mrb[16].mxu1 %v3856_v48  ;;  %v434_v51 = vsel %vm306_vm13, %v242_v32, %v370_v42  ;;  %v376_v32 = vmul.f32 0.1, %v248_v23  ;;  %vm312_vm5 = vcmp.gt.f32.partialorder %v248_v23, 0.0  ;;  %v2750_v42 = vunpack.c.h.bf16 %v3318_v35  ;;  %v3323_v35 = vld [vmem:[%s4341_s0 + $0x88] sm:$0xff]  }
  0x43   :  { %757 = vmatprep.mubr.bf16.mxu0 %v3602_v1  ;;  %997 = vmatprep.mubr.bf16.mxu1 %v3602_v1  ;;  %v3910_v58 = vpack.c.bf16 %v434_v51, %v433_v50  ;;  %v377_v45 = vmul.f32 0.1, %v249_v38  ;;  %vm313_vm6 = vcmp.gt.f32.partialorder %v249_v38, 0.0  ;;  %v2765_v21 = vunpack.c.l.bf16 %v3322_v11 }
  0x44   :  { %v440_v37 = vsel %vm312_vm5, %v248_v23, %v376_v32  ;;  %v181_v49 = vmul.f32 %v2750_v42, %v3673_v13  ;;  %v2766_v23 = vunpack.c.h.bf16 %v3322_v11 }
  0x45   :  { %v441_v51 = vsel %vm313_vm6, %v249_v38, %v377_v45  ;;  %v2770_v45 = vunpack.c.h.bf16 %v3323_v35 }
  0x46   :  { %v252_v53 = vadd.f32 %v3681_v15, %v181_v49  ;;  %v2774_v49 = vunpack.c.h.bf16 %v3324_v36 }
  0x48   :  { %v380_v63 = vmul.f32 0.1, %v252_v53  ;;  %vm316_vm9 = vcmp.gt.f32.partialorder %v252_v53, 0.0 }
  0x4a   :  { %758 = vmatmul.mubr.bf16.gmra.mrb[20].mxu0 %v3876_v12  ;;  %998 = vmatmul.mubr.bf16.gmra.mrb[20].mxu1 %v3878_v14  ;;  %v444_v6 = vsel %vm316_vm9, %v252_v53, %v380_v63 }
  0x4b   :  { %767 = vmatprep.mubr.bf16.mxu0 %v3602_v1  ;;  %1007 = vmatprep.mubr.bf16.mxu1 %v3602_v1 }
  0x52   :  { %768 = vmatmul.mubr.bf16.gmra.mrb[24].mxu0 %v3895_v39  ;;  %1008 = vmatmul.mubr.bf16.gmra.mrb[24].mxu1 %v3897_v40 }
  0x53   :  { %777 = vmatprep.mubr.bf16.mxu0 %v3602_v1  ;;  %1017 = vmatprep.mubr.bf16.mxu1 %v3602_v1 }
  0x5a   :  { %778 = vmatmul.mubr.bf16.gmra.mrb[28].mxu0 %v3910_v58  ;;  %1018 = vmatmul.mubr.bf16.gmra.mrb[28].mxu1 %v3912_v60 }
  0x5b   :  { %787 = vmatprep.mubr.bf16.mxu0 %v3602_v1  ;;  %3487 = vmatprep.mubr.bf16.mxu1 %v3732_v59  ;;  %v247_v59 = vadd.f32 %v3681_v15, %v176_v18 }
  0x5d   :  { %v375_v31 = vmul.f32 0.1, %v247_v59  ;;  %vm311_vm4 = vcmp.gt.f32.partialorder %v247_v59, 0.0 }
  0x62   :  { %788 = vmatmul.mubr.bf16.gmra.mrb[32].mxu0 %v3925_v17  ;;  %3488 = vmatmul.mubr.bf16.vlgmr.msra.gmra.mrb[32].mxu1 %v3765_v28  ;;  %v179_v28 = vmul.f32 %v2746_v27, %v3673_v13  ;;  %v187_v27 = vmul.f32 %v2762_v20, %v3673_v13 }
  0x63   :  { %797 = vmatprep.mubr.bf16.mxu0 %v3602_v1  ;;  %3491 = vmatprep.mubr.bf16.mxu1 %v3804_v61  ;;  %v439_v61 = vsel %vm311_vm4, %v247_v59, %v375_v31  ;;  %v188_v31 = vmul.f32 %v2765_v21, %v3673_v13 }
  0x64   :  { %v250_v41 = vadd.f32 %v3681_v15, %v179_v28  ;;  %v493_v43 = vpack.c.bf16 %v440_v37, %v439_v61  ;;  %v258_v37 = vadd.f32 %v3681_v15, %v187_v27 }
  0x65   :  { %v259_v38 = vadd.f32 %v3681_v15, %v188_v31 }
  0x66   :  { %v378_v46 = vmul.f32 0.1, %v250_v41  ;;  %vm314_vm7 = vcmp.gt.f32.partialorder %v250_v41, 0.0  ;;  %vm322_vm15 = vcmp.gt.f32.partialorder %v258_v37, 0.0 }
  0x67   :  { %vm323_vm0 = vcmp.gt.f32.partialorder %v259_v38, 0.0 }
  0x68   :  { %v442_v52 = vsel %vm314_vm7, %v250_v41, %v378_v46  ;;  %v2769_v41 = vunpack.c.l.bf16 %v3323_v35  ;;  %v2773_v46 = vunpack.c.l.bf16 %v3324_v36 }
  0x69   :  { %v494_v55 = vpack.c.bf16 %v442_v52, %v441_v51  ;;  %v387_v51 = vmul.f32 0.1, %v259_v38 }
  0x6a   :  { %798 = vmatmul.mubr.bf16.gmra.mrb[36].mxu0 %v3938_v30  ;;  %3492 = vmatmul.mubr.bf16.gmra.mrb[36].mxu1 %v3821_v16  ;;  %v3319_v16 = vld [vmem:[%s4341_s0 + $0x68] sm:$0xff]   ;;  %v190_v53 = vmul.f32 %v2769_v41, %v3673_v13 }
  0x6b   :  { %807 = vmatprep.mubr.bf16.mxu0 %v3602_v1  ;;  %3495 = vmatprep.mubr.bf16.mxu1 %v3854_v47  ;;  %v251_v47 = vadd.f32 %v3681_v15, %v180_v44  ;;  %v2753_v50 = vunpack.c.l.bf16 %v3319_v16  ;;  %v2754_v54 = vunpack.c.h.bf16 %v3319_v16 }
  0x6d   :  { %v182_v56 = vmul.f32 %v2753_v50, %v3673_v13  ;;  %v379_v57 = vmul.f32 0.1, %v251_v47  ;;  %v183_v2 = vmul.f32 %v2754_v54, %v3673_v13  ;;  %vm315_vm8 = vcmp.gt.f32.partialorder %v251_v47, 0.0 }
  0x6e   :  { %v386_v50 = vmul.f32 0.1, %v258_v37  ;;  %v191_v54 = vmul.f32 %v2770_v45, %v3673_v13 }
  0x6f   :  { %v443_v5 = vsel %vm315_vm8, %v251_v47, %v379_v57  ;;  %v254_v7 = vadd.f32 %v3681_v15, %v183_v2  ;;  %v3325_v57 = vld [vmem:[%s4341_s0 + $0x98] sm:$0xff]  }
  0x70   :  { %v495_v9 = vpack.c.bf16 %v444_v6, %v443_v5  ;;  %v450_v2 = vsel %vm322_vm15, %v258_v37, %v386_v50  ;;  %v262_v5 = vadd.f32 %v3681_v15, %v191_v54  ;;  %v2777_v6 = vunpack.c.l.bf16 %v3325_v57 }
  0x71   :  { %v382_v19 = vmul.f32 0.1, %v254_v7  ;;  %vm318_vm11 = vcmp.gt.f32.partialorder %v254_v7, 0.0 }
  0x72   :  { %808 = vmatmul.mubr.bf16.gmra.mrb[40].mxu0 %v493_v43  ;;  %3496 = vmatmul.mubr.bf16.gmra.mrb[40].mxu1 %v3876_v12  ;;  %v3320_v12 = vld [vmem:[%s4341_s0 + $0x70] sm:$0xff]   ;;  %v194_v20 = vmul.f32 %v2777_v6, %v3673_v13  ;;  %vm326_vm3 = vcmp.gt.f32.partialorder %v262_v5, 0.0 }
  0x73   :  { %817 = vmatprep.mubr.bf16.mxu0 %v3602_v1  ;;  %3499 = vmatprep.mubr.bf16.mxu1 %v3895_v39  ;;  %v253_v39 = vadd.f32 %v3681_v15, %v182_v56  ;;  %v2757_v3 = vunpack.c.l.bf16 %v3320_v12  ;;  %v2758_v4 = vunpack.c.h.bf16 %v3320_v12  ;;  %v446_v25 = vsel %vm318_vm11, %v254_v7, %v382_v19 }
  0x74   :  { %v193_v56 = vmul.f32 %v2774_v49, %v3673_v13  ;;  %v451_v12 = vsel %vm323_vm0, %v259_v38, %v387_v51 }
  0x75   :  { %v184_v10 = vmul.f32 %v2757_v3, %v3673_v13  ;;  %v381_v18 = vmul.f32 0.1, %v253_v39  ;;  %vm317_vm10 = vcmp.gt.f32.partialorder %v253_v39, 0.0 }
  0x77   :  { %v255_v22 = vadd.f32 %v3681_v15, %v184_v10  ;;  %v445_v24 = vsel %vm317_vm10, %v253_v39, %v381_v18  ;;  %v3326_v39 = vld [vmem:[%s4341_s0 + $0xa0] sm:$0xff]  }
  0x78   :  { %v496_v32 = vpack.c.bf16 %v446_v25, %v445_v24  ;;  %v2781_v10 = vunpack.c.l.bf16 %v3326_v39 }
  0x79   :  { %v383_v34 = vmul.f32 0.1, %v255_v22  ;;  %vm319_vm12 = vcmp.gt.f32.partialorder %v255_v22, 0.0 }
  0x7a   :  { %818 = vmatmul.mubr.bf16.gmra.mrb[44].mxu0 %v494_v55  ;;  %3500 = vmatmul.mubr.bf16.gmra.mrb[44].mxu1 %v3910_v58  ;;  %v185_v58 = vmul.f32 %v2758_v4, %v3673_v13  ;;  %v261_v4 = vadd.f32 %v3681_v15, %v190_v53  ;;  %v196_v24 = vmul.f32 %v2781_v10, %v3673_v13 }
  0x7b   :  { %827 = vmatprep.mubr.bf16.mxu0 %v3602_v1  ;;  %3503 = vmatprep.mubr.bf16.mxu1 %v3925_v17  ;;  %v2761_v17 = vunpack.c.l.bf16 %v3321_v8  ;;  %v447_v42 = vsel %vm319_vm12, %v255_v22, %v383_v34  ;;  %v264_v8 = vadd.f32 %v3681_v15, %v193_v56 }
  0x7c   :  { %v256_v59 = vadd.f32 %v3681_v15, %v185_v58  ;;  %v2782_v58 = vunpack.c.h.bf16 %v3326_v39  ;;  %vm325_vm2 = vcmp.gt.f32.partialorder %v261_v4, 0.0  ;;  %v389_v19 = vmul.f32 0.1, %v261_v4 }
  0x7d   :  { %v186_v26 = vmul.f32 %v2761_v17, %v3673_v13  ;;  %v390_v17 = vmul.f32 0.1, %v262_v5  ;;  %v392_v22 = vmul.f32 0.1, %v264_v8  ;;  %vm328_vm5 = vcmp.gt.f32.partialorder %v264_v8, 0.0 }
  0x7e   :  { %v384_v28 = vmul.f32 0.1, %v256_v59  ;;  %vm320_vm13 = vcmp.gt.f32.partialorder %v256_v59, 0.0  ;;  %v197_v25 = vmul.f32 %v2782_v58, %v3673_v13  ;;  %v453_v27 = vsel %vm325_vm2, %v261_v4, %v389_v19 }
  0x7f   :  { %v257_v61 = vadd.f32 %v3681_v15, %v186_v26  ;;  %v3328_v26 = vld [vmem:[%s4341_s0 + $0xb0] sm:$0xff]   ;;  %v454_v31 = vsel %vm326_vm3, %v262_v5, %v390_v17 }
  0x80   :  { %v2789_v38 = vunpack.c.l.bf16 %v3328_v26  ;;  %v2790_v41 = vunpack.c.h.bf16 %v3328_v26 }
  0x81   :  { %vm321_vm14 = vcmp.gt.f32.partialorder %v257_v61, 0.0  ;;  %v385_v16 = vmul.f32 0.1, %v257_v61 }
  0x82   :  { %828 = vmatmul.mubr.bf16.gmra.mrb[48].mxu0 %v495_v9  ;;  %3504 = vmatmul.mubr.bf16.gmra.mrb[48].mxu1 %v3938_v30  ;;  %v189_v30 = vmul.f32 %v2766_v23, %v3673_v13  ;;  %v3327_v23 = vld [vmem:[%s4341_s0 + $0xa8] sm:$0xff]  }
  0x83   :  { %837 = vmatprep.mubr.bf16.mxu0 %v3602_v1  ;;  %3507 = vmatprep.mubr.bf16.mxu1 %v493_v43  ;;  %v448_v43 = vsel %vm320_vm13, %v256_v59, %v384_v28  ;;  %v449_v63 = vsel %vm321_vm14, %v257_v61, %v385_v16  ;;  %v2785_v34 = vunpack.c.l.bf16 %v3327_v23  ;;  %v2786_v61 = vunpack.c.h.bf16 %v3327_v23 }
  0x84   :  { %v260_v44 = vadd.f32 %v3681_v15, %v189_v30  ;;  %v497_v47 = vpack.c.bf16 %v448_v43, %v447_v42  ;;  %v498_v11 = vpack.c.bf16 %v450_v2, %v449_v63  ;;  %v456_v30 = vsel %vm328_vm5, %v264_v8, %v392_v22 }
  0x85   :  { %v500_v42 = vpack.c.bf16 %v454_v31, %v453_v27 }
  0x86   :  { %v388_v52 = vmul.f32 0.1, %v260_v44  ;;  %vm324_vm1 = vcmp.gt.f32.partialorder %v260_v44, 0.0 }
  0x88   :  { %v452_v3 = vsel %vm324_vm1, %v260_v44, %v388_v52  ;;  %v3329_v52 = vld [vmem:[%s4341_s0 + $0xb8] sm:$0xff]  }
  0x89   :  { %v499_v18 = vpack.c.bf16 %v452_v3, %v451_v12  ;;  %v2794_v63 = vunpack.c.h.bf16 %v3329_v52 }
  0x8a   :  { %838 = vmatmul.mubr.bf16.gmra.mrb[52].mxu0 %v496_v32  ;;  %3508 = vmatmul.mubr.bf16.gmra.mrb[52].mxu1 %v494_v55  ;;  %v192_v55 = vmul.f32 %v2773_v46, %v3673_v13 }
  0x8b   :  { %847 = vmatprep.mubr.bf16.mxu0 %v3602_v1  ;;  %3511 = vmatprep.mubr.bf16.mxu1 %v495_v9  ;;  %v2778_v9 = vunpack.c.h.bf16 %v3325_v57  ;;  %v2793_v57 = vunpack.c.l.bf16 %v3329_v52 }
  0x8c   :  { %v263_v7 = vadd.f32 %v3681_v15, %v192_v55 }
  0x8d   :  { %v195_v59 = vmul.f32 %v2778_v9, %v3673_v13  ;;  %v3600_v13 = vld [vmem:[%s4343_s2] ss:$0 sm:$0xff] }
  0x8e   :  { %v391_v21 = vmul.f32 0.1, %v263_v7  ;;  %vm327_vm4 = vcmp.gt.f32.partialorder %v263_v7, 0.0  ;;  %v267_v36 = vadd.f32 %v3600_v13, %v196_v24  ;;  %v268_v37 = vadd.f32 %v3600_v13, %v197_v25 }
  0x8f   :  { %v266_v35 = vadd.f32 %v3600_v13, %v195_v59 }
  0x90   :  { %v455_v28 = vsel %vm327_vm4, %v263_v7, %v391_v21  ;;  %v395_v16 = vmul.f32 0.1, %v267_v36  ;;  %vm331_vm8 = vcmp.gt.f32.partialorder %v267_v36, 0.0  ;;  %vm332_vm9 = vcmp.gt.f32.partialorder %v268_v37, 0.0 }
  0x91   :  { %v501_v45 = vpack.c.bf16 %v456_v30, %v455_v28  ;;  %vm330_vm7 = vcmp.gt.f32.partialorder %v266_v35, 0.0  ;;  %v394_v46 = vmul.f32 0.1, %v266_v35 }
  0x92   :  { %848 = vmatmul.mubr.bf16.gmra.mrb[56].mxu0 %v497_v47  ;;  %3512 = vmatmul.mubr.bf16.gmra.mrb[56].mxu1 %v496_v32  ;;  %v265_v32 = vadd.f32 %v3681_v15, %v194_v20  ;;  %v3601_v15 = vld [vmem:[%s4342_s1] ss:$0 sm:$0xff]  ;;  %v459_v2 = vsel %vm331_vm8, %v267_v36, %v395_v16 }
  0x93   :  { %857 = vmatprep.mubr.bf16.mxu0 %v3602_v1  ;;  %3515 = vmatprep.mubr.bf16.mxu1 %v497_v47  ;;  %v198_v44 = vmul.f32 %v3601_v15, %v2785_v34  ;;  %v199_v49 = vmul.f32 %v3601_v15, %v2786_v61  ;;  %v396_v47 = vmul.f32 0.1, %v268_v37  ;;  %v200_v50 = vmul.f32 %v3601_v15, %v2789_v38 }
  0x94   :  { %vm329_vm6 = vcmp.gt.f32.partialorder %v265_v32, 0.0  ;;  %v393_v43 = vmul.f32 0.1, %v265_v32  ;;  %v201_v51 = vmul.f32 %v3601_v15, %v2790_v41  ;;  %v458_v55 = vsel %vm330_vm7, %v266_v35, %v394_v46 }
  0x95   :  { %v269_v54 = vadd.f32 %v3600_v13, %v198_v44  ;;  %v270_v56 = vadd.f32 %v3600_v13, %v199_v49  ;;  %v460_v12 = vsel %vm332_vm9, %v268_v37, %v396_v47  ;;  %v271_v39 = vadd.f32 %v3600_v13, %v200_v50 }
  0x96   :  { %v457_v53 = vsel %vm329_vm6, %v265_v32, %v393_v43  ;;  %v272_v3 = vadd.f32 %v3600_v13, %v201_v51  ;;  %v503_v6 = vpack.c.bf16 %v460_v12, %v459_v2  ;;  %v202_v8 = vmul.f32 %v3601_v15, %v2793_v57 }
  0x97   :  { %v502_v4 = vpack.c.bf16 %v458_v55, %v457_v53  ;;  %vm333_vm10 = vcmp.gt.f32.partialorder %v269_v54, 0.0  ;;  %v397_v5 = vmul.f32 0.1, %v269_v54  ;;  %v398_v7 = vmul.f32 0.1, %v270_v56 }
  0x98   :  { %v203_v9 = vmul.f32 %v3601_v15, %v2794_v63  ;;  %vm334_vm11 = vcmp.gt.f32.partialorder %v270_v56, 0.0  ;;  %v399_v10 = vmul.f32 0.1, %v271_v39  ;;  %v400_v58 = vmul.f32 0.1, %v272_v3 }
  0x99   :  { %vm335_vm12 = vcmp.gt.f32.partialorder %v271_v39, 0.0  ;;  %vm336_vm13 = vcmp.gt.f32.partialorder %v272_v3, 0.0  ;;  %v273_v19 = vadd.f32 %v3600_v13, %v202_v8 }
  0x9a   :  { %858 = vmatmul.mubr.bf16.gmra.mrb[60].mxu0 %v498_v11  ;;  %3516 = vmatmul.mubr.bf16.gmra.mrb[60].mxu1 %v498_v11  ;;  %v461_v11 = vsel %vm333_vm10, %v269_v54, %v397_v5  ;;  %v274_v17 = vadd.f32 %v3600_v13, %v203_v9  ;;  %v463_v20 = vsel %vm335_vm12, %v271_v39, %v399_v10 }
  0x9b   :  { %867 = vmatprep.mubr.bf16.mxu0 %v3602_v1  ;;  %3519 = vmatprep.mubr.bf16.mxu1 %v499_v18  ;;  %v464_v21 = vsel %vm336_vm13, %v272_v3, %v400_v58  ;;  %v401_v23 = vmul.f32 0.1, %v273_v19  ;;  %vm337_vm14 = vcmp.gt.f32.partialorder %v273_v19, 0.0 }
  0x9c   :  { %v505_v59 = vpack.c.bf16 %v464_v21, %v463_v20  ;;  %v402_v24 = vmul.f32 0.1, %v274_v17  ;;  %vm338_vm15 = vcmp.gt.f32.partialorder %v274_v17, 0.0 }
  0x9d   :  { %v465_v25 = vsel %vm337_vm14, %v273_v19, %v401_v23 }
  0x9e   :  { %v466_v26 = vsel %vm338_vm15, %v274_v17, %v402_v24 }
  0x9f   :  { %v506_v27 = vpack.c.bf16 %v466_v26, %v465_v25 }
  0xa2   :  { %868 = vmatmul.mubr.bf16.gmra.mrb[64].mxu0 %v499_v18  ;;  %3520 = vmatmul.mubr.bf16.gmra.mrb[64].mxu1 %v500_v42  ;;  %v462_v18 = vsel %vm334_vm11, %v270_v56, %v398_v7 }
  0xa3   :  { %877 = vmatprep.mubr.bf16.mxu0 %v3602_v1  ;;  %3523 = vmatprep.mubr.bf16.mxu1 %v501_v45  ;;  %v504_v22 = vpack.c.bf16 %v462_v18, %v461_v11 }
  0xaa   :  { %878 = vmatmul.mubr.bf16.gmra.mrb[68].mxu0 %v500_v42  ;;  %3524 = vmatmul.mubr.bf16.gmra.mrb[68].mxu1 %v502_v4 }
  0xab   :  { %887 = vmatprep.mubr.bf16.mxu0 %v3602_v1  ;;  %3527 = vmatprep.mubr.bf16.mxu1 %v503_v6 }
  0xb2   :  { %888 = vmatmul.mubr.bf16.gmra.mrb[72].mxu0 %v501_v45  ;;  %3528 = vmatmul.mubr.bf16.gmra.mrb[72].mxu1 %v504_v22 }
  0xb3   :  { %897 = vmatprep.mubr.bf16.mxu0 %v3602_v1  ;;  %3531 = vmatprep.mubr.bf16.mxu1 %v505_v59 }
  0xba   :  { %898 = vmatmul.mubr.bf16.gmra.mrb[76].mxu0 %v502_v4  ;;  %3532 = vmatmul.mubr.bf16.gmra.mrb[76].mxu1 %v506_v27 }
  0xbb   :  { %907 = vmatprep.mubr.bf16.mxu0 %v3602_v1  ;;  %3535 = vmatprep.mubr.bf16.mxu1 %v3741_v0 }
  0xc2   :  { %908 = vmatmul.mubr.bf16.gmra.mrb[80].mxu0 %v503_v6  ;;  %3536 = vmatmul.mubr.bf16.gmra.mrb[80].mxu1 %v3773_v33 }
  0xc3   :  { %917 = vmatprep.mubr.bf16.mxu0 %v3602_v1  ;;  %3539 = vmatprep.mubr.bf16.mxu1 %v3806_v62 }
  0xca   :  { %918 = vmatmul.mubr.bf16.gmra.mrb[84].mxu0 %v504_v22  ;;  %3540 = vmatmul.mubr.bf16.gmra.mrb[84].mxu1 %v3833_v29 }
  0xcb   :  { %927 = vmatprep.mubr.bf16.mxu0 %v3602_v1  ;;  %3543 = vmatprep.mubr.bf16.mxu1 %v3856_v48 }
  0xd2   :  { %928 = vmatmul.mubr.bf16.gmra.mrb[88].mxu0 %v505_v59  ;;  %3544 = vmatmul.mubr.bf16.gmra.mrb[88].mxu1 %v3878_v14 }
  0xd3   :  { %937 = vmatprep.mubr.bf16.mxu0 %v3602_v1  ;;  %3547 = vmatprep.mubr.bf16.mxu1 %v3897_v40 }
  0xda   :  { %938 = vmatmul.mubr.bf16.gmra.mrb[92].mxu0 %v506_v27  ;;  %3548 = vmatmul.mubr.bf16.gmra.mrb[92].mxu1 %v3912_v60 }
  0xf5   :  { %v709_v0 = vpop.f32.mrb[0].mxu0  ;;  %v949_v33 = vpop.f32.mrb[0].mxu1 }
  0xf6   :  { %v711_v62 = vpop.f32.mrb[1].mxu0  ;;  %v951_v31 = vpop.f32.mrb[1].mxu1 }
  0xf7   :  { %v713_v32 = vpop.f32.mrb[2].mxu0  ;;  %v953_v29 = vpop.f32.mrb[2].mxu1 }
  0xf8   :  { %v2830_v34 = vpack.c.bf16 %v713_v32, %v709_v0  ;;  %v2950_v28 = vpack.c.bf16 %v953_v29, %v949_v33  ;;  %v715_v30 = vpop.f32.mrb[3].mxu0  ;;  %v955_v48 = vpop.f32.mrb[3].mxu1 }
  0xf9   :  { %v2990_v13 = vpack.c.bf16 %v715_v30, %v711_v62  ;;  %v3110_v35 = vpack.c.bf16 %v955_v48, %v951_v31 }
  0xfa   :  { %2831 = vst [vmem:[%s4344_s4] sm:$0xff] %v2830_v34   ;;  %3361 = vst [vmem:[%s4344_s4 + $0xc0] sm:$0xff] %v2950_v28  }
  0xfb   :  { %2991 = vst [vmem:[%s4345_s5] sm:$0xff] %v2990_v13   ;;  %3392 = vst [vmem:[%s4345_s5 + $0xc0] sm:$0xff] %v3110_v35  }
  0xfd   :  { %v719_v1 = vpop.f32.mrb[4].mxu0  ;;  %v959_v14 = vpop.f32.mrb[4].mxu1 }
  0xfe   :  { %v721_v40 = vpop.f32.mrb[5].mxu0  ;;  %v961_v60 = vpop.f32.mrb[5].mxu1 }
  0xff   :  { %v723_v61 = vpop.f32.mrb[6].mxu0  ;;  %v963_v36 = vpop.f32.mrb[6].mxu1 }
 0x100   :  { %v2835_v37 = vpack.c.bf16 %v723_v61, %v719_v1  ;;  %v2955_v38 = vpack.c.bf16 %v963_v36, %v959_v14  ;;  %v725_v41 = vpop.f32.mrb[7].mxu0  ;;  %v965_v42 = vpop.f32.mrb[7].mxu1 }
 0x101   :  { %v2995_v43 = vpack.c.bf16 %v725_v41, %v721_v40  ;;  %v3115_v15 = vpack.c.bf16 %v965_v42, %v961_v60 }
 0x102   :  { %3338 = vst [vmem:[%s4344_s4 + $0x8] sm:$0xff] %v2835_v37   ;;  %3362 = vst [vmem:[%s4344_s4 + $0xc8] sm:$0xff] %v2955_v38  }
 0x103   :  { %3369 = vst [vmem:[%s4345_s5 + $0x8] sm:$0xff] %v2995_v43   ;;  %3393 = vst [vmem:[%s4345_s5 + $0xc8] sm:$0xff] %v3115_v15  }
 0x105   :  { %v729_v44 = vpop.f32.mrb[8].mxu0  ;;  %v969_v45 = vpop.f32.mrb[8].mxu1 }
 0x106   :  { %v731_v46 = vpop.f32.mrb[9].mxu0  ;;  %v971_v49 = vpop.f32.mrb[9].mxu1 }
 0x107   :  { %v733_v16 = vpop.f32.mrb[10].mxu0  ;;  %v973_v47 = vpop.f32.mrb[10].mxu1 }
 0x108   :  { %v2840_v50 = vpack.c.bf16 %v733_v16, %v729_v44  ;;  %v2960_v51 = vpack.c.bf16 %v973_v47, %v969_v45  ;;  %v735_v52 = vpop.f32.mrb[11].mxu0  ;;  %v975_v53 = vpop.f32.mrb[11].mxu1 }
 0x109   :  { %v3000_v54 = vpack.c.bf16 %v735_v52, %v731_v46  ;;  %v3120_v55 = vpack.c.bf16 %v975_v53, %v971_v49 }
 0x10a   :  { %3339 = vst [vmem:[%s4344_s4 + $0x10] sm:$0xff] %v2840_v50   ;;  %3363 = vst [vmem:[%s4344_s4 + $0xd0] sm:$0xff] %v2960_v51  }
 0x10b   :  { %3370 = vst [vmem:[%s4345_s5 + $0x10] sm:$0xff] %v3000_v54   ;;  %3394 = vst [vmem:[%s4345_s5 + $0xd0] sm:$0xff] %v3120_v55  }
 0x10d   :  { %v739_v56 = vpop.f32.mrb[12].mxu0  ;;  %v979_v57 = vpop.f32.mrb[12].mxu1 }
 0x10e   :  { %v741_v63 = vpop.f32.mrb[13].mxu0  ;;  %v981_v2 = vpop.f32.mrb[13].mxu1 }
 0x10f   :  { %v743_v12 = vpop.f32.mrb[14].mxu0  ;;  %v983_v39 = vpop.f32.mrb[14].mxu1 }
 0x110   :  { %v2845_v3 = vpack.c.bf16 %v743_v12, %v739_v56  ;;  %v2965_v4 = vpack.c.bf16 %v983_v39, %v979_v57  ;;  %v745_v5 = vpop.f32.mrb[15].mxu0  ;;  %v985_v6 = vpop.f32.mrb[15].mxu1 }
 0x111   :  { %v3005_v7 = vpack.c.bf16 %v745_v5, %v741_v63  ;;  %v3125_v8 = vpack.c.bf16 %v985_v6, %v981_v2 }
 0x112   :  { %3340 = vst [vmem:[%s4344_s4 + $0x18] sm:$0xff] %v2845_v3   ;;  %3364 = vst [vmem:[%s4344_s4 + $0xd8] sm:$0xff] %v2965_v4  }
 0x113   :  { %3371 = vst [vmem:[%s4345_s5 + $0x18] sm:$0xff] %v3005_v7   ;;  %3395 = vst [vmem:[%s4345_s5 + $0xd8] sm:$0xff] %v3125_v8  }
 0x115   :  { %v749_v9 = vpop.f32.mrb[16].mxu0  ;;  %v989_v10 = vpop.f32.mrb[16].mxu1 }
 0x116   :  { %v751_v58 = vpop.f32.mrb[17].mxu0  ;;  %v991_v11 = vpop.f32.mrb[17].mxu1 }
 0x117   :  { %v753_v18 = vpop.f32.mrb[18].mxu0  ;;  %v993_v19 = vpop.f32.mrb[18].mxu1 }
 0x118   :  { %v2850_v17 = vpack.c.bf16 %v753_v18, %v749_v9  ;;  %v2970_v20 = vpack.c.bf16 %v993_v19, %v989_v10  ;;  %v755_v21 = vpop.f32.mrb[19].mxu0  ;;  %v995_v22 = vpop.f32.mrb[19].mxu1 }
 0x119   :  { %v3010_v59 = vpack.c.bf16 %v755_v21, %v751_v58  ;;  %v3130_v23 = vpack.c.bf16 %v995_v22, %v991_v11 }
 0x11a   :  { %3341 = vst [vmem:[%s4344_s4 + $0x20] sm:$0xff] %v2850_v17   ;;  %3365 = vst [vmem:[%s4344_s4 + $0xe0] sm:$0xff] %v2970_v20  }
 0x11b   :  { %3372 = vst [vmem:[%s4345_s5 + $0x20] sm:$0xff] %v3010_v59   ;;  %3396 = vst [vmem:[%s4345_s5 + $0xe0] sm:$0xff] %v3130_v23  }
 0x11d   :  { %v759_v24 = vpop.f32.mrb[20].mxu0  ;;  %v999_v25 = vpop.f32.mrb[20].mxu1 }
 0x11e   :  { %v761_v26 = vpop.f32.mrb[21].mxu0  ;;  %v1001_v27 = vpop.f32.mrb[21].mxu1 }
 0x11f   :  { %v763_v0 = vpop.f32.mrb[22].mxu0  ;;  %v1003_v33 = vpop.f32.mrb[22].mxu1 }
 0x120   :  { %v2855_v62 = vpack.c.bf16 %v763_v0, %v759_v24  ;;  %v2975_v31 = vpack.c.bf16 %v1003_v33, %v999_v25  ;;  %v765_v32 = vpop.f32.mrb[23].mxu0  ;;  %v1005_v29 = vpop.f32.mrb[23].mxu1 }
 0x121   :  { %v3015_v34 = vpack.c.bf16 %v765_v32, %v761_v26  ;;  %v3135_v28 = vpack.c.bf16 %v1005_v29, %v1001_v27 }
 0x122   :  { %3342 = vst [vmem:[%s4344_s4 + $0x28] sm:$0xff] %v2855_v62   ;;  %3366 = vst [vmem:[%s4344_s4 + $0xe8] sm:$0xff] %v2975_v31  }
 0x123   :  { %3373 = vst [vmem:[%s4345_s5 + $0x28] sm:$0xff] %v3015_v34   ;;  %3397 = vst [vmem:[%s4345_s5 + $0xe8] sm:$0xff] %v3135_v28  }
 0x125   :  { %v769_v30 = vpop.f32.mrb[24].mxu0  ;;  %v1009_v48 = vpop.f32.mrb[24].mxu1 }
 0x126   :  { %v771_v13 = vpop.f32.mrb[25].mxu0  ;;  %v1011_v35 = vpop.f32.mrb[25].mxu1 }
 0x127   :  { %v773_v1 = vpop.f32.mrb[26].mxu0  ;;  %v1013_v14 = vpop.f32.mrb[26].mxu1 }
 0x128   :  { %v2860_v40 = vpack.c.bf16 %v773_v1, %v769_v30  ;;  %v2980_v60 = vpack.c.bf16 %v1013_v14, %v1009_v48  ;;  %v775_v61 = vpop.f32.mrb[27].mxu0  ;;  %v1015_v36 = vpop.f32.mrb[27].mxu1 }
 0x129   :  { %v3020_v37 = vpack.c.bf16 %v775_v61, %v771_v13  ;;  %v3140_v38 = vpack.c.bf16 %v1015_v36, %v1011_v35 }
 0x12a   :  { %3343 = vst [vmem:[%s4344_s4 + $0x30] sm:$0xff] %v2860_v40   ;;  %3367 = vst [vmem:[%s4344_s4 + $0xf0] sm:$0xff] %v2980_v60  }
 0x12b   :  { %3374 = vst [vmem:[%s4345_s5 + $0x30] sm:$0xff] %v3020_v37   ;;  %3398 = vst [vmem:[%s4345_s5 + $0xf0] sm:$0xff] %v3140_v38  }
 0x12d   :  { %v779_v41 = vpop.f32.mrb[28].mxu0  ;;  %v1019_v42 = vpop.f32.mrb[28].mxu1 }
 0x12e   :  { %v781_v43 = vpop.f32.mrb[29].mxu0  ;;  %v1021_v15 = vpop.f32.mrb[29].mxu1 }
 0x12f   :  { %v783_v44 = vpop.f32.mrb[30].mxu0  ;;  %v1023_v45 = vpop.f32.mrb[30].mxu1 }
 0x130   :  { %v2865_v46 = vpack.c.bf16 %v783_v44, %v779_v41  ;;  %v2985_v49 = vpack.c.bf16 %v1023_v45, %v1019_v42  ;;  %v785_v16 = vpop.f32.mrb[31].mxu0  ;;  %v1025_v47 = vpop.f32.mrb[31].mxu1 }
 0x131   :  { %v3025_v50 = vpack.c.bf16 %v785_v16, %v781_v43  ;;  %v3145_v51 = vpack.c.bf16 %v1025_v47, %v1021_v15 }
 0x132   :  { %3344 = vst [vmem:[%s4344_s4 + $0x38] sm:$0xff] %v2865_v46   ;;  %3368 = vst [vmem:[%s4344_s4 + $0xf8] sm:$0xff] %v2985_v49  }
 0x133   :  { %3375 = vst [vmem:[%s4345_s5 + $0x38] sm:$0xff] %v3025_v50   ;;  %3399 = vst [vmem:[%s4345_s5 + $0xf8] sm:$0xff] %v3145_v51  }
 0x135   :  { %v789_v52 = vpop.f32.mrb[32].mxu0  ;;  %v3489_v53 = vpop.f32.mrb[32].mxu1 }
 0x136   :  { %v791_v54 = vpop.f32.mrb[33].mxu0  ;;  %v1062_v55 = vpop.f32.mrb[33].mxu1 }
 0x137   :  { %v793_v56 = vpop.f32.mrb[34].mxu0  ;;  %v3490_v57 = vpop.f32.mrb[34].mxu1 }
 0x138   :  { %v2870_v63 = vpack.c.bf16 %v793_v56, %v789_v52  ;;  %v3155_v2 = vpack.c.bf16 %v3490_v57, %v3489_v53  ;;  %v795_v12 = vpop.f32.mrb[35].mxu0  ;;  %v1065_v39 = vpop.f32.mrb[35].mxu1 }
 0x139   :  { %v3030_v3 = vpack.c.bf16 %v795_v12, %v791_v54  ;;  %v3150_v4 = vpack.c.bf16 %v1065_v39, %v1062_v55 }
 0x13a   :  { %3345 = vst [vmem:[%s4344_s4 + $0x40] sm:$0xff] %v2870_v63   ;;  %3400 = vst [vmem:[%s4346_s6 + $0x8] sm:$0xff] %v3155_v2  }
 0x13b   :  { %3376 = vst [vmem:[%s4345_s5 + $0x40] sm:$0xff] %v3030_v3   ;;  %3151 = vst [vmem:[%s4346_s6] sm:$0xff] %v3150_v4  }
 0x13d   :  { %v799_v5 = vpop.f32.mrb[36].mxu0  ;;  %v3493_v6 = vpop.f32.mrb[36].mxu1 }
 0x13e   :  { %v801_v7 = vpop.f32.mrb[37].mxu0  ;;  %v1078_v8 = vpop.f32.mrb[37].mxu1 }
 0x13f   :  { %v803_v9 = vpop.f32.mrb[38].mxu0  ;;  %v3494_v10 = vpop.f32.mrb[38].mxu1 }
 0x140   :  { %v2875_v58 = vpack.c.bf16 %v803_v9, %v799_v5  ;;  %v3165_v11 = vpack.c.bf16 %v3494_v10, %v3493_v6  ;;  %v805_v18 = vpop.f32.mrb[39].mxu0  ;;  %v1081_v19 = vpop.f32.mrb[39].mxu1 }
 0x141   :  { %v3035_v17 = vpack.c.bf16 %v805_v18, %v801_v7  ;;  %v3160_v20 = vpack.c.bf16 %v1081_v19, %v1078_v8 }
 0x142   :  { %3346 = vst [vmem:[%s4344_s4 + $0x48] sm:$0xff] %v2875_v58   ;;  %3402 = vst [vmem:[%s4346_s6 + $0x18] sm:$0xff] %v3165_v11  }
 0x143   :  { %3377 = vst [vmem:[%s4345_s5 + $0x48] sm:$0xff] %v3035_v17   ;;  %3401 = vst [vmem:[%s4346_s6 + $0x10] sm:$0xff] %v3160_v20  }
 0x145   :  { %v809_v21 = vpop.f32.mrb[40].mxu0  ;;  %v3497_v22 = vpop.f32.mrb[40].mxu1 }
 0x146   :  { %v811_v59 = vpop.f32.mrb[41].mxu0  ;;  %v1094_v23 = vpop.f32.mrb[41].mxu1 }
 0x147   :  { %v813_v24 = vpop.f32.mrb[42].mxu0  ;;  %v3498_v25 = vpop.f32.mrb[42].mxu1 }
 0x148   :  { %v2880_v26 = vpack.c.bf16 %v813_v24, %v809_v21  ;;  %v3175_v27 = vpack.c.bf16 %v3498_v25, %v3497_v22  ;;  %v815_v0 = vpop.f32.mrb[43].mxu0  ;;  %v1097_v33 = vpop.f32.mrb[43].mxu1 }
 0x149   :  { %v3040_v62 = vpack.c.bf16 %v815_v0, %v811_v59  ;;  %v3170_v31 = vpack.c.bf16 %v1097_v33, %v1094_v23 }
 0x14a   :  { %3347 = vst [vmem:[%s4344_s4 + $0x50] sm:$0xff] %v2880_v26   ;;  %3404 = vst [vmem:[%s4346_s6 + $0x28] sm:$0xff] %v3175_v27  }
 0x14b   :  { %3378 = vst [vmem:[%s4345_s5 + $0x50] sm:$0xff] %v3040_v62   ;;  %3403 = vst [vmem:[%s4346_s6 + $0x20] sm:$0xff] %v3170_v31  }
 0x14d   :  { %v819_v32 = vpop.f32.mrb[44].mxu0  ;;  %v3501_v29 = vpop.f32.mrb[44].mxu1 }
 0x14e   :  { %v821_v34 = vpop.f32.mrb[45].mxu0  ;;  %v1110_v28 = vpop.f32.mrb[45].mxu1 }
 0x14f   :  { %v823_v30 = vpop.f32.mrb[46].mxu0  ;;  %v3502_v48 = vpop.f32.mrb[46].mxu1 }
 0x150   :  { %v2885_v13 = vpack.c.bf16 %v823_v30, %v819_v32  ;;  %v3185_v35 = vpack.c.bf16 %v3502_v48, %v3501_v29  ;;  %v825_v1 = vpop.f32.mrb[47].mxu0  ;;  %v1113_v14 = vpop.f32.mrb[47].mxu1 }
 0x151   :  { %v3045_v40 = vpack.c.bf16 %v825_v1, %v821_v34  ;;  %v3180_v60 = vpack.c.bf16 %v1113_v14, %v1110_v28 }
 0x152   :  { %3348 = vst [vmem:[%s4344_s4 + $0x58] sm:$0xff] %v2885_v13   ;;  %3406 = vst [vmem:[%s4346_s6 + $0x38] sm:$0xff] %v3185_v35  }
 0x153   :  { %3379 = vst [vmem:[%s4345_s5 + $0x58] sm:$0xff] %v3045_v40   ;;  %3405 = vst [vmem:[%s4346_s6 + $0x30] sm:$0xff] %v3180_v60  }
 0x155   :  { %v829_v61 = vpop.f32.mrb[48].mxu0  ;;  %v3505_v36 = vpop.f32.mrb[48].mxu1 }
 0x156   :  { %v831_v37 = vpop.f32.mrb[49].mxu0  ;;  %v1126_v38 = vpop.f32.mrb[49].mxu1 }
 0x157   :  { %v833_v41 = vpop.f32.mrb[50].mxu0  ;;  %v3506_v42 = vpop.f32.mrb[50].mxu1 }
 0x158   :  { %v2890_v43 = vpack.c.bf16 %v833_v41, %v829_v61  ;;  %v3195_v15 = vpack.c.bf16 %v3506_v42, %v3505_v36  ;;  %v835_v44 = vpop.f32.mrb[51].mxu0  ;;  %v1129_v45 = vpop.f32.mrb[51].mxu1 }
 0x159   :  { %v3050_v46 = vpack.c.bf16 %v835_v44, %v831_v37  ;;  %v3190_v49 = vpack.c.bf16 %v1129_v45, %v1126_v38 }
 0x15a   :  { %3349 = vst [vmem:[%s4344_s4 + $0x60] sm:$0xff] %v2890_v43   ;;  %3408 = vst [vmem:[%s4346_s6 + $0x48] sm:$0xff] %v3195_v15  }
 0x15b   :  { %3380 = vst [vmem:[%s4345_s5 + $0x60] sm:$0xff] %v3050_v46   ;;  %3407 = vst [vmem:[%s4346_s6 + $0x40] sm:$0xff] %v3190_v49  }
 0x15d   :  { %v839_v16 = vpop.f32.mrb[52].mxu0  ;;  %v3509_v47 = vpop.f32.mrb[52].mxu1 }
 0x15e   :  { %v841_v50 = vpop.f32.mrb[53].mxu0  ;;  %v1142_v51 = vpop.f32.mrb[53].mxu1 }
 0x15f   :  { %v843_v52 = vpop.f32.mrb[54].mxu0  ;;  %v3510_v53 = vpop.f32.mrb[54].mxu1 }
 0x160   :  { %v2895_v54 = vpack.c.bf16 %v843_v52, %v839_v16  ;;  %v3205_v55 = vpack.c.bf16 %v3510_v53, %v3509_v47  ;;  %v845_v56 = vpop.f32.mrb[55].mxu0  ;;  %v1145_v57 = vpop.f32.mrb[55].mxu1 }
 0x161   :  { %v3055_v63 = vpack.c.bf16 %v845_v56, %v841_v50  ;;  %v3200_v2 = vpack.c.bf16 %v1145_v57, %v1142_v51 }
 0x162   :  { %3350 = vst [vmem:[%s4344_s4 + $0x68] sm:$0xff] %v2895_v54   ;;  %3410 = vst [vmem:[%s4346_s6 + $0x58] sm:$0xff] %v3205_v55  }
 0x163   :  { %3381 = vst [vmem:[%s4345_s5 + $0x68] sm:$0xff] %v3055_v63   ;;  %3409 = vst [vmem:[%s4346_s6 + $0x50] sm:$0xff] %v3200_v2  }
 0x165   :  { %v849_v12 = vpop.f32.mrb[56].mxu0  ;;  %v3513_v39 = vpop.f32.mrb[56].mxu1 }
 0x166   :  { %v851_v3 = vpop.f32.mrb[57].mxu0  ;;  %v1158_v4 = vpop.f32.mrb[57].mxu1 }
 0x167   :  { %v853_v5 = vpop.f32.mrb[58].mxu0  ;;  %v3514_v6 = vpop.f32.mrb[58].mxu1 }
 0x168   :  { %v2900_v7 = vpack.c.bf16 %v853_v5, %v849_v12  ;;  %v3215_v8 = vpack.c.bf16 %v3514_v6, %v3513_v39  ;;  %v855_v9 = vpop.f32.mrb[59].mxu0  ;;  %v1161_v10 = vpop.f32.mrb[59].mxu1 }
 0x169   :  { %v3060_v58 = vpack.c.bf16 %v855_v9, %v851_v3  ;;  %v3210_v11 = vpack.c.bf16 %v1161_v10, %v1158_v4 }
 0x16a   :  { %3351 = vst [vmem:[%s4344_s4 + $0x70] sm:$0xff] %v2900_v7   ;;  %3412 = vst [vmem:[%s4346_s6 + $0x68] sm:$0xff] %v3215_v8  }
 0x16b   :  { %3382 = vst [vmem:[%s4345_s5 + $0x70] sm:$0xff] %v3060_v58   ;;  %3411 = vst [vmem:[%s4346_s6 + $0x60] sm:$0xff] %v3210_v11  }
 0x16d   :  { %v859_v18 = vpop.f32.mrb[60].mxu0  ;;  %v3517_v19 = vpop.f32.mrb[60].mxu1 }
 0x16e   :  { %v861_v17 = vpop.f32.mrb[61].mxu0  ;;  %v1174_v20 = vpop.f32.mrb[61].mxu1 }
 0x16f   :  { %v863_v21 = vpop.f32.mrb[62].mxu0  ;;  %v3518_v22 = vpop.f32.mrb[62].mxu1 }
 0x170   :  { %v2905_v59 = vpack.c.bf16 %v863_v21, %v859_v18  ;;  %v3225_v23 = vpack.c.bf16 %v3518_v22, %v3517_v19  ;;  %v865_v24 = vpop.f32.mrb[63].mxu0  ;;  %v1177_v25 = vpop.f32.mrb[63].mxu1 }
 0x171   :  { %v3065_v26 = vpack.c.bf16 %v865_v24, %v861_v17  ;;  %v3220_v27 = vpack.c.bf16 %v1177_v25, %v1174_v20 }
 0x172   :  { %3352 = vst [vmem:[%s4344_s4 + $0x78] sm:$0xff] %v2905_v59   ;;  %3414 = vst [vmem:[%s4346_s6 + $0x78] sm:$0xff] %v3225_v23  }
 0x173   :  { %3383 = vst [vmem:[%s4345_s5 + $0x78] sm:$0xff] %v3065_v26   ;;  %3413 = vst [vmem:[%s4346_s6 + $0x70] sm:$0xff] %v3220_v27  }
 0x175   :  { %v869_v0 = vpop.f32.mrb[64].mxu0  ;;  %v3521_v33 = vpop.f32.mrb[64].mxu1 }
 0x176   :  { %v871_v62 = vpop.f32.mrb[65].mxu0  ;;  %v1190_v31 = vpop.f32.mrb[65].mxu1 }
 0x177   :  { %v873_v32 = vpop.f32.mrb[66].mxu0  ;;  %v3522_v29 = vpop.f32.mrb[66].mxu1 }
 0x178   :  { %v2910_v34 = vpack.c.bf16 %v873_v32, %v869_v0  ;;  %v3235_v28 = vpack.c.bf16 %v3522_v29, %v3521_v33  ;;  %v875_v30 = vpop.f32.mrb[67].mxu0  ;;  %v1193_v48 = vpop.f32.mrb[67].mxu1 }
 0x179   :  { %v3070_v13 = vpack.c.bf16 %v875_v30, %v871_v62  ;;  %v3230_v35 = vpack.c.bf16 %v1193_v48, %v1190_v31 }
 0x17a   :  { %3353 = vst [vmem:[%s4344_s4 + $0x80] sm:$0xff] %v2910_v34   ;;  %3416 = vst [vmem:[%s4346_s6 + $0x88] sm:$0xff] %v3235_v28  }
 0x17b   :  { %3384 = vst [vmem:[%s4345_s5 + $0x80] sm:$0xff] %v3070_v13   ;;  %3415 = vst [vmem:[%s4346_s6 + $0x80] sm:$0xff] %v3230_v35  }
 0x17d   :  { %v879_v1 = vpop.f32.mrb[68].mxu0  ;;  %v3525_v14 = vpop.f32.mrb[68].mxu1 }
 0x17e   :  { %v881_v40 = vpop.f32.mrb[69].mxu0  ;;  %v1206_v60 = vpop.f32.mrb[69].mxu1 }
 0x17f   :  { %v883_v61 = vpop.f32.mrb[70].mxu0  ;;  %v3526_v36 = vpop.f32.mrb[70].mxu1 }
 0x180   :  { %v2915_v37 = vpack.c.bf16 %v883_v61, %v879_v1  ;;  %v3245_v38 = vpack.c.bf16 %v3526_v36, %v3525_v14  ;;  %v885_v41 = vpop.f32.mrb[71].mxu0  ;;  %v1209_v42 = vpop.f32.mrb[71].mxu1 }
 0x181   :  { %v3075_v43 = vpack.c.bf16 %v885_v41, %v881_v40  ;;  %v3240_v15 = vpack.c.bf16 %v1209_v42, %v1206_v60 }
 0x182   :  { %3354 = vst [vmem:[%s4344_s4 + $0x88] sm:$0xff] %v2915_v37   ;;  %3418 = vst [vmem:[%s4346_s6 + $0x98] sm:$0xff] %v3245_v38  }
 0x183   :  { %3385 = vst [vmem:[%s4345_s5 + $0x88] sm:$0xff] %v3075_v43   ;;  %3417 = vst [vmem:[%s4346_s6 + $0x90] sm:$0xff] %v3240_v15  }
 0x185   :  { %v889_v44 = vpop.f32.mrb[72].mxu0  ;;  %v3529_v45 = vpop.f32.mrb[72].mxu1 }
 0x186   :  { %v891_v46 = vpop.f32.mrb[73].mxu0  ;;  %v1222_v49 = vpop.f32.mrb[73].mxu1 }
 0x187   :  { %v893_v16 = vpop.f32.mrb[74].mxu0  ;;  %v3530_v47 = vpop.f32.mrb[74].mxu1 }
 0x188   :  { %v2920_v50 = vpack.c.bf16 %v893_v16, %v889_v44  ;;  %v3255_v51 = vpack.c.bf16 %v3530_v47, %v3529_v45  ;;  %v895_v52 = vpop.f32.mrb[75].mxu0  ;;  %v1225_v53 = vpop.f32.mrb[75].mxu1 }
 0x189   :  { %v3080_v54 = vpack.c.bf16 %v895_v52, %v891_v46  ;;  %v3250_v55 = vpack.c.bf16 %v1225_v53, %v1222_v49 }
 0x18a   :  { %3355 = vst [vmem:[%s4344_s4 + $0x90] sm:$0xff] %v2920_v50   ;;  %3420 = vst [vmem:[%s4346_s6 + $0xa8] sm:$0xff] %v3255_v51  }
 0x18b   :  { %3386 = vst [vmem:[%s4345_s5 + $0x90] sm:$0xff] %v3080_v54   ;;  %3419 = vst [vmem:[%s4346_s6 + $0xa0] sm:$0xff] %v3250_v55  }
 0x18d   :  { %v899_v56 = vpop.f32.mrb[76].mxu0  ;;  %v3533_v57 = vpop.f32.mrb[76].mxu1 }
 0x18e   :  { %v901_v63 = vpop.f32.mrb[77].mxu0  ;;  %v1238_v2 = vpop.f32.mrb[77].mxu1 }
 0x18f   :  { %v903_v12 = vpop.f32.mrb[78].mxu0  ;;  %v3534_v39 = vpop.f32.mrb[78].mxu1 }
 0x190   :  { %v2925_v3 = vpack.c.bf16 %v903_v12, %v899_v56  ;;  %v3265_v4 = vpack.c.bf16 %v3534_v39, %v3533_v57  ;;  %v905_v5 = vpop.f32.mrb[79].mxu0  ;;  %v1241_v6 = vpop.f32.mrb[79].mxu1 }
 0x191   :  { %v3085_v7 = vpack.c.bf16 %v905_v5, %v901_v63  ;;  %v3260_v8 = vpack.c.bf16 %v1241_v6, %v1238_v2 }
 0x192   :  { %3356 = vst [vmem:[%s4344_s4 + $0x98] sm:$0xff] %v2925_v3   ;;  %3422 = vst [vmem:[%s4346_s6 + $0xb8] sm:$0xff] %v3265_v4  }
 0x193   :  { %3387 = vst [vmem:[%s4345_s5 + $0x98] sm:$0xff] %v3085_v7   ;;  %3421 = vst [vmem:[%s4346_s6 + $0xb0] sm:$0xff] %v3260_v8  }
 0x195   :  { %v909_v9 = vpop.f32.mrb[80].mxu0  ;;  %v3537_v10 = vpop.f32.mrb[80].mxu1 }
 0x196   :  { %v911_v58 = vpop.f32.mrb[81].mxu0  ;;  %v1254_v11 = vpop.f32.mrb[81].mxu1 }
 0x197   :  { %v913_v18 = vpop.f32.mrb[82].mxu0  ;;  %v3538_v19 = vpop.f32.mrb[82].mxu1 }
 0x198   :  { %v2930_v17 = vpack.c.bf16 %v913_v18, %v909_v9  ;;  %v3275_v20 = vpack.c.bf16 %v3538_v19, %v3537_v10  ;;  %v915_v21 = vpop.f32.mrb[83].mxu0  ;;  %v1257_v22 = vpop.f32.mrb[83].mxu1 }
 0x199   :  { %v3090_v59 = vpack.c.bf16 %v915_v21, %v911_v58  ;;  %v3270_v23 = vpack.c.bf16 %v1257_v22, %v1254_v11 }
 0x19a   :  { %3357 = vst [vmem:[%s4344_s4 + $0xa0] sm:$0xff] %v2930_v17   ;;  %3424 = vst [vmem:[%s4346_s6 + $0xc8] sm:$0xff] %v3275_v20  }
 0x19b   :  { %3388 = vst [vmem:[%s4345_s5 + $0xa0] sm:$0xff] %v3090_v59   ;;  %3423 = vst [vmem:[%s4346_s6 + $0xc0] sm:$0xff] %v3270_v23  }
 0x19d   :  { %v919_v24 = vpop.f32.mrb[84].mxu0  ;;  %v3541_v25 = vpop.f32.mrb[84].mxu1 }
 0x19e   :  { %v921_v26 = vpop.f32.mrb[85].mxu0  ;;  %v1270_v27 = vpop.f32.mrb[85].mxu1 }
 0x19f   :  { %v923_v0 = vpop.f32.mrb[86].mxu0  ;;  %v3542_v33 = vpop.f32.mrb[86].mxu1 }
 0x1a0   :  { %v2935_v62 = vpack.c.bf16 %v923_v0, %v919_v24  ;;  %v3285_v31 = vpack.c.bf16 %v3542_v33, %v3541_v25  ;;  %v925_v32 = vpop.f32.mrb[87].mxu0  ;;  %v1273_v29 = vpop.f32.mrb[87].mxu1 }
 0x1a1   :  { %v3095_v34 = vpack.c.bf16 %v925_v32, %v921_v26  ;;  %v3280_v28 = vpack.c.bf16 %v1273_v29, %v1270_v27 }
 0x1a2   :  { %3358 = vst [vmem:[%s4344_s4 + $0xa8] sm:$0xff] %v2935_v62   ;;  %3426 = vst [vmem:[%s4346_s6 + $0xd8] sm:$0xff] %v3285_v31  }
 0x1a3   :  { %3389 = vst [vmem:[%s4345_s5 + $0xa8] sm:$0xff] %v3095_v34   ;;  %3425 = vst [vmem:[%s4346_s6 + $0xd0] sm:$0xff] %v3280_v28  }
 0x1a5   :  { %v929_v30 = vpop.f32.mrb[88].mxu0  ;;  %v3545_v48 = vpop.f32.mrb[88].mxu1 }
 0x1a6   :  { %v931_v13 = vpop.f32.mrb[89].mxu0  ;;  %v1286_v35 = vpop.f32.mrb[89].mxu1 }
 0x1a7   :  { %v933_v1 = vpop.f32.mrb[90].mxu0  ;;  %v3546_v14 = vpop.f32.mrb[90].mxu1 }
 0x1a8   :  { %v2940_v40 = vpack.c.bf16 %v933_v1, %v929_v30  ;;  %v3295_v60 = vpack.c.bf16 %v3546_v14, %v3545_v48  ;;  %v935_v61 = vpop.f32.mrb[91].mxu0  ;;  %v1289_v36 = vpop.f32.mrb[91].mxu1 }
 0x1a9   :  { %v3100_v37 = vpack.c.bf16 %v935_v61, %v931_v13  ;;  %v3290_v38 = vpack.c.bf16 %v1289_v36, %v1286_v35 }
 0x1aa   :  { %3359 = vst [vmem:[%s4344_s4 + $0xb0] sm:$0xff] %v2940_v40   ;;  %3428 = vst [vmem:[%s4346_s6 + $0xe8] sm:$0xff] %v3295_v60  }
 0x1ab   :  { %3390 = vst [vmem:[%s4345_s5 + $0xb0] sm:$0xff] %v3100_v37   ;;  %3427 = vst [vmem:[%s4346_s6 + $0xe0] sm:$0xff] %v3290_v38  }
 0x1ad   :  { %v939_v41 = vpop.f32.mrb[92].mxu0  ;;  %v3549_v42 = vpop.f32.mrb[92].mxu1 }
 0x1ae   :  { %v941_v43 = vpop.f32.mrb[93].mxu0  ;;  %v1302_v15 = vpop.f32.mrb[93].mxu1 }
 0x1af   :  { %v943_v44 = vpop.f32.mrb[94].mxu0  ;;  %v3550_v45 = vpop.f32.mrb[94].mxu1 }
 0x1b0   :  { %v2945_v46 = vpack.c.bf16 %v943_v44, %v939_v41  ;;  %v3305_v49 = vpack.c.bf16 %v3550_v45, %v3549_v42  ;;  %v945_v16 = vpop.f32.mrb[95].mxu0  ;;  %v1305_v47 = vpop.f32.mrb[95].mxu1 }
 0x1b1   :  { %v3105_v50 = vpack.c.bf16 %v945_v16, %v941_v43  ;;  %v3300_v51 = vpack.c.bf16 %v1305_v47, %v1302_v15 }
 0x1b2   :  { %3360 = vst [vmem:[%s4344_s4 + $0xb8] sm:$0xff] %v2945_v46   ;;  %3430 = vst [vmem:[%s4346_s6 + $0xf8] sm:$0xff] %v3305_v49  }
 0x1b3   :  { %3391 = vst [vmem:[%s4345_s5 + $0xb8] sm:$0xff] %v3105_v50   ;;  %3429 = vst [vmem:[%s4346_s6 + $0xf0] sm:$0xff] %v3300_v51  }

// kernel: sa_module_pct_forward.9
= control target key start
LH: loop header
LB: loop body
LE: loop exit
PB: predicated region body
PF: predicated region fallthrough
CT: control target
= control target key end

     0   :  { %s3025_s15 = smov 0   ;;  %s3027_s16 = smov 0   ;;  %s4062_s0 = inlined_call_operand.vmem [shape: bf16[512,128], index: 0, kind: input, shape index: {}]   ;;  %s4063_s1 = inlined_call_operand.vmem [shape: bf16[512,128], index: 1, kind: input, shape index: {}]   ;;  %s4064_s2 = inlined_call_operand.vmem [shape: bf16[512,128], index: 2, kind: input, shape index: {}]   ;;  %s4065_s3 = inlined_call_operand.vmem [shape: f32[512,1], index: 3, kind: input, shape index: {}]   ;;  %s4066_s4 = inlined_call_operand.vmem [shape: f32[512,128], index: 4, kind: output, shape index: {}]  }
   0x1   :  { %s3029_s17 = smov 0   ;;  %s3031_s18 = smov 0  }
   0x2   :  { %s3033_s19 = smov 0  }
   0x3 LB: > { %s23_s20 = sadd.s32 1, %s2986_s17  ;;  %s26_s21 = sadd.s32 1, %s2990_s18  ;;  %s2994_s19 = sphi %s3033_s19, %s14_s19   ;;  %s2990_s18 = sphi %s3031_s18, %s4186_s18   ;;  %s2986_s17 = sphi %s3029_s17, %s4185_s17   ;;  %s2982_s16 = sphi %s3027_s16, %s4184_s16   ;;  %s2978_s15 = sphi %s3025_s15, %s4183_s15  }
   0x4   : > { %p24_p0 = scmp.ge.s32.totalorder %s23_s20, 2  ;;  %p2555_p1 = scmp.ge.s32.totalorder %s2994_s19, 1 }
   0x5   : > { %p208_p2 = scmp.lt.s32.totalorder %s2994_s19, 5 }
   0x6   : > { %s4188_s20 = smov (%p24_p0, %s23_s20), 0  ;;  %s4190_s21 = smov (!%p24_p0, %s26_s21), %s2990_s18 }
   0x7   : > { %p209_p3 = pnand %p2555_p1, %p208_p2  ;;  %p28_p4 = scmp.ge.s32.totalorder %s4190_s21, 2 }
   0x8   : > { %s2556_s22 = sshll.u32 (!%p209_p3), %s2978_s15, 5  ;;  %s2558_s23 = sshll.u32 (!%p209_p3), %s2982_s16, 5 }
   0x9   : > { %s4192_s21 = smov (%p28_p4, %s4190_s21), 0  ;;  %212 = sbr.rel (%p209_p3) target bundleno = 1056 (0x420), region = 36 }
   0xa   : > { %p250_p5 = scmp.lt.s32.totalorder (!%p209_p3), %s2556_s22, 63  ;;  %p256_p6 = scmp.lt.s32.totalorder (!%p209_p3), %s2558_s23, 63 }
   0xb   : > { %p2566_p7 = scmp.ne.s32.totalorder (!%p209_p3), %s2978_s15, 0 }
  0x10   : > { %s4194_s22 = smov (!%p250_p5, %s2556_s22), 63  ;;  %s4196_s23 = smov (!%p256_p6, %s2558_s23), 63 }
  0x11   : > { %s2557_s24 = sshll.u32 %s4194_s22, 2  ;;  %s2563_s25 = sshll.u32 %s4194_s22, 3  ;;  %v2996_v0 = vmov (!%p2566_p7), 0.0   ;;  %v2997_v1 = vmov (!%p2566_p7), 1065369472  }
  0x12   : > { %s3064_s28 = scalar_lea.vmem %s4062_s0, %s2557_s24  ;;  %s2559_s29 = sshll.u32 %s4196_s23, 2  ;;  %285 = vst [vmem:[#allocation2] sm:$0xff] (!%p2566_p7), %v2996_v0  ;;  %286 = vst [vmem:[#allocation2 + $0x8] sm:$0xff] (!%p2566_p7), %v2996_v0 }
  0x13   : > { %s3069_s6 = scalar_lea.vmem %s4063_s1, %s2559_s29  ;;  %s3074_s9 = scalar_lea.vmem %s4064_s2, %s2557_s24  ;;  %287 = vst [vmem:[#allocation2 + $0x10] sm:$0xff] (!%p2566_p7), %v2996_v0  ;;  %288 = vst [vmem:[#allocation2 + $0x18] sm:$0xff] (!%p2566_p7), %v2996_v0 }
  0x14   : > { %s3079_s12 = scalar_lea.vmem %s4065_s3, %s2563_s25  ;;  %s2565_s13 = sshll.u32 %s4196_s23, 3  ;;  %289 = vst [vmem:[#allocation2 + $0x20] sm:$0xff] (!%p2566_p7), %v2996_v0  ;;  %290 = vst [vmem:[#allocation2 + $0x28] sm:$0xff] (!%p2566_p7), %v2996_v0 }
  0x15   : > { %s3084_s26 = scalar_lea.vmem %s4066_s4, %s2565_s13  ;;  %284 = sbr.rel (%p2566_p7) target bundleno = 58 (0x3a), region = 40  ;;  %291 = vst [vmem:[#allocation2 + $0x30] sm:$0xff] (!%p2566_p7), %v2996_v0  ;;  %292 = vst [vmem:[#allocation2 + $0x38] sm:$0xff] (!%p2566_p7), %v2996_v0 }
  0x16   : > { %293 = vst [vmem:[#allocation2 + $0x40] sm:$0xff] (!%p2566_p7), %v2996_v0  ;;  %294 = vst [vmem:[#allocation2 + $0x48] sm:$0xff] (!%p2566_p7), %v2996_v0 }
  0x17   : > { %295 = vst [vmem:[#allocation2 + $0x50] sm:$0xff] (!%p2566_p7), %v2996_v0  ;;  %296 = vst [vmem:[#allocation2 + $0x58] sm:$0xff] (!%p2566_p7), %v2996_v0 }
  0x18   : > { %297 = vst [vmem:[#allocation2 + $0x60] sm:$0xff] (!%p2566_p7), %v2996_v0  ;;  %298 = vst [vmem:[#allocation2 + $0x68] sm:$0xff] (!%p2566_p7), %v2996_v0 }
  0x19   : > { %299 = vst [vmem:[#allocation2 + $0x70] sm:$0xff] (!%p2566_p7), %v2996_v0  ;;  %300 = vst [vmem:[#allocation2 + $0x78] sm:$0xff] (!%p2566_p7), %v2996_v0 }
  0x1a   : > { %301 = vst [vmem:[#allocation2 + $0x80] sm:$0xff] (!%p2566_p7), %v2996_v0  ;;  %302 = vst [vmem:[#allocation2 + $0x88] sm:$0xff] (!%p2566_p7), %v2996_v0 }
  0x1b   : > { %303 = vst [vmem:[#allocation2 + $0x90] sm:$0xff] (!%p2566_p7), %v2996_v0  ;;  %304 = vst [vmem:[#allocation2 + $0x98] sm:$0xff] (!%p2566_p7), %v2996_v0 }
  0x1c   : > { %305 = vst [vmem:[#allocation2 + $0xa0] sm:$0xff] %v2996_v0  ;;  %306 = vst [vmem:[#allocation2 + $0xa8] sm:$0xff] %v2996_v0 }
  0x1d   : > { %307 = vst [vmem:[#allocation2 + $0xb0] sm:$0xff] %v2996_v0  ;;  %308 = vst [vmem:[#allocation2 + $0xb8] sm:$0xff] %v2996_v0 }
  0x1e   : > { %309 = vst [vmem:[#allocation2 + $0xc0] sm:$0xff] %v2996_v0  ;;  %310 = vst [vmem:[#allocation2 + $0xc8] sm:$0xff] %v2996_v0 }
  0x1f   : > { %311 = vst [vmem:[#allocation2 + $0xd0] sm:$0xff] %v2996_v0  ;;  %312 = vst [vmem:[#allocation2 + $0xd8] sm:$0xff] %v2996_v0 }
  0x20   : > { %313 = vst [vmem:[#allocation2 + $0xe0] sm:$0xff] %v2996_v0  ;;  %314 = vst [vmem:[#allocation2 + $0xe8] sm:$0xff] %v2996_v0 }
  0x21   : > { %315 = vst [vmem:[#allocation2 + $0xf0] sm:$0xff] %v2996_v0  ;;  %316 = vst [vmem:[#allocation2 + $0xf8] sm:$0xff] %v2996_v0 }
  0x22   : > { %317 = vst [vmem:[#allocation2 + $0x100] sm:$0xff] %v2996_v0  ;;  %318 = vst [vmem:[#allocation2 + $0x108] sm:$0xff] %v2996_v0 }
  0x23   : > { %319 = vst [vmem:[#allocation2 + $0x110] sm:$0xff] %v2996_v0  ;;  %320 = vst [vmem:[#allocation2 + $0x118] sm:$0xff] %v2996_v0 }
  0x24   : > { %321 = vst [vmem:[#allocation2 + $0x120] sm:$0xff] %v2996_v0  ;;  %322 = vst [vmem:[#allocation2 + $0x128] sm:$0xff] %v2996_v0 }
  0x25   : > { %323 = vst [vmem:[#allocation2 + $0x130] sm:$0xff] %v2996_v0  ;;  %324 = vst [vmem:[#allocation2 + $0x138] sm:$0xff] %v2996_v0 }
  0x26   : > { %325 = vst [vmem:[#allocation2 + $0x140] sm:$0xff] %v2996_v0  ;;  %326 = vst [vmem:[#allocation2 + $0x148] sm:$0xff] %v2996_v0 }
  0x27   : > { %327 = vst [vmem:[#allocation2 + $0x150] sm:$0xff] %v2996_v0  ;;  %328 = vst [vmem:[#allocation2 + $0x158] sm:$0xff] %v2996_v0 }
  0x28   : > { %329 = vst [vmem:[#allocation2 + $0x160] sm:$0xff] %v2996_v0  ;;  %330 = vst [vmem:[#allocation2 + $0x168] sm:$0xff] %v2996_v0 }
  0x29   : > { %331 = vst [vmem:[#allocation2 + $0x170] sm:$0xff] %v2996_v0  ;;  %332 = vst [vmem:[#allocation2 + $0x178] sm:$0xff] %v2996_v0 }
  0x2a   : > { %333 = vst [vmem:[#allocation2 + $0x180] sm:$0xff] %v2996_v0  ;;  %334 = vst [vmem:[#allocation2 + $0x188] sm:$0xff] %v2996_v0 }
  0x2b   : > { %335 = vst [vmem:[#allocation2 + $0x190] sm:$0xff] %v2996_v0  ;;  %336 = vst [vmem:[#allocation2 + $0x198] sm:$0xff] %v2996_v0 }
  0x2c   : > { %337 = vst [vmem:[#allocation2 + $0x1a0] sm:$0xff] %v2996_v0  ;;  %338 = vst [vmem:[#allocation2 + $0x1a8] sm:$0xff] %v2996_v0 }
  0x2d   : > { %339 = vst [vmem:[#allocation2 + $0x1b0] sm:$0xff] %v2996_v0  ;;  %340 = vst [vmem:[#allocation2 + $0x1b8] sm:$0xff] %v2996_v0 }
  0x2e   : > { %341 = vst [vmem:[#allocation2 + $0x1c0] sm:$0xff] %v2996_v0  ;;  %342 = vst [vmem:[#allocation2 + $0x1c8] sm:$0xff] %v2996_v0 }
  0x2f   : > { %343 = vst [vmem:[#allocation2 + $0x1d0] sm:$0xff] %v2996_v0  ;;  %344 = vst [vmem:[#allocation2 + $0x1d8] sm:$0xff] %v2996_v0 }
  0x30   : > { %345 = vst [vmem:[#allocation2 + $0x1e0] sm:$0xff] %v2996_v0  ;;  %346 = vst [vmem:[#allocation2 + $0x1e8] sm:$0xff] %v2996_v0 }
  0x31   : > { %347 = vst [vmem:[#allocation2 + $0x1f0] sm:$0xff] %v2996_v0  ;;  %348 = vst [vmem:[#allocation2 + $0x1f8] sm:$0xff] %v2996_v0 }
  0x32   : > { %349 = vst [vmem:[#allocation3 + $0x8] sm:$0xff] %v2997_v1  ;;  %350 = vst [vmem:[#allocation3 + $0x18] sm:$0xff] %v2997_v1 }
  0x33   : > { %351 = vst [vmem:[#allocation3 + $0x28] sm:$0xff] %v2997_v1  ;;  %352 = vst [vmem:[#allocation3 + $0x38] sm:$0xff] %v2997_v1 }
  0x34   : > { %353 = vst [vmem:[#allocation3 + $0x48] sm:$0xff] %v2997_v1  ;;  %354 = vst [vmem:[#allocation3 + $0x58] sm:$0xff] %v2997_v1 }
  0x35   : > { %355 = vst [vmem:[#allocation3 + $0x68] sm:$0xff] %v2997_v1  ;;  %356 = vst [vmem:[#allocation3 + $0x78] sm:$0xff] %v2997_v1 }
  0x36   : > { %357 = vst [vmem:[#allocation3 + $0x88] sm:$0xff] %v2997_v1  ;;  %358 = vst [vmem:[#allocation3 + $0x98] sm:$0xff] %v2997_v1 }
  0x37   : > { %359 = vst [vmem:[#allocation3 + $0xa8] sm:$0xff] %v2997_v1  ;;  %360 = vst [vmem:[#allocation3 + $0xb8] sm:$0xff] %v2997_v1 }
  0x38   : > { %361 = vst [vmem:[#allocation3 + $0xc8] sm:$0xff] %v2997_v1  ;;  %362 = vst [vmem:[#allocation3 + $0xd8] sm:$0xff] %v2997_v1 }
  0x39   : > { %363 = vst [vmem:[#allocation3 + $0xe8] sm:$0xff] %v2997_v1  ;;  %364 = vst [vmem:[#allocation3 + $0xf8] sm:$0xff] %v2997_v1 }
  0x3a PF: > { %v2714_v2 = vld [vmem:[%s3069_s6 + $0x40] sm:$0xff]   ;;  %v2716_v4 = vld [vmem:[%s3069_s6 + $0x48] sm:$0xff]   ;;  %v2718_v6 = vld [vmem:[%s3069_s6 + $0x50] sm:$0xff]   ;;  %v2998_v7 = vmov 0   ;;  %s2615_s23 = sshll.u32 %s2978_s15, 8  ;;  %s2616_s24 = sshll.u32 %s2982_s16, 8 }
  0x3b   : > { %v2715_v3 = vld [vmem:[%s3069_s6] sm:$0xff]   ;;  %2620 = vmatprep.subr.bf16.mxu0 %v2714_v2  ;;  %v2717_v5 = vld [vmem:[%s3069_s6 + $0x8] sm:$0xff]   ;;  %2712 = vset.pattern.permute.xlu0 %v2998_v7  ;;  %v2719_v8 = vld [vmem:[%s3069_s6 + $0x10] sm:$0xff]   ;;  %p2617_p8 = scmp.ne.s32.totalorder %s2978_s15, 1 }
  0x3c   : > { %2621 = vmatpush3.bf16.xpose.msra.mxu0 %v2715_v3  ;;  %2713 = vset.pattern.permute.xlu1 %v2998_v7  ;;  %v2720_v9 = vld [vmem:[%s3069_s6 + $0x58] sm:$0xff]   ;;  %v3159_v10 = vld [vmem:[%s3064_s28] sm:$0xff]   ;;  %v975_v15 = vld [vmem:[%s3079_s12 + $0x88] sm:$0xff] }
  0x3d   : > { %2622 = vmatprep.subr.bf16.mxu0 %v2716_v4  ;;  %2636 = vmatprep.mubr.bf16.mxu0 %v3159_v10  ;;  %v2721_v11 = vld [vmem:[%s3069_s6 + $0x18] sm:$0xff]   ;;  %v2722_v12 = vld [vmem:[%s3069_s6 + $0x60] sm:$0xff]   ;;  %v959_v17 = vld [vmem:[%s3079_s12 + $0x8] sm:$0xff] }
  0x3e   : > { %v974_v13 = vld [vmem:[%s3079_s12 + $0x80] sm:$0xff]  ;;  %v2724_v18 = vld [vmem:[%s3069_s6 + $0x68] sm:$0xff]   ;;  %v976_v19 = vld [vmem:[%s3079_s12 + $0x90] sm:$0xff] }
  0x3f   : > { %v958_v14 = vld [vmem:[%s3079_s12] sm:$0xff]  ;;  %1072 = vperm.xlu0 %2712, %v974_v13   ;;  %v977_v20 = vld [vmem:[%s3079_s12 + $0x98] sm:$0xff]  ;;  %v960_v21 = vld [vmem:[%s3079_s12 + $0x10] sm:$0xff] }
  0x40   : > { %992 = vperm.xlu1 %2713, %v958_v14   ;;  %v2723_v16 = vld [vmem:[%s3069_s6 + $0x20] sm:$0xff]   ;;  %v961_v22 = vld [vmem:[%s3079_s12 + $0x18] sm:$0xff]  ;;  %v2725_v23 = vld [vmem:[%s3069_s6 + $0x28] sm:$0xff]   ;;  %v1343_v14 = vlaneseq }
  0x41   : > { %v2726_v24 = vld [vmem:[%s3069_s6 + $0x70] sm:$0xff]   ;;  %v978_v25 = vld [vmem:[%s3079_s12 + $0xa0] sm:$0xff]  ;;  %v979_v26 = vld [vmem:[%s3079_s12 + $0xa8] sm:$0xff] }
  0x42   : > { %v962_v27 = vld [vmem:[%s3079_s12 + $0x20] sm:$0xff]  ;;  %v963_v28 = vld [vmem:[%s3079_s12 + $0x28] sm:$0xff]  ;;  %v2727_v29 = vld [vmem:[%s3069_s6 + $0x30] sm:$0xff]  }
  0x43   : > { %1077 = vperm.xlu0 %2712, %v975_v15   ;;  %v2728_v30 = vld [vmem:[%s3069_s6 + $0x78] sm:$0xff]   ;;  %v980_v31 = vld [vmem:[%s3079_s12 + $0xb0] sm:$0xff]  ;;  %v982_v36 = vld [vmem:[%s3079_s12 + $0xc0] sm:$0xff] }
  0x44   : > { %2623 = vmatpush3.bf16.xpose.msra.mxu0 %v2717_v5  ;;  %997 = vperm.xlu1 %2713, %v959_v17   ;;  %v981_v32 = vld [vmem:[%s3079_s12 + $0xb8] sm:$0xff]  ;;  %v964_v33 = vld [vmem:[%s3079_s12 + $0x30] sm:$0xff]  ;;  %v983_v37 = vld [vmem:[%s3079_s12 + $0xc8] sm:$0xff] }
  0x45   : > { %2624 = vmatprep.subr.bf16.mxu0 %v2718_v6  ;;  %v965_v34 = vld [vmem:[%s3079_s12 + $0x38] sm:$0xff]  ;;  %v966_v38 = vld [vmem:[%s3079_s12 + $0x40] sm:$0xff]  ;;  %v967_v39 = vld [vmem:[%s3079_s12 + $0x48] sm:$0xff] }
  0x46   : > { %v2729_v35 = vld [vmem:[%s3069_s6 + $0x38] sm:$0xff]   ;;  %v2731_v40 = vld [vmem:[%s3064_s28 + $0x8] sm:$0xff]   ;;  %v984_v41 = vld [vmem:[%s3079_s12 + $0xd0] sm:$0xff] }
  0x47   : > { %1082 = vperm.xlu0 %2712, %v976_v19   ;;  %v985_v42 = vld [vmem:[%s3079_s12 + $0xd8] sm:$0xff]  ;;  %v968_v43 = vld [vmem:[%s3079_s12 + $0x50] sm:$0xff]  ;;  %v986_v46 = vld [vmem:[%s3079_s12 + $0xe0] sm:$0xff]  ;;  %v3238_v19 = vshrl.u32 %v1343_v14, 7 }
  0x48   : > { %1087 = vperm.xlu1 %2713, %v977_v20   ;;  %v969_v44 = vld [vmem:[%s3079_s12 + $0x58] sm:$0xff]  ;;  %v2732_v45 = vld [vmem:[%s3064_s28 + $0x10] sm:$0xff]   ;;  %v987_v47 = vld [vmem:[%s3079_s12 + $0xe8] sm:$0xff] }
  0x49   : > { %v970_v48 = vld [vmem:[%s3079_s12 + $0x60] sm:$0xff]  ;;  %v971_v49 = vld [vmem:[%s3079_s12 + $0x68] sm:$0xff]  ;;  %v2733_v50 = vld [vmem:[%s3064_s28 + $0x18] sm:$0xff]  }
  0x4a   : > { %v988_v51 = vld [vmem:[%s3079_s12 + $0xf0] sm:$0xff]  ;;  %v989_v52 = vld [vmem:[%s3079_s12 + $0xf8] sm:$0xff]  ;;  %v2734_v55 = vld [vmem:[%s3064_s28 + $0x20] sm:$0xff]  }
  0x4b   : > { %1002 = vperm.xlu0 %2712, %v960_v21   ;;  %v972_v53 = vld [vmem:[%s3079_s12 + $0x70] sm:$0xff]  ;;  %v973_v54 = vld [vmem:[%s3079_s12 + $0x78] sm:$0xff]  ;;  %v2735_v56 = vld [vmem:[%s3064_s28 + $0x28] sm:$0xff]  }
  0x4c   : > { %2625 = vmatpush3.bf16.xpose.msra.mxu0 %v2719_v8  ;;  %1007 = vperm.xlu1 %2713, %v961_v22   ;;  %v2736_v57 = vld [vmem:[%s3064_s28 + $0x30] sm:$0xff]   ;;  %v2737_v58 = vld [vmem:[%s3064_s28 + $0x38] sm:$0xff]   ;;  %v2738_v59 = vld [vmem:[%s3064_s28 + $0x40] sm:$0xff]  }
  0x4d   : > { %2626 = vmatprep.subr.bf16.mxu0 %v2720_v9  ;;  %v2739_v60 = vld [vmem:[%s3064_s28 + $0x48] sm:$0xff]   ;;  %v2740_v61 = vld [vmem:[%s3064_s28 + $0x50] sm:$0xff]   ;;  %v2741_v62 = vld [vmem:[%s3064_s28 + $0x58] sm:$0xff]  }
  0x4e   : > { %v2742_v63 = vld [vmem:[%s3064_s28 + $0x60] sm:$0xff]   ;;  %v2743_v0 = vld [vmem:[%s3064_s28 + $0x68] sm:$0xff]   ;;  %v2744_v1 = vld [vmem:[%s3064_s28 + $0x70] sm:$0xff]  }
  0x4f   : > { %1092 = vperm.xlu0 %2712, %v978_v25   ;;  %v2745_v2 = vld [vmem:[%s3064_s28 + $0x78] sm:$0xff]  }
  0x50   : > { %1097 = vperm.xlu1 %2713, %v979_v26  }
  0x53   : > { %1012 = vperm.xlu0 %2712, %v962_v27  }
  0x54   : > { %2627 = vmatpush3.bf16.xpose.msra.mxu0 %v2721_v11  ;;  %1017 = vperm.xlu1 %2713, %v963_v28  }
  0x55   : > { %2628 = vmatprep.subr.bf16.mxu0 %v2722_v12 }
  0x57   : > { %1102 = vperm.xlu0 %2712, %v980_v31  }
  0x58   : > { %1107 = vperm.xlu1 %2713, %v981_v32  }
  0x5b   : > { %1022 = vperm.xlu0 %2712, %v964_v33   ;;  %v1345_v33 = vadd.s32 8, %v3238_v19 }
  0x5c   : > { %2629 = vmatpush3.bf16.xpose.msra.mxu0 %v2723_v16  ;;  %1027 = vperm.xlu1 %2713, %v965_v34   ;;  %v1411_v16 = vand.u32 127, %v1343_v14  ;;  %v1349_v14 = vadd.s32 40, %v3238_v19 }
  0x5d   : > { %2630 = vmatprep.subr.bf16.mxu0 %v2724_v18 }
  0x5f   : > { %1112 = vperm.xlu0 %2712, %v982_v36  }
  0x60   : > { %1117 = vperm.xlu1 %2713, %v983_v37  }
  0x63   : > { %1032 = vperm.xlu0 %2712, %v966_v38  }
  0x64   : > { %2631 = vmatpush3.bf16.xpose.msra.mxu0 %v2725_v23  ;;  %1037 = vperm.xlu1 %2713, %v967_v39  }
  0x65   : > { %2632 = vmatprep.subr.bf16.mxu0 %v2726_v24  ;;  %v3241_v24 = vstv %s2615_s23 }
  0x66   : > { %v1377_v36 = vadd.s32 %v3241_v24, %v3238_v19 }
  0x67   : > { %1122 = vperm.xlu0 %2712, %v984_v41   ;;  %v1378_v41 = vadd.s32 %v3241_v24, %v1345_v33 }
  0x68   : > { %1127 = vperm.xlu1 %2713, %v985_v42   ;;  %vm1416_vm0 = vcmp.lt.s32.totalorder %v1377_v36, 200 }
  0x69   : > { %vm1417_vm3 = vcmp.lt.s32.totalorder %v1378_v41, 200  ;;  %v1675_v41 = vld [vmem:[#allocation3 + $0x8] sm:$0xff] }
  0x6a   : > { %1770 = vmatprep.subr.bf16.mxu1 %v1675_v41  ;;  %v2748_v41 = vld [vmem:[%s3074_s9 + $0x10] sm:$0xff]  }
  0x6b   : > { %1042 = vperm.xlu0 %2712, %v968_v43  }
  0x6c   : > { %2633 = vmatpush3.bf16.xpose.msra.mxu0 %v2727_v29  ;;  %1047 = vperm.xlu1 %2713, %v969_v44   ;;  %v1413_v29 = vstv %s2616_s24 }
  0x6d   : > { %2634 = vmatprep.subr.bf16.mxu0 %v2728_v30  ;;  %v1412_v30 = vadd.s32 128, %v1411_v16  ;;  %v3248_v37 = vadd.s32 %v1413_v29, %v1411_v16 }
  0x6f   : > { %1132 = vperm.xlu0 %2712, %v986_v46   ;;  %v3252_v39 = vadd.s32 %v1413_v29, %v1412_v30  ;;  %vm1448_vm1 = vcmp.lt.s32.totalorder %v3248_v37, 200 }
  0x70   : > { %1137 = vperm.xlu1 %2713, %v987_v47   ;;  %vm3266_vm4 = vmand %vm1416_vm0, %vm1448_vm1 }
  0x71   : > { %vm1449_vm2 = vcmp.lt.s32.totalorder %v3252_v39, 200  ;;  %vm3283_vm6 = vmand %vm1417_vm3, %vm1448_vm1 }
  0x72   : > { %vm3276_vm5 = vmand %vm1416_vm0, %vm1449_vm2 }
  0x73   : > { %1052 = vperm.xlu0 %2712, %v970_v48   ;;  %vm3291_vm7 = vmand %vm1417_vm3, %vm1449_vm2 }
  0x74   : > { %2635 = vmatpush3.bf16.xpose.msra.mxu0 %v2729_v35  ;;  %1057 = vperm.xlu1 %2713, %v971_v49  }
  0x77   : > { %1142 = vperm.xlu0 %2712, %v988_v51  }
  0x78   : > { %1147 = vperm.xlu1 %2713, %v989_v52  }
  0x7b   : > { %2637 = vmatmul.mubr.bf16.vlgmr.msra.gmra.mrb[0].mxu0 %v3159_v10  ;;  %1062 = vperm.xlu0 %2712, %v972_v53  }
  0x7c   : > { %2638 = vmatprep.mubr.bf16.mxu0 %v2731_v40  ;;  %1067 = vperm.xlu1 %2713, %v973_v54   ;;  %v1347_v54 = vadd.s32 24, %v3238_v19 }
  0x83   : > { %2639 = vmatmul.mubr.bf16.gmra.mrb[4].mxu0 %v2731_v40 }
  0x84   : > { %2640 = vmatprep.mubr.bf16.mxu0 %v2732_v45 }
  0x8b   : > { %2641 = vmatmul.mubr.bf16.gmra.mrb[8].mxu0 %v2732_v45  ;;  %v1346_v45 = vadd.s32 16, %v3238_v19 }
  0x8c   : > { %2642 = vmatprep.mubr.bf16.mxu0 %v2733_v50 }
  0x93   : > { %2643 = vmatmul.mubr.bf16.gmra.mrb[12].mxu0 %v2733_v50 }
  0x94   : > { %2644 = vmatprep.mubr.bf16.mxu0 %v2734_v55 }
  0x9b   : > { %2645 = vmatmul.mubr.bf16.gmra.mrb[16].mxu0 %v2734_v55 }
  0x9c   : > { %2646 = vmatprep.mubr.bf16.mxu0 %v2735_v56 }
  0xa3   : > { %2647 = vmatmul.mubr.bf16.gmra.mrb[20].mxu0 %v2735_v56  ;;  %v1350_v56 = vadd.s32 48, %v3238_v19 }
  0xa4   : > { %2648 = vmatprep.mubr.bf16.mxu0 %v2736_v57 }
  0xab   : > { %2649 = vmatmul.mubr.bf16.gmra.mrb[24].mxu0 %v2736_v57  ;;  %v1379_v57 = vadd.s32 %v3241_v24, %v1346_v45 }
  0xac   : > { %2650 = vmatprep.mubr.bf16.mxu0 %v2737_v58 }
  0xad   : > { %vm1418_vm8 = vcmp.lt.s32.totalorder %v1379_v57, 200 }
  0xae   : > { %vm3318_vm10 = vmand %vm1418_vm8, %vm1448_vm1 }
  0xaf   : > { %vm3327_vm11 = vmand %vm1418_vm8, %vm1449_vm2 }
  0xb3   : > { %2651 = vmatmul.mubr.bf16.gmra.mrb[28].mxu0 %v2737_v58 }
  0xb4   : > { %2652 = vmatprep.mubr.bf16.mxu0 %v2738_v59 }
  0xbb   : > { %2653 = vmatmul.mubr.bf16.gmra.mrb[32].mxu0 %v2738_v59 }
  0xbc   : > { %2654 = vmatprep.mubr.bf16.mxu0 %v2739_v60 }
  0xbe   : > { %v3219_v3 = vpop.permute.xlu0 %1072 }
  0xbf   : > { %v993_v4 = vpop.permute.xlu1 %992 }
  0xc2   : > { %v3221_v5 = vpop.permute.xlu0 %1077 }
  0xc3   : > { %2655 = vmatmul.mubr.bf16.gmra.mrb[36].mxu0 %v2739_v60  ;;  %v998_v6 = vpop.permute.xlu1 %997 }
  0xc4   : > { %2656 = vmatprep.mubr.bf16.mxu0 %v2740_v61 }
  0xc6   : > { %v3223_v7 = vpop.permute.xlu0 %1082 }
  0xc7   : > { %v3225_v8 = vpop.permute.xlu1 %1087 }
  0xca   : > { %v1003_v9 = vpop.permute.xlu0 %1002 }
  0xcb   : > { %2657 = vmatmul.mubr.bf16.gmra.mrb[40].mxu0 %v2740_v61  ;;  %v1008_v10 = vpop.permute.xlu1 %1007 }
  0xcc   : > { %2658 = vmatprep.mubr.bf16.mxu0 %v2741_v62 }
  0xce   : > { %v3227_v11 = vpop.permute.xlu0 %1092 }
  0xcf   : > { %v3229_v12 = vpop.permute.xlu1 %1097 }
  0xd2   : > { %v3231_v13 = vpop.permute.xlu0 %1012 }
  0xd3   : > { %2659 = vmatmul.mubr.bf16.gmra.mrb[44].mxu0 %v2741_v62  ;;  %v3233_v15 = vpop.permute.xlu1 %1017 }
  0xd4   : > { %2660 = vmatprep.mubr.bf16.mxu0 %v2742_v63 }
  0xd6   : > { %v3236_v18 = vpop.permute.xlu0 %1102 }
  0xd7   : > { %v3243_v25 = vpop.permute.xlu1 %1107 }
  0xda   : > { %v3250_v38 = vpop.permute.xlu0 %1022 }
  0xdb   : > { %2661 = vmatmul.mubr.bf16.gmra.mrb[48].mxu0 %v2742_v63  ;;  %v3255_v42 = vpop.permute.xlu1 %1027 }
  0xdc   : > { %2662 = vmatprep.mubr.bf16.mxu0 %v2743_v0 }
  0xde   : > { %v3260_v53 = vpop.permute.xlu0 %1112 }
  0xdf   : > { %v3271_v59 = vpop.permute.xlu1 %1117 }
  0xe3   : > { %2663 = vmatmul.mubr.bf16.gmra.mrb[52].mxu0 %v2743_v0  ;;  %v3311_v33 = vpop.permute.xlu1 %1037 }
  0xe4   : > { %2664 = vmatprep.mubr.bf16.mxu0 %v2744_v1 }
  0xeb   : > { %2665 = vmatmul.mubr.bf16.gmra.mrb[56].mxu0 %v2744_v1  ;;  %v1380_v1 = vadd.s32 %v3241_v24, %v1347_v54 }
  0xec   : > { %2666 = vmatprep.mubr.bf16.mxu0 %v2745_v2 }
  0xed   : > { %vm1419_vm9 = vcmp.lt.s32.totalorder %v1380_v1, 200 }
  0xee   : > { %vm3334_vm12 = vmand %vm1419_vm9, %vm1448_vm1 }
  0xef   : > { %vm3343_vm13 = vmand %vm1419_vm9, %vm1449_vm2 }
  0xf3   : > { %2667 = vmatmul.mubr.bf16.gmra.mrb[60].mxu0 %v2745_v2 }
 0x14e   : > { %v799_v17 = vpop.f32.mrb[0].mxu0 }
 0x14f   : > { %v1150_v20 = vsub.f32 %v799_v17, %v993_v4  ;;  %v801_v21 = vpop.f32.mrb[1].mxu0 }
 0x150   : > { %v1151_v22 = vsub.f32 %v801_v21, %v993_v4  ;;  %v803_v23 = vpop.f32.mrb[2].mxu0 }
 0x151   : > { %v1214_v26 = vmul.f32 1.442695, %v1150_v20  ;;  %v1152_v27 = vsub.f32 %v803_v23, %v998_v6  ;;  %v805_v28 = vpop.f32.mrb[3].mxu0  ;;  %v3303_v23 = vpop.permute.xlu0 %1032 }
 0x152   : > { %v1216_v31 = vmul.f32 1.442695, %v1151_v22  ;;  %v1153_v32 = vsub.f32 %v805_v28, %v998_v6 }
 0x153   : > { %2762 = vpow2.f32 %v1214_v26  ;;  %v1218_v34 = vmul.f32 1.442695, %v1152_v27 }
 0x154   : > { %2764 = vpow2.f32 %v1216_v31  ;;  %v1220_v35 = vmul.f32 1.442695, %v1153_v32 }
 0x155   : > { %2766 = vpow2.f32 %v1218_v34 }
 0x156   : > { %2768 = vpow2.f32 %v1220_v35  ;;  %v809_v40 = vpop.f32.mrb[4].mxu0 }
 0x157   : > { %v1154_v43 = vsub.f32 %v809_v40, %v1003_v9  ;;  %v811_v44 = vpop.f32.mrb[5].mxu0 }
 0x158   : > { %v1155_v46 = vsub.f32 %v811_v44, %v1003_v9  ;;  %v813_v47 = vpop.f32.mrb[6].mxu0 }
 0x159   : > { %v1222_v48 = vmul.f32 1.442695, %v1154_v43  ;;  %v1156_v49 = vsub.f32 %v813_v47, %v1008_v10  ;;  %v815_v50 = vpop.f32.mrb[7].mxu0 }
 0x15a   : > { %v1224_v51 = vmul.f32 1.442695, %v1155_v46  ;;  %v1157_v52 = vsub.f32 %v815_v50, %v1008_v10  ;;  %v1348_v10 = vadd.s32 32, %v3238_v19  ;;  %v1352_v46 = vadd.s32 64, %v3238_v19 }
 0x15b   : > { %2770 = vpow2.f32 %v1222_v48  ;;  %v1226_v55 = vmul.f32 1.442695, %v1156_v49  ;;  %v3338_v49 = vpop.permute.xlu0 %1122 }
 0x15c   : > { %2772 = vpow2.f32 %v1224_v51  ;;  %v1228_v58 = vmul.f32 1.442695, %v1157_v52  ;;  %v1381_v40 = vadd.s32 %v3241_v24, %v1348_v10  ;;  %v2746_v51 = vld [vmem:[%s3074_s9] sm:$0xff]  }
 0x15d   : > { %v2763_v61 = vpop.eup %2762  ;;  %2774 = vpow2.f32 %v1226_v55  ;;  %1771 = vmatpush1.bf16.msra.mxu1 %v2746_v51 }
 0x15e   : > { %v2765_v63 = vpop.eup %2764  ;;  %2776 = vpow2.f32 %v1228_v58  ;;  %v819_v0 = vpop.f32.mrb[8].mxu0  ;;  %v1514_v21 = vsel %vm3266_vm4, %v2763_v61, 0.0  ;;  %vm1420_vm14 = vcmp.lt.s32.totalorder %v1381_v40, 200  ;;  %v1679_v40 = vld [vmem:[#allocation3 + $0x28] sm:$0xff] }
 0x15f   : > { %v2767_v4 = vpop.eup %2766  ;;  %v1158_v6 = vsub.f32 %v819_v0, %v3231_v13  ;;  %v821_v9 = vpop.f32.mrb[9].mxu0  ;;  %v1515_v26 = vsel %vm3276_vm5, %v2765_v63, 0.0  ;;  %vm3370_vm0 = vmand %vm1420_vm14, %vm1448_vm1 }
 0x160   : > { %v2769_v16 = vpop.eup %2768  ;;  %v1159_v17 = vsub.f32 %v821_v9, %v3231_v13  ;;  %v823_v20 = vpop.f32.mrb[10].mxu0  ;;  %v1516_v22 = vsel %vm3283_vm6, %v2767_v4, 0.0  ;;  %vm3380_vm3 = vmand %vm1420_vm14, %vm1449_vm2 }
 0x161   : > { %v1230_v27 = vmul.f32 1.442695, %v1158_v6  ;;  %v1160_v28 = vsub.f32 %v823_v20, %v3233_v15  ;;  %v825_v29 = vpop.f32.mrb[11].mxu0  ;;  %v1642_v30 = vpack.c.bf16 %v1516_v22, %v1514_v21  ;;  %v1517_v13 = vsel %vm3291_vm7, %v2769_v16, 0.0  ;;  %v3355_v63 = vpop.permute.xlu1 %1127  ;;  %v2747_v20 = vld [vmem:[%s3074_s9 + $0x8] sm:$0xff]  }
 0x162   : > { %v1232_v31 = vmul.f32 1.442695, %v1159_v17  ;;  %v1161_v32 = vsub.f32 %v825_v29, %v3233_v15  ;;  %v3313_v34 = vpack.c.bf16 %v1517_v13, %v1515_v26  ;;  %v1382_v15 = vadd.s32 %v3241_v24, %v1349_v14  ;;  %v1677_v17 = vld [vmem:[#allocation3 + $0x18] sm:$0xff] }
 0x163   : > { %2778 = vpow2.f32 %v1230_v27  ;;  %v1234_v35 = vmul.f32 1.442695, %v1160_v28  ;;  %1706 = vxpose.xlu1.c.b16.start [1/8] %v1642_v30, 128  ;;  %v1351_v14 = vadd.s32 56, %v3238_v19  ;;  %v1383_v26 = vadd.s32 %v3241_v24, %v1350_v56  ;;  %1772 = vmatprep.subr.bf16.mxu1 %v1677_v17  ;;  %v3375_v27 = vpop.permute.xlu0 %1042  ;;  %v2750_v28 = vld [vmem:[%s3074_s9 + $0x20] sm:$0xff]  }
 0x164   : > { %2780 = vpow2.f32 %v1232_v31  ;;  %v1236_v43 = vmul.f32 1.442695, %v1161_v32  ;;  %vm1421_vm15 = vcmp.lt.s32.totalorder %v1382_v15, 200  ;;  %1773 = vmatpush1.bf16.msra.mxu1 %v2747_v20 }
 0x165   : > { %v2771_v45 = vpop.eup %2770  ;;  %2782 = vpow2.f32 %v1234_v35  ;;  %vm3387_vm4 = vmand %vm1421_vm15, %vm1448_vm1  ;;  %v3391_v32 = vpop.permute.xlu1 %1047  ;;  %v1384_v35 = vadd.s32 %v3241_v24, %v1351_v14  ;;  %vm1422_vm6 = vcmp.lt.s32.totalorder %v1383_v26, 200  ;;  %1774 = vmatprep.subr.bf16.mxu1 %v1679_v40 }
 0x166   : > { %v2773_v47 = vpop.eup %2772  ;;  %2784 = vpow2.f32 %v1236_v43  ;;  %v829_v48 = vpop.f32.mrb[12].mxu0  ;;  %v1518_v61 = vsel %vm3318_vm10, %v2771_v45, 0.0  ;;  %vm3397_vm5 = vmand %vm1421_vm15, %vm1449_vm2 }
 0x167   : > { %v2775_v52 = vpop.eup %2774  ;;  %v1162_v54 = vsub.f32 %v829_v48, %v3250_v38  ;;  %v831_v55 = vpop.f32.mrb[13].mxu0  ;;  %v1519_v0 = vsel %vm3327_vm11, %v2773_v47, 0.0  ;;  %v1353_v47 = vadd.s32 72, %v3238_v19  ;;  %vm1423_vm7 = vcmp.lt.s32.totalorder %v1384_v35, 200  ;;  %vm3424_vm8 = vmand %vm1422_vm6, %vm1448_vm1 }
 0x168   : > { %v2777_v57 = vpop.eup %2776  ;;  %v1163_v58 = vsub.f32 %v831_v55, %v3250_v38  ;;  %v833_v60 = vpop.f32.mrb[14].mxu0  ;;  %v1520_v62 = vsel %vm3334_vm12, %v2775_v52, 0.0  ;;  %1775 = vmatpush1.bf16.msra.mxu1 %v2748_v41  ;;  %vm3435_vm9 = vmand %vm1422_vm6, %vm1449_vm2 }
 0x169   : > { %v1238_v1 = vmul.f32 1.442695, %v1162_v54  ;;  %v1164_v2 = vsub.f32 %v833_v60, %v3255_v42  ;;  %v835_v4 = vpop.f32.mrb[15].mxu0  ;;  %v1644_v6 = vpack.c.bf16 %v1520_v62, %v1518_v61  ;;  %v1521_v38 = vsel %vm3343_vm13, %v2777_v57, 0.0  ;;  %v3416_v62 = vpop.permute.xlu0 %1132  ;;  %vm3442_vm10 = vmand %vm1423_vm7, %vm1448_vm1 }
 0x16a   : > { %v1240_v9 = vmul.f32 1.442695, %v1163_v58  ;;  %v1165_v10 = vsub.f32 %v835_v4, %v3255_v42  ;;  %v3364_v16 = vpack.c.bf16 %v1521_v38, %v1519_v0  ;;  %v1385_v38 = vadd.s32 %v3241_v24, %v1352_v46  ;;  %vm3449_vm11 = vmand %vm1423_vm7, %vm1449_vm2 }
 0x16b   : > { %2786 = vpow2.f32 %v1238_v1  ;;  %v1242_v21 = vmul.f32 1.442695, %v1164_v2  ;;  %1707 = vxpose.xlu1.c.b16.cont [2/8] %v1644_v6, 128  ;;  %v1681_v1 = vld [vmem:[#allocation3 + $0x38] sm:$0xff] }
 0x16c   : > { %2788 = vpow2.f32 %v1240_v9  ;;  %v1244_v42 = vmul.f32 1.442695, %v1165_v10  ;;  %v2749_v2 = vld [vmem:[%s3074_s9 + $0x18] sm:$0xff]   ;;  %1776 = vmatprep.subr.bf16.mxu1 %v1681_v1  ;;  %v3430_v10 = vpop.permute.xlu1 %1137  ;;  %vm1424_vm12 = vcmp.lt.s32.totalorder %v1385_v38, 200  ;;  %v2752_v1 = vld [vmem:[%s3074_s9 + $0x30] sm:$0xff]   ;;  %v3500_v38 = vld [vmem:[%s3074_s9 + $0x40] sm:$0xff]  }
 0x16d   : > { %v2779_v29 = vpop.eup %2778  ;;  %2790 = vpow2.f32 %v1242_v21  ;;  %1777 = vmatpush1.bf16.msra.mxu1 %v2749_v2  ;;  %vm3474_vm14 = vmand %vm1424_vm12, %vm1448_vm1  ;;  %v2753_v6 = vld [vmem:[%s3074_s9 + $0x38] sm:$0xff]  }
 0x16e   : > { %v2781_v13 = vpop.eup %2780  ;;  %2792 = vpow2.f32 %v1244_v42  ;;  %v839_v31 = vpop.f32.mrb[16].mxu0  ;;  %v1522_v51 = vsel %vm3370_vm0, %v2779_v29, 0.0  ;;  %v1683_v42 = vld [vmem:[#allocation3 + $0x48] sm:$0xff]  ;;  %vm3486_vm15 = vmand %vm1424_vm12, %vm1449_vm2 }
 0x16f   : > { %v2783_v43 = vpop.eup %2782  ;;  %v1166_v44 = vsub.f32 %v839_v31, %v3303_v23  ;;  %v841_v45 = vpop.f32.mrb[17].mxu0  ;;  %v1523_v54 = vsel %vm3380_vm3, %v2781_v13, 0.0  ;;  %v1354_v31 = vadd.s32 80, %v3238_v19  ;;  %1778 = vmatprep.subr.bf16.mxu1 %v1683_v42  ;;  %v1689_v42 = vld [vmem:[#allocation3 + $0x78] sm:$0xff] }
 0x170   : > { %v2785_v48 = vpop.eup %2784  ;;  %v1167_v50 = vsub.f32 %v841_v45, %v3303_v23  ;;  %v843_v15 = vpop.f32.mrb[18].mxu0  ;;  %v1524_v52 = vsel %vm3387_vm4, %v2783_v43, 0.0 }
 0x171   : > { %v1246_v55 = vmul.f32 1.442695, %v1166_v44  ;;  %v1168_v56 = vsub.f32 %v843_v15, %v3311_v33  ;;  %v845_v57 = vpop.f32.mrb[19].mxu0  ;;  %v1646_v58 = vpack.c.bf16 %v1524_v52, %v1522_v51  ;;  %v1525_v23 = vsel %vm3397_vm5, %v2785_v48, 0.0  ;;  %v3461_v44 = vpop.permute.xlu0 %1052  ;;  %1779 = vmatpush1.bf16.msra.mxu1 %v2750_v28  ;;  %v3516_v28 = vld [vmem:[%s3074_s9 + $0x50] sm:$0xff]  }
 0x172   : > { %v1248_v60 = vmul.f32 1.442695, %v1167_v50  ;;  %v1169_v61 = vsub.f32 %v845_v57, %v3311_v33  ;;  %v3418_v0 = vpack.c.bf16 %v1525_v23, %v1523_v54  ;;  %v1386_v33 = vadd.s32 %v3241_v24, %v1353_v47  ;;  %v3469_v52 = vpop.permute.xlu1 %1057  ;;  %v1685_v57 = vld [vmem:[#allocation3 + $0x58] sm:$0xff] }
 0x173   : > { %2794 = vpow2.f32 %v1246_v55  ;;  %v1250_v4 = vmul.f32 1.442695, %v1168_v56  ;;  %1708 = vxpose.xlu1.c.b16.cont [3/8] %v1646_v58, 128  ;;  %v1355_v55 = vadd.s32 88, %v3238_v19  ;;  %v2751_v58 = vld [vmem:[%s3074_s9 + $0x28] sm:$0xff]   ;;  %1780 = vmatprep.subr.bf16.mxu1 %v1685_v57  ;;  %v3546_v57 = vld [vmem:[%s3074_s9 + $0x78] sm:$0xff]  }
 0x174   : > { %2796 = vpow2.f32 %v1248_v60  ;;  %v1252_v9 = vmul.f32 1.442695, %v1169_v61  ;;  %vm1425_vm13 = vcmp.lt.s32.totalorder %v1386_v33, 200  ;;  %v1687_v61 = vld [vmem:[#allocation3 + $0x68] sm:$0xff] }
 0x175   : > { %v2787_v17 = vpop.eup %2786  ;;  %2798 = vpow2.f32 %v1250_v4  ;;  %vm3494_vm0 = vmand %vm1425_vm13, %vm1448_vm1  ;;  %1781 = vmatpush1.bf16.msra.mxu1 %v2751_v58  ;;  %v1388_v26 = vadd.s32 %v3241_v24, %v1355_v55 }
 0x176   : > { %v2789_v21 = vpop.eup %2788  ;;  %2800 = vpow2.f32 %v1252_v9  ;;  %v849_v22 = vpop.f32.mrb[20].mxu0  ;;  %v1526_v35 = vsel %vm3424_vm8, %v2787_v17, 0.0  ;;  %vm3505_vm3 = vmand %vm1425_vm13, %vm1449_vm2  ;;  %1782 = vmatprep.subr.bf16.mxu1 %v1687_v61  ;;  %v3510_v17 = vld [vmem:[%s3074_s9 + $0x48] sm:$0xff]  }
 0x177   : > { %v2791_v29 = vpop.eup %2790  ;;  %v1170_v30 = vsub.f32 %v849_v22, %v3375_v27  ;;  %v851_v13 = vpop.f32.mrb[21].mxu0  ;;  %v1527_v45 = vsel %vm3435_vm9, %v2789_v21, 0.0  ;;  %vm1427_vm5 = vcmp.lt.s32.totalorder %v1388_v26, 200  ;;  %v1691_v61 = vld [vmem:[#allocation3 + $0x88] sm:$0xff] }
 0x178   : > { %v2793_v36 = vpop.eup %2792  ;;  %v1171_v40 = vsub.f32 %v851_v13, %v3375_v27  ;;  %v853_v41 = vpop.f32.mrb[22].mxu0  ;;  %v1528_v43 = vsel %vm3442_vm10, %v2791_v29, 0.0  ;;  %v3519_v29 = vld [vmem:[%s3074_s9 + $0x58] sm:$0xff]   ;;  %vm3570_vm8 = vmand %vm1427_vm5, %vm1448_vm1 }
 0x179   : > { %v1254_v46 = vmul.f32 1.442695, %v1170_v30  ;;  %v1172_v47 = vsub.f32 %v853_v41, %v3391_v32  ;;  %v855_v48 = vpop.f32.mrb[23].mxu0  ;;  %v1648_v50 = vpack.c.bf16 %v1528_v43, %v1526_v35  ;;  %v1529_v27 = vsel %vm3449_vm11, %v2793_v36, 0.0  ;;  %v3512_v22 = vpop.permute.xlu0 %1142  ;;  %1783 = vmatpush1.bf16.msra.mxu1 %v2752_v1  ;;  %vm3577_vm9 = vmand %vm1427_vm5, %vm1449_vm2 }
 0x17a   : > { %v1256_v15 = vmul.f32 1.442695, %v1171_v40  ;;  %v1173_v51 = vsub.f32 %v855_v48, %v3391_v32  ;;  %v3479_v56 = vpack.c.bf16 %v1529_v27, %v1527_v45  ;;  %v1387_v32 = vadd.s32 %v3241_v24, %v1354_v31  ;;  %v3525_v40 = vld [vmem:[%s3074_s9 + $0x60] sm:$0xff]   ;;  %v3540_v27 = vld [vmem:[%s3074_s9 + $0x70] sm:$0xff]   ;;  %1784 = vmatprep.subr.bf16.mxu1 %v1689_v42 }
 0x17b   : > { %2802 = vpow2.f32 %v1254_v46  ;;  %v1258_v23 = vmul.f32 1.442695, %v1172_v47  ;;  %1709 = vxpose.xlu1.c.b16.cont [4/8] %v1648_v50, 128  ;;  %v1356_v31 = vadd.s32 96, %v3238_v19  ;;  %v1357_v36 = vadd.s32 104, %v3238_v19  ;;  %v3532_v47 = vpop.permute.xlu1 %1147  ;;  %v3537_v50 = vld [vmem:[%s3074_s9 + $0x68] sm:$0xff]  }
 0x17c   : > { %2804 = vpow2.f32 %v1256_v15  ;;  %v1260_v2 = vmul.f32 1.442695, %v1173_v51  ;;  %vm1426_vm4 = vcmp.lt.s32.totalorder %v1387_v32, 200 }
 0x17d   : > { %v2795_v9 = vpop.eup %2794  ;;  %2806 = vpow2.f32 %v1258_v23  ;;  %vm3554_vm6 = vmand %vm1426_vm4, %vm1448_vm1  ;;  %v1389_v4 = vadd.s32 %v3241_v24, %v1356_v31  ;;  %v1063_v14 = vpop.permute.xlu0 %1062  ;;  %1785 = vmatpush1.bf16.msra.mxu1 %v2753_v6  ;;  %v1693_v6 = vld [vmem:[#allocation3 + $0x98] sm:$0xff] }
 0x17e   : > { %v2797_v20 = vpop.eup %2796  ;;  %2808 = vpow2.f32 %v1260_v2  ;;  %v859_v21 = vpop.f32.mrb[24].mxu0  ;;  %v1530_v45 = vsel %vm3474_vm14, %v2795_v9, 0.0  ;;  %v1390_v9 = vadd.s32 %v3241_v24, %v1357_v36  ;;  %vm3563_vm7 = vmand %vm1426_vm4, %vm1449_vm2  ;;  %1786 = vmatprep.subr.bf16.mxu1 %v1691_v61 }
 0x17f   : > { %v2799_v33 = vpop.eup %2798  ;;  %v1174_v30 = vsub.f32 %v859_v21, %v3461_v44  ;;  %v861_v13 = vpop.f32.mrb[25].mxu0  ;;  %v1531_v48 = vsel %vm3486_vm15, %v2797_v20, 0.0  ;;  %vm1428_vm10 = vcmp.lt.s32.totalorder %v1389_v4, 200 }
 0x180   : > { %v2801_v41 = vpop.eup %2800  ;;  %v1175_v35 = vsub.f32 %v861_v13, %v3461_v44  ;;  %v863_v43 = vpop.f32.mrb[26].mxu0  ;;  %v1532_v46 = vsel %vm3494_vm0, %v2799_v33, 0.0  ;;  %vm1429_vm11 = vcmp.lt.s32.totalorder %v1390_v9, 200  ;;  %vm3597_vm12 = vmand %vm1428_vm10, %vm1448_vm1 }
 0x181   : > { %v1262_v15 = vmul.f32 1.442695, %v1174_v30  ;;  %v1176_v44 = vsub.f32 %v863_v43, %v3469_v52  ;;  %v865_v51 = vpop.f32.mrb[27].mxu0  ;;  %v1650_v55 = vpack.c.bf16 %v1532_v46, %v1530_v45  ;;  %v1533_v54 = vsel %vm3505_vm3, %v2801_v41, 0.0  ;;  %v1068_v13 = vpop.permute.xlu1 %1067  ;;  %1787 = vmatpush1.bf16.msra.mxu1 %v3500_v38  ;;  %vm3605_vm13 = vmand %vm1428_vm10, %vm1449_vm2 }
 0x182   : > { %v1264_v58 = vmul.f32 1.442695, %v1175_v35  ;;  %v1177_v23 = vsub.f32 %v865_v51, %v3469_v52  ;;  %v3549_v60 = vpack.c.bf16 %v1533_v54, %v1531_v48  ;;  %v1358_v35 = vadd.s32 112, %v3238_v19  ;;  %1788 = vmatprep.subr.bf16.mxu1 %v1693_v6  ;;  %vm3613_vm14 = vmand %vm1429_vm11, %vm1448_vm1  ;;  %v1697_v6 = vld [vmem:[#allocation3 + $0xb8] sm:$0xff] }
 0x183   : > { %2810 = vpow2.f32 %v1262_v15  ;;  %v1266_v1 = vmul.f32 1.442695, %v1176_v44  ;;  %1710 = vxpose.xlu1.c.b16.cont [5/8] %v1650_v55, 128  ;;  %vm3621_vm15 = vmand %vm1429_vm11, %vm1449_vm2 }
 0x184   : > { %2812 = vpow2.f32 %v1264_v58  ;;  %v1268_v52 = vmul.f32 1.442695, %v1177_v23  ;;  %v1391_v20 = vadd.s32 %v3241_v24, %v1358_v35  ;;  %v1360_v35 = vadd.s32 128, %v3238_v19 }
 0x185   : > { %v2803_v21 = vpop.eup %2802  ;;  %2814 = vpow2.f32 %v1266_v1  ;;  %v1359_v1 = vadd.s32 120, %v3238_v19  ;;  %1789 = vmatpush1.bf16.msra.mxu1 %v3510_v17 }
 0x186   : > { %v2805_v33 = vpop.eup %2804  ;;  %2816 = vpow2.f32 %v1268_v52  ;;  %v869_v30 = vpop.f32.mrb[28].mxu0  ;;  %v1534_v48 = vsel %vm3554_vm6, %v2803_v21, 0.0  ;;  %v1695_v52 = vld [vmem:[#allocation3 + $0xa8] sm:$0xff]  ;;  %vm1430_vm0 = vcmp.lt.s32.totalorder %v1391_v20, 200  ;;  %v1365_v20 = vadd.s32 168, %v3238_v19 }
 0x187   : > { %v2807_v31 = vpop.eup %2806  ;;  %v1178_v36 = vsub.f32 %v869_v30, %v1063_v14  ;;  %v871_v41 = vpop.f32.mrb[29].mxu0  ;;  %v1535_v15 = vsel %vm3563_vm7, %v2805_v33, 0.0  ;;  %1790 = vmatprep.subr.bf16.mxu1 %v1695_v52  ;;  %v1392_v4 = vadd.s32 %v3241_v24, %v1359_v1  ;;  %v1699_v1 = vld [vmem:[#allocation3 + $0xc8] sm:$0xff]  ;;  %vm3645_vm4 = vmand %vm1430_vm0, %vm1448_vm1 }
 0x188   : > { %v2809_v43 = vpop.eup %2808  ;;  %v1179_v45 = vsub.f32 %v871_v41, %v1063_v14  ;;  %v873_v46 = vpop.f32.mrb[30].mxu0  ;;  %v1536_v26 = vsel %vm3570_vm8, %v2807_v31, 0.0  ;;  %vm3654_vm5 = vmand %vm1430_vm0, %vm1449_vm2 }
 0x189   : > { %v1270_v44 = vmul.f32 1.442695, %v1178_v36  ;;  %v1180_v51 = vsub.f32 %v873_v46, %v1068_v13  ;;  %v875_v55 = vpop.f32.mrb[31].mxu0  ;;  %v1652_v54 = vpack.c.bf16 %v1536_v26, %v1534_v48  ;;  %v1537_v58 = vsel %vm3577_vm9, %v2809_v43, 0.0  ;;  %1791 = vmatpush1.bf16.msra.mxu1 %v3516_v28 }
 0x18a   : > { %v1272_v23 = vmul.f32 1.442695, %v1179_v45  ;;  %v1181_v61 = vsub.f32 %v875_v55, %v1068_v13  ;;  %v3592_v2 = vpack.c.bf16 %v1537_v58, %v1535_v15  ;;  %v1361_v43 = vadd.s32 136, %v3238_v19  ;;  %1792 = vmatprep.subr.bf16.mxu1 %v1697_v6 }
 0x18b   : > { %2818 = vpow2.f32 %v1270_v44  ;;  %v1274_v14 = vmul.f32 1.442695, %v1180_v51  ;;  %1711 = vxpose.xlu1.c.b16.cont [6/8] %v1652_v54, 128  ;;  %vm1431_vm3 = vcmp.lt.s32.totalorder %v1392_v4, 200 }
 0x18c   : > { %2820 = vpow2.f32 %v1272_v23  ;;  %v1276_v21 = vmul.f32 1.442695, %v1181_v61  ;;  %v1394_v38 = vadd.s32 %v3241_v24, %v1361_v43  ;;  %vm3662_vm6 = vmand %vm1431_vm3, %vm1448_vm1 }
 0x18d   : > { %v2811_v33 = vpop.eup %2810  ;;  %2822 = vpow2.f32 %v1274_v14  ;;  %v1393_v14 = vadd.s32 %v3241_v24, %v1360_v35  ;;  %1793 = vmatpush1.bf16.msra.mxu1 %v3519_v29  ;;  %vm3669_vm7 = vmand %vm1431_vm3, %vm1449_vm2  ;;  %v1701_v29 = vld [vmem:[#allocation3 + $0xd8] sm:$0xff] }
 0x18e   : > { %v2813_v13 = vpop.eup %2812  ;;  %2824 = vpow2.f32 %v1276_v21  ;;  %v879_v32 = vpop.f32.mrb[32].mxu0  ;;  %v1538_v9 = vsel %vm3597_vm12, %v2811_v33, 0.0  ;;  %1794 = vmatprep.subr.bf16.mxu1 %v1699_v1  ;;  %vm1433_vm9 = vcmp.lt.s32.totalorder %v1394_v38, 200  ;;  %v1705_v21 = vld [vmem:[#allocation3 + $0xf8] sm:$0xff] }
 0x18f   : > { %v2815_v31 = vpop.eup %2814  ;;  %v1182_v36 = vsub.f32 %v879_v32, %v3219_v3  ;;  %v881_v41 = vpop.f32.mrb[33].mxu0  ;;  %v1539_v15 = vsel %vm3605_vm13, %v2813_v13, 0.0  ;;  %vm1432_vm8 = vcmp.lt.s32.totalorder %v1393_v14, 200  ;;  %vm3709_vm12 = vmand %vm1433_vm9, %vm1448_vm1 }
 0x190   : > { %v2817_v45 = vpop.eup %2816  ;;  %v1183_v46 = vsub.f32 %v881_v41, %v3219_v3  ;;  %v883_v48 = vpop.f32.mrb[34].mxu0  ;;  %v1540_v26 = vsel %vm3613_vm14, %v2815_v31, 0.0  ;;  %v1362_v31 = vadd.s32 144, %v3238_v19  ;;  %vm3693_vm10 = vmand %vm1432_vm8, %vm1448_vm1 }
 0x191   : > { %v1278_v44 = vmul.f32 1.442695, %v1182_v36  ;;  %v1184_v51 = vsub.f32 %v883_v48, %v3221_v5  ;;  %v885_v55 = vpop.f32.mrb[35].mxu0  ;;  %v1654_v54 = vpack.c.bf16 %v1540_v26, %v1538_v9  ;;  %v1541_v3 = vsel %vm3621_vm15, %v2817_v45, 0.0  ;;  %1795 = vmatpush1.bf16.msra.mxu1 %v3525_v40  ;;  %vm3701_vm11 = vmand %vm1432_vm8, %vm1449_vm2 }
 0x192   : > { %v1280_v58 = vmul.f32 1.442695, %v1183_v46  ;;  %v1185_v23 = vsub.f32 %v885_v55, %v3221_v5  ;;  %v3640_v61 = vpack.c.bf16 %v1541_v3, %v1539_v15  ;;  %1796 = vmatprep.subr.bf16.mxu1 %v1701_v29  ;;  %vm3717_vm13 = vmand %vm1433_vm9, %vm1449_vm2  ;;  %v1366_v40 = vadd.s32 176, %v3238_v19 }
 0x193   : > { %2826 = vpow2.f32 %v1278_v44  ;;  %v1282_v52 = vmul.f32 1.442695, %v1184_v51  ;;  %1712 = vxpose.xlu1.c.b16.cont [7/8] %v1654_v54, 128  ;;  %v1363_v51 = vadd.s32 152, %v3238_v19  ;;  %v1703_v54 = vld [vmem:[#allocation3 + $0xe8] sm:$0xff] }
 0x194   : > { %2828 = vpow2.f32 %v1280_v58  ;;  %v1284_v5 = vmul.f32 1.442695, %v1185_v23  ;;  %v1395_v58 = vadd.s32 %v3241_v24, %v1362_v31 }
 0x195   : > { %v2819_v42 = vpop.eup %2818  ;;  %2830 = vpow2.f32 %v1282_v52  ;;  %1797 = vmatpush1.bf16.msra.mxu1 %v3537_v50  ;;  %v1396_v14 = vadd.s32 %v3241_v24, %v1363_v51 }
 0x196   : > { %v2821_v30 = vpop.eup %2820  ;;  %2832 = vpow2.f32 %v1284_v5  ;;  %v889_v13 = vpop.f32.mrb[36].mxu0  ;;  %v1542_v4 = vsel %vm3645_vm4, %v2819_v42, 0.0  ;;  %1798 = vmatprep.subr.bf16.mxu1 %v1703_v54  ;;  %vm1434_vm14 = vcmp.lt.s32.totalorder %v1395_v58, 200 }
 0x197   : > { %v2823_v32 = vpop.eup %2822  ;;  %v1186_v17 = vsub.f32 %v889_v13, %v3223_v7  ;;  %v891_v6 = vpop.f32.mrb[37].mxu0  ;;  %v1543_v45 = vsel %vm3654_vm5, %v2821_v30, 0.0  ;;  %v1364_v13 = vadd.s32 160, %v3238_v19  ;;  %vm1435_vm15 = vcmp.lt.s32.totalorder %v1396_v14, 200  ;;  %vm3743_vm0 = vmand %vm1434_vm14, %vm1448_vm1 }
 0x198   : > { %v2825_v36 = vpop.eup %2824  ;;  %v1187_v41 = vsub.f32 %v891_v6, %v3223_v7  ;;  %v893_v35 = vpop.f32.mrb[38].mxu0  ;;  %v1544_v43 = vsel %vm3662_vm6, %v2823_v32, 0.0  ;;  %vm3752_vm3 = vmand %vm1434_vm14, %vm1449_vm2 }
 0x199   : > { %v1286_v46 = vmul.f32 1.442695, %v1186_v17  ;;  %v1188_v48 = vsub.f32 %v893_v35, %v3225_v8  ;;  %v895_v9 = vpop.f32.mrb[39].mxu0  ;;  %v1656_v26 = vpack.c.bf16 %v1544_v43, %v1542_v4  ;;  %v1545_v7 = vsel %vm3669_vm7, %v2825_v36, 0.0  ;;  %1799 = vmatpush1.bf16.msra.mxu1 %v3540_v27  ;;  %vm3760_vm4 = vmand %vm1435_vm15, %vm1448_vm1 }
 0x19a   : > { %v1288_v15 = vmul.f32 1.442695, %v1187_v41  ;;  %v1189_v44 = vsub.f32 %v895_v9, %v3225_v8  ;;  %v3688_v55 = vpack.c.bf16 %v1545_v7, %v1543_v45  ;;  %1800 = vmatprep.subr.bf16.mxu1 %v1705_v21  ;;  %v1398_v9 = vadd.s32 %v3241_v24, %v1365_v20  ;;  %vm3767_vm5 = vmand %vm1435_vm15, %vm1449_vm2 }
 0x19b   : > { %2834 = vpow2.f32 %v1286_v46  ;;  %v1290_v3 = vmul.f32 1.442695, %v1188_v48  ;;  %1713 = vxpose.xlu1.c.b16.end [8/8] %v1656_v26, 128  ;;  %v1397_v48 = vadd.s32 %v3241_v24, %v1364_v13 }
 0x19c   : > { %2836 = vpow2.f32 %v1288_v15  ;;  %v1292_v23 = vmul.f32 1.442695, %v1189_v44  ;;  %vm1437_vm7 = vcmp.lt.s32.totalorder %v1398_v9, 200 }
 0x19d   : > { %v2827_v1 = vpop.eup %2826  ;;  %2838 = vpow2.f32 %v1290_v3  ;;  %1801 = vmatpush1.bf16.msra.mxu1 %v3546_v57  ;;  %vm1436_vm6 = vcmp.lt.s32.totalorder %v1397_v48, 200 }
 0x19e   : > { %v2829_v28 = vpop.eup %2828  ;;  %2840 = vpow2.f32 %v1292_v23  ;;  %v899_v5 = vpop.f32.mrb[40].mxu0  ;;  %v1546_v17 = vsel %vm3693_vm10, %v2827_v1, 0.0  ;;  %vm3792_vm8 = vmand %vm1436_vm6, %vm1448_vm1 }
 0x19f   : > { %v2831_v42 = vpop.eup %2830  ;;  %v1190_v33 = vsub.f32 %v899_v5, %v3227_v11  ;;  %1722 = vxpose.xlu1.c.b16.start [1/8] %v3313_v34, 128  ;;  %v901_v30 = vpop.f32.mrb[41].mxu0  ;;  %v1547_v31 = vsel %vm3701_vm11, %v2829_v28, 0.0  ;;  %vm3800_vm9 = vmand %vm1436_vm6, %vm1449_vm2 }
 0x1a0   : > { %v2833_v29 = vpop.eup %2832  ;;  %v1191_v32 = vsub.f32 %v901_v30, %v3227_v11  ;;  %v903_v38 = vpop.f32.mrb[42].mxu0  ;;  %v1548_v6 = vsel %vm3709_vm12, %v2831_v42, 0.0  ;;  %vm3807_vm10 = vmand %vm1437_vm7, %vm1448_vm1 }
 0x1a1   : > { %v1294_v34 = vmul.f32 1.442695, %v1190_v33  ;;  %v1192_v36 = vsub.f32 %v903_v38, %v3229_v12  ;;  %v905_v41 = vpop.f32.mrb[43].mxu0  ;;  %v1658_v35 = vpack.c.bf16 %v1548_v6, %v1546_v17  ;;  %v1549_v11 = vsel %vm3717_vm13, %v2833_v29, 0.0  ;;  %vm3815_vm11 = vmand %vm1437_vm7, %vm1449_vm2 }
 0x1a2   : > { %v1296_v4 = vmul.f32 1.442695, %v1191_v32  ;;  %v1193_v43 = vsub.f32 %v905_v41, %v3229_v12  ;;  %v3737_v45 = vpack.c.bf16 %v1549_v11, %v1547_v31  ;;  %v1367_v33 = vadd.s32 184, %v3238_v19 }
 0x1a3   : > { %2842 = vpow2.f32 %v1294_v34  ;;  %v1298_v46 = vmul.f32 1.442695, %v1192_v36  ;;  %1723 = vxpose.xlu1.c.b16.cont [2/8] %v3364_v16, 128  ;;  %1738 = vxpose.xlu0.c.b16.start [1/8] %v1658_v35, 128  ;;  %v1399_v29 = vadd.s32 %v3241_v24, %v1366_v40  ;;  %v1368_v11 = vadd.s32 192, %v3238_v19 }
 0x1a4   : > { %2844 = vpow2.f32 %v1296_v4  ;;  %v1300_v12 = vmul.f32 1.442695, %v1193_v43  ;;  %v1400_v31 = vadd.s32 %v3241_v24, %v1367_v33  ;;  %v1369_v4 = vadd.s32 200, %v3238_v19 }
 0x1a5   : > { %v2835_v16 = vpop.eup %2834  ;;  %2846 = vpow2.f32 %v1298_v46  ;;  %vm1438_vm12 = vcmp.lt.s32.totalorder %v1399_v29, 200  ;;  %v1371_v38 = vadd.s32 216, %v3238_v19 }
 0x1a6   : > { %v2837_v15 = vpop.eup %2836  ;;  %2848 = vpow2.f32 %v1300_v12  ;;  %v909_v44 = vpop.f32.mrb[44].mxu0  ;;  %v1550_v1 = vsel %vm3743_vm0, %v2835_v16, 0.0  ;;  %vm1439_vm13 = vcmp.lt.s32.totalorder %v1400_v31, 200  ;;  %vm3840_vm14 = vmand %vm1438_vm12, %vm1448_vm1  ;;  %v1402_v40 = vadd.s32 %v3241_v24, %v1369_v4 }
 0x1a7   : > { %v2839_v57 = vpop.eup %2838  ;;  %v1194_v54 = vsub.f32 %v909_v44, %v3236_v18  ;;  %1724 = vxpose.xlu1.c.b16.cont [3/8] %v3418_v0, 128  ;;  %v911_v3 = vpop.f32.mrb[45].mxu0  ;;  %v1551_v28 = vsel %vm3752_vm3, %v2837_v15, 0.0  ;;  %vm3849_vm15 = vmand %vm1438_vm12, %vm1449_vm2  ;;  %v1404_v4 = vadd.s32 %v3241_v24, %v1371_v38 }
 0x1a8   : > { %v2841_v58 = vpop.eup %2840  ;;  %v1195_v23 = vsub.f32 %v911_v3, %v3236_v18  ;;  %v913_v8 = vpop.f32.mrb[46].mxu0  ;;  %v1552_v52 = vsel %vm3760_vm4, %v2839_v57, 0.0  ;;  %v1401_v3 = vadd.s32 %v3241_v24, %v1368_v11  ;;  %vm3856_vm0 = vmand %vm1439_vm13, %vm1448_vm1 }
 0x1a9   : > { %v1302_v5 = vmul.f32 1.442695, %v1194_v54  ;;  %v1196_v0 = vsub.f32 %v913_v8, %v3243_v25  ;;  %v915_v14 = vpop.f32.mrb[47].mxu0  ;;  %v1660_v50 = vpack.c.bf16 %v1552_v52, %v1550_v1  ;;  %v1553_v21 = vsel %vm3767_vm5, %v2841_v58, 0.0  ;;  %vm3863_vm3 = vmand %vm1439_vm13, %vm1449_vm2 }
 0x1aa   : > { %v1304_v42 = vmul.f32 1.442695, %v1195_v23  ;;  %v1197_v18 = vsub.f32 %v915_v14, %v3243_v25  ;;  %v3786_v30 = vpack.c.bf16 %v1553_v21, %v1551_v28  ;;  %vm1440_vm4 = vcmp.lt.s32.totalorder %v1401_v3, 200 }
 0x1ab   : > { %2850 = vpow2.f32 %v1302_v5  ;;  %v1306_v13 = vmul.f32 1.442695, %v1196_v0  ;;  %1725 = vxpose.xlu1.c.b16.cont [4/8] %v3479_v56, 128  ;;  %1739 = vxpose.xlu0.c.b16.cont [2/8] %v1660_v50, 128  ;;  %vm1441_vm5 = vcmp.lt.s32.totalorder %v1402_v40, 200  ;;  %v1370_v14 = vadd.s32 208, %v3238_v19  ;;  %vm3888_vm6 = vmand %vm1440_vm4, %vm1448_vm1 }
 0x1ac   : > { %2852 = vpow2.f32 %v1304_v42  ;;  %v1308_v25 = vmul.f32 1.442695, %v1197_v18  ;;  %vm3896_vm7 = vmand %vm1440_vm4, %vm1449_vm2 }
 0x1ad   : > { %v2843_v56 = vpop.eup %2842  ;;  %2854 = vpow2.f32 %v1306_v13  ;;  %v1403_v34 = vadd.s32 %v3241_v24, %v1370_v14 }
 0x1ae   : > { %v2845_v17 = vpop.eup %2844  ;;  %2856 = vpow2.f32 %v1308_v25  ;;  %v919_v6 = vpop.f32.mrb[48].mxu0  ;;  %v1554_v48 = vsel %vm3792_vm8, %v2843_v56, 0.0  ;;  %vm3903_vm8 = vmand %vm1441_vm5, %vm1448_vm1 }
 0x1af   : > { %v2847_v36 = vpop.eup %2846  ;;  %v1198_v41 = vsub.f32 %v919_v6, %v3260_v53  ;;  %1726 = vxpose.xlu1.c.b16.cont [5/8] %v3549_v60, 128  ;;  %v921_v35 = vpop.f32.mrb[49].mxu0  ;;  %v1555_v12 = vsel %vm3800_vm9, %v2845_v17, 0.0  ;;  %vm3911_vm9 = vmand %vm1441_vm5, %vm1449_vm2 }
 0x1b0   : > { %v2849_v43 = vpop.eup %2848  ;;  %v1199_v46 = vsub.f32 %v921_v35, %v3260_v53  ;;  %v923_v27 = vpop.f32.mrb[50].mxu0  ;;  %v1556_v9 = vsel %vm3807_vm10, %v2847_v36, 0.0  ;;  %vm1442_vm10 = vcmp.lt.s32.totalorder %v1403_v34, 200 }
 0x1b1   : > { %v1310_v60 = vmul.f32 1.442695, %v1198_v41  ;;  %v1200_v26 = vsub.f32 %v923_v27, %v3271_v59  ;;  %v925_v16 = vpop.f32.mrb[51].mxu0  ;;  %v1662_v7 = vpack.c.bf16 %v1556_v9, %v1554_v48  ;;  %v1557_v15 = vsel %vm3815_vm11, %v2849_v43, 0.0  ;;  %vm3934_vm12 = vmand %vm1442_vm10, %vm1448_vm1 }
 0x1b2   : > { %v1312_v44 = vmul.f32 1.442695, %v1199_v46  ;;  %v1201_v53 = vsub.f32 %v925_v16, %v3271_v59  ;;  %v3834_v51 = vpack.c.bf16 %v1557_v15, %v1555_v12  ;;  %v1372_v9 = vadd.s32 224, %v3238_v19  ;;  %vm3943_vm13 = vmand %vm1442_vm10, %vm1449_vm2 }
 0x1b3   : > { %2858 = vpow2.f32 %v1310_v60  ;;  %v1314_v57 = vmul.f32 1.442695, %v1200_v26  ;;  %1727 = vxpose.xlu1.c.b16.cont [6/8] %v3592_v2, 128  ;;  %1740 = vxpose.xlu0.c.b16.cont [3/8] %v1662_v7, 128  ;;  %v1373_v12 = vadd.s32 232, %v3238_v19  ;;  %vm1443_vm11 = vcmp.lt.s32.totalorder %v1404_v4, 200 }
 0x1b4   : > { %2860 = vpow2.f32 %v1312_v44  ;;  %v1316_v59 = vmul.f32 1.442695, %v1201_v53 }
 0x1b5   : > { %v2851_v2 = vpop.eup %2850  ;;  %2862 = vpow2.f32 %v1314_v57 }
 0x1b6   : > { %v2853_v8 = vpop.eup %2852  ;;  %2864 = vpow2.f32 %v1316_v59  ;;  %v929_v1 = vpop.f32.mrb[52].mxu0  ;;  %v1558_v18 = vsel %vm3840_vm14, %v2851_v2, 0.0  ;;  %vm3950_vm14 = vmand %vm1443_vm11, %vm1448_vm1 }
 0x1b7   : > { %v2855_v28 = vpop.eup %2854  ;;  %v1202_v5 = vsub.f32 %v929_v1, %v3338_v49  ;;  %1728 = vxpose.xlu1.c.b16.cont [7/8] %v3640_v61, 128  ;;  %v931_v0 = vpop.f32.mrb[53].mxu0  ;;  %v1559_v13 = vsel %vm3849_vm15, %v2853_v8, 0.0  ;;  %v1405_v8 = vadd.s32 %v3241_v24, %v1372_v9  ;;  %v1406_v1 = vadd.s32 %v3241_v24, %v1373_v12  ;;  %vm3957_vm15 = vmand %vm1443_vm11, %vm1449_vm2 }
 0x1b8   : > { %v2857_v50 = vpop.eup %2856  ;;  %v1203_v21 = vsub.f32 %v931_v0, %v3338_v49  ;;  %v933_v42 = vpop.f32.mrb[54].mxu0  ;;  %v1560_v33 = vsel %vm3856_vm0, %v2855_v28, 0.0 }
 0x1b9   : > { %v1318_v20 = vmul.f32 1.442695, %v1202_v5  ;;  %v1204_v61 = vsub.f32 %v933_v42, %v3355_v63  ;;  %v935_v29 = vpop.f32.mrb[55].mxu0  ;;  %v1664_v25 = vpack.c.bf16 %v1560_v33, %v1558_v18  ;;  %v1561_v32 = vsel %vm3863_vm3, %v2857_v50, 0.0 }
 0x1ba   : > { %v1320_v56 = vmul.f32 1.442695, %v1203_v21  ;;  %v1205_v49 = vsub.f32 %v935_v29, %v3355_v63  ;;  %v3882_v17 = vpack.c.bf16 %v1561_v32, %v1559_v13  ;;  %vm1444_vm0 = vcmp.lt.s32.totalorder %v1405_v8, 200 }
 0x1bb   : > { %2866 = vpow2.f32 %v1318_v20  ;;  %v1322_v6 = vmul.f32 1.442695, %v1204_v61  ;;  %1729 = vxpose.xlu1.c.b16.end [8/8] %v3688_v55, 128  ;;  %1741 = vxpose.xlu0.c.b16.cont [4/8] %v1664_v25, 128  ;;  %vm1445_vm3 = vcmp.lt.s32.totalorder %v1406_v1, 200  ;;  %v1374_v33 = vadd.s32 240, %v3238_v19  ;;  %vm3978_vm4 = vmand %vm1444_vm0, %vm1448_vm1 }
 0x1bc   : > { %2868 = vpow2.f32 %v1320_v56  ;;  %v1324_v63 = vmul.f32 1.442695, %v1205_v49  ;;  %vm3986_vm5 = vmand %vm1444_vm0, %vm1449_vm2 }
 0x1bd   : > { %v2859_v55 = vpop.eup %2858  ;;  %2870 = vpow2.f32 %v1322_v6 }
 0x1be   : > { %v2861_v35 = vpop.eup %2860  ;;  %2872 = vpow2.f32 %v1324_v63  ;;  %v939_v11 = vpop.f32.mrb[56].mxu0  ;;  %v1562_v7 = vsel %vm3888_vm6, %v2859_v55, 0.0  ;;  %v1375_v63 = vadd.s32 248, %v3238_v19  ;;  %vm1508_vm6 = vmand %vm1445_vm3, %vm1448_vm1 }
 0x1bf   : > { %v2863_v46 = vpop.eup %2862  ;;  %v1206_v27 = vsub.f32 %v939_v11, %v3416_v62  ;;  %v941_v48 = vpop.f32.mrb[57].mxu0  ;;  %v1563_v44 = vsel %vm3896_vm7, %v2861_v35, 0.0  ;;  %v1407_v11 = vadd.s32 %v3241_v24, %v1374_v33  ;;  %vm1509_vm7 = vmand %vm1445_vm3, %vm1449_vm2 }
 0x1c0   : > { %v2865_v60 = vpop.eup %2864  ;;  %v1207_v26 = vsub.f32 %v941_v48, %v3416_v62  ;;  %v943_v16 = vpop.f32.mrb[58].mxu0  ;;  %v1564_v15 = vsel %vm3903_vm8, %v2863_v46, 0.0  ;;  %v1408_v43 = vadd.s32 %v3241_v24, %v1375_v63 }
 0x1c1   : > { %v1326_v53 = vmul.f32 1.442695, %v1206_v27  ;;  %v1208_v57 = vsub.f32 %v943_v16, %v3430_v10  ;;  %v945_v54 = vpop.f32.mrb[59].mxu0  ;;  %v1666_v3 = vpack.c.bf16 %v1564_v15, %v1562_v7  ;;  %v1565_v40 = vsel %vm3911_vm9, %v2865_v60, 0.0 }
 0x1c2   : > { %v1328_v59 = vmul.f32 1.442695, %v1207_v26  ;;  %v1209_v62 = vsub.f32 %v945_v54, %v3430_v10  ;;  %v3929_v58 = vpack.c.bf16 %v1565_v40, %v1563_v44  ;;  %vm1446_vm8 = vcmp.lt.s32.totalorder %v1407_v11, 200 }
 0x1c3   : > { %2874 = vpow2.f32 %v1326_v53  ;;  %v1330_v2 = vmul.f32 1.442695, %v1208_v57  ;;  %1742 = vxpose.xlu0.c.b16.cont [5/8] %v1666_v3, 128  ;;  %vm1447_vm9 = vcmp.lt.s32.totalorder %v1408_v43, 200  ;;  %vm1510_vm10 = vmand %vm1446_vm8, %vm1448_vm1  ;;  %v1583_v43 = vld [vmem:[#allocation2 + $0x28] sm:$0xff] }
 0x1c4   : > { %2876 = vpow2.f32 %v1328_v59  ;;  %v1332_v52 = vmul.f32 1.442695, %v1209_v62  ;;  %vm1511_vm11 = vmand %vm1446_vm8, %vm1449_vm2 }
 0x1c5   : > { %v2867_v28 = vpop.eup %2866  ;;  %2878 = vpow2.f32 %v1330_v2 }
 0x1c6   : > { %v2869_v0 = vpop.eup %2868  ;;  %2880 = vpow2.f32 %v1332_v52  ;;  %v949_v14 = vpop.f32.mrb[60].mxu0  ;;  %v1566_v29 = vsel %vm3934_vm12, %v2867_v28, 0.0  ;;  %vm1512_vm12 = vmand %vm1447_vm9, %vm1448_vm1 }
 0x1c7   : > { %v2871_v21 = vpop.eup %2870  ;;  %v1210_v42 = vsub.f32 %v949_v14, %v3512_v22  ;;  %v951_v18 = vpop.f32.mrb[61].mxu0  ;;  %v1567_v32 = vsel %vm3943_vm13, %v2869_v0, 0.0  ;;  %vm1513_vm13 = vmand %vm1447_vm9, %vm1449_vm2 }
 0x1c8   : > { %v2873_v13 = vpop.eup %2872  ;;  %v1211_v20 = vsub.f32 %v951_v18, %v3512_v22  ;;  %v953_v61 = vpop.f32.mrb[62].mxu0  ;;  %v1568_v25 = vsel %vm3950_vm14, %v2871_v21, 0.0 }
 0x1c9   : > { %v1334_v56 = vmul.f32 1.442695, %v1210_v42  ;;  %v1212_v49 = vsub.f32 %v953_v61, %v3532_v47  ;;  %v955_v38 = vpop.f32.mrb[63].mxu0  ;;  %v1668_v6 = vpack.c.bf16 %v1568_v25, %v1566_v29  ;;  %v1569_v31 = vsel %vm3957_vm15, %v2873_v13, 0.0 }
 0x1ca   : > { %v1336_v34 = vmul.f32 1.442695, %v1211_v20  ;;  %v1213_v22 = vsub.f32 %v955_v38, %v3532_v47  ;;  %v1669_v36 = vpack.c.bf16 %v1569_v31, %v1567_v32  ;;  %v1579_v31 = vld [vmem:[#allocation2 + $0x8] sm:$0xff] }
 0x1cb   : > { %2882 = vpow2.f32 %v1334_v56  ;;  %v1338_v55 = vmul.f32 1.442695, %v1212_v49  ;;  %1743 = vxpose.xlu0.c.b16.cont [6/8] %v1668_v6, 128  ;;  %v1578_v6 = vld [vmem:[#allocation2] sm:$0xff] }
 0x1cc   : > { %2884 = vpow2.f32 %v1336_v34  ;;  %v1340_v35 = vmul.f32 1.442695, %v1213_v22  ;;  %v1580_v22 = vld [vmem:[#allocation2 + $0x10] sm:$0xff] }
 0x1cd   : > { %v2875_v47 = vpop.eup %2874  ;;  %2886 = vpow2.f32 %v1338_v55  ;;  %v1581_v55 = vld [vmem:[#allocation2 + $0x18] sm:$0xff] }
 0x1ce   : > { %v2877_v4 = vpop.eup %2876  ;;  %2888 = vpow2.f32 %v1340_v35  ;;  %v1570_v48 = vsel %vm3978_vm4, %v2875_v47, 0.0 }
 0x1cf   : > { %v2879_v46 = vpop.eup %2878  ;;  %v1571_v60 = vsel %vm3986_vm5, %v2877_v4, 0.0  ;;  %v1582_v4 = vld [vmem:[#allocation2 + $0x20] sm:$0xff] }
 0x1d0   : > { %v2881_v27 = vpop.eup %2880  ;;  %v1572_v9 = vsel %vm1508_vm6, %v2879_v46, 0.0 }
 0x1d1   : > { %v1670_v12 = vpack.c.bf16 %v1572_v9, %v1570_v48  ;;  %v1573_v26 = vsel %vm1509_vm7, %v2881_v27, 0.0  ;;  %v1584_v27 = vld [vmem:[#allocation2 + $0x30] sm:$0xff] }
 0x1d2   : > { %v1671_v16 = vpack.c.bf16 %v1573_v26, %v1571_v60 }
 0x1d3   : > { %1744 = vxpose.xlu0.c.b16.cont [7/8] %v1670_v12, 128  ;;  %v1585_v12 = vld [vmem:[#allocation2 + $0x38] sm:$0xff] }
 0x1d5   : > { %v2883_v24 = vpop.eup %2882 }
 0x1d6   : > { %v2885_v7 = vpop.eup %2884  ;;  %v1574_v53 = vsel %vm1510_vm10, %v2883_v24, 0.0 }
 0x1d7   : > { %v2887_v15 = vpop.eup %2886  ;;  %v1575_v3 = vsel %vm1511_vm11, %v2885_v7, 0.0 }
 0x1d8   : > { %v2889_v44 = vpop.eup %2888  ;;  %v1576_v57 = vsel %vm1512_vm12, %v2887_v15, 0.0  ;;  %v1586_v15 = vld [vmem:[#allocation2 + $0x40] sm:$0xff] }
 0x1d9   : > { %v1672_v54 = vpack.c.bf16 %v1576_v57, %v1574_v53  ;;  %v1577_v40 = vsel %vm1513_vm13, %v2889_v44, 0.0  ;;  %v1587_v44 = vld [vmem:[#allocation2 + $0x48] sm:$0xff]  ;;  %v1588_v57 = vld [vmem:[#allocation2 + $0x50] sm:$0xff] }
 0x1da   : > { %v1673_v59 = vpack.c.bf16 %v1577_v40, %v1575_v3  ;;  %v1589_v40 = vld [vmem:[#allocation2 + $0x58] sm:$0xff] }
 0x1db   : > { %1745 = vxpose.xlu0.c.b16.end [8/8] %v1672_v54, 128 }
 0x1df   : > { %1754 = vxpose.xlu0.c.b16.start [1/8] %v3737_v45, 128 }
 0x1e3   : > { %1755 = vxpose.xlu0.c.b16.cont [2/8] %v3786_v30, 128 }
 0x1e5   : > { %v1714_v37 = vpop.trf.xlu1 }
 0x1e7   : > { %1756 = vxpose.xlu0.c.b16.cont [3/8] %v3834_v51, 128 }
 0x1e9   : > { %v1715_v2 = vpop.trf.xlu1 }
 0x1eb   : > { %1757 = vxpose.xlu0.c.b16.cont [4/8] %v3882_v17, 128 }
 0x1ed   : > { %v1716_v45 = vpop.trf.xlu1 }
 0x1ef   : > { %1758 = vxpose.xlu0.c.b16.cont [5/8] %v3929_v58, 128 }
 0x1f1   : > { %v1717_v51 = vpop.trf.xlu1 }
 0x1f3   : > { %1759 = vxpose.xlu0.c.b16.cont [6/8] %v1669_v36, 128 }
 0x1f5   : > { %v1718_v58 = vpop.trf.xlu1 }
 0x1f7   : > { %1760 = vxpose.xlu0.c.b16.cont [7/8] %v1671_v16, 128 }
 0x1f9   : > { %v1719_v1 = vpop.trf.xlu1 }
 0x1fb   : > { %1761 = vxpose.xlu0.c.b16.end [8/8] %v1673_v59, 128 }
 0x1fd   : > { %v1720_v10 = vpop.trf.xlu1 }
 0x201   : > { %v1721_v5 = vpop.trf.xlu1 }
 0x205   : > { %v1730_v14 = vpop.trf.xlu1 }
 0x209   : > { %v1731_v21 = vpop.trf.xlu1 }
 0x20d   : > { %v1732_v18 = vpop.trf.xlu1 }
 0x211   : > { %v1733_v13 = vpop.trf.xlu1 }
 0x215   : > { %v1734_v61 = vpop.trf.xlu1 }
 0x219   : > { %v1735_v25 = vpop.trf.xlu1 }
 0x21d   : > { %v1736_v56 = vpop.trf.xlu1 }
 0x221   : > { %v1737_v38 = vpop.trf.xlu1 }
 0x225   : > { %v1746_v39 = vpop.trf.xlu0 }
 0x226   : > { %1802 = vmatprep.mubr.bf16.mxu1 %v1746_v39 }
 0x227   : > { %1803 = vmatmul.mubr.bf16.vlgmr.msra.gmra.mrb[0].mxu1 %v1714_v37 }
 0x229   : > { %v1747_v62 = vpop.trf.xlu0 }
 0x22a   : > { %1812 = vmatprep.mubr.bf16.mxu1 %v1747_v62 }
 0x22d   : > { %v1748_v23 = vpop.trf.xlu0 }
 0x22f   : > { %1813 = vmatmul.mubr.bf16.gmra.mrb[4].mxu1 %v1715_v2 }
 0x230   : > { %1822 = vmatprep.mubr.bf16.mxu1 %v1748_v23  ;;  %v1590_v23 = vld [vmem:[#allocation2 + $0x60] sm:$0xff] }
 0x231   : > { %v1749_v30 = vpop.trf.xlu0 }
 0x235   : > { %v1750_v17 = vpop.trf.xlu0 }
 0x237   : > { %1823 = vmatmul.mubr.bf16.gmra.mrb[8].mxu1 %v1716_v45  ;;  %v1591_v45 = vld [vmem:[#allocation2 + $0x68] sm:$0xff] }
 0x238   : > { %1832 = vmatprep.mubr.bf16.mxu1 %v1749_v30 }
 0x239   : > { %v1751_v8 = vpop.trf.xlu0 }
 0x23d   : > { %v1752_v52 = vpop.trf.xlu0 }
 0x23f   : > { %1833 = vmatmul.mubr.bf16.gmra.mrb[12].mxu1 %v1717_v51  ;;  %v1592_v51 = vld [vmem:[#allocation2 + $0x70] sm:$0xff] }
 0x240   : > { %1842 = vmatprep.mubr.bf16.mxu1 %v1750_v17 }
 0x241   : > { %v1753_v28 = vpop.trf.xlu0 }
 0x245   : > { %v1762_v0 = vpop.trf.xlu0 }
 0x247   : > { %1843 = vmatmul.mubr.bf16.gmra.mrb[16].mxu1 %v1718_v58 }
 0x248   : > { %1852 = vmatprep.mubr.bf16.mxu1 %v1751_v8  ;;  %v1593_v8 = vld [vmem:[#allocation2 + $0x78] sm:$0xff] }
 0x249   : > { %v1763_v50 = vpop.trf.xlu0 }
 0x24d   : > { %v1764_v42 = vpop.trf.xlu0 }
 0x24f   : > { %1853 = vmatmul.mubr.bf16.gmra.mrb[20].mxu1 %v1719_v1 }
 0x250   : > { %1862 = vmatprep.mubr.bf16.mxu1 %v1752_v52 }
 0x251   : > { %v1765_v33 = vpop.trf.xlu0 }
 0x255   : > { %v1766_v20 = vpop.trf.xlu0 }
 0x257   : > { %1863 = vmatmul.mubr.bf16.gmra.mrb[24].mxu1 %v1720_v10 }
 0x258   : > { %1872 = vmatprep.mubr.bf16.mxu1 %v1753_v28 }
 0x259   : > { %v1767_v29 = vpop.trf.xlu0 }
 0x25d   : > { %v1768_v32 = vpop.trf.xlu0 }
 0x25f   : > { %1873 = vmatmul.mubr.bf16.gmra.mrb[28].mxu1 %v1721_v5 }
 0x260   : > { %1882 = vmatprep.mubr.bf16.mxu1 %v1762_v0  ;;  %v1594_v0 = vld [vmem:[#allocation2 + $0x80] sm:$0xff] }
 0x261   : > { %v1769_v49 = vpop.trf.xlu0 }
 0x267   : > { %1883 = vmatmul.mubr.bf16.gmra.mrb[32].mxu1 %v1730_v14  ;;  %v1595_v14 = vld [vmem:[#allocation2 + $0x88] sm:$0xff] }
 0x268   : > { %1892 = vmatprep.mubr.bf16.mxu1 %v1763_v50 }
 0x26f   : > { %1893 = vmatmul.mubr.bf16.gmra.mrb[36].mxu1 %v1731_v21  ;;  %v1596_v21 = vld [vmem:[#allocation2 + $0x90] sm:$0xff] }
 0x270   : > { %1902 = vmatprep.mubr.bf16.mxu1 %v1764_v42 }
 0x277   : > { %1903 = vmatmul.mubr.bf16.gmra.mrb[40].mxu1 %v1732_v18 }
 0x278   : > { %1912 = vmatprep.mubr.bf16.mxu1 %v1765_v33  ;;  %v1597_v33 = vld [vmem:[#allocation2 + $0x98] sm:$0xff] }
 0x27f   : > { %1913 = vmatmul.mubr.bf16.gmra.mrb[44].mxu1 %v1733_v13 }
 0x280   : > { %1922 = vmatprep.mubr.bf16.mxu1 %v1766_v20 }
 0x287   : > { %1923 = vmatmul.mubr.bf16.gmra.mrb[48].mxu1 %v1734_v61 }
 0x288   : > { %1932 = vmatprep.mubr.bf16.mxu1 %v1767_v29 }
 0x28f   : > { %1933 = vmatmul.mubr.bf16.gmra.mrb[52].mxu1 %v1735_v25 }
 0x290   : > { %1942 = vmatprep.mubr.bf16.mxu1 %v1768_v32  ;;  %v1598_v32 = vld [vmem:[#allocation2 + $0xa0] sm:$0xff] }
 0x297   : > { %1943 = vmatmul.mubr.bf16.gmra.mrb[56].mxu1 %v1736_v56  ;;  %v1599_v56 = vld [vmem:[#allocation2 + $0xa8] sm:$0xff] }
 0x298   : > { %1952 = vmatprep.mubr.bf16.mxu1 %v1769_v49 }
 0x29f   : > { %1953 = vmatmul.mubr.bf16.gmra.mrb[60].mxu1 %v1737_v38  ;;  %v1600_v38 = vld [vmem:[#allocation2 + $0xb0] sm:$0xff] }
 0x2fa   : > { %v1804_v34 = vpop.f32.mrb[0].mxu1 }
 0x2fb   : > { %v1963_v63 = vadd.f32 %v1804_v34, %v1578_v6  ;;  %v1806_v36 = vpop.f32.mrb[1].mxu1  ;;  %v1601_v34 = vld [vmem:[#allocation2 + $0xb8] sm:$0xff] }
 0x2fc   : > { %v1964_v41 = vadd.f32 %v1806_v36, %v1579_v31  ;;  %v1808_v35 = vpop.f32.mrb[2].mxu1 }
 0x2fd   : > { %2027 = vst [vmem:[#allocation2] sm:$0xff] %v1963_v63  ;;  %v1965_v11 = vadd.f32 %v1808_v35, %v1580_v22  ;;  %v1810_v19 = vpop.f32.mrb[3].mxu1  ;;  %v1602_v35 = vld [vmem:[#allocation2 + $0xc0] sm:$0xff] }
 0x2fe   : > { %2028 = vst [vmem:[#allocation2 + $0x8] sm:$0xff] %v1964_v41  ;;  %v1966_v47 = vadd.f32 %v1810_v19, %v1581_v55 }
 0x2ff   : > { %2029 = vst [vmem:[#allocation2 + $0x10] sm:$0xff] %v1965_v11  ;;  %v1603_v11 = vld [vmem:[#allocation2 + $0xc8] sm:$0xff] }
 0x300   : > { %2030 = vst [vmem:[#allocation2 + $0x18] sm:$0xff] %v1966_v47  ;;  %v1604_v47 = vld [vmem:[#allocation2 + $0xd0] sm:$0xff] }
 0x302   : > { %v1814_v46 = vpop.f32.mrb[4].mxu1 }
 0x303   : > { %v1967_v48 = vadd.f32 %v1814_v46, %v1582_v4  ;;  %v1816_v9 = vpop.f32.mrb[5].mxu1  ;;  %v1605_v46 = vld [vmem:[#allocation2 + $0xd8] sm:$0xff] }
 0x304   : > { %v1968_v60 = vadd.f32 %v1816_v9, %v1583_v43  ;;  %v1818_v26 = vpop.f32.mrb[6].mxu1 }
 0x305   : > { %2031 = vst [vmem:[#allocation2 + $0x20] sm:$0xff] %v1967_v48  ;;  %v1969_v16 = vadd.f32 %v1818_v26, %v1584_v27  ;;  %v1820_v24 = vpop.f32.mrb[7].mxu1  ;;  %v1606_v26 = vld [vmem:[#allocation2 + $0xe0] sm:$0xff] }
 0x306   : > { %2032 = vst [vmem:[#allocation2 + $0x28] sm:$0xff] %v1968_v60  ;;  %v1970_v7 = vadd.f32 %v1820_v24, %v1585_v12 }
 0x307   : > { %2033 = vst [vmem:[#allocation2 + $0x30] sm:$0xff] %v1969_v16  ;;  %v1607_v16 = vld [vmem:[#allocation2 + $0xe8] sm:$0xff] }
 0x308   : > { %2034 = vst [vmem:[#allocation2 + $0x38] sm:$0xff] %v1970_v7  ;;  %v1608_v7 = vld [vmem:[#allocation2 + $0xf0] sm:$0xff] }
 0x30a   : > { %v1824_v53 = vpop.f32.mrb[8].mxu1 }
 0x30b   : > { %v1971_v54 = vadd.f32 %v1824_v53, %v1586_v15  ;;  %v1826_v3 = vpop.f32.mrb[9].mxu1  ;;  %v1609_v53 = vld [vmem:[#allocation2 + $0xf8] sm:$0xff] }
 0x30c   : > { %v1972_v59 = vadd.f32 %v1826_v3, %v1587_v44  ;;  %v1828_v37 = vpop.f32.mrb[10].mxu1 }
 0x30d   : > { %2035 = vst [vmem:[#allocation2 + $0x40] sm:$0xff] %v1971_v54  ;;  %v1973_v39 = vadd.f32 %v1828_v37, %v1588_v57  ;;  %v1830_v62 = vpop.f32.mrb[11].mxu1  ;;  %v1610_v37 = vld [vmem:[#allocation2 + $0x100] sm:$0xff] }
 0x30e   : > { %2036 = vst [vmem:[#allocation2 + $0x48] sm:$0xff] %v1972_v59  ;;  %v1974_v2 = vadd.f32 %v1830_v62, %v1589_v40 }
 0x30f   : > { %2037 = vst [vmem:[#allocation2 + $0x50] sm:$0xff] %v1973_v39  ;;  %v1611_v39 = vld [vmem:[#allocation2 + $0x108] sm:$0xff] }
 0x310   : > { %2038 = vst [vmem:[#allocation2 + $0x58] sm:$0xff] %v1974_v2  ;;  %v1612_v2 = vld [vmem:[#allocation2 + $0x110] sm:$0xff] }
 0x312   : > { %v1834_v30 = vpop.f32.mrb[12].mxu1 }
 0x313   : > { %v1975_v17 = vadd.f32 %v1834_v30, %v1590_v23  ;;  %v1836_v58 = vpop.f32.mrb[13].mxu1  ;;  %v1613_v30 = vld [vmem:[#allocation2 + $0x118] sm:$0xff] }
 0x314   : > { %v1976_v1 = vadd.f32 %v1836_v58, %v1591_v45  ;;  %v1838_v52 = vpop.f32.mrb[14].mxu1 }
 0x315   : > { %2039 = vst [vmem:[#allocation2 + $0x60] sm:$0xff] %v1975_v17  ;;  %v1977_v10 = vadd.f32 %v1838_v52, %v1592_v51  ;;  %v1840_v28 = vpop.f32.mrb[15].mxu1  ;;  %v1614_v52 = vld [vmem:[#allocation2 + $0x120] sm:$0xff] }
 0x316   : > { %2040 = vst [vmem:[#allocation2 + $0x68] sm:$0xff] %v1976_v1  ;;  %v1978_v5 = vadd.f32 %v1840_v28, %v1593_v8 }
 0x317   : > { %2041 = vst [vmem:[#allocation2 + $0x70] sm:$0xff] %v1977_v10  ;;  %v1615_v10 = vld [vmem:[#allocation2 + $0x128] sm:$0xff] }
 0x318   : > { %2042 = vst [vmem:[#allocation2 + $0x78] sm:$0xff] %v1978_v5  ;;  %v1616_v5 = vld [vmem:[#allocation2 + $0x130] sm:$0xff] }
 0x31a   : > { %v1844_v50 = vpop.f32.mrb[16].mxu1 }
 0x31b   : > { %v1979_v42 = vadd.f32 %v1844_v50, %v1594_v0  ;;  %v1846_v18 = vpop.f32.mrb[17].mxu1  ;;  %v1617_v50 = vld [vmem:[#allocation2 + $0x138] sm:$0xff] }
 0x31c   : > { %v1980_v13 = vadd.f32 %v1846_v18, %v1595_v14  ;;  %v1848_v20 = vpop.f32.mrb[18].mxu1 }
 0x31d   : > { %2043 = vst [vmem:[#allocation2 + $0x80] sm:$0xff] %v1979_v42  ;;  %v1981_v61 = vadd.f32 %v1848_v20, %v1596_v21  ;;  %v1850_v29 = vpop.f32.mrb[19].mxu1  ;;  %v1618_v20 = vld [vmem:[#allocation2 + $0x140] sm:$0xff] }
 0x31e   : > { %2044 = vst [vmem:[#allocation2 + $0x88] sm:$0xff] %v1980_v13  ;;  %v1982_v25 = vadd.f32 %v1850_v29, %v1597_v33 }
 0x31f   : > { %2045 = vst [vmem:[#allocation2 + $0x90] sm:$0xff] %v1981_v61  ;;  %v1619_v61 = vld [vmem:[#allocation2 + $0x148] sm:$0xff] }
 0x320   : > { %2046 = vst [vmem:[#allocation2 + $0x98] sm:$0xff] %v1982_v25  ;;  %v1620_v25 = vld [vmem:[#allocation2 + $0x150] sm:$0xff] }
 0x322   : > { %v1854_v49 = vpop.f32.mrb[20].mxu1 }
 0x323   : > { %v1983_v6 = vadd.f32 %v1854_v49, %v1598_v32  ;;  %v1856_v31 = vpop.f32.mrb[21].mxu1  ;;  %v1621_v49 = vld [vmem:[#allocation2 + $0x158] sm:$0xff] }
 0x324   : > { %v1984_v22 = vadd.f32 %v1856_v31, %v1599_v56  ;;  %v1858_v63 = vpop.f32.mrb[22].mxu1 }
 0x325   : > { %2047 = vst [vmem:[#allocation2 + $0xa0] sm:$0xff] %v1983_v6  ;;  %v1985_v36 = vadd.f32 %v1858_v63, %v1600_v38  ;;  %v1860_v55 = vpop.f32.mrb[23].mxu1  ;;  %v1622_v63 = vld [vmem:[#allocation2 + $0x160] sm:$0xff] }
 0x326   : > { %2048 = vst [vmem:[#allocation2 + $0xa8] sm:$0xff] %v1984_v22  ;;  %v1986_v41 = vadd.f32 %v1860_v55, %v1601_v34 }
 0x327   : > { %2049 = vst [vmem:[#allocation2 + $0xb0] sm:$0xff] %v1985_v36  ;;  %v1623_v36 = vld [vmem:[#allocation2 + $0x168] sm:$0xff] }
 0x328   : > { %2050 = vst [vmem:[#allocation2 + $0xb8] sm:$0xff] %v1986_v41  ;;  %v1624_v41 = vld [vmem:[#allocation2 + $0x170] sm:$0xff] }
 0x32a   : > { %v1864_v19 = vpop.f32.mrb[24].mxu1 }
 0x32b   : > { %v1987_v4 = vadd.f32 %v1864_v19, %v1602_v35  ;;  %v1866_v43 = vpop.f32.mrb[25].mxu1  ;;  %v1625_v19 = vld [vmem:[#allocation2 + $0x178] sm:$0xff] }
 0x32c   : > { %v1988_v27 = vadd.f32 %v1866_v43, %v1603_v11  ;;  %v1868_v48 = vpop.f32.mrb[26].mxu1 }
 0x32d   : > { %2051 = vst [vmem:[#allocation2 + $0xc0] sm:$0xff] %v1987_v4  ;;  %v1989_v9 = vadd.f32 %v1868_v48, %v1604_v47  ;;  %v1870_v12 = vpop.f32.mrb[27].mxu1  ;;  %v1626_v48 = vld [vmem:[#allocation2 + $0x180] sm:$0xff] }
 0x32e   : > { %2052 = vst [vmem:[#allocation2 + $0xc8] sm:$0xff] %v1988_v27  ;;  %v1990_v60 = vadd.f32 %v1870_v12, %v1605_v46 }
 0x32f   : > { %2053 = vst [vmem:[#allocation2 + $0xd0] sm:$0xff] %v1989_v9  ;;  %v1627_v9 = vld [vmem:[#allocation2 + $0x188] sm:$0xff] }
 0x330   : > { %2054 = vst [vmem:[#allocation2 + $0xd8] sm:$0xff] %v1990_v60  ;;  %v1628_v60 = vld [vmem:[#allocation2 + $0x190] sm:$0xff] }
 0x332   : > { %v1874_v24 = vpop.f32.mrb[28].mxu1 }
 0x333   : > { %v1991_v15 = vadd.f32 %v1874_v24, %v1606_v26  ;;  %v1876_v44 = vpop.f32.mrb[29].mxu1  ;;  %v1629_v24 = vld [vmem:[#allocation2 + $0x198] sm:$0xff] }
 0x334   : > { %v1992_v57 = vadd.f32 %v1876_v44, %v1607_v16  ;;  %v1878_v54 = vpop.f32.mrb[30].mxu1 }
 0x335   : > { %2055 = vst [vmem:[#allocation2 + $0xe0] sm:$0xff] %v1991_v15  ;;  %v1993_v3 = vadd.f32 %v1878_v54, %v1608_v7  ;;  %v1880_v40 = vpop.f32.mrb[31].mxu1  ;;  %v1630_v54 = vld [vmem:[#allocation2 + $0x1a0] sm:$0xff] }
 0x336   : > { %2056 = vst [vmem:[#allocation2 + $0xe8] sm:$0xff] %v1992_v57  ;;  %v1994_v59 = vadd.f32 %v1880_v40, %v1609_v53 }
 0x337   : > { %2057 = vst [vmem:[#allocation2 + $0xf0] sm:$0xff] %v1993_v3  ;;  %v1631_v3 = vld [vmem:[#allocation2 + $0x1a8] sm:$0xff] }
 0x338   : > { %2058 = vst [vmem:[#allocation2 + $0xf8] sm:$0xff] %v1994_v59  ;;  %v1632_v59 = vld [vmem:[#allocation2 + $0x1b0] sm:$0xff] }
 0x33a   : > { %v1884_v62 = vpop.f32.mrb[32].mxu1 }
 0x33b   : > { %v1995_v23 = vadd.f32 %v1884_v62, %v1610_v37  ;;  %v1886_v45 = vpop.f32.mrb[33].mxu1  ;;  %v1633_v62 = vld [vmem:[#allocation2 + $0x1b8] sm:$0xff] }
 0x33c   : > { %v1996_v51 = vadd.f32 %v1886_v45, %v1611_v39  ;;  %v1888_v17 = vpop.f32.mrb[34].mxu1 }
 0x33d   : > { %2059 = vst [vmem:[#allocation2 + $0x100] sm:$0xff] %v1995_v23  ;;  %v1997_v58 = vadd.f32 %v1888_v17, %v1612_v2  ;;  %v1890_v8 = vpop.f32.mrb[35].mxu1  ;;  %v1634_v17 = vld [vmem:[#allocation2 + $0x1c0] sm:$0xff] }
 0x33e   : > { %2060 = vst [vmem:[#allocation2 + $0x108] sm:$0xff] %v1996_v51  ;;  %v1998_v1 = vadd.f32 %v1890_v8, %v1613_v30 }
 0x33f   : > { %2061 = vst [vmem:[#allocation2 + $0x110] sm:$0xff] %v1997_v58  ;;  %v1635_v58 = vld [vmem:[#allocation2 + $0x1c8] sm:$0xff] }
 0x340   : > { %2062 = vst [vmem:[#allocation2 + $0x118] sm:$0xff] %v1998_v1  ;;  %v1636_v1 = vld [vmem:[#allocation2 + $0x1d0] sm:$0xff] }
 0x342   : > { %v1894_v28 = vpop.f32.mrb[36].mxu1 }
 0x343   : > { %v1999_v0 = vadd.f32 %v1894_v28, %v1614_v52  ;;  %v1896_v14 = vpop.f32.mrb[37].mxu1  ;;  %v1637_v28 = vld [vmem:[#allocation2 + $0x1d8] sm:$0xff] }
 0x344   : > { %v2000_v21 = vadd.f32 %v1896_v14, %v1615_v10  ;;  %v1898_v42 = vpop.f32.mrb[38].mxu1 }
 0x345   : > { %2063 = vst [vmem:[#allocation2 + $0x120] sm:$0xff] %v1999_v0  ;;  %v2001_v18 = vadd.f32 %v1898_v42, %v1616_v5  ;;  %v1900_v33 = vpop.f32.mrb[39].mxu1  ;;  %v1638_v42 = vld [vmem:[#allocation2 + $0x1e0] sm:$0xff] }
 0x346   : > { %2064 = vst [vmem:[#allocation2 + $0x128] sm:$0xff] %v2000_v21  ;;  %v2002_v13 = vadd.f32 %v1900_v33, %v1617_v50 }
 0x347   : > { %2065 = vst [vmem:[#allocation2 + $0x130] sm:$0xff] %v2001_v18  ;;  %v1639_v18 = vld [vmem:[#allocation2 + $0x1e8] sm:$0xff] }
 0x348   : > { %2066 = vst [vmem:[#allocation2 + $0x138] sm:$0xff] %v2002_v13  ;;  %v1640_v13 = vld [vmem:[#allocation2 + $0x1f0] sm:$0xff] }
 0x34a   : > { %v1904_v29 = vpop.f32.mrb[40].mxu1 }
 0x34b   : > { %v2003_v32 = vadd.f32 %v1904_v29, %v1618_v20  ;;  %v1906_v56 = vpop.f32.mrb[41].mxu1  ;;  %v1641_v29 = vld [vmem:[#allocation2 + $0x1f8] sm:$0xff] }
 0x34c   : > { %v2004_v38 = vadd.f32 %v1906_v56, %v1619_v61  ;;  %v1908_v6 = vpop.f32.mrb[42].mxu1 }
 0x34d   : > { %2067 = vst [vmem:[#allocation2 + $0x140] sm:$0xff] %v2003_v32  ;;  %v2005_v31 = vadd.f32 %v1908_v6, %v1620_v25  ;;  %v1910_v34 = vpop.f32.mrb[43].mxu1  ;;  %v2100_v6 = vld [vmem:[#allocation2 + $0x28] sm:$0xff] (!%p2617_p8) }
 0x34e   : > { %2068 = vst [vmem:[#allocation2 + $0x148] sm:$0xff] %v2004_v38  ;;  %v2006_v22 = vadd.f32 %v1910_v34, %v1621_v49  ;;  %v2102_v34 = vld [vmem:[#allocation2 + $0x38] sm:$0xff] (!%p2617_p8) }
 0x34f   : > { %2069 = vst [vmem:[#allocation2 + $0x150] sm:$0xff] %v2005_v31  ;;  %v2096_v31 = vld [vmem:[#allocation2 + $0x8] sm:$0xff] (!%p2617_p8) }
 0x350   : > { %2070 = vst [vmem:[#allocation2 + $0x158] sm:$0xff] %v2006_v22  ;;  %v2999_v22 = vmov (!%p2617_p8), 0  }
 0x351   : > { %2891 = vset.pattern.permute.xlu1 (!%p2617_p8), %v2999_v22  ;;  %2890 = vset.pattern.permute.xlu0 (!%p2617_p8), %v2999_v22 }
 0x352   : > { %v1914_v55 = vpop.f32.mrb[44].mxu1 }
 0x353   : > { %v2007_v35 = vadd.f32 %v1914_v55, %v1622_v63  ;;  %v1916_v11 = vpop.f32.mrb[45].mxu1  ;;  %v2161_v63 = vadd.f32 (!%p2617_p8), 1e-09, %v2100_v6  ;;  %v2162_v55 = vadd.f32 (!%p2617_p8), 1e-09, %v2102_v34 }
 0x354   : > { %v2008_v47 = vadd.f32 %v1916_v11, %v1623_v36  ;;  %v1918_v4 = vpop.f32.mrb[46].mxu1  ;;  %v2159_v36 = vadd.f32 (!%p2617_p8), 1e-09, %v2096_v31 }
 0x355   : > { %2071 = vst [vmem:[#allocation2 + $0x160] sm:$0xff] %v2007_v35  ;;  %v2009_v43 = vadd.f32 %v1918_v4, %v1624_v41  ;;  %v1920_v46 = vpop.f32.mrb[47].mxu1  ;;  %v2098_v41 = vld [vmem:[#allocation2 + $0x18] sm:$0xff] (!%p2617_p8)  ;;  %2892 = vrcp.f32 (!%p2617_p8), %v2161_v63 }
 0x356   : > { %2072 = vst [vmem:[#allocation2 + $0x168] sm:$0xff] %v2008_v47  ;;  %v2010_v27 = vadd.f32 %v1920_v46, %v1625_v19  ;;  %v2106_v35 = vld [vmem:[#allocation2 + $0x58] sm:$0xff] (!%p2617_p8)  ;;  %v2160_v11 = vadd.f32 (!%p2617_p8), 1e-09, %v2098_v41  ;;  %v2104_v19 = vld [vmem:[#allocation2 + $0x48] sm:$0xff] (!%p2617_p8)  ;;  %2894 = vrcp.f32 (!%p2617_p8), %v2159_v36 }
 0x357   : > { %2073 = vst [vmem:[#allocation2 + $0x170] sm:$0xff] %v2009_v43  ;;  %2896 = vrcp.f32 (!%p2617_p8), %v2162_v55  ;;  %v2164_v47 = vadd.f32 (!%p2617_p8), 1e-09, %v2106_v35  ;;  %v2163_v4 = vadd.f32 (!%p2617_p8), 1e-09, %v2104_v19  ;;  %v2110_v43 = vld [vmem:[#allocation2 + $0x78] sm:$0xff] (!%p2617_p8) }
 0x358   : > { %2074 = vst [vmem:[#allocation2 + $0x178] sm:$0xff] %v2010_v27  ;;  %2898 = vrcp.f32 (!%p2617_p8), %v2160_v11  ;;  %v2108_v46 = vld [vmem:[#allocation2 + $0x68] sm:$0xff] (!%p2617_p8)  ;;  %v2166_v27 = vadd.f32 (!%p2617_p8), 1e-09, %v2110_v43 }
 0x359   : > { %2900 = vrcp.f32 (!%p2617_p8), %v2164_v47 }
 0x35a   : > { %v1924_v12 = vpop.f32.mrb[48].mxu1  ;;  %2902 = vrcp.f32 (!%p2617_p8), %v2163_v4 }
 0x35b   : > { %v2011_v26 = vadd.f32 %v1924_v12, %v1626_v48  ;;  %v1926_v16 = vpop.f32.mrb[49].mxu1  ;;  %v2165_v48 = vadd.f32 (!%p2617_p8), 1e-09, %v2108_v46  ;;  %v2112_v12 = vld [vmem:[#allocation2 + $0x88] sm:$0xff] (!%p2617_p8)  ;;  %2904 = vrcp.f32 (!%p2617_p8), %v2166_v27 }
 0x35c   : > { %v2012_v7 = vadd.f32 %v1926_v16, %v1627_v9  ;;  %v1928_v15 = vpop.f32.mrb[50].mxu1  ;;  %v2114_v9 = vld [vmem:[#allocation2 + $0x98] sm:$0xff] (!%p2617_p8) }
 0x35d   : > { %2075 = vst [vmem:[#allocation2 + $0x180] sm:$0xff] %v2011_v26  ;;  %v2013_v44 = vadd.f32 %v1928_v15, %v1628_v60  ;;  %v1930_v53 = vpop.f32.mrb[51].mxu1  ;;  %v2168_v26 = vadd.f32 (!%p2617_p8), 1e-09, %v2114_v9  ;;  %2906 = vrcp.f32 (!%p2617_p8), %v2165_v48 }
 0x35e   : > { %2076 = vst [vmem:[#allocation2 + $0x188] sm:$0xff] %v2012_v7  ;;  %v2014_v57 = vadd.f32 %v1930_v53, %v1629_v24  ;;  %v2167_v24 = vadd.f32 (!%p2617_p8), 1e-09, %v2112_v12  ;;  %v2118_v7 = vld [vmem:[#allocation2 + $0xb8] sm:$0xff] (!%p2617_p8) }
 0x35f   : > { %2077 = vst [vmem:[#allocation2 + $0x190] sm:$0xff] %v2013_v44  ;;  %v2893_v60 = vpop.eup (!%p2617_p8), %2892  ;;  %v2116_v44 = vld [vmem:[#allocation2 + $0xa8] sm:$0xff] (!%p2617_p8)  ;;  %2908 = vrcp.f32 (!%p2617_p8), %v2168_v26 }
 0x360   : > { %2078 = vst [vmem:[#allocation2 + $0x198] sm:$0xff] %v2014_v57  ;;  %v2895_v16 = vpop.eup (!%p2617_p8), %2894  ;;  %2235 = vperm.xlu1 (!%p2617_p8), %2891, %v2893_v60   ;;  %v2170_v57 = vadd.f32 (!%p2617_p8), 1e-09, %v2118_v7  ;;  %2910 = vrcp.f32 (!%p2617_p8), %v2167_v24 }
 0x361   : > { %v2897_v15 = vpop.eup (!%p2617_p8), %2896  ;;  %2225 = vperm.xlu0 (!%p2617_p8), %2890, %v2895_v16  }
 0x362   : > { %v1934_v40 = vpop.f32.mrb[52].mxu1  ;;  %v2899_v53 = vpop.eup (!%p2617_p8), %2898  ;;  %2912 = vrcp.f32 (!%p2617_p8), %v2170_v57 }
 0x363   : > { %v2015_v37 = vadd.f32 %v1934_v40, %v1630_v54  ;;  %v1936_v39 = vpop.f32.mrb[53].mxu1  ;;  %v2169_v54 = vadd.f32 (!%p2617_p8), 1e-09, %v2116_v44  ;;  %v2901_v40 = vpop.eup (!%p2617_p8), %2900 }
 0x364   : > { %v2016_v2 = vadd.f32 %v1936_v39, %v1631_v3  ;;  %v1938_v23 = vpop.f32.mrb[54].mxu1  ;;  %2240 = vperm.xlu1 (!%p2617_p8), %2891, %v2897_v15   ;;  %v2122_v3 = vld [vmem:[#allocation2 + $0xd8] sm:$0xff] (!%p2617_p8) }
 0x365   : > { %2079 = vst [vmem:[#allocation2 + $0x1a0] sm:$0xff] %v2015_v37  ;;  %v2017_v45 = vadd.f32 %v1938_v23, %v1632_v59  ;;  %v1940_v30 = vpop.f32.mrb[55].mxu1  ;;  %2230 = vperm.xlu0 (!%p2617_p8), %2890, %v2899_v53   ;;  %v2120_v59 = vld [vmem:[#allocation2 + $0xc8] sm:$0xff] (!%p2617_p8)  ;;  %v2903_v37 = vpop.eup (!%p2617_p8), %2902  ;;  %v2172_v39 = vadd.f32 (!%p2617_p8), 1e-09, %v2122_v3  ;;  %2914 = vrcp.f32 (!%p2617_p8), %v2169_v54 }
 0x366   : > { %2080 = vst [vmem:[#allocation2 + $0x1a8] sm:$0xff] %v2016_v2  ;;  %v2018_v51 = vadd.f32 %v1940_v30, %v1633_v62  ;;  %v2171_v62 = vadd.f32 (!%p2617_p8), 1e-09, %v2120_v59  ;;  %v2126_v2 = vld [vmem:[#allocation2 + $0xf8] sm:$0xff] (!%p2617_p8)  ;;  %v2905_v23 = vpop.eup (!%p2617_p8), %2904  ;;  %v2144_v22 = vld [vmem:[#allocation2 + $0x188] sm:$0xff] (!%p2617_p8) }
 0x367   : > { %2081 = vst [vmem:[#allocation2 + $0x1b0] sm:$0xff] %v2017_v45  ;;  %v2124_v45 = vld [vmem:[#allocation2 + $0xe8] sm:$0xff] (!%p2617_p8)  ;;  %v2907_v30 = vpop.eup (!%p2617_p8), %2906  ;;  %2916 = vrcp.f32 (!%p2617_p8), %v2172_v39  ;;  %v2146_v31 = vld [vmem:[#allocation2 + $0x198] sm:$0xff] (!%p2617_p8)  ;;  %v2183_v55 = vadd.f32 (!%p2617_p8), 1e-09, %v2144_v22  ;;  %v2099_v39 = vld [vmem:[#allocation2 + $0x20] sm:$0xff] (!%p2617_p8) }
 0x368   : > { %2082 = vst [vmem:[#allocation2 + $0x1b8] sm:$0xff] %v2018_v51  ;;  %2250 = vperm.xlu1 (!%p2617_p8), %2891, %v2901_v40   ;;  %v2174_v51 = vadd.f32 (!%p2617_p8), 1e-09, %v2126_v2  ;;  %2918 = vrcp.f32 (!%p2617_p8), %v2171_v62  ;;  %v2184_v36 = vadd.f32 (!%p2617_p8), 1e-09, %v2146_v31  ;;  %v2095_v62 = vld [vmem:[#allocation2] sm:$0xff] (!%p2617_p8) }
 0x369   : > { %2245 = vperm.xlu0 (!%p2617_p8), %2890, %v2903_v37  }
 0x36a   : > { %v1944_v8 = vpop.f32.mrb[56].mxu1  ;;  %2920 = vrcp.f32 (!%p2617_p8), %v2174_v51  ;;  %v2101_v51 = vld [vmem:[#allocation2 + $0x30] sm:$0xff] (!%p2617_p8) }
 0x36b   : > { %v2019_v52 = vadd.f32 %v1944_v8, %v1634_v17  ;;  %v1946_v10 = vpop.f32.mrb[57].mxu1  ;;  %v2173_v17 = vadd.f32 (!%p2617_p8), 1e-09, %v2124_v45  ;;  %v2909_v8 = vpop.eup (!%p2617_p8), %2908 }
 0x36c   : > { %v2020_v5 = vadd.f32 %v1946_v10, %v1635_v58  ;;  %v1948_v0 = vpop.f32.mrb[58].mxu1  ;;  %2260 = vperm.xlu1 (!%p2617_p8), %2891, %v2905_v23   ;;  %v2130_v58 = vld [vmem:[#allocation2 + $0x118] sm:$0xff] (!%p2617_p8) }
 0x36d   : > { %2083 = vst [vmem:[#allocation2 + $0x1c0] sm:$0xff] %v2019_v52  ;;  %v2021_v14 = vadd.f32 %v1948_v0, %v1636_v1  ;;  %v1950_v50 = vpop.f32.mrb[59].mxu1  ;;  %2255 = vperm.xlu0 (!%p2617_p8), %2890, %v2907_v30   ;;  %v2128_v1 = vld [vmem:[#allocation2 + $0x108] sm:$0xff] (!%p2617_p8)  ;;  %v2911_v52 = vpop.eup (!%p2617_p8), %2910  ;;  %v2176_v10 = vadd.f32 (!%p2617_p8), 1e-09, %v2130_v58  ;;  %2922 = vrcp.f32 (!%p2617_p8), %v2173_v17  ;;  %v2097_v17 = vld [vmem:[#allocation2 + $0x10] sm:$0xff] (!%p2617_p8) }
 0x36e   : > { %2084 = vst [vmem:[#allocation2 + $0x1c8] sm:$0xff] %v2020_v5  ;;  %v2022_v21 = vadd.f32 %v1950_v50, %v1637_v28  ;;  %v2175_v28 = vadd.f32 (!%p2617_p8), 1e-09, %v2128_v1  ;;  %v2134_v5 = vld [vmem:[#allocation2 + $0x138] sm:$0xff] (!%p2617_p8)  ;;  %v2913_v0 = vpop.eup (!%p2617_p8), %2912  ;;  %v2148_v11 = vld [vmem:[#allocation2 + $0x1a8] sm:$0xff] (!%p2617_p8) }
 0x36f   : > { %2085 = vst [vmem:[#allocation2 + $0x1d0] sm:$0xff] %v2021_v14  ;;  %v2132_v14 = vld [vmem:[#allocation2 + $0x128] sm:$0xff] (!%p2617_p8)  ;;  %v2915_v50 = vpop.eup (!%p2617_p8), %2914  ;;  %2924 = vrcp.f32 (!%p2617_p8), %v2176_v10  ;;  %v2150_v41 = vld [vmem:[#allocation2 + $0x1b8] sm:$0xff] (!%p2617_p8)  ;;  %v2185_v4 = vadd.f32 (!%p2617_p8), 1e-09, %v2148_v11  ;;  %v2105_v10 = vld [vmem:[#allocation2 + $0x50] sm:$0xff] (!%p2617_p8) }
 0x370   : > { %2086 = vst [vmem:[#allocation2 + $0x1d8] sm:$0xff] %v2022_v21  ;;  %2270 = vperm.xlu1 (!%p2617_p8), %2891, %v2909_v8   ;;  %v2178_v21 = vadd.f32 (!%p2617_p8), 1e-09, %v2134_v5  ;;  %2926 = vrcp.f32 (!%p2617_p8), %v2175_v28  ;;  %v2186_v47 = vadd.f32 (!%p2617_p8), 1e-09, %v2150_v41  ;;  %v2103_v28 = vld [vmem:[#allocation2 + $0x40] sm:$0xff] (!%p2617_p8) }
 0x371   : > { %2265 = vperm.xlu0 (!%p2617_p8), %2890, %v2911_v52  }
 0x372   : > { %v1954_v33 = vpop.f32.mrb[60].mxu1  ;;  %2094 = sbr.rel (%p2617_p8) target bundleno = 1056 (0x420), region = 44  ;;  %2928 = vrcp.f32 (!%p2617_p8), %v2178_v21  ;;  %v2109_v21 = vld [vmem:[#allocation2 + $0x70] sm:$0xff] (!%p2617_p8) }
 0x373   : > { %v2023_v20 = vadd.f32 %v1954_v33, %v1638_v42  ;;  %v1956_v61 = vpop.f32.mrb[61].mxu1  ;;  %v2177_v42 = vadd.f32 (!%p2617_p8), 1e-09, %v2132_v14  ;;  %v2917_v33 = vpop.eup (!%p2617_p8), %2916 }
 0x374   : > { %v2024_v25 = vadd.f32 %v1956_v61, %v1639_v18  ;;  %v1958_v32 = vpop.f32.mrb[62].mxu1  ;;  %2280 = vperm.xlu1 (!%p2617_p8), %2891, %v2913_v0   ;;  %v2138_v18 = vld [vmem:[#allocation2 + $0x158] sm:$0xff] (!%p2617_p8) }
 0x375   : > { %2087 = vst [vmem:[#allocation2 + $0x1e0] sm:$0xff] %v2023_v20  ;;  %v2025_v56 = vadd.f32 %v1958_v32, %v1640_v13  ;;  %v1960_v49 = vpop.f32.mrb[63].mxu1  ;;  %2275 = vperm.xlu0 (!%p2617_p8), %2890, %v2915_v50   ;;  %v2136_v13 = vld [vmem:[#allocation2 + $0x148] sm:$0xff] (!%p2617_p8)  ;;  %v2919_v20 = vpop.eup (!%p2617_p8), %2918  ;;  %v2180_v61 = vadd.f32 (!%p2617_p8), 1e-09, %v2138_v18  ;;  %2930 = vrcp.f32 (!%p2617_p8), %v2177_v42  ;;  %v2107_v42 = vld [vmem:[#allocation2 + $0x60] sm:$0xff] (!%p2617_p8) }
 0x376   : > { %2088 = vst [vmem:[#allocation2 + $0x1e8] sm:$0xff] %v2024_v25  ;;  %v2026_v38 = vadd.f32 %v1960_v49, %v1641_v29  ;;  %v2179_v29 = vadd.f32 (!%p2617_p8), 1e-09, %v2136_v13  ;;  %v2142_v25 = vld [vmem:[#allocation2 + $0x178] sm:$0xff] (!%p2617_p8)  ;;  %v2921_v32 = vpop.eup (!%p2617_p8), %2920  ;;  %v2152_v27 = vld [vmem:[#allocation2 + $0x1c8] sm:$0xff] (!%p2617_p8) }
 0x377   : > { %2089 = vst [vmem:[#allocation2 + $0x1f0] sm:$0xff] %v2025_v56  ;;  %v2140_v56 = vld [vmem:[#allocation2 + $0x168] sm:$0xff] (!%p2617_p8)  ;;  %v2923_v49 = vpop.eup (!%p2617_p8), %2922  ;;  %2932 = vrcp.f32 (!%p2617_p8), %v2180_v61  ;;  %v2154_v43 = vld [vmem:[#allocation2 + $0x1d8] sm:$0xff] (!%p2617_p8)  ;;  %v2187_v12 = vadd.f32 (!%p2617_p8), 1e-09, %v2152_v27  ;;  %v2113_v61 = vld [vmem:[#allocation2 + $0x90] sm:$0xff] (!%p2617_p8) }
 0x378   : > { %2090 = vst [vmem:[#allocation2 + $0x1f8] sm:$0xff] %v2026_v38  ;;  %2290 = vperm.xlu1 (!%p2617_p8), %2891, %v2917_v33   ;;  %v2182_v38 = vadd.f32 (!%p2617_p8), 1e-09, %v2142_v25  ;;  %2934 = vrcp.f32 (!%p2617_p8), %v2179_v29  ;;  %v2181_v6 = vadd.f32 (!%p2617_p8), 1e-09, %v2140_v56  ;;  %v2111_v29 = vld [vmem:[#allocation2 + $0x80] sm:$0xff] (!%p2617_p8) }
 0x379   : > { %2285 = vperm.xlu0 %2890, %v2919_v20   ;;  %v2925_v34 = vpop.eup %2924  ;;  %v2188_v9 = vadd.f32 1e-09, %v2154_v43 }
 0x37a   : > { %v2927_v63 = vpop.eup %2926  ;;  %2936 = vrcp.f32 %v2182_v38  ;;  %v2117_v38 = vld [vmem:[#allocation2 + $0xb0] sm:$0xff] }
 0x37b   : > { %2938 = vrcp.f32 %v2181_v6  ;;  %v2115_v6 = vld [vmem:[#allocation2 + $0xa0] sm:$0xff] }
 0x37c   : > { %2300 = vperm.xlu1 %2891, %v2921_v32   ;;  %v2929_v35 = vpop.eup %2928  ;;  %2940 = vrcp.f32 %v2184_v36  ;;  %v2121_v36 = vld [vmem:[#allocation2 + $0xd0] sm:$0xff] }
 0x37d   : > { %2295 = vperm.xlu0 %2890, %v2923_v49   ;;  %2942 = vrcp.f32 %v2183_v55  ;;  %v2156_v16 = vld [vmem:[#allocation2 + $0x1e8] sm:$0xff]  ;;  %v2119_v55 = vld [vmem:[#allocation2 + $0xc0] sm:$0xff] }
 0x37e   : > { %2944 = vrcp.f32 %v2186_v47  ;;  %v2189_v15 = vadd.f32 1e-09, %v2156_v16  ;;  %v2125_v47 = vld [vmem:[#allocation2 + $0xf0] sm:$0xff] }
 0x37f   : > { %v2931_v19 = vpop.eup %2930  ;;  %2946 = vrcp.f32 %v2185_v4  ;;  %v2158_v60 = vld [vmem:[#allocation2 + $0x1f8] sm:$0xff]  ;;  %v2123_v4 = vld [vmem:[#allocation2 + $0xe0] sm:$0xff] }
 0x380   : > { %2310 = vperm.xlu1 %2891, %v2925_v34   ;;  %2948 = vrcp.f32 %v2188_v9  ;;  %v2190_v7 = vadd.f32 1e-09, %v2158_v60  ;;  %v2129_v9 = vld [vmem:[#allocation2 + $0x110] sm:$0xff] }
 0x381   : > { %2305 = vperm.xlu0 %2890, %v2927_v63   ;;  %v2933_v46 = vpop.eup %2932  ;;  %2950 = vrcp.f32 %v2187_v12  ;;  %v2127_v12 = vld [vmem:[#allocation2 + $0x100] sm:$0xff] }
 0x382   : > { %v2935_v48 = vpop.eup %2934  ;;  %2952 = vrcp.f32 %v2190_v7  ;;  %v2133_v7 = vld [vmem:[#allocation2 + $0x130] sm:$0xff] }
 0x383   : > { %2954 = vrcp.f32 %v2189_v15  ;;  %v2131_v15 = vld [vmem:[#allocation2 + $0x120] sm:$0xff] }
 0x384   : > { %2320 = vperm.xlu1 %2891, %v2929_v35   ;;  %v2937_v26 = vpop.eup %2936 }
 0x385   : > { %2315 = vperm.xlu0 %2890, %v2931_v19   ;;  %v2939_v24 = vpop.eup %2938 }
 0x386   : > { %v2941_v44 = vpop.eup %2940 }
 0x387   : > { %v2943_v53 = vpop.eup %2942 }
 0x388   : > { %2330 = vperm.xlu1 %2891, %v2933_v46   ;;  %v2945_v57 = vpop.eup %2944 }
 0x389   : > { %2325 = vperm.xlu0 %2890, %v2935_v48   ;;  %v2947_v54 = vpop.eup %2946 }
 0x38a   : > { %v2949_v3 = vpop.eup %2948 }
 0x38b   : > { %v2951_v40 = vpop.eup %2950 }
 0x38c   : > { %2340 = vperm.xlu1 %2891, %v2937_v26   ;;  %v2953_v59 = vpop.eup %2952 }
 0x38d   : > { %2335 = vperm.xlu0 %2890, %v2939_v24   ;;  %v2955_v37 = vpop.eup %2954 }
 0x390   : > { %2350 = vperm.xlu1 %2891, %v2941_v44  }
 0x391   : > { %2345 = vperm.xlu0 %2890, %v2943_v53  }
 0x394   : > { %2360 = vperm.xlu1 %2891, %v2945_v57  }
 0x395   : > { %2355 = vperm.xlu0 %2890, %v2947_v54  }
 0x398   : > { %2370 = vperm.xlu1 %2891, %v2949_v3   ;;  %v2137_v3 = vld [vmem:[#allocation2 + $0x150] sm:$0xff] }
 0x399   : > { %2365 = vperm.xlu0 %2890, %v2951_v40   ;;  %v2135_v40 = vld [vmem:[#allocation2 + $0x140] sm:$0xff] }
 0x39c   : > { %2380 = vperm.xlu1 %2891, %v2953_v59  }
 0x39d   : > { %2375 = vperm.xlu0 %2890, %v2955_v37  }
 0x3df   : > { %v2236_v2 = vpop.permute.xlu1 %2235 }
 0x3e0   : > { %v2385_v23 = vmul.f32 %v2236_v2, %v2099_v39  ;;  %v2226_v45 = vpop.permute.xlu0 %2225  ;;  %v2141_v2 = vld [vmem:[#allocation2 + $0x170] sm:$0xff] }
 0x3e1   : > { %v2383_v30 = vmul.f32 %v2226_v45, %v2095_v62 }
 0x3e2   : > { %2417 = vst [vmem:[%s3084_s26 + $0x10] sm:$0xff] %v2385_v23  ;;  %v2139_v23 = vld [vmem:[#allocation2 + $0x160] sm:$0xff] }
 0x3e3   : > { %2415 = vst [vmem:[%s3084_s26] sm:$0xff] %v2383_v30  ;;  %v2241_v58 = vpop.permute.xlu1 %2240 }
 0x3e4   : > { %v2386_v8 = vmul.f32 %v2241_v58, %v2101_v51  ;;  %v2231_v1 = vpop.permute.xlu0 %2230  ;;  %v2145_v58 = vld [vmem:[#allocation2 + $0x190] sm:$0xff] }
 0x3e5   : > { %v2384_v52 = vmul.f32 %v2231_v1, %v2097_v17 }
 0x3e6   : > { %2418 = vst [vmem:[%s3084_s26 + $0x18] sm:$0xff] %v2386_v8  ;;  %v2143_v8 = vld [vmem:[#allocation2 + $0x180] sm:$0xff] }
 0x3e7   : > { %2416 = vst [vmem:[%s3084_s26 + $0x8] sm:$0xff] %v2384_v52  ;;  %v2251_v5 = vpop.permute.xlu1 %2250 }
 0x3e8   : > { %v2388_v0 = vmul.f32 %v2251_v5, %v2105_v10  ;;  %v2246_v14 = vpop.permute.xlu0 %2245  ;;  %v2149_v5 = vld [vmem:[#allocation2 + $0x1b0] sm:$0xff] }
 0x3e9   : > { %v2387_v50 = vmul.f32 %v2246_v14, %v2103_v28 }
 0x3ea   : > { %2420 = vst [vmem:[%s3084_s26 + $0x28] sm:$0xff] %v2388_v0  ;;  %v2147_v0 = vld [vmem:[#allocation2 + $0x1a0] sm:$0xff] }
 0x3eb   : > { %2419 = vst [vmem:[%s3084_s26 + $0x20] sm:$0xff] %v2387_v50  ;;  %v2261_v18 = vpop.permute.xlu1 %2260 }
 0x3ec   : > { %v2390_v33 = vmul.f32 %v2261_v18, %v2109_v21  ;;  %v2256_v13 = vpop.permute.xlu0 %2255  ;;  %v2153_v18 = vld [vmem:[#allocation2 + $0x1d0] sm:$0xff] }
 0x3ed   : > { %v2389_v20 = vmul.f32 %v2256_v13, %v2107_v42 }
 0x3ee   : > { %2422 = vst [vmem:[%s3084_s26 + $0x38] sm:$0xff] %v2390_v33  ;;  %v2151_v33 = vld [vmem:[#allocation2 + $0x1c0] sm:$0xff] }
 0x3ef   : > { %2421 = vst [vmem:[%s3084_s26 + $0x30] sm:$0xff] %v2389_v20  ;;  %v2271_v25 = vpop.permute.xlu1 %2270 }
 0x3f0   : > { %v2392_v32 = vmul.f32 %v2271_v25, %v2113_v61  ;;  %v2266_v56 = vpop.permute.xlu0 %2265  ;;  %v2157_v25 = vld [vmem:[#allocation2 + $0x1f0] sm:$0xff] }
 0x3f1   : > { %v2391_v49 = vmul.f32 %v2266_v56, %v2111_v29 }
 0x3f2   : > { %2424 = vst [vmem:[%s3084_s26 + $0x48] sm:$0xff] %v2392_v32  ;;  %v2155_v32 = vld [vmem:[#allocation2 + $0x1e0] sm:$0xff] }
 0x3f3   : > { %2423 = vst [vmem:[%s3084_s26 + $0x40] sm:$0xff] %v2391_v49  ;;  %v2281_v31 = vpop.permute.xlu1 %2280 }
 0x3f4   : > { %v2394_v34 = vmul.f32 %v2281_v31, %v2117_v38  ;;  %v2276_v22 = vpop.permute.xlu0 %2275 }
 0x3f5   : > { %v2393_v63 = vmul.f32 %v2276_v22, %v2115_v6 }
 0x3f6   : > { %2426 = vst [vmem:[%s3084_s26 + $0x58] sm:$0xff] %v2394_v34 }
 0x3f7   : > { %2425 = vst [vmem:[%s3084_s26 + $0x50] sm:$0xff] %v2393_v63  ;;  %v2291_v41 = vpop.permute.xlu1 %2290 }
 0x3f8   : > { %v2396_v35 = vmul.f32 %v2291_v41, %v2121_v36  ;;  %v2286_v11 = vpop.permute.xlu0 %2285 }
 0x3f9   : > { %v2395_v19 = vmul.f32 %v2286_v11, %v2119_v55 }
 0x3fa   : > { %2428 = vst [vmem:[%s3084_s26 + $0x68] sm:$0xff] %v2396_v35 }
 0x3fb   : > { %2427 = vst [vmem:[%s3084_s26 + $0x60] sm:$0xff] %v2395_v19  ;;  %v2301_v43 = vpop.permute.xlu1 %2300 }
 0x3fc   : > { %v2398_v46 = vmul.f32 %v2301_v43, %v2125_v47  ;;  %v2296_v27 = vpop.permute.xlu0 %2295 }
 0x3fd   : > { %v2397_v48 = vmul.f32 %v2296_v27, %v2123_v4 }
 0x3fe   : > { %2430 = vst [vmem:[%s3084_s26 + $0x78] sm:$0xff] %v2398_v46 }
 0x3ff   : > { %2429 = vst [vmem:[%s3084_s26 + $0x70] sm:$0xff] %v2397_v48  ;;  %v2311_v60 = vpop.permute.xlu1 %2310 }
 0x400   : > { %v2400_v26 = vmul.f32 %v2311_v60, %v2129_v9  ;;  %v2306_v16 = vpop.permute.xlu0 %2305 }
 0x401   : > { %v2399_v24 = vmul.f32 %v2306_v16, %v2127_v12 }
 0x402   : > { %2432 = vst [vmem:[%s3084_s26 + $0x88] sm:$0xff] %v2400_v26 }
 0x403   : > { %2431 = vst [vmem:[%s3084_s26 + $0x80] sm:$0xff] %v2399_v24  ;;  %v2321_v44 = vpop.permute.xlu1 %2320 }
 0x404   : > { %v2402_v53 = vmul.f32 %v2321_v44, %v2133_v7  ;;  %v2316_v57 = vpop.permute.xlu0 %2315 }
 0x405   : > { %v2401_v54 = vmul.f32 %v2316_v57, %v2131_v15 }
 0x406   : > { %2434 = vst [vmem:[%s3084_s26 + $0x98] sm:$0xff] %v2402_v53 }
 0x407   : > { %2433 = vst [vmem:[%s3084_s26 + $0x90] sm:$0xff] %v2401_v54  ;;  %v2331_v59 = vpop.permute.xlu1 %2330 }
 0x408   : > { %v2404_v37 = vmul.f32 %v2331_v59, %v2137_v3  ;;  %v2326_v39 = vpop.permute.xlu0 %2325 }
 0x409   : > { %v2403_v62 = vmul.f32 %v2326_v39, %v2135_v40 }
 0x40a   : > { %2436 = vst [vmem:[%s3084_s26 + $0xa8] sm:$0xff] %v2404_v37 }
 0x40b   : > { %2435 = vst [vmem:[%s3084_s26 + $0xa0] sm:$0xff] %v2403_v62  ;;  %v2341_v45 = vpop.permute.xlu1 %2340 }
 0x40c   : > { %v2406_v30 = vmul.f32 %v2341_v45, %v2141_v2  ;;  %v2336_v51 = vpop.permute.xlu0 %2335 }
 0x40d   : > { %v2405_v17 = vmul.f32 %v2336_v51, %v2139_v23 }
 0x40e   : > { %2438 = vst [vmem:[%s3084_s26 + $0xb8] sm:$0xff] %v2406_v30 }
 0x40f   : > { %2437 = vst [vmem:[%s3084_s26 + $0xb0] sm:$0xff] %v2405_v17  ;;  %v2351_v1 = vpop.permute.xlu1 %2350 }
 0x410   : > { %v2408_v52 = vmul.f32 %v2351_v1, %v2145_v58  ;;  %v2346_v10 = vpop.permute.xlu0 %2345 }
 0x411   : > { %v2407_v28 = vmul.f32 %v2346_v10, %v2143_v8 }
 0x412   : > { %2440 = vst [vmem:[%s3084_s26 + $0xc8] sm:$0xff] %v2408_v52 }
 0x413   : > { %2439 = vst [vmem:[%s3084_s26 + $0xc0] sm:$0xff] %v2407_v28  ;;  %v2361_v14 = vpop.permute.xlu1 %2360 }
 0x414   : > { %v2410_v50 = vmul.f32 %v2361_v14, %v2149_v5  ;;  %v2356_v21 = vpop.permute.xlu0 %2355 }
 0x415   : > { %v2409_v42 = vmul.f32 %v2356_v21, %v2147_v0 }
 0x416   : > { %2442 = vst [vmem:[%s3084_s26 + $0xd8] sm:$0xff] %v2410_v50 }
 0x417   : > { %2441 = vst [vmem:[%s3084_s26 + $0xd0] sm:$0xff] %v2409_v42  ;;  %v2371_v13 = vpop.permute.xlu1 %2370 }
 0x418   : > { %v2412_v20 = vmul.f32 %v2371_v13, %v2153_v18  ;;  %v2366_v61 = vpop.permute.xlu0 %2365 }
 0x419   : > { %v2411_v29 = vmul.f32 %v2366_v61, %v2151_v33 }
 0x41a   : > { %2444 = vst [vmem:[%s3084_s26 + $0xe8] sm:$0xff] %v2412_v20 }
 0x41b   : > { %2443 = vst [vmem:[%s3084_s26 + $0xe0] sm:$0xff] %v2411_v29  ;;  %v2381_v56 = vpop.permute.xlu1 %2380 }
 0x41c   : > { %v2414_v49 = vmul.f32 %v2381_v56, %v2157_v25  ;;  %v2376_v38 = vpop.permute.xlu0 %2375 }
 0x41d   : > { %v2413_v6 = vmul.f32 %v2376_v38, %v2155_v32 }
 0x41e   : > { %2446 = vst [vmem:[%s3084_s26 + $0xf8] sm:$0xff] %v2414_v49 }
 0x41f   : > { %2445 = vst [vmem:[%s3084_s26 + $0xf0] sm:$0xff] %v2413_v6 }
 0x420 PF: > { %s14_s19 = sadd.s32 1, %s2994_s19   ;;  %s4183_s15 = smov %s2986_s17 }
 0x421   : > { %p11_p9 = scmp.ge.s32.totalorder %s14_s19, 6   ;;  %s4184_s16 = smov %s2990_s18 }
 0x422   : > { %s4185_s17 = smov %s4188_s20  ;;  %s4186_s18 = smov %s4192_s21 }
 0x423   :  { %13 = sbr.rel (!%p11_p9) target bundleno = 3 (0x3), region = 83 }

// kernel: sa_module_pct_forward.10
= control target key start
LH: loop header
LB: loop body
LE: loop exit
PB: predicated region body
PF: predicated region fallthrough
CT: control target
= control target key end

     0   :  { %s2295_s2 = inlined_call_operand.vmem [shape: bf16[128,128], index: 2, kind: input, shape index: {}]   ;;  %s2296_s0 = inlined_call_operand.vmem [shape: f32[512,128], index: 0, kind: input, shape index: {}]   ;;  %s2297_s1 = inlined_call_operand.vmem [shape: f32[512,128], index: 1, kind: input, shape index: {}]   ;;  %s2298_s3 = inlined_call_operand.vmem [shape: bf16[128,128], index: 3, kind: input, shape index: {}]   ;;  %s2299_s4 = inlined_call_operand.vmem [shape: f32[512,128], index: 4, kind: output, shape index: {0}]   ;;  %s2300_s5 = inlined_call_operand.vmem [shape: f32[1,2,128], index: 5, kind: output, shape index: {1}]  }
   0x1   :  { %v1514_v0 = vld [vmem:[%s2295_s2] sm:$0xff]   ;;  %v1515_v1 = vld [vmem:[%s2295_s2 + $0x8] sm:$0xff]   ;;  %v1516_v2 = vld [vmem:[%s2295_s2 + $0x10] sm:$0xff]  }
   0x2   :  { %1354 = vmatprep.subr.bf16.mxu0 %v1514_v0  ;;  %v1517_v3 = vld [vmem:[%s2295_s2 + $0x18] sm:$0xff]   ;;  %v20_v4 = vld [vmem:[%s2296_s0] sm:$0xff]  ;;  %v21_v5 = vld [vmem:[%s2296_s0 + $0x8] sm:$0xff] }
   0x3   :  { %1355 = vmatpush3.bf16.msra.mxu0 %v1514_v0  ;;  %v84_v6 = vld [vmem:[%s2297_s1] sm:$0xff]  ;;  %v85_v7 = vld [vmem:[%s2297_s1 + $0x8] sm:$0xff]  ;;  %v1520_v13 = vld [vmem:[%s2295_s2 + $0x30] sm:$0xff]  }
   0x4   :  { %1356 = vmatprep.subr.bf16.mxu0 %v1515_v1  ;;  %v148_v8 = vsub.f32 %v20_v4, %v84_v6  ;;  %v149_v9 = vsub.f32 %v21_v5, %v85_v7  ;;  %v1518_v10 = vld [vmem:[%s2295_s2 + $0x20] sm:$0xff]   ;;  %v1519_v12 = vld [vmem:[%s2295_s2 + $0x28] sm:$0xff]   ;;  %v1521_v14 = vld [vmem:[%s2295_s2 + $0x38] sm:$0xff]  }
   0x5   :  { %v22_v15 = vld [vmem:[%s2296_s0 + $0x10] sm:$0xff]  ;;  %v23_v16 = vld [vmem:[%s2296_s0 + $0x18] sm:$0xff]  ;;  %v24_v19 = vld [vmem:[%s2296_s0 + $0x20] sm:$0xff] }
   0x6   :  { %v212_v11 = vpack.c.bf16 %v149_v9, %v148_v8  ;;  %v86_v17 = vld [vmem:[%s2297_s1 + $0x10] sm:$0xff]  ;;  %v87_v18 = vld [vmem:[%s2297_s1 + $0x18] sm:$0xff]  ;;  %v25_v20 = vld [vmem:[%s2296_s0 + $0x28] sm:$0xff] }
   0x7   :  { %1357 = vmatpush3.bf16.msra.mxu0 %v1515_v1  ;;  %v88_v21 = vld [vmem:[%s2297_s1 + $0x20] sm:$0xff]  ;;  %v89_v22 = vld [vmem:[%s2297_s1 + $0x28] sm:$0xff]  ;;  %v46_v23 = vld [vmem:[%s2296_s0 + $0xd0] sm:$0xff]  ;;  %v150_v25 = vsub.f32 %v22_v15, %v86_v17  ;;  %v151_v26 = vsub.f32 %v23_v16, %v87_v18 }
   0x8   :  { %1358 = vmatprep.subr.bf16.mxu0 %v1516_v2  ;;  %1370 = vmatprep.mubr.bf16.mxu0 %v212_v11  ;;  %v47_v24 = vld [vmem:[%s2296_s0 + $0xd8] sm:$0xff]  ;;  %v110_v27 = vld [vmem:[%s2297_s1 + $0xd0] sm:$0xff]  ;;  %v48_v29 = vld [vmem:[%s2296_s0 + $0xe0] sm:$0xff]  ;;  %v152_v30 = vsub.f32 %v24_v19, %v88_v21  ;;  %v153_v31 = vsub.f32 %v25_v20, %v89_v22 }
   0x9   :  { %v111_v28 = vld [vmem:[%s2297_s1 + $0xd8] sm:$0xff]  ;;  %v174_v32 = vsub.f32 %v46_v23, %v110_v27  ;;  %v49_v34 = vld [vmem:[%s2296_s0 + $0xe8] sm:$0xff]  ;;  %v112_v35 = vld [vmem:[%s2297_s1 + $0xe0] sm:$0xff]  ;;  %v213_v51 = vpack.c.bf16 %v151_v26, %v150_v25 }
   0xa   :  { %v175_v33 = vsub.f32 %v47_v24, %v111_v28  ;;  %v113_v36 = vld [vmem:[%s2297_s1 + $0xe8] sm:$0xff]  ;;  %v176_v37 = vsub.f32 %v48_v29, %v112_v35  ;;  %v50_v39 = vld [vmem:[%s2296_s0 + $0xf0] sm:$0xff]  ;;  %v51_v40 = vld [vmem:[%s2296_s0 + $0xf8] sm:$0xff]  ;;  %v214_v61 = vpack.c.bf16 %v153_v31, %v152_v30 }
   0xb   :  { %1359 = vmatpush3.bf16.msra.mxu0 %v1516_v2  ;;  %v177_v38 = vsub.f32 %v49_v34, %v113_v36  ;;  %v114_v41 = vld [vmem:[%s2297_s1 + $0xf0] sm:$0xff]  ;;  %v1661_v43 = vld [vmem:[%s2296_s0 + $0x38] sm:$0xff]  ;;  %v52_v49 = vld [vmem:[%s2296_s0 + $0x100] sm:$0xff] }
   0xc   :  { %1360 = vmatprep.subr.bf16.mxu0 %v1517_v3  ;;  %v1656_v42 = vld [vmem:[%s2296_s0 + $0x30] sm:$0xff]  ;;  %v1671_v45 = vld [vmem:[%s2297_s1 + $0x38] sm:$0xff]  ;;  %v1673_v46 = vpack.c.bf16 %v175_v33, %v174_v32  ;;  %v178_v48 = vsub.f32 %v50_v39, %v114_v41  ;;  %v53_v50 = vld [vmem:[%s2296_s0 + $0x108] sm:$0xff] }
   0xd   :  { %v1666_v44 = vld [vmem:[%s2297_s1 + $0x30] sm:$0xff]  ;;  %v115_v47 = vld [vmem:[%s2297_s1 + $0xf8] sm:$0xff]  ;;  %v1687_v52 = vld [vmem:[%s2296_s0 + $0x40] sm:$0xff]  ;;  %v1704_v56 = vpack.c.bf16 %v177_v38, %v176_v37  ;;  %v155_v15 = vsub.f32 %v1661_v43, %v1671_v45 }
   0xe   :  { %v1692_v53 = vld [vmem:[%s2296_s0 + $0x48] sm:$0xff]  ;;  %v1697_v54 = vld [vmem:[%s2297_s1 + $0x40] sm:$0xff]  ;;  %v179_v57 = vsub.f32 %v51_v40, %v115_v47  ;;  %v54_v60 = vld [vmem:[%s2296_s0 + $0x110] sm:$0xff] }
   0xf   :  { %1361 = vmatpush3.bf16.msra.mxu0 %v1517_v3  ;;  %v1702_v55 = vld [vmem:[%s2297_s1 + $0x48] sm:$0xff]  ;;  %v116_v58 = vld [vmem:[%s2297_s1 + $0x100] sm:$0xff]  ;;  %v55_v0 = vld [vmem:[%s2296_s0 + $0x118] sm:$0xff]  ;;  %v156_v21 = vsub.f32 %v1687_v52, %v1697_v54 }
  0x10   :  { %1362 = vmatprep.subr.bf16.mxu0 %v1518_v10  ;;  %v117_v59 = vld [vmem:[%s2297_s1 + $0x108] sm:$0xff]  ;;  %v180_v62 = vsub.f32 %v52_v49, %v116_v58  ;;  %v118_v1 = vld [vmem:[%s2297_s1 + $0x110] sm:$0xff]  ;;  %v119_v2 = vld [vmem:[%s2297_s1 + $0x118] sm:$0xff]  ;;  %v1724_v3 = vpack.c.bf16 %v179_v57, %v178_v48  ;;  %v157_v22 = vsub.f32 %v1692_v53, %v1702_v55 }
  0x11   :  { %v181_v63 = vsub.f32 %v53_v50, %v117_v59  ;;  %v182_v4 = vsub.f32 %v54_v60, %v118_v1  ;;  %v183_v5 = vsub.f32 %v55_v0, %v119_v2  ;;  %v56_v6 = vld [vmem:[%s2296_s0 + $0x120] sm:$0xff]  ;;  %v57_v7 = vld [vmem:[%s2296_s0 + $0x128] sm:$0xff]  ;;  %v122_v18 = vld [vmem:[%s2297_s1 + $0x130] sm:$0xff] }
  0x12   :  { %v120_v8 = vld [vmem:[%s2297_s1 + $0x120] sm:$0xff]  ;;  %v123_v19 = vld [vmem:[%s2297_s1 + $0x138] sm:$0xff]  ;;  %v61_v25 = vld [vmem:[%s2296_s0 + $0x148] sm:$0xff]  ;;  %v216_v54 = vpack.c.bf16 %v157_v22, %v156_v21 }
  0x13   :  { %1363 = vmatpush3.bf16.msra.mxu0 %v1518_v10  ;;  %v1735_v9 = vpack.c.bf16 %v181_v63, %v180_v62  ;;  %v121_v10 = vld [vmem:[%s2297_s1 + $0x128] sm:$0xff]  ;;  %v184_v11 = vsub.f32 %v56_v6, %v120_v8  ;;  %v1750_v16 = vpack.c.bf16 %v183_v5, %v182_v4  ;;  %v60_v20 = vld [vmem:[%s2296_s0 + $0x140] sm:$0xff]  ;;  %v62_v31 = vld [vmem:[%s2296_s0 + $0x150] sm:$0xff] }
  0x14   :  { %1364 = vmatprep.subr.bf16.mxu0 %v1519_v12  ;;  %v185_v17 = vsub.f32 %v57_v7, %v121_v10  ;;  %v124_v26 = vld [vmem:[%s2297_s1 + $0x140] sm:$0xff]  ;;  %v125_v27 = vld [vmem:[%s2297_s1 + $0x148] sm:$0xff]  ;;  %v63_v32 = vld [vmem:[%s2296_s0 + $0x158] sm:$0xff] }
  0x15   :  { %v188_v29 = vsub.f32 %v60_v20, %v124_v26  ;;  %v189_v30 = vsub.f32 %v61_v25, %v125_v27  ;;  %v126_v33 = vld [vmem:[%s2297_s1 + $0x150] sm:$0xff]  ;;  %v1793_v35 = vld [vmem:[%s2296_s0 + $0x58] sm:$0xff]  ;;  %v64_v41 = vld [vmem:[%s2296_s0 + $0x160] sm:$0xff] }
  0x16   :  { %v1774_v28 = vpack.c.bf16 %v185_v17, %v184_v11  ;;  %v1788_v34 = vld [vmem:[%s2296_s0 + $0x50] sm:$0xff]  ;;  %v1803_v37 = vld [vmem:[%s2297_s1 + $0x58] sm:$0xff]  ;;  %v190_v40 = vsub.f32 %v62_v31, %v126_v33  ;;  %v1824_v45 = vld [vmem:[%s2296_s0 + $0x68] sm:$0xff] }
  0x17   :  { %1365 = vmatpush3.bf16.msra.mxu0 %v1519_v12  ;;  %v58_v12 = vld [vmem:[%s2296_s0 + $0x130] sm:$0xff]  ;;  %v127_v39 = vld [vmem:[%s2297_s1 + $0x158] sm:$0xff]  ;;  %v1829_v47 = vld [vmem:[%s2297_s1 + $0x60] sm:$0xff]  ;;  %v1836_v49 = vpack.c.bf16 %v189_v30, %v188_v29  ;;  %v159_v11 = vsub.f32 %v1793_v35, %v1803_v37 }
  0x18   :  { %1366 = vmatprep.subr.bf16.mxu0 %v1520_v13  ;;  %v186_v23 = vsub.f32 %v58_v12, %v122_v18  ;;  %v1798_v36 = vld [vmem:[%s2297_s1 + $0x50] sm:$0xff]  ;;  %v1834_v48 = vld [vmem:[%s2297_s1 + $0x68] sm:$0xff]  ;;  %v191_v50 = vsub.f32 %v63_v32, %v127_v39  ;;  %v67_v58 = vld [vmem:[%s2296_s0 + $0x178] sm:$0xff] }
  0x19   :  { %v129_v52 = vld [vmem:[%s2297_s1 + $0x168] sm:$0xff]  ;;  %v66_v53 = vld [vmem:[%s2296_s0 + $0x170] sm:$0xff]  ;;  %v131_v60 = vld [vmem:[%s2297_s1 + $0x178] sm:$0xff]  ;;  %v158_v10 = vsub.f32 %v1788_v34, %v1798_v36 }
  0x1a   :  { %v130_v59 = vld [vmem:[%s2297_s1 + $0x170] sm:$0xff]  ;;  %v195_v63 = vsub.f32 %v67_v58, %v131_v60  ;;  %v68_v0 = vld [vmem:[%s2296_s0 + $0x180] sm:$0xff]  ;;  %v69_v1 = vld [vmem:[%s2296_s0 + $0x188] sm:$0xff] }
  0x1b   :  { %1367 = vmatpush3.bf16.msra.mxu0 %v1520_v13  ;;  %v59_v13 = vld [vmem:[%s2296_s0 + $0x138] sm:$0xff]  ;;  %v194_v62 = vsub.f32 %v66_v53, %v130_v59  ;;  %v132_v2 = vld [vmem:[%s2297_s1 + $0x180] sm:$0xff]  ;;  %v133_v5 = vld [vmem:[%s2297_s1 + $0x188] sm:$0xff] }
  0x1c   :  { %1368 = vmatprep.subr.bf16.mxu0 %v1521_v14  ;;  %v187_v24 = vsub.f32 %v59_v13, %v123_v19  ;;  %v196_v6 = vsub.f32 %v68_v0, %v132_v2  ;;  %v70_v7 = vld [vmem:[%s2296_s0 + $0x190] sm:$0xff]  ;;  %v71_v8 = vld [vmem:[%s2296_s0 + $0x198] sm:$0xff]  ;;  %v197_v13 = vsub.f32 %v69_v1, %v133_v5  ;;  %v72_v17 = vld [vmem:[%s2296_s0 + $0x1a0] sm:$0xff]  ;;  %v161_v19 = vsub.f32 %v1824_v45, %v1834_v48 }
  0x1d   :  { %v1882_v12 = vpack.c.bf16 %v195_v63, %v194_v62  ;;  %v73_v22 = vld [vmem:[%s2296_s0 + $0x1a8] sm:$0xff]  ;;  %v74_v29 = vld [vmem:[%s2296_s0 + $0x1b0] sm:$0xff]  ;;  %v75_v30 = vld [vmem:[%s2296_s0 + $0x1b8] sm:$0xff] }
  0x1e   :  { %v1805_v38 = vpack.c.bf16 %v187_v24, %v186_v23  ;;  %v136_v23 = vld [vmem:[%s2297_s1 + $0x1a0] sm:$0xff]  ;;  %v137_v24 = vld [vmem:[%s2297_s1 + $0x1a8] sm:$0xff]  ;;  %v1906_v25 = vpack.c.bf16 %v197_v13, %v196_v6  ;;  %v138_v31 = vld [vmem:[%s2297_s1 + $0x1b0] sm:$0xff] }
  0x1f   :  { %1369 = vmatpush3.bf16.msra.mxu0 %v1521_v14  ;;  %v154_v14 = vsub.f32 %v1656_v42, %v1666_v44  ;;  %v65_v42 = vld [vmem:[%s2296_s0 + $0x168] sm:$0xff]  ;;  %v1819_v44 = vld [vmem:[%s2296_s0 + $0x60] sm:$0xff]  ;;  %v200_v26 = vsub.f32 %v72_v17, %v136_v23  ;;  %v201_v27 = vsub.f32 %v73_v22, %v137_v24  ;;  %v34_v32 = vld [vmem:[%s2296_s0 + $0x70] sm:$0xff]  ;;  %v202_v39 = vsub.f32 %v74_v29, %v138_v31 }
  0x20   :  { %v193_v57 = vsub.f32 %v65_v42, %v129_v52  ;;  %v160_v18 = vsub.f32 %v1819_v44, %v1829_v47  ;;  %v35_v33 = vld [vmem:[%s2296_s0 + $0x78] sm:$0xff]  ;;  %v98_v34 = vld [vmem:[%s2297_s1 + $0x70] sm:$0xff]  ;;  %v217_v42 = vpack.c.bf16 %v159_v11, %v158_v10  ;;  %v37_v44 = vld [vmem:[%s2296_s0 + $0x88] sm:$0xff] }
  0x21   :  { %v215_v43 = vpack.c.bf16 %v155_v15, %v154_v14  ;;  %v134_v14 = vld [vmem:[%s2297_s1 + $0x190] sm:$0xff]  ;;  %v135_v15 = vld [vmem:[%s2297_s1 + $0x198] sm:$0xff]  ;;  %v100_v45 = vld [vmem:[%s2297_s1 + $0x80] sm:$0xff]  ;;  %v1952_v48 = vpack.c.bf16 %v201_v27, %v200_v26  ;;  %v162_v13 = vsub.f32 %v34_v32, %v98_v34 }
  0x22   :  { %1371 = vmatmul.mubr.bf16.vlgmr.msra.gmra.mrb[0].mxu0 %v213_v51  ;;  %v128_v51 = vld [vmem:[%s2297_s1 + $0x160] sm:$0xff]  ;;  %v198_v20 = vsub.f32 %v70_v7, %v134_v14  ;;  %v199_v21 = vsub.f32 %v71_v8, %v135_v15  ;;  %v99_v35 = vld [vmem:[%s2297_s1 + $0x78] sm:$0xff]  ;;  %v101_v47 = vld [vmem:[%s2297_s1 + $0x88] sm:$0xff] }
  0x23   :  { %1374 = vmatprep.mubr.bf16.mxu0 %v214_v61  ;;  %v192_v55 = vsub.f32 %v64_v41, %v128_v51  ;;  %v1856_v61 = vpack.c.bf16 %v191_v50, %v190_v40  ;;  %v139_v37 = vld [vmem:[%s2297_s1 + $0x1b8] sm:$0xff]  ;;  %v76_v40 = vld [vmem:[%s2296_s0 + $0x1c0] sm:$0xff]  ;;  %v77_v41 = vld [vmem:[%s2296_s0 + $0x1c8] sm:$0xff]  ;;  %v163_v14 = vsub.f32 %v35_v33, %v99_v35 }
  0x24   :  { %v1929_v36 = vpack.c.bf16 %v199_v21, %v198_v20  ;;  %v203_v50 = vsub.f32 %v75_v30, %v139_v37  ;;  %v140_v51 = vld [vmem:[%s2297_s1 + $0x1c0] sm:$0xff]  ;;  %v141_v52 = vld [vmem:[%s2297_s1 + $0x1c8] sm:$0xff]  ;;  %v78_v53 = vld [vmem:[%s2296_s0 + $0x1d0] sm:$0xff]  ;;  %v165_v21 = vsub.f32 %v37_v44, %v101_v47 }
  0x25   :  { %v1867_v4 = vpack.c.bf16 %v193_v57, %v192_v55  ;;  %v204_v55 = vsub.f32 %v76_v40, %v140_v51  ;;  %v205_v57 = vsub.f32 %v77_v41, %v141_v52  ;;  %v79_v58 = vld [vmem:[%s2296_s0 + $0x1d8] sm:$0xff]  ;;  %v142_v59 = vld [vmem:[%s2297_s1 + $0x1d0] sm:$0xff]  ;;  %v80_v1 = vld [vmem:[%s2296_s0 + $0x1e0] sm:$0xff]  ;;  %v219_v34 = vpack.c.bf16 %v163_v14, %v162_v13 }
  0x26   :  { %v143_v60 = vld [vmem:[%s2297_s1 + $0x1d8] sm:$0xff]  ;;  %v1972_v62 = vpack.c.bf16 %v203_v50, %v202_v39  ;;  %v206_v63 = vsub.f32 %v78_v53, %v142_v59  ;;  %v81_v2 = vld [vmem:[%s2296_s0 + $0x1e8] sm:$0xff]  ;;  %v144_v5 = vld [vmem:[%s2297_s1 + $0x1e0] sm:$0xff] }
  0x27   :  { %v207_v0 = vsub.f32 %v79_v58, %v143_v60  ;;  %v1983_v6 = vpack.c.bf16 %v205_v57, %v204_v55  ;;  %v145_v7 = vld [vmem:[%s2297_s1 + $0x1e8] sm:$0xff]  ;;  %v208_v8 = vsub.f32 %v80_v1, %v144_v5  ;;  %v82_v10 = vld [vmem:[%s2296_s0 + $0x1f0] sm:$0xff]  ;;  %v83_v11 = vld [vmem:[%s2296_s0 + $0x1f8] sm:$0xff] }
  0x28   :  { %v209_v17 = vsub.f32 %v81_v2, %v145_v7  ;;  %v1522_v24 = vld [vmem:[%s2298_s3] sm:$0xff]   ;;  %v1523_v27 = vld [vmem:[%s2298_s3 + $0x8] sm:$0xff]   ;;  %v38_v29 = vld [vmem:[%s2296_s0 + $0x90] sm:$0xff] }
  0x29   :  { %v1994_v15 = vpack.c.bf16 %v207_v0, %v206_v63  ;;  %v39_v30 = vld [vmem:[%s2296_s0 + $0x98] sm:$0xff]  ;;  %v102_v31 = vld [vmem:[%s2297_s1 + $0x90] sm:$0xff]  ;;  %1434 = vmatprep.subr.bf16.mxu1 %v1522_v24  ;;  %v40_v35 = vld [vmem:[%s2296_s0 + $0xa0] sm:$0xff] }
  0x2a   :  { %1375 = vmatmul.mubr.bf16.gmra.mrb[4].mxu0 %v215_v43  ;;  %v36_v43 = vld [vmem:[%s2296_s0 + $0x80] sm:$0xff]  ;;  %v2005_v26 = vpack.c.bf16 %v209_v17, %v208_v8  ;;  %v103_v32 = vld [vmem:[%s2297_s1 + $0x98] sm:$0xff]  ;;  %v41_v37 = vld [vmem:[%s2296_s0 + $0xa8] sm:$0xff]  ;;  %1435 = vmatpush3.bf16.msra.mxu1 %v1522_v24 }
  0x2b   :  { %1378 = vmatprep.mubr.bf16.mxu0 %v216_v54  ;;  %v218_v54 = vpack.c.bf16 %v161_v19, %v160_v18  ;;  %v146_v18 = vld [vmem:[%s2297_s1 + $0x1f0] sm:$0xff]  ;;  %v147_v19 = vld [vmem:[%s2297_s1 + $0x1f8] sm:$0xff]  ;;  %v164_v20 = vsub.f32 %v36_v43, %v100_v45  ;;  %v104_v39 = vld [vmem:[%s2297_s1 + $0xa0] sm:$0xff]  ;;  %1436 = vmatprep.subr.bf16.mxu1 %v1523_v27  ;;  %v166_v43 = vsub.f32 %v38_v29, %v102_v31 }
  0x2c   :  { %v210_v22 = vsub.f32 %v82_v10, %v146_v18  ;;  %v211_v23 = vsub.f32 %v83_v11, %v147_v19  ;;  %v1524_v41 = vld [vmem:[%s2298_s3 + $0x10] sm:$0xff]   ;;  %v167_v44 = vsub.f32 %v39_v30, %v103_v32  ;;  %v168_v45 = vsub.f32 %v40_v35, %v104_v39  ;;  %v1525_v50 = vld [vmem:[%s2298_s3 + $0x18] sm:$0xff]   ;;  %v44_v58 = vld [vmem:[%s2296_s0 + $0xc0] sm:$0xff] }
  0x2d   :  { %v220_v40 = vpack.c.bf16 %v165_v21, %v164_v20  ;;  %v42_v52 = vld [vmem:[%s2296_s0 + $0xb0] sm:$0xff]  ;;  %v43_v53 = vld [vmem:[%s2296_s0 + $0xb8] sm:$0xff]  ;;  %v1526_v59 = vld [vmem:[%s2298_s3 + $0x20] sm:$0xff]  }
  0x2e   :  { %v2022_v33 = vpack.c.bf16 %v211_v23, %v210_v22  ;;  %1437 = vmatpush3.bf16.msra.mxu1 %v1523_v27  ;;  %v221_v51 = vpack.c.bf16 %v167_v44, %v166_v43  ;;  %v107_v57 = vld [vmem:[%s2297_s1 + $0xb8] sm:$0xff]  ;;  %v45_v60 = vld [vmem:[%s2296_s0 + $0xc8] sm:$0xff]  ;;  %v108_v63 = vld [vmem:[%s2297_s1 + $0xc0] sm:$0xff] }
  0x2f   :  { %1438 = vmatprep.subr.bf16.mxu1 %v1524_v41  ;;  %v109_v0 = vld [vmem:[%s2297_s1 + $0xc8] sm:$0xff]  ;;  %v171_v2 = vsub.f32 %v43_v53, %v107_v57  ;;  %v172_v5 = vsub.f32 %v44_v58, %v108_v63  ;;  %v1528_v13 = vld [vmem:[%s2298_s3 + $0x30] sm:$0xff]  }
  0x30   :  { %v173_v7 = vsub.f32 %v45_v60, %v109_v0  ;;  %v1527_v8 = vld [vmem:[%s2298_s3 + $0x28] sm:$0xff]  }
  0x32   :  { %1379 = vmatmul.mubr.bf16.gmra.mrb[8].mxu0 %v217_v42  ;;  %v105_v42 = vld [vmem:[%s2297_s1 + $0xa8] sm:$0xff]  ;;  %1439 = vmatpush3.bf16.msra.mxu1 %v1524_v41  ;;  %v224_v11 = vpack.c.bf16 %v173_v7, %v172_v5 }
  0x33   :  { %1382 = vmatprep.mubr.bf16.mxu0 %v218_v54  ;;  %v169_v47 = vsub.f32 %v41_v37, %v105_v42  ;;  %v106_v54 = vld [vmem:[%s2297_s1 + $0xb0] sm:$0xff]  ;;  %1440 = vmatprep.subr.bf16.mxu1 %v1525_v50 }
  0x34   :  { %v170_v1 = vsub.f32 %v42_v52, %v106_v54 }
  0x35   :  { %v222_v55 = vpack.c.bf16 %v169_v47, %v168_v45 }
  0x36   :  { %1441 = vmatpush3.bf16.msra.mxu1 %v1525_v50  ;;  %v223_v10 = vpack.c.bf16 %v171_v2, %v170_v1 }
  0x37   :  { %1442 = vmatprep.subr.bf16.mxu1 %v1526_v59 }
  0x3a   :  { %1383 = vmatmul.mubr.bf16.gmra.mrb[12].mxu0 %v219_v34  ;;  %1443 = vmatpush3.bf16.msra.mxu1 %v1526_v59 }
  0x3b   :  { %1386 = vmatprep.mubr.bf16.mxu0 %v220_v40  ;;  %1444 = vmatprep.subr.bf16.mxu1 %v1527_v8 }
  0x3e   :  { %1445 = vmatpush3.bf16.msra.mxu1 %v1527_v8 }
  0x3f   :  { %1446 = vmatprep.subr.bf16.mxu1 %v1528_v13 }
  0x42   :  { %1387 = vmatmul.mubr.bf16.gmra.mrb[16].mxu0 %v221_v51  ;;  %1447 = vmatpush3.bf16.msra.mxu1 %v1528_v13 }
  0x43   :  { %1390 = vmatprep.mubr.bf16.mxu0 %v222_v55 }
  0x4a   :  { %1391 = vmatmul.mubr.bf16.gmra.mrb[20].mxu0 %v223_v10 }
  0x4b   :  { %1394 = vmatprep.mubr.bf16.mxu0 %v224_v11 }
  0x52   :  { %1395 = vmatmul.mubr.bf16.gmra.mrb[24].mxu0 %v1673_v46  ;;  %v1529_v46 = vld [vmem:[%s2298_s3 + $0x38] sm:$0xff]  }
  0x53   :  { %1398 = vmatprep.mubr.bf16.mxu0 %v1704_v56  ;;  %1448 = vmatprep.subr.bf16.mxu1 %v1529_v46 }
  0x54   :  { %1449 = vmatpush3.bf16.msra.mxu1 %v1529_v46 }
  0x5a   :  { %1399 = vmatmul.mubr.bf16.gmra.mrb[28].mxu0 %v1724_v3 }
  0x5b   :  { %1402 = vmatprep.mubr.bf16.mxu0 %v1735_v9 }
  0x62   :  { %1403 = vmatmul.mubr.bf16.gmra.mrb[32].mxu0 %v1750_v16 }
  0x63   :  { %1406 = vmatprep.mubr.bf16.mxu0 %v1774_v28 }
  0x6a   :  { %1407 = vmatmul.mubr.bf16.gmra.mrb[36].mxu0 %v1805_v38 }
  0x6b   :  { %1410 = vmatprep.mubr.bf16.mxu0 %v1836_v49 }
  0x72   :  { %1411 = vmatmul.mubr.bf16.gmra.mrb[40].mxu0 %v1856_v61 }
  0x73   :  { %1414 = vmatprep.mubr.bf16.mxu0 %v1867_v4 }
  0x7a   :  { %1415 = vmatmul.mubr.bf16.gmra.mrb[44].mxu0 %v1882_v12 }
  0x7b   :  { %1418 = vmatprep.mubr.bf16.mxu0 %v1906_v25 }
  0x82   :  { %1419 = vmatmul.mubr.bf16.gmra.mrb[48].mxu0 %v1929_v36 }
  0x83   :  { %1422 = vmatprep.mubr.bf16.mxu0 %v1952_v48 }
  0x8a   :  { %1423 = vmatmul.mubr.bf16.gmra.mrb[52].mxu0 %v1972_v62 }
  0x8b   :  { %1426 = vmatprep.mubr.bf16.mxu0 %v1983_v6 }
  0x92   :  { %1427 = vmatmul.mubr.bf16.gmra.mrb[56].mxu0 %v1994_v15 }
  0x93   :  { %1430 = vmatprep.mubr.bf16.mxu0 %v2005_v26 }
  0x9a   :  { %1431 = vmatmul.mubr.bf16.gmra.mrb[60].mxu0 %v2022_v33 }
  0xf5   :  { %v1372_v56 = vpop.f32.mrb[0].mxu0 }
  0xf6   :  { %v342_v3 = vpop.f32.mrb[1].mxu0 }
  0xf7   :  { %v1373_v9 = vpop.f32.mrb[2].mxu0 }
  0xf8   :  { %v598_v16 = vpack.c.bf16 %v1373_v9, %v1372_v56  ;;  %v345_v28 = vpop.f32.mrb[3].mxu0 }
  0xf9   :  { %v597_v38 = vpack.c.bf16 %v345_v28, %v342_v3 }
  0xfb   :  { %1450 = vmatprep.mubr.bf16.mxu1 %v597_v38 }
  0xfc   :  { %1451 = vmatmul.mubr.bf16.vlgmr.msra.gmra.mrb[0].mxu1 %v598_v16 }
  0xfd   :  { %v1376_v49 = vpop.f32.mrb[4].mxu0 }
  0xfe   :  { %v358_v61 = vpop.f32.mrb[5].mxu0 }
  0xff   :  { %v1377_v4 = vpop.f32.mrb[6].mxu0 }
 0x100   :  { %v600_v12 = vpack.c.bf16 %v1377_v4, %v1376_v49  ;;  %v361_v25 = vpop.f32.mrb[7].mxu0 }
 0x101   :  { %v599_v36 = vpack.c.bf16 %v361_v25, %v358_v61 }
 0x103   :  { %1454 = vmatprep.mubr.bf16.mxu1 %v599_v36 }
 0x104   :  { %1455 = vmatmul.mubr.bf16.gmra.mrb[4].mxu1 %v600_v12 }
 0x105   :  { %v1380_v48 = vpop.f32.mrb[8].mxu0 }
 0x106   :  { %v374_v62 = vpop.f32.mrb[9].mxu0 }
 0x107   :  { %v1381_v6 = vpop.f32.mrb[10].mxu0 }
 0x108   :  { %v602_v14 = vpack.c.bf16 %v1381_v6, %v1380_v48  ;;  %v377_v15 = vpop.f32.mrb[11].mxu0 }
 0x109   :  { %v601_v17 = vpack.c.bf16 %v377_v15, %v374_v62 }
 0x10b   :  { %1458 = vmatprep.mubr.bf16.mxu1 %v601_v17 }
 0x10c   :  { %1459 = vmatmul.mubr.bf16.gmra.mrb[8].mxu1 %v602_v14 }
 0x10d   :  { %v1384_v18 = vpop.f32.mrb[12].mxu0 }
 0x10e   :  { %v390_v19 = vpop.f32.mrb[13].mxu0 }
 0x10f   :  { %v1385_v20 = vpop.f32.mrb[14].mxu0 }
 0x110   :  { %v604_v21 = vpack.c.bf16 %v1385_v20, %v1384_v18  ;;  %v393_v22 = vpop.f32.mrb[15].mxu0 }
 0x111   :  { %v603_v23 = vpack.c.bf16 %v393_v22, %v390_v19 }
 0x113   :  { %1462 = vmatprep.mubr.bf16.mxu1 %v603_v23 }
 0x114   :  { %1463 = vmatmul.mubr.bf16.gmra.mrb[12].mxu1 %v604_v21 }
 0x115   :  { %v1388_v24 = vpop.f32.mrb[16].mxu0 }
 0x116   :  { %v406_v26 = vpop.f32.mrb[17].mxu0 }
 0x117   :  { %v1389_v27 = vpop.f32.mrb[18].mxu0 }
 0x118   :  { %v606_v29 = vpack.c.bf16 %v1389_v27, %v1388_v24  ;;  %v409_v30 = vpop.f32.mrb[19].mxu0 }
 0x119   :  { %v605_v31 = vpack.c.bf16 %v409_v30, %v406_v26 }
 0x11b   :  { %1466 = vmatprep.mubr.bf16.mxu1 %v605_v31 }
 0x11c   :  { %1467 = vmatmul.mubr.bf16.gmra.mrb[16].mxu1 %v606_v29 }
 0x11d   :  { %v1392_v32 = vpop.f32.mrb[20].mxu0 }
 0x11e   :  { %v422_v33 = vpop.f32.mrb[21].mxu0 }
 0x11f   :  { %v1393_v34 = vpop.f32.mrb[22].mxu0 }
 0x120   :  { %v608_v35 = vpack.c.bf16 %v1393_v34, %v1392_v32  ;;  %v425_v37 = vpop.f32.mrb[23].mxu0 }
 0x121   :  { %v607_v39 = vpack.c.bf16 %v425_v37, %v422_v33 }
 0x123   :  { %1470 = vmatprep.mubr.bf16.mxu1 %v607_v39 }
 0x124   :  { %1471 = vmatmul.mubr.bf16.gmra.mrb[20].mxu1 %v608_v35 }
 0x125   :  { %v1396_v40 = vpop.f32.mrb[24].mxu0 }
 0x126   :  { %v438_v41 = vpop.f32.mrb[25].mxu0 }
 0x127   :  { %v1397_v42 = vpop.f32.mrb[26].mxu0 }
 0x128   :  { %v610_v43 = vpack.c.bf16 %v1397_v42, %v1396_v40  ;;  %v441_v44 = vpop.f32.mrb[27].mxu0 }
 0x129   :  { %v609_v45 = vpack.c.bf16 %v441_v44, %v438_v41 }
 0x12b   :  { %1474 = vmatprep.mubr.bf16.mxu1 %v609_v45 }
 0x12c   :  { %1475 = vmatmul.mubr.bf16.gmra.mrb[24].mxu1 %v610_v43 }
 0x12d   :  { %v1400_v47 = vpop.f32.mrb[28].mxu0 }
 0x12e   :  { %v454_v50 = vpop.f32.mrb[29].mxu0 }
 0x12f   :  { %v1401_v51 = vpop.f32.mrb[30].mxu0 }
 0x130   :  { %v612_v52 = vpack.c.bf16 %v1401_v51, %v1400_v47  ;;  %v457_v53 = vpop.f32.mrb[31].mxu0 }
 0x131   :  { %v611_v54 = vpack.c.bf16 %v457_v53, %v454_v50 }
 0x133   :  { %1478 = vmatprep.mubr.bf16.mxu1 %v611_v54 }
 0x134   :  { %1479 = vmatmul.mubr.bf16.gmra.mrb[28].mxu1 %v612_v52 }
 0x135   :  { %v1404_v55 = vpop.f32.mrb[32].mxu0 }
 0x136   :  { %v470_v57 = vpop.f32.mrb[33].mxu0 }
 0x137   :  { %v1405_v58 = vpop.f32.mrb[34].mxu0 }
 0x138   :  { %v614_v59 = vpack.c.bf16 %v1405_v58, %v1404_v55  ;;  %v473_v60 = vpop.f32.mrb[35].mxu0 }
 0x139   :  { %v613_v63 = vpack.c.bf16 %v473_v60, %v470_v57 }
 0x13b   :  { %1482 = vmatprep.mubr.bf16.mxu1 %v613_v63 }
 0x13c   :  { %1483 = vmatmul.mubr.bf16.gmra.mrb[32].mxu1 %v614_v59 }
 0x13d   :  { %v1408_v0 = vpop.f32.mrb[36].mxu0 }
 0x13e   :  { %v486_v1 = vpop.f32.mrb[37].mxu0 }
 0x13f   :  { %v1409_v2 = vpop.f32.mrb[38].mxu0 }
 0x140   :  { %v616_v5 = vpack.c.bf16 %v1409_v2, %v1408_v0  ;;  %v489_v7 = vpop.f32.mrb[39].mxu0 }
 0x141   :  { %v615_v8 = vpack.c.bf16 %v489_v7, %v486_v1 }
 0x143   :  { %1486 = vmatprep.mubr.bf16.mxu1 %v615_v8 }
 0x144   :  { %1487 = vmatmul.mubr.bf16.gmra.mrb[36].mxu1 %v616_v5 }
 0x145   :  { %v1412_v10 = vpop.f32.mrb[40].mxu0 }
 0x146   :  { %v502_v11 = vpop.f32.mrb[41].mxu0 }
 0x147   :  { %v1413_v13 = vpop.f32.mrb[42].mxu0 }
 0x148   :  { %v618_v46 = vpack.c.bf16 %v1413_v13, %v1412_v10  ;;  %v505_v56 = vpop.f32.mrb[43].mxu0 }
 0x149   :  { %v617_v3 = vpack.c.bf16 %v505_v56, %v502_v11 }
 0x14b   :  { %1490 = vmatprep.mubr.bf16.mxu1 %v617_v3 }
 0x14c   :  { %1491 = vmatmul.mubr.bf16.gmra.mrb[40].mxu1 %v618_v46 }
 0x14d   :  { %v1416_v9 = vpop.f32.mrb[44].mxu0 }
 0x14e   :  { %v518_v16 = vpop.f32.mrb[45].mxu0 }
 0x14f   :  { %v1417_v28 = vpop.f32.mrb[46].mxu0 }
 0x150   :  { %v620_v38 = vpack.c.bf16 %v1417_v28, %v1416_v9  ;;  %v521_v49 = vpop.f32.mrb[47].mxu0 }
 0x151   :  { %v619_v61 = vpack.c.bf16 %v521_v49, %v518_v16 }
 0x153   :  { %1494 = vmatprep.mubr.bf16.mxu1 %v619_v61 }
 0x154   :  { %1495 = vmatmul.mubr.bf16.gmra.mrb[44].mxu1 %v620_v38 }
 0x155   :  { %v1420_v4 = vpop.f32.mrb[48].mxu0 }
 0x156   :  { %v534_v12 = vpop.f32.mrb[49].mxu0 }
 0x157   :  { %v1421_v25 = vpop.f32.mrb[50].mxu0 }
 0x158   :  { %v622_v36 = vpack.c.bf16 %v1421_v25, %v1420_v4  ;;  %v537_v48 = vpop.f32.mrb[51].mxu0 }
 0x159   :  { %v621_v62 = vpack.c.bf16 %v537_v48, %v534_v12 }
 0x15b   :  { %1498 = vmatprep.mubr.bf16.mxu1 %v621_v62 }
 0x15c   :  { %1499 = vmatmul.mubr.bf16.gmra.mrb[48].mxu1 %v622_v36 }
 0x15d   :  { %v1424_v6 = vpop.f32.mrb[52].mxu0 }
 0x15e   :  { %v550_v14 = vpop.f32.mrb[53].mxu0 }
 0x15f   :  { %v1425_v15 = vpop.f32.mrb[54].mxu0 }
 0x160   :  { %v624_v17 = vpack.c.bf16 %v1425_v15, %v1424_v6  ;;  %v553_v18 = vpop.f32.mrb[55].mxu0 }
 0x161   :  { %v623_v19 = vpack.c.bf16 %v553_v18, %v550_v14 }
 0x163   :  { %1502 = vmatprep.mubr.bf16.mxu1 %v623_v19 }
 0x164   :  { %1503 = vmatmul.mubr.bf16.gmra.mrb[52].mxu1 %v624_v17 }
 0x165   :  { %v1428_v20 = vpop.f32.mrb[56].mxu0 }
 0x166   :  { %v566_v21 = vpop.f32.mrb[57].mxu0 }
 0x167   :  { %v1429_v22 = vpop.f32.mrb[58].mxu0 }
 0x168   :  { %v626_v23 = vpack.c.bf16 %v1429_v22, %v1428_v20  ;;  %v569_v24 = vpop.f32.mrb[59].mxu0 }
 0x169   :  { %v625_v26 = vpack.c.bf16 %v569_v24, %v566_v21 }
 0x16b   :  { %1506 = vmatprep.mubr.bf16.mxu1 %v625_v26 }
 0x16c   :  { %1507 = vmatmul.mubr.bf16.gmra.mrb[56].mxu1 %v626_v23 }
 0x16d   :  { %v1432_v27 = vpop.f32.mrb[60].mxu0 }
 0x16e   :  { %v582_v29 = vpop.f32.mrb[61].mxu0 }
 0x16f   :  { %v1433_v30 = vpop.f32.mrb[62].mxu0 }
 0x170   :  { %v628_v31 = vpack.c.bf16 %v1433_v30, %v1432_v27  ;;  %v585_v32 = vpop.f32.mrb[63].mxu0 }
 0x171   :  { %v627_v33 = vpack.c.bf16 %v585_v32, %v582_v29 }
 0x173   :  { %1510 = vmatprep.mubr.bf16.mxu1 %v627_v33 }
 0x174   :  { %1511 = vmatmul.mubr.bf16.gmra.mrb[60].mxu1 %v628_v31 }
 0x1cf   :  { %v1452_v34 = vpop.f32.mrb[0].mxu1 }
 0x1d0   :  { %984 = vst [vmem:[%s2299_s4 + $0x10] sm:$0xff] %v1452_v34  ;;  %v727_v35 = vpop.f32.mrb[1].mxu1  ;;  %v1118_v43 = vmul.f32 %v1452_v34, %v1452_v34 }
 0x1d1   :  { %982 = vst [vmem:[%s2299_s4] sm:$0xff] %v727_v35  ;;  %v1453_v37 = vpop.f32.mrb[2].mxu1  ;;  %v1116_v40 = vmul.f32 %v727_v35, %v727_v35 }
 0x1d2   :  { %985 = vst [vmem:[%s2299_s4 + $0x18] sm:$0xff] %v1453_v37  ;;  %v730_v39 = vpop.f32.mrb[3].mxu1  ;;  %v1119_v47 = vmul.f32 %v1453_v37, %v1453_v37 }
 0x1d3   :  { %983 = vst [vmem:[%s2299_s4 + $0x8] sm:$0xff] %v730_v39  ;;  %v1046_v41 = vadd.f32 %v730_v39, %v727_v35  ;;  %v1117_v42 = vmul.f32 %v730_v39, %v730_v39 }
 0x1d5   :  { %v1047_v44 = vadd.f32 %v1452_v34, %v1046_v41  ;;  %v1180_v45 = vadd.f32 %v1117_v42, %v1116_v40 }
 0x1d7   :  { %v1181_v50 = vadd.f32 %v1180_v45, %v1118_v43  ;;  %v1456_v51 = vpop.f32.mrb[4].mxu1  ;;  %v1048_v52 = vadd.f32 %v1453_v37, %v1047_v44 }
 0x1d8   :  { %988 = vst [vmem:[%s2299_s4 + $0x30] sm:$0xff] %v1456_v51  ;;  %v743_v53 = vpop.f32.mrb[5].mxu1  ;;  %v1122_v1 = vmul.f32 %v1456_v51, %v1456_v51 }
 0x1d9   :  { %986 = vst [vmem:[%s2299_s4 + $0x20] sm:$0xff] %v743_v53  ;;  %v1049_v54 = vadd.f32 %v1048_v52, %v743_v53  ;;  %v1120_v55 = vmul.f32 %v743_v53, %v743_v53  ;;  %v1182_v57 = vadd.f32 %v1181_v50, %v1119_v47  ;;  %v1457_v58 = vpop.f32.mrb[6].mxu1 }
 0x1da   :  { %989 = vst [vmem:[%s2299_s4 + $0x38] sm:$0xff] %v1457_v58  ;;  %v746_v59 = vpop.f32.mrb[7].mxu1  ;;  %v1123_v7 = vmul.f32 %v1457_v58, %v1457_v58 }
 0x1db   :  { %v1183_v60 = vadd.f32 %v1182_v57, %v1120_v55  ;;  %987 = vst [vmem:[%s2299_s4 + $0x28] sm:$0xff] %v746_v59  ;;  %v1050_v63 = vadd.f32 %v1049_v54, %v746_v59  ;;  %v1121_v0 = vmul.f32 %v746_v59, %v746_v59 }
 0x1dd   :  { %v1051_v2 = vadd.f32 %v1456_v51, %v1050_v63  ;;  %v1184_v5 = vadd.f32 %v1183_v60, %v1121_v0 }
 0x1df   :  { %v1185_v8 = vadd.f32 %v1184_v5, %v1122_v1  ;;  %v1460_v10 = vpop.f32.mrb[8].mxu1  ;;  %v1052_v11 = vadd.f32 %v1457_v58, %v1051_v2 }
 0x1e0   :  { %992 = vst [vmem:[%s2299_s4 + $0x50] sm:$0xff] %v1460_v10  ;;  %v759_v13 = vpop.f32.mrb[9].mxu1  ;;  %v1126_v61 = vmul.f32 %v1460_v10, %v1460_v10 }
 0x1e1   :  { %990 = vst [vmem:[%s2299_s4 + $0x40] sm:$0xff] %v759_v13  ;;  %v1053_v46 = vadd.f32 %v1052_v11, %v759_v13  ;;  %v1124_v56 = vmul.f32 %v759_v13, %v759_v13  ;;  %v1186_v3 = vadd.f32 %v1185_v8, %v1123_v7  ;;  %v1461_v9 = vpop.f32.mrb[10].mxu1 }
 0x1e2   :  { %993 = vst [vmem:[%s2299_s4 + $0x58] sm:$0xff] %v1461_v9  ;;  %v762_v16 = vpop.f32.mrb[11].mxu1  ;;  %v1127_v25 = vmul.f32 %v1461_v9, %v1461_v9 }
 0x1e3   :  { %v1187_v28 = vadd.f32 %v1186_v3, %v1124_v56  ;;  %991 = vst [vmem:[%s2299_s4 + $0x48] sm:$0xff] %v762_v16  ;;  %v1054_v38 = vadd.f32 %v1053_v46, %v762_v16  ;;  %v1125_v49 = vmul.f32 %v762_v16, %v762_v16 }
 0x1e5   :  { %v1055_v4 = vadd.f32 %v1460_v10, %v1054_v38  ;;  %v1188_v12 = vadd.f32 %v1187_v28, %v1125_v49 }
 0x1e7   :  { %v1189_v36 = vadd.f32 %v1188_v12, %v1126_v61  ;;  %v1464_v48 = vpop.f32.mrb[12].mxu1  ;;  %v1056_v62 = vadd.f32 %v1461_v9, %v1055_v4 }
 0x1e8   :  { %996 = vst [vmem:[%s2299_s4 + $0x70] sm:$0xff] %v1464_v48  ;;  %v775_v6 = vpop.f32.mrb[13].mxu1  ;;  %v1130_v23 = vmul.f32 %v1464_v48, %v1464_v48 }
 0x1e9   :  { %994 = vst [vmem:[%s2299_s4 + $0x60] sm:$0xff] %v775_v6  ;;  %v1057_v14 = vadd.f32 %v1056_v62, %v775_v6  ;;  %v1128_v15 = vmul.f32 %v775_v6, %v775_v6  ;;  %v1190_v17 = vadd.f32 %v1189_v36, %v1127_v25  ;;  %v1465_v18 = vpop.f32.mrb[14].mxu1 }
 0x1ea   :  { %997 = vst [vmem:[%s2299_s4 + $0x78] sm:$0xff] %v1465_v18  ;;  %v778_v19 = vpop.f32.mrb[15].mxu1  ;;  %v1131_v27 = vmul.f32 %v1465_v18, %v1465_v18 }
 0x1eb   :  { %v1191_v20 = vadd.f32 %v1190_v17, %v1128_v15  ;;  %995 = vst [vmem:[%s2299_s4 + $0x68] sm:$0xff] %v778_v19  ;;  %v1058_v21 = vadd.f32 %v1057_v14, %v778_v19  ;;  %v1129_v22 = vmul.f32 %v778_v19, %v778_v19 }
 0x1ed   :  { %v1059_v24 = vadd.f32 %v1464_v48, %v1058_v21  ;;  %v1192_v26 = vadd.f32 %v1191_v20, %v1129_v22 }
 0x1ef   :  { %v1193_v29 = vadd.f32 %v1192_v26, %v1130_v23  ;;  %v1468_v30 = vpop.f32.mrb[16].mxu1  ;;  %v1060_v31 = vadd.f32 %v1465_v18, %v1059_v24 }
 0x1f0   :  { %1000 = vst [vmem:[%s2299_s4 + $0x90] sm:$0xff] %v1468_v30  ;;  %v791_v32 = vpop.f32.mrb[17].mxu1  ;;  %v1134_v43 = vmul.f32 %v1468_v30, %v1468_v30 }
 0x1f1   :  { %998 = vst [vmem:[%s2299_s4 + $0x80] sm:$0xff] %v791_v32  ;;  %v1061_v33 = vadd.f32 %v1060_v31, %v791_v32  ;;  %v1132_v34 = vmul.f32 %v791_v32, %v791_v32  ;;  %v1194_v35 = vadd.f32 %v1193_v29, %v1131_v27  ;;  %v1469_v37 = vpop.f32.mrb[18].mxu1 }
 0x1f2   :  { %1001 = vst [vmem:[%s2299_s4 + $0x98] sm:$0xff] %v1469_v37  ;;  %v794_v39 = vpop.f32.mrb[19].mxu1  ;;  %v1135_v47 = vmul.f32 %v1469_v37, %v1469_v37 }
 0x1f3   :  { %v1195_v40 = vadd.f32 %v1194_v35, %v1132_v34  ;;  %999 = vst [vmem:[%s2299_s4 + $0x88] sm:$0xff] %v794_v39  ;;  %v1062_v41 = vadd.f32 %v1061_v33, %v794_v39  ;;  %v1133_v42 = vmul.f32 %v794_v39, %v794_v39 }
 0x1f5   :  { %v1063_v44 = vadd.f32 %v1468_v30, %v1062_v41  ;;  %v1196_v45 = vadd.f32 %v1195_v40, %v1133_v42 }
 0x1f7   :  { %v1197_v50 = vadd.f32 %v1196_v45, %v1134_v43  ;;  %v1472_v51 = vpop.f32.mrb[20].mxu1  ;;  %v1064_v52 = vadd.f32 %v1469_v37, %v1063_v44 }
 0x1f8   :  { %1004 = vst [vmem:[%s2299_s4 + $0xb0] sm:$0xff] %v1472_v51  ;;  %v807_v53 = vpop.f32.mrb[21].mxu1  ;;  %v1138_v1 = vmul.f32 %v1472_v51, %v1472_v51 }
 0x1f9   :  { %1002 = vst [vmem:[%s2299_s4 + $0xa0] sm:$0xff] %v807_v53  ;;  %v1065_v54 = vadd.f32 %v1064_v52, %v807_v53  ;;  %v1136_v55 = vmul.f32 %v807_v53, %v807_v53  ;;  %v1198_v57 = vadd.f32 %v1197_v50, %v1135_v47  ;;  %v1473_v58 = vpop.f32.mrb[22].mxu1 }
 0x1fa   :  { %1005 = vst [vmem:[%s2299_s4 + $0xb8] sm:$0xff] %v1473_v58  ;;  %v810_v59 = vpop.f32.mrb[23].mxu1  ;;  %v1139_v7 = vmul.f32 %v1473_v58, %v1473_v58 }
 0x1fb   :  { %v1199_v60 = vadd.f32 %v1198_v57, %v1136_v55  ;;  %1003 = vst [vmem:[%s2299_s4 + $0xa8] sm:$0xff] %v810_v59  ;;  %v1066_v63 = vadd.f32 %v1065_v54, %v810_v59  ;;  %v1137_v0 = vmul.f32 %v810_v59, %v810_v59 }
 0x1fd   :  { %v1067_v2 = vadd.f32 %v1472_v51, %v1066_v63  ;;  %v1200_v5 = vadd.f32 %v1199_v60, %v1137_v0 }
 0x1ff   :  { %v1201_v8 = vadd.f32 %v1200_v5, %v1138_v1  ;;  %v1476_v10 = vpop.f32.mrb[24].mxu1  ;;  %v1068_v11 = vadd.f32 %v1473_v58, %v1067_v2 }
 0x200   :  { %1008 = vst [vmem:[%s2299_s4 + $0xd0] sm:$0xff] %v1476_v10  ;;  %v823_v13 = vpop.f32.mrb[25].mxu1  ;;  %v1142_v61 = vmul.f32 %v1476_v10, %v1476_v10 }
 0x201   :  { %1006 = vst [vmem:[%s2299_s4 + $0xc0] sm:$0xff] %v823_v13  ;;  %v1069_v46 = vadd.f32 %v1068_v11, %v823_v13  ;;  %v1140_v56 = vmul.f32 %v823_v13, %v823_v13  ;;  %v1202_v3 = vadd.f32 %v1201_v8, %v1139_v7  ;;  %v1477_v9 = vpop.f32.mrb[26].mxu1 }
 0x202   :  { %1009 = vst [vmem:[%s2299_s4 + $0xd8] sm:$0xff] %v1477_v9  ;;  %v826_v16 = vpop.f32.mrb[27].mxu1  ;;  %v1143_v25 = vmul.f32 %v1477_v9, %v1477_v9 }
 0x203   :  { %v1203_v28 = vadd.f32 %v1202_v3, %v1140_v56  ;;  %1007 = vst [vmem:[%s2299_s4 + $0xc8] sm:$0xff] %v826_v16  ;;  %v1070_v38 = vadd.f32 %v1069_v46, %v826_v16  ;;  %v1141_v49 = vmul.f32 %v826_v16, %v826_v16 }
 0x205   :  { %v1071_v4 = vadd.f32 %v1476_v10, %v1070_v38  ;;  %v1204_v12 = vadd.f32 %v1203_v28, %v1141_v49 }
 0x207   :  { %v1205_v36 = vadd.f32 %v1204_v12, %v1142_v61  ;;  %v1480_v48 = vpop.f32.mrb[28].mxu1  ;;  %v1072_v62 = vadd.f32 %v1477_v9, %v1071_v4 }
 0x208   :  { %1012 = vst [vmem:[%s2299_s4 + $0xf0] sm:$0xff] %v1480_v48  ;;  %v839_v6 = vpop.f32.mrb[29].mxu1  ;;  %v1146_v23 = vmul.f32 %v1480_v48, %v1480_v48 }
 0x209   :  { %1010 = vst [vmem:[%s2299_s4 + $0xe0] sm:$0xff] %v839_v6  ;;  %v1073_v14 = vadd.f32 %v1072_v62, %v839_v6  ;;  %v1144_v15 = vmul.f32 %v839_v6, %v839_v6  ;;  %v1206_v17 = vadd.f32 %v1205_v36, %v1143_v25  ;;  %v1481_v18 = vpop.f32.mrb[30].mxu1 }
 0x20a   :  { %1013 = vst [vmem:[%s2299_s4 + $0xf8] sm:$0xff] %v1481_v18  ;;  %v842_v19 = vpop.f32.mrb[31].mxu1  ;;  %v1147_v27 = vmul.f32 %v1481_v18, %v1481_v18 }
 0x20b   :  { %v1207_v20 = vadd.f32 %v1206_v17, %v1144_v15  ;;  %1011 = vst [vmem:[%s2299_s4 + $0xe8] sm:$0xff] %v842_v19  ;;  %v1074_v21 = vadd.f32 %v1073_v14, %v842_v19  ;;  %v1145_v22 = vmul.f32 %v842_v19, %v842_v19 }
 0x20d   :  { %v1075_v24 = vadd.f32 %v1480_v48, %v1074_v21  ;;  %v1208_v26 = vadd.f32 %v1207_v20, %v1145_v22 }
 0x20f   :  { %v1209_v29 = vadd.f32 %v1208_v26, %v1146_v23  ;;  %v1484_v30 = vpop.f32.mrb[32].mxu1  ;;  %v1076_v31 = vadd.f32 %v1481_v18, %v1075_v24 }
 0x210   :  { %1016 = vst [vmem:[%s2299_s4 + $0x110] sm:$0xff] %v1484_v30  ;;  %v855_v32 = vpop.f32.mrb[33].mxu1  ;;  %v1150_v43 = vmul.f32 %v1484_v30, %v1484_v30 }
 0x211   :  { %1014 = vst [vmem:[%s2299_s4 + $0x100] sm:$0xff] %v855_v32  ;;  %v1077_v33 = vadd.f32 %v1076_v31, %v855_v32  ;;  %v1148_v34 = vmul.f32 %v855_v32, %v855_v32  ;;  %v1210_v35 = vadd.f32 %v1209_v29, %v1147_v27  ;;  %v1485_v37 = vpop.f32.mrb[34].mxu1 }
 0x212   :  { %1017 = vst [vmem:[%s2299_s4 + $0x118] sm:$0xff] %v1485_v37  ;;  %v858_v39 = vpop.f32.mrb[35].mxu1  ;;  %v1151_v47 = vmul.f32 %v1485_v37, %v1485_v37 }
 0x213   :  { %v1211_v40 = vadd.f32 %v1210_v35, %v1148_v34  ;;  %1015 = vst [vmem:[%s2299_s4 + $0x108] sm:$0xff] %v858_v39  ;;  %v1078_v41 = vadd.f32 %v1077_v33, %v858_v39  ;;  %v1149_v42 = vmul.f32 %v858_v39, %v858_v39 }
 0x215   :  { %v1079_v44 = vadd.f32 %v1484_v30, %v1078_v41  ;;  %v1212_v45 = vadd.f32 %v1211_v40, %v1149_v42 }
 0x217   :  { %v1213_v50 = vadd.f32 %v1212_v45, %v1150_v43  ;;  %v1488_v51 = vpop.f32.mrb[36].mxu1  ;;  %v1080_v52 = vadd.f32 %v1485_v37, %v1079_v44 }
 0x218   :  { %1020 = vst [vmem:[%s2299_s4 + $0x130] sm:$0xff] %v1488_v51  ;;  %v871_v53 = vpop.f32.mrb[37].mxu1  ;;  %v1154_v1 = vmul.f32 %v1488_v51, %v1488_v51 }
 0x219   :  { %1018 = vst [vmem:[%s2299_s4 + $0x120] sm:$0xff] %v871_v53  ;;  %v1081_v54 = vadd.f32 %v1080_v52, %v871_v53  ;;  %v1152_v55 = vmul.f32 %v871_v53, %v871_v53  ;;  %v1214_v57 = vadd.f32 %v1213_v50, %v1151_v47  ;;  %v1489_v58 = vpop.f32.mrb[38].mxu1 }
 0x21a   :  { %1021 = vst [vmem:[%s2299_s4 + $0x138] sm:$0xff] %v1489_v58  ;;  %v874_v59 = vpop.f32.mrb[39].mxu1  ;;  %v1155_v7 = vmul.f32 %v1489_v58, %v1489_v58 }
 0x21b   :  { %v1215_v60 = vadd.f32 %v1214_v57, %v1152_v55  ;;  %1019 = vst [vmem:[%s2299_s4 + $0x128] sm:$0xff] %v874_v59  ;;  %v1082_v63 = vadd.f32 %v1081_v54, %v874_v59  ;;  %v1153_v0 = vmul.f32 %v874_v59, %v874_v59 }
 0x21d   :  { %v1083_v2 = vadd.f32 %v1488_v51, %v1082_v63  ;;  %v1216_v5 = vadd.f32 %v1215_v60, %v1153_v0 }
 0x21f   :  { %v1217_v8 = vadd.f32 %v1216_v5, %v1154_v1  ;;  %v1492_v10 = vpop.f32.mrb[40].mxu1  ;;  %v1084_v11 = vadd.f32 %v1489_v58, %v1083_v2 }
 0x220   :  { %1024 = vst [vmem:[%s2299_s4 + $0x150] sm:$0xff] %v1492_v10  ;;  %v887_v13 = vpop.f32.mrb[41].mxu1  ;;  %v1158_v61 = vmul.f32 %v1492_v10, %v1492_v10 }
 0x221   :  { %1022 = vst [vmem:[%s2299_s4 + $0x140] sm:$0xff] %v887_v13  ;;  %v1085_v46 = vadd.f32 %v1084_v11, %v887_v13  ;;  %v1156_v56 = vmul.f32 %v887_v13, %v887_v13  ;;  %v1218_v3 = vadd.f32 %v1217_v8, %v1155_v7  ;;  %v1493_v9 = vpop.f32.mrb[42].mxu1 }
 0x222   :  { %1025 = vst [vmem:[%s2299_s4 + $0x158] sm:$0xff] %v1493_v9  ;;  %v890_v16 = vpop.f32.mrb[43].mxu1  ;;  %v1159_v25 = vmul.f32 %v1493_v9, %v1493_v9 }
 0x223   :  { %v1219_v28 = vadd.f32 %v1218_v3, %v1156_v56  ;;  %1023 = vst [vmem:[%s2299_s4 + $0x148] sm:$0xff] %v890_v16  ;;  %v1086_v38 = vadd.f32 %v1085_v46, %v890_v16  ;;  %v1157_v49 = vmul.f32 %v890_v16, %v890_v16 }
 0x225   :  { %v1087_v4 = vadd.f32 %v1492_v10, %v1086_v38  ;;  %v1220_v12 = vadd.f32 %v1219_v28, %v1157_v49 }
 0x227   :  { %v1221_v36 = vadd.f32 %v1220_v12, %v1158_v61  ;;  %v1496_v48 = vpop.f32.mrb[44].mxu1  ;;  %v1088_v62 = vadd.f32 %v1493_v9, %v1087_v4 }
 0x228   :  { %1028 = vst [vmem:[%s2299_s4 + $0x170] sm:$0xff] %v1496_v48  ;;  %v903_v6 = vpop.f32.mrb[45].mxu1  ;;  %v1162_v23 = vmul.f32 %v1496_v48, %v1496_v48 }
 0x229   :  { %1026 = vst [vmem:[%s2299_s4 + $0x160] sm:$0xff] %v903_v6  ;;  %v1089_v14 = vadd.f32 %v1088_v62, %v903_v6  ;;  %v1160_v15 = vmul.f32 %v903_v6, %v903_v6  ;;  %v1222_v17 = vadd.f32 %v1221_v36, %v1159_v25  ;;  %v1497_v18 = vpop.f32.mrb[46].mxu1 }
 0x22a   :  { %1029 = vst [vmem:[%s2299_s4 + $0x178] sm:$0xff] %v1497_v18  ;;  %v906_v19 = vpop.f32.mrb[47].mxu1  ;;  %v1163_v27 = vmul.f32 %v1497_v18, %v1497_v18 }
 0x22b   :  { %v1223_v20 = vadd.f32 %v1222_v17, %v1160_v15  ;;  %1027 = vst [vmem:[%s2299_s4 + $0x168] sm:$0xff] %v906_v19  ;;  %v1090_v21 = vadd.f32 %v1089_v14, %v906_v19  ;;  %v1161_v22 = vmul.f32 %v906_v19, %v906_v19 }
 0x22d   :  { %v1091_v24 = vadd.f32 %v1496_v48, %v1090_v21  ;;  %v1224_v26 = vadd.f32 %v1223_v20, %v1161_v22 }
 0x22f   :  { %v1225_v29 = vadd.f32 %v1224_v26, %v1162_v23  ;;  %v1500_v30 = vpop.f32.mrb[48].mxu1  ;;  %v1092_v31 = vadd.f32 %v1497_v18, %v1091_v24 }
 0x230   :  { %1032 = vst [vmem:[%s2299_s4 + $0x190] sm:$0xff] %v1500_v30  ;;  %v919_v32 = vpop.f32.mrb[49].mxu1  ;;  %v1166_v43 = vmul.f32 %v1500_v30, %v1500_v30 }
 0x231   :  { %1030 = vst [vmem:[%s2299_s4 + $0x180] sm:$0xff] %v919_v32  ;;  %v1093_v33 = vadd.f32 %v1092_v31, %v919_v32  ;;  %v1164_v34 = vmul.f32 %v919_v32, %v919_v32  ;;  %v1226_v35 = vadd.f32 %v1225_v29, %v1163_v27  ;;  %v1501_v37 = vpop.f32.mrb[50].mxu1 }
 0x232   :  { %1033 = vst [vmem:[%s2299_s4 + $0x198] sm:$0xff] %v1501_v37  ;;  %v922_v39 = vpop.f32.mrb[51].mxu1  ;;  %v1167_v47 = vmul.f32 %v1501_v37, %v1501_v37 }
 0x233   :  { %v1227_v40 = vadd.f32 %v1226_v35, %v1164_v34  ;;  %1031 = vst [vmem:[%s2299_s4 + $0x188] sm:$0xff] %v922_v39  ;;  %v1094_v41 = vadd.f32 %v1093_v33, %v922_v39  ;;  %v1165_v42 = vmul.f32 %v922_v39, %v922_v39 }
 0x235   :  { %v1095_v44 = vadd.f32 %v1500_v30, %v1094_v41  ;;  %v1228_v45 = vadd.f32 %v1227_v40, %v1165_v42 }
 0x237   :  { %v1229_v50 = vadd.f32 %v1228_v45, %v1166_v43  ;;  %v1504_v51 = vpop.f32.mrb[52].mxu1  ;;  %v1096_v52 = vadd.f32 %v1501_v37, %v1095_v44 }
 0x238   :  { %1036 = vst [vmem:[%s2299_s4 + $0x1b0] sm:$0xff] %v1504_v51  ;;  %v935_v53 = vpop.f32.mrb[53].mxu1  ;;  %v1170_v1 = vmul.f32 %v1504_v51, %v1504_v51 }
 0x239   :  { %1034 = vst [vmem:[%s2299_s4 + $0x1a0] sm:$0xff] %v935_v53  ;;  %v1097_v54 = vadd.f32 %v1096_v52, %v935_v53  ;;  %v1168_v55 = vmul.f32 %v935_v53, %v935_v53  ;;  %v1230_v57 = vadd.f32 %v1229_v50, %v1167_v47  ;;  %v1505_v58 = vpop.f32.mrb[54].mxu1 }
 0x23a   :  { %1037 = vst [vmem:[%s2299_s4 + $0x1b8] sm:$0xff] %v1505_v58  ;;  %v938_v59 = vpop.f32.mrb[55].mxu1  ;;  %v1171_v7 = vmul.f32 %v1505_v58, %v1505_v58 }
 0x23b   :  { %v1231_v60 = vadd.f32 %v1230_v57, %v1168_v55  ;;  %1035 = vst [vmem:[%s2299_s4 + $0x1a8] sm:$0xff] %v938_v59  ;;  %v1098_v63 = vadd.f32 %v1097_v54, %v938_v59  ;;  %v1169_v0 = vmul.f32 %v938_v59, %v938_v59 }
 0x23d   :  { %v1099_v2 = vadd.f32 %v1504_v51, %v1098_v63  ;;  %v1232_v5 = vadd.f32 %v1231_v60, %v1169_v0 }
 0x23f   :  { %v1233_v8 = vadd.f32 %v1232_v5, %v1170_v1  ;;  %v1508_v10 = vpop.f32.mrb[56].mxu1  ;;  %v1100_v11 = vadd.f32 %v1505_v58, %v1099_v2 }
 0x240   :  { %1040 = vst [vmem:[%s2299_s4 + $0x1d0] sm:$0xff] %v1508_v10  ;;  %v951_v13 = vpop.f32.mrb[57].mxu1  ;;  %v1174_v61 = vmul.f32 %v1508_v10, %v1508_v10 }
 0x241   :  { %1038 = vst [vmem:[%s2299_s4 + $0x1c0] sm:$0xff] %v951_v13  ;;  %v1101_v46 = vadd.f32 %v1100_v11, %v951_v13  ;;  %v1172_v56 = vmul.f32 %v951_v13, %v951_v13  ;;  %v1234_v3 = vadd.f32 %v1233_v8, %v1171_v7  ;;  %v1509_v9 = vpop.f32.mrb[58].mxu1 }
 0x242   :  { %1041 = vst [vmem:[%s2299_s4 + $0x1d8] sm:$0xff] %v1509_v9  ;;  %v954_v16 = vpop.f32.mrb[59].mxu1  ;;  %v1175_v25 = vmul.f32 %v1509_v9, %v1509_v9 }
 0x243   :  { %v1235_v28 = vadd.f32 %v1234_v3, %v1172_v56  ;;  %1039 = vst [vmem:[%s2299_s4 + $0x1c8] sm:$0xff] %v954_v16  ;;  %v1102_v38 = vadd.f32 %v1101_v46, %v954_v16  ;;  %v1173_v49 = vmul.f32 %v954_v16, %v954_v16 }
 0x245   :  { %v1103_v4 = vadd.f32 %v1508_v10, %v1102_v38  ;;  %v1236_v12 = vadd.f32 %v1235_v28, %v1173_v49 }
 0x247   :  { %v1237_v36 = vadd.f32 %v1236_v12, %v1174_v61  ;;  %v1512_v48 = vpop.f32.mrb[60].mxu1  ;;  %v1104_v62 = vadd.f32 %v1509_v9, %v1103_v4 }
 0x248   :  { %1044 = vst [vmem:[%s2299_s4 + $0x1f0] sm:$0xff] %v1512_v48  ;;  %v967_v6 = vpop.f32.mrb[61].mxu1  ;;  %v1178_v23 = vmul.f32 %v1512_v48, %v1512_v48 }
 0x249   :  { %1042 = vst [vmem:[%s2299_s4 + $0x1e0] sm:$0xff] %v967_v6  ;;  %v1105_v14 = vadd.f32 %v1104_v62, %v967_v6  ;;  %v1176_v15 = vmul.f32 %v967_v6, %v967_v6  ;;  %v1238_v17 = vadd.f32 %v1237_v36, %v1175_v25  ;;  %v1513_v18 = vpop.f32.mrb[62].mxu1 }
 0x24a   :  { %1045 = vst [vmem:[%s2299_s4 + $0x1f8] sm:$0xff] %v1513_v18  ;;  %v970_v19 = vpop.f32.mrb[63].mxu1  ;;  %v1179_v27 = vmul.f32 %v1513_v18, %v1513_v18 }
 0x24b   :  { %v1239_v20 = vadd.f32 %v1238_v17, %v1176_v15  ;;  %1043 = vst [vmem:[%s2299_s4 + $0x1e8] sm:$0xff] %v970_v19  ;;  %v1106_v21 = vadd.f32 %v1105_v14, %v970_v19  ;;  %v1177_v22 = vmul.f32 %v970_v19, %v970_v19 }
 0x24d   :  { %v1107_v24 = vadd.f32 %v1512_v48, %v1106_v21  ;;  %v1240_v26 = vadd.f32 %v1239_v20, %v1177_v22 }
 0x24f   :  { %v1108_v29 = vadd.f32 %v1513_v18, %v1107_v24  ;;  %v1241_v30 = vadd.f32 %v1240_v26, %v1178_v23 }
 0x251   :  { %v1109_v31 = vrot.slane %v1108_v29, 4  ;;  %v1242_v32 = vadd.f32 %v1241_v30, %v1179_v27 }
 0x253   :  { %v1110_v33 = vadd.f32 %v1109_v31, %v1108_v29  ;;  %v1243_v34 = vrot.slane %v1242_v32, 4 }
 0x255   :  { %v1111_v35 = vrot.slane %v1110_v33, 2  ;;  %v1244_v37 = vadd.f32 %v1243_v34, %v1242_v32 }
 0x257   :  { %v1112_v39 = vadd.f32 %v1111_v35, %v1110_v33  ;;  %v1245_v40 = vrot.slane %v1244_v37, 2 }
 0x259   :  { %v1113_v41 = vrot.slane %v1112_v39, 1  ;;  %v1246_v42 = vadd.f32 %v1245_v40, %v1244_v37 }
 0x25b   :  { %v1114_v43 = vadd.f32 %v1113_v41, %v1112_v39  ;;  %v1247_v44 = vrot.slane %v1246_v42, 1 }
 0x25d   :  { %1115 = vst [vmem:[%s2300_s5] sm:$0x1] %v1114_v43  ;;  %v1248_v45 = vadd.f32 %v1247_v44, %v1246_v42 }
 0x25f   :  { %1249 = vst [vmem:[%s2300_s5 + $0x1] sm:$0x1] %v1248_v45 }

// kernel: sa_module_pct_forward.11
= control target key start
LH: loop header
LB: loop body
LE: loop exit
PB: predicated region body
PF: predicated region fallthrough
CT: control target
= control target key end

     0   :  { %s1565_s0 = inlined_call_operand.vmem [shape: f32[512,128], index: 0, kind: input, shape index: {}]   ;;  %s1566_s2 = inlined_call_operand.vmem [shape: f32[1,128], index: 2, kind: input, shape index: {}]   ;;  %s1567_s3 = inlined_call_operand.vmem [shape: f32[1,128], index: 3, kind: input, shape index: {}]   ;;  %s1568_s1 = inlined_call_operand.vmem [shape: f32[512,128], index: 1, kind: input, shape index: {}]   ;;  %s1569_s4 = inlined_call_operand.vmem [shape: f32[512,128], index: 4, kind: output, shape index: {}]  }
   0x1   :  { %v17_v0 = vld [vmem:[%s1565_s0] sm:$0xff]  ;;  %v18_v4 = vld [vmem:[%s1565_s0 + $0x8] sm:$0xff]  ;;  %v19_v6 = vld [vmem:[%s1565_s0 + $0x10] sm:$0xff] }
   0x2   :  { %v838_v1 = vld [vmem:[%s1566_s2] ss:$0 sm:$0xff]  ;;  %v20_v7 = vld [vmem:[%s1565_s0 + $0x18] sm:$0xff]  ;;  %v22_v14 = vld [vmem:[%s1565_s0 + $0x28] sm:$0xff] }
   0x3   :  { %v843_v2 = vld [vmem:[%s1567_s3] ss:$0 sm:$0xff]  ;;  %v88_v3 = vmul.f32 %v838_v1, %v17_v0  ;;  %v89_v5 = vmul.f32 %v838_v1, %v18_v4  ;;  %v90_v9 = vmul.f32 %v838_v1, %v19_v6  ;;  %v91_v10 = vmul.f32 %v838_v1, %v20_v7  ;;  %v416_v20 = vld [vmem:[%s1568_s1 + $0x8] sm:$0xff]  ;;  %v417_v25 = vld [vmem:[%s1568_s1 + $0x10] sm:$0xff] }
   0x4   :  { %v21_v11 = vld [vmem:[%s1565_s0 + $0x20] sm:$0xff]  ;;  %v93_v22 = vmul.f32 %v838_v1, %v22_v14  ;;  %v418_v29 = vld [vmem:[%s1568_s1 + $0x18] sm:$0xff]  ;;  %v23_v44 = vld [vmem:[%s1565_s0 + $0x30] sm:$0xff] }
   0x5   :  { %v159_v8 = vadd.f32 %v843_v2, %v88_v3  ;;  %v160_v12 = vadd.f32 %v843_v2, %v89_v5  ;;  %v92_v13 = vmul.f32 %v838_v1, %v21_v11  ;;  %v415_v16 = vld [vmem:[%s1568_s1] sm:$0xff]  ;;  %v161_v17 = vadd.f32 %v843_v2, %v90_v9  ;;  %v24_v45 = vld [vmem:[%s1565_s0 + $0x38] sm:$0xff]  ;;  %v26_v49 = vld [vmem:[%s1565_s0 + $0x48] sm:$0xff] }
   0x6   :  { %v162_v18 = vadd.f32 %v843_v2, %v91_v10  ;;  %v419_v33 = vld [vmem:[%s1568_s1 + $0x20] sm:$0xff]  ;;  %v164_v34 = vadd.f32 %v843_v2, %v93_v22  ;;  %v27_v50 = vld [vmem:[%s1565_s0 + $0x50] sm:$0xff]  ;;  %v420_v54 = vld [vmem:[%s1568_s1 + $0x28] sm:$0xff]  ;;  %v94_v56 = vmul.f32 %v838_v1, %v23_v44  ;;  %v95_v57 = vmul.f32 %v838_v1, %v24_v45 }
   0x7   :  { %vm223_vm0 = vcmp.gt.f32.partialorder %v159_v8, 0.0  ;;  %v287_v15 = vmul.f32 0.1, %v159_v8  ;;  %vm224_vm1 = vcmp.gt.f32.partialorder %v160_v12, 0.0  ;;  %v288_v19 = vmul.f32 0.1, %v160_v12 }
   0x8   :  { %v163_v21 = vadd.f32 %v843_v2, %v92_v13  ;;  %vm225_vm2 = vcmp.gt.f32.partialorder %v161_v17, 0.0  ;;  %v289_v24 = vmul.f32 0.1, %v161_v17  ;;  %vm226_vm3 = vcmp.gt.f32.partialorder %v162_v18, 0.0  ;;  %v25_v46 = vld [vmem:[%s1565_s0 + $0x40] sm:$0xff]  ;;  %v28_v59 = vld [vmem:[%s1565_s0 + $0x58] sm:$0xff] }
   0x9   :  { %v351_v23 = vsel %vm223_vm0, %v159_v8, %v287_v15  ;;  %v352_v27 = vsel %vm224_vm1, %v160_v12, %v288_v19  ;;  %v290_v28 = vmul.f32 0.1, %v162_v18  ;;  %vm228_vm9 = vcmp.gt.f32.partialorder %v164_v34, 0.0  ;;  %v29_v60 = vld [vmem:[%s1565_s0 + $0x60] sm:$0xff]  ;;  %v421_v7 = vld [vmem:[%s1568_s1 + $0x30] sm:$0xff]  ;;  %v422_v8 = vld [vmem:[%s1568_s1 + $0x38] sm:$0xff] }
   0xa   :  { %v479_v26 = vadd.f32 %v415_v16, %v351_v23  ;;  %vm227_vm4 = vcmp.gt.f32.partialorder %v163_v21, 0.0  ;;  %v480_v30 = vadd.f32 %v416_v20, %v352_v27  ;;  %v353_v31 = vsel %vm225_vm2, %v161_v17, %v289_v24  ;;  %v423_v9 = vld [vmem:[%s1568_s1 + $0x40] sm:$0xff] }
   0xb   :  { %v291_v32 = vmul.f32 0.1, %v163_v21  ;;  %v481_v36 = vadd.f32 %v417_v25, %v353_v31  ;;  %v354_v37 = vsel %vm226_vm3, %v162_v18, %v290_v28  ;;  %v292_v53 = vmul.f32 0.1, %v164_v34  ;;  %v425_v31 = vld [vmem:[%s1568_s1 + $0x50] sm:$0xff] }
   0xc   :  { %vm543_vm5 = vcmp.gt.f32.partialorder %v479_v26, 0.0  ;;  %v607_v35 = vmul.f32 0.1, %v479_v26  ;;  %vm544_vm6 = vcmp.gt.f32.partialorder %v480_v30, 0.0  ;;  %v608_v38 = vmul.f32 0.1, %v480_v30 }
   0xd   :  { %v482_v39 = vadd.f32 %v418_v29, %v354_v37  ;;  %v355_v40 = vsel %vm227_vm4, %v163_v21, %v291_v32  ;;  %vm545_vm7 = vcmp.gt.f32.partialorder %v481_v36, 0.0  ;;  %v609_v42 = vmul.f32 0.1, %v481_v36  ;;  %v424_v21 = vld [vmem:[%s1568_s1 + $0x48] sm:$0xff] }
   0xe   :  { %v671_v41 = vsel %vm543_vm5, %v479_v26, %v607_v35  ;;  %v483_v43 = vadd.f32 %v419_v33, %v355_v40  ;;  %v672_v47 = vsel %vm544_vm6, %v480_v30, %v608_v38  ;;  %v96_v58 = vmul.f32 %v838_v1, %v25_v46  ;;  %v30_v33 = vld [vmem:[%s1565_s0 + $0x68] sm:$0xff]  ;;  %v32_v40 = vld [vmem:[%s1565_s0 + $0x78] sm:$0xff] }
   0xf   :  { %735 = vst [vmem:[%s1569_s4] sm:$0xff] %v671_v41  ;;  %vm546_vm8 = vcmp.gt.f32.partialorder %v482_v39, 0.0  ;;  %v610_v48 = vmul.f32 0.1, %v482_v39  ;;  %736 = vst [vmem:[%s1569_s4 + $0x8] sm:$0xff] %v672_v47  ;;  %v673_v51 = vsel %vm545_vm7, %v481_v36, %v609_v42  ;;  %v356_v62 = vsel %vm228_vm9, %v164_v34, %v292_v53  ;;  %v426_v46 = vld [vmem:[%s1568_s1 + $0x58] sm:$0xff] }
  0x10   :  { %vm547_vm10 = vcmp.gt.f32.partialorder %v483_v43, 0.0  ;;  %v611_v52 = vmul.f32 0.1, %v483_v43  ;;  %737 = vst [vmem:[%s1569_s4 + $0x10] sm:$0xff] %v673_v51  ;;  %v97_v63 = vmul.f32 %v838_v1, %v26_v49  ;;  %v98_v0 = vmul.f32 %v838_v1, %v27_v50 }
  0x11   :  { %v674_v55 = vsel %vm546_vm8, %v482_v39, %v610_v48  ;;  %v484_v3 = vadd.f32 %v420_v54, %v356_v62  ;;  %v165_v4 = vadd.f32 %v843_v2, %v94_v56  ;;  %v166_v5 = vadd.f32 %v843_v2, %v95_v57  ;;  %v31_v39 = vld [vmem:[%s1565_s0 + $0x70] sm:$0xff] }
  0x12   :  { %738 = vst [vmem:[%s1569_s4 + $0x18] sm:$0xff] %v674_v55  ;;  %v675_v61 = vsel %vm547_vm10, %v483_v43, %v611_v52  ;;  %v167_v6 = vadd.f32 %v843_v2, %v96_v58  ;;  %v168_v10 = vadd.f32 %v843_v2, %v97_v63  ;;  %v169_v11 = vadd.f32 %v843_v2, %v98_v0  ;;  %v33_v52 = vld [vmem:[%s1565_s0 + $0x80] sm:$0xff]  ;;  %v428_v63 = vld [vmem:[%s1568_s1 + $0x68] sm:$0xff] }
  0x13   :  { %739 = vst [vmem:[%s1569_s4 + $0x20] sm:$0xff] %v675_v61  ;;  %v99_v12 = vmul.f32 %v838_v1, %v28_v59  ;;  %v100_v13 = vmul.f32 %v838_v1, %v29_v60  ;;  %vm548_vm11 = vcmp.gt.f32.partialorder %v484_v3, 0.0  ;;  %v612_v14 = vmul.f32 0.1, %v484_v3  ;;  %v427_v55 = vld [vmem:[%s1568_s1 + $0x60] sm:$0xff] }
  0x14   :  { %vm229_vm12 = vcmp.gt.f32.partialorder %v165_v4, 0.0  ;;  %v293_v15 = vmul.f32 0.1, %v165_v4  ;;  %vm230_vm13 = vcmp.gt.f32.partialorder %v166_v5, 0.0  ;;  %v294_v16 = vmul.f32 0.1, %v166_v5 }
  0x15   :  { %vm231_vm14 = vcmp.gt.f32.partialorder %v167_v6, 0.0  ;;  %v295_v17 = vmul.f32 0.1, %v167_v6  ;;  %v676_v18 = vsel %vm548_vm11, %v484_v3, %v612_v14  ;;  %vm232_vm15 = vcmp.gt.f32.partialorder %v168_v10, 0.0 }
  0x16   :  { %v357_v19 = vsel %vm229_vm12, %v165_v4, %v293_v15  ;;  %v296_v20 = vmul.f32 0.1, %v168_v10  ;;  %740 = vst [vmem:[%s1569_s4 + $0x28] sm:$0xff] %v676_v18  ;;  %v358_v23 = vsel %vm230_vm13, %v166_v5, %v294_v16  ;;  %vm233_vm0 = vcmp.gt.f32.partialorder %v169_v11, 0.0  ;;  %v34_v5 = vld [vmem:[%s1565_s0 + $0x88] sm:$0xff]  ;;  %v35_v18 = vld [vmem:[%s1565_s0 + $0x90] sm:$0xff] }
  0x17   :  { %v485_v22 = vadd.f32 %v421_v7, %v357_v19  ;;  %v359_v24 = vsel %vm231_vm14, %v167_v6, %v295_v17  ;;  %v486_v25 = vadd.f32 %v422_v8, %v358_v23  ;;  %v297_v28 = vmul.f32 0.1, %v169_v11  ;;  %v429_v8 = vld [vmem:[%s1568_s1 + $0x70] sm:$0xff] }
  0x18   :  { %v487_v26 = vadd.f32 %v423_v9, %v359_v24  ;;  %v360_v27 = vsel %vm232_vm15, %v168_v10, %v296_v20  ;;  %v170_v32 = vadd.f32 %v843_v2, %v99_v12  ;;  %v171_v47 = vadd.f32 %v843_v2, %v100_v13  ;;  %v430_v13 = vld [vmem:[%s1568_s1 + $0x78] sm:$0xff]  ;;  %v431_v24 = vld [vmem:[%s1568_s1 + $0x80] sm:$0xff] }
  0x19   :  { %vm549_vm1 = vcmp.gt.f32.partialorder %v485_v22, 0.0  ;;  %v613_v29 = vmul.f32 0.1, %v485_v22  ;;  %v488_v30 = vadd.f32 %v424_v21, %v360_v27  ;;  %vm550_vm2 = vcmp.gt.f32.partialorder %v486_v25, 0.0 }
  0x1a   :  { %v614_v34 = vmul.f32 0.1, %v486_v25  ;;  %vm551_vm3 = vcmp.gt.f32.partialorder %v487_v26, 0.0  ;;  %v615_v35 = vmul.f32 0.1, %v487_v26  ;;  %v361_v38 = vsel %vm233_vm0, %v169_v11, %v297_v28 }
  0x1b   :  { %v677_v36 = vsel %vm549_vm1, %v485_v22, %v613_v29  ;;  %vm552_vm4 = vcmp.gt.f32.partialorder %v488_v30, 0.0  ;;  %v616_v37 = vmul.f32 0.1, %v488_v30  ;;  %v489_v43 = vadd.f32 %v425_v31, %v361_v38  ;;  %v36_v29 = vld [vmem:[%s1565_s0 + $0x98] sm:$0xff]  ;;  %v38_v31 = vld [vmem:[%s1565_s0 + $0xa8] sm:$0xff] }
  0x1c   :  { %741 = vst [vmem:[%s1569_s4 + $0x30] sm:$0xff] %v677_v36  ;;  %v678_v41 = vsel %vm550_vm2, %v486_v25, %v614_v34  ;;  %v679_v42 = vsel %vm551_vm3, %v487_v26, %v615_v35  ;;  %vm234_vm5 = vcmp.gt.f32.partialorder %v170_v32, 0.0  ;;  %v298_v45 = vmul.f32 0.1, %v170_v32 }
  0x1d   :  { %742 = vst [vmem:[%s1569_s4 + $0x38] sm:$0xff] %v678_v41  ;;  %743 = vst [vmem:[%s1569_s4 + $0x40] sm:$0xff] %v679_v42  ;;  %v680_v44 = vsel %vm552_vm4, %v488_v30, %v616_v37  ;;  %v101_v48 = vmul.f32 %v838_v1, %v30_v33  ;;  %vm553_vm6 = vcmp.gt.f32.partialorder %v489_v43, 0.0  ;;  %v617_v49 = vmul.f32 0.1, %v489_v43  ;;  %v37_v30 = vld [vmem:[%s1565_s0 + $0xa0] sm:$0xff] }
  0x1e   :  { %744 = vst [vmem:[%s1569_s4 + $0x48] sm:$0xff] %v680_v44  ;;  %v102_v50 = vmul.f32 %v838_v1, %v31_v39  ;;  %v103_v51 = vmul.f32 %v838_v1, %v32_v40  ;;  %v362_v53 = vsel %vm234_vm5, %v170_v32, %v298_v45  ;;  %vm235_vm7 = vcmp.gt.f32.partialorder %v171_v47, 0.0  ;;  %v432_v37 = vld [vmem:[%s1568_s1 + $0x88] sm:$0xff]  ;;  %v40_v44 = vld [vmem:[%s1565_s0 + $0xb8] sm:$0xff] }
  0x1f   :  { %v299_v54 = vmul.f32 0.1, %v171_v47  ;;  %v172_v56 = vadd.f32 %v843_v2, %v101_v48  ;;  %v681_v57 = vsel %vm553_vm6, %v489_v43, %v617_v49  ;;  %v490_v58 = vadd.f32 %v426_v46, %v362_v53  ;;  %v39_v43 = vld [vmem:[%s1565_s0 + $0xb0] sm:$0xff] }
  0x20   :  { %v173_v59 = vadd.f32 %v843_v2, %v102_v50  ;;  %v174_v60 = vadd.f32 %v843_v2, %v103_v51  ;;  %745 = vst [vmem:[%s1569_s4 + $0x50] sm:$0xff] %v681_v57  ;;  %v104_v0 = vmul.f32 %v838_v1, %v33_v52  ;;  %v105_v17 = vmul.f32 %v838_v1, %v34_v5  ;;  %v433_v49 = vld [vmem:[%s1568_s1 + $0x90] sm:$0xff] }
  0x21   :  { %v363_v61 = vsel %vm235_vm7, %v171_v47, %v299_v54  ;;  %vm236_vm8 = vcmp.gt.f32.partialorder %v172_v56, 0.0  ;;  %v300_v62 = vmul.f32 0.1, %v172_v56  ;;  %vm554_vm9 = vcmp.gt.f32.partialorder %v490_v58, 0.0 }
  0x22   :  { %v618_v3 = vmul.f32 0.1, %v490_v58  ;;  %v491_v4 = vadd.f32 %v427_v55, %v363_v61  ;;  %vm237_vm10 = vcmp.gt.f32.partialorder %v173_v59, 0.0  ;;  %v301_v7 = vmul.f32 0.1, %v173_v59 }
  0x23   :  { %v364_v6 = vsel %vm236_vm8, %v172_v56, %v300_v62  ;;  %vm238_vm11 = vcmp.gt.f32.partialorder %v174_v60, 0.0  ;;  %v302_v9 = vmul.f32 0.1, %v174_v60  ;;  %v175_v16 = vadd.f32 %v843_v2, %v104_v0  ;;  %v435_v62 = vld [vmem:[%s1568_s1 + $0xa0] sm:$0xff] }
  0x24   :  { %v682_v10 = vsel %vm554_vm9, %v490_v58, %v618_v3  ;;  %vm555_vm12 = vcmp.gt.f32.partialorder %v491_v4, 0.0  ;;  %v619_v11 = vmul.f32 0.1, %v491_v4  ;;  %v492_v12 = vadd.f32 %v428_v63, %v364_v6  ;;  %v434_v58 = vld [vmem:[%s1568_s1 + $0x98] sm:$0xff]  ;;  %v436_v3 = vld [vmem:[%s1568_s1 + $0xa8] sm:$0xff] }
  0x25   :  { %746 = vst [vmem:[%s1569_s4 + $0x58] sm:$0xff] %v682_v10  ;;  %v365_v14 = vsel %vm237_vm10, %v173_v59, %v301_v7  ;;  %v366_v15 = vsel %vm238_vm11, %v174_v60, %v302_v9  ;;  %vm239_vm14 = vcmp.gt.f32.partialorder %v175_v16, 0.0  ;;  %v303_v23 = vmul.f32 0.1, %v175_v16 }
  0x26   :  { %v683_v19 = vsel %vm555_vm12, %v491_v4, %v619_v11  ;;  %vm556_vm13 = vcmp.gt.f32.partialorder %v492_v12, 0.0  ;;  %v620_v20 = vmul.f32 0.1, %v492_v12  ;;  %v493_v21 = vadd.f32 %v429_v8, %v365_v14  ;;  %v437_v11 = vld [vmem:[%s1568_s1 + $0xb0] sm:$0xff] }
  0x27   :  { %747 = vst [vmem:[%s1569_s4 + $0x60] sm:$0xff] %v683_v19  ;;  %v494_v22 = vadd.f32 %v430_v13, %v366_v15  ;;  %v176_v25 = vadd.f32 %v843_v2, %v105_v17  ;;  %v106_v28 = vmul.f32 %v838_v1, %v35_v18  ;;  %v367_v33 = vsel %vm239_vm14, %v175_v16, %v303_v23  ;;  %v41_v16 = vld [vmem:[%s1565_s0 + $0xc0] sm:$0xff]  ;;  %v42_v17 = vld [vmem:[%s1565_s0 + $0xc8] sm:$0xff]  ;;  %v43_v18 = vld [vmem:[%s1565_s0 + $0xd0] sm:$0xff] }
  0x28   :  { %v684_v26 = vsel %vm556_vm13, %v492_v12, %v620_v20  ;;  %vm557_vm15 = vcmp.gt.f32.partialorder %v493_v21, 0.0  ;;  %v621_v27 = vmul.f32 0.1, %v493_v21  ;;  %v495_v35 = vadd.f32 %v431_v24, %v367_v33  ;;  %v44_v23 = vld [vmem:[%s1565_s0 + $0xd8] sm:$0xff]  ;;  %v45_v33 = vld [vmem:[%s1565_s0 + $0xe0] sm:$0xff] }
  0x29   :  { %748 = vst [vmem:[%s1569_s4 + $0x68] sm:$0xff] %v684_v26  ;;  %vm558_vm0 = vcmp.gt.f32.partialorder %v494_v22, 0.0  ;;  %v622_v32 = vmul.f32 0.1, %v494_v22  ;;  %vm240_vm1 = vcmp.gt.f32.partialorder %v176_v25, 0.0  ;;  %v177_v38 = vadd.f32 %v843_v2, %v106_v28  ;;  %v438_v28 = vld [vmem:[%s1568_s1 + $0xb8] sm:$0xff] }
  0x2a   :  { %v685_v34 = vsel %vm557_vm15, %v493_v21, %v621_v27  ;;  %v304_v36 = vmul.f32 0.1, %v176_v25  ;;  %v107_v40 = vmul.f32 %v838_v1, %v36_v29  ;;  %v108_v41 = vmul.f32 %v838_v1, %v37_v30 }
  0x2b   :  { %749 = vst [vmem:[%s1569_s4 + $0x70] sm:$0xff] %v685_v34  ;;  %v686_v39 = vsel %vm558_vm0, %v494_v22, %v622_v32  ;;  %v109_v42 = vmul.f32 %v838_v1, %v38_v31  ;;  %vm559_vm2 = vcmp.gt.f32.partialorder %v495_v35, 0.0  ;;  %v623_v45 = vmul.f32 0.1, %v495_v35  ;;  %v46_v34 = vld [vmem:[%s1565_s0 + $0xe8] sm:$0xff] }
  0x2c   :  { %750 = vst [vmem:[%s1569_s4 + $0x78] sm:$0xff] %v686_v39  ;;  %v368_v46 = vsel %vm240_vm1, %v176_v25, %v304_v36  ;;  %vm241_vm3 = vcmp.gt.f32.partialorder %v177_v38, 0.0  ;;  %v305_v48 = vmul.f32 0.1, %v177_v38  ;;  %v178_v50 = vadd.f32 %v843_v2, %v107_v40 }
  0x2d   :  { %v496_v47 = vadd.f32 %v432_v37, %v368_v46  ;;  %v179_v51 = vadd.f32 %v843_v2, %v108_v41  ;;  %v687_v52 = vsel %vm559_vm2, %v495_v35, %v623_v45  ;;  %v180_v53 = vadd.f32 %v843_v2, %v109_v42  ;;  %v441_v45 = vld [vmem:[%s1568_s1 + $0xd0] sm:$0xff] }
  0x2e   :  { %v110_v54 = vmul.f32 %v838_v1, %v39_v43  ;;  %v111_v55 = vmul.f32 %v838_v1, %v40_v44  ;;  %751 = vst [vmem:[%s1569_s4 + $0x80] sm:$0xff] %v687_v52  ;;  %v369_v57 = vsel %vm241_vm3, %v177_v38, %v305_v48  ;;  %vm242_vm5 = vcmp.gt.f32.partialorder %v178_v50, 0.0  ;;  %v439_v43 = vld [vmem:[%s1568_s1 + $0xc0] sm:$0xff]  ;;  %v440_v44 = vld [vmem:[%s1568_s1 + $0xc8] sm:$0xff] }
  0x2f   :  { %vm560_vm4 = vcmp.gt.f32.partialorder %v496_v47, 0.0  ;;  %v624_v56 = vmul.f32 0.1, %v496_v47  ;;  %v497_v59 = vadd.f32 %v433_v49, %v369_v57  ;;  %v306_v60 = vmul.f32 0.1, %v178_v50 }
  0x30   :  { %vm243_vm6 = vcmp.gt.f32.partialorder %v179_v51, 0.0  ;;  %v307_v61 = vmul.f32 0.1, %v179_v51  ;;  %vm244_vm7 = vcmp.gt.f32.partialorder %v180_v53, 0.0  ;;  %v308_v0 = vmul.f32 0.1, %v180_v53 }
  0x31   :  { %v688_v63 = vsel %vm560_vm4, %v496_v47, %v624_v56  ;;  %v181_v4 = vadd.f32 %v843_v2, %v110_v54  ;;  %vm561_vm8 = vcmp.gt.f32.partialorder %v497_v59, 0.0  ;;  %v625_v5 = vmul.f32 0.1, %v497_v59  ;;  %v442_v56 = vld [vmem:[%s1568_s1 + $0xd8] sm:$0xff] }
  0x32   :  { %752 = vst [vmem:[%s1569_s4 + $0x88] sm:$0xff] %v688_v63  ;;  %v370_v6 = vsel %vm242_vm5, %v178_v50, %v306_v60  ;;  %v371_v7 = vsel %vm243_vm6, %v179_v51, %v307_v61  ;;  %v372_v10 = vsel %vm244_vm7, %v180_v53, %v308_v0  ;;  %v182_v15 = vadd.f32 %v843_v2, %v111_v55 }
  0x33   :  { %v498_v8 = vadd.f32 %v434_v58, %v370_v6  ;;  %v499_v9 = vadd.f32 %v435_v62, %v371_v7  ;;  %vm245_vm9 = vcmp.gt.f32.partialorder %v181_v4, 0.0  ;;  %v689_v12 = vsel %vm561_vm8, %v497_v59, %v625_v5  ;;  %v443_v6 = vld [vmem:[%s1568_s1 + $0xe0] sm:$0xff]  ;;  %v48_v7 = vld [vmem:[%s1565_s0 + $0xf8] sm:$0xff] }
  0x34   :  { %v500_v13 = vadd.f32 %v436_v3, %v372_v10  ;;  %v309_v14 = vmul.f32 0.1, %v181_v4  ;;  %753 = vst [vmem:[%s1569_s4 + $0x90] sm:$0xff] %v689_v12  ;;  %vm246_vm13 = vcmp.gt.f32.partialorder %v182_v15, 0.0  ;;  %v310_v27 = vmul.f32 0.1, %v182_v15 }
  0x35   :  { %vm562_vm10 = vcmp.gt.f32.partialorder %v498_v8, 0.0  ;;  %v626_v19 = vmul.f32 0.1, %v498_v8  ;;  %vm563_vm11 = vcmp.gt.f32.partialorder %v499_v9, 0.0  ;;  %v627_v20 = vmul.f32 0.1, %v499_v9 }
  0x36   :  { %vm564_vm12 = vcmp.gt.f32.partialorder %v500_v13, 0.0  ;;  %v628_v21 = vmul.f32 0.1, %v500_v13  ;;  %v373_v22 = vsel %vm245_vm9, %v181_v4, %v309_v14  ;;  %v112_v30 = vmul.f32 %v838_v1, %v41_v16  ;;  %v47_v3 = vld [vmem:[%s1565_s0 + $0xf0] sm:$0xff]  ;;  %v50_v14 = vld [vmem:[%s1565_s0 + $0x108] sm:$0xff] }
  0x37   :  { %v690_v24 = vsel %vm562_vm10, %v498_v8, %v626_v19  ;;  %v691_v25 = vsel %vm563_vm11, %v499_v9, %v627_v20  ;;  %v501_v26 = vadd.f32 %v437_v11, %v373_v22  ;;  %v113_v31 = vmul.f32 %v838_v1, %v42_v17  ;;  %v49_v8 = vld [vmem:[%s1565_s0 + $0x100] sm:$0xff]  ;;  %v51_v19 = vld [vmem:[%s1565_s0 + $0x110] sm:$0xff] }
  0x38   :  { %754 = vst [vmem:[%s1569_s4 + $0x98] sm:$0xff] %v690_v24  ;;  %755 = vst [vmem:[%s1569_s4 + $0xa0] sm:$0xff] %v691_v25  ;;  %v692_v29 = vsel %vm564_vm12, %v500_v13, %v628_v21  ;;  %v114_v32 = vmul.f32 %v838_v1, %v43_v18  ;;  %v374_v36 = vsel %vm246_vm13, %v182_v15, %v310_v27  ;;  %v444_v18 = vld [vmem:[%s1568_s1 + $0xe8] sm:$0xff] }
  0x39   :  { %756 = vst [vmem:[%s1569_s4 + $0xa8] sm:$0xff] %v692_v29  ;;  %vm565_vm14 = vcmp.gt.f32.partialorder %v501_v26, 0.0  ;;  %v629_v35 = vmul.f32 0.1, %v501_v26  ;;  %v115_v37 = vmul.f32 %v838_v1, %v44_v23  ;;  %v502_v38 = vadd.f32 %v438_v28, %v374_v36 }
  0x3a   :  { %v183_v39 = vadd.f32 %v843_v2, %v112_v30  ;;  %v184_v40 = vadd.f32 %v843_v2, %v113_v31  ;;  %v185_v41 = vadd.f32 %v843_v2, %v114_v32  ;;  %v116_v47 = vmul.f32 %v838_v1, %v45_v33  ;;  %v445_v33 = vld [vmem:[%s1568_s1 + $0xf0] sm:$0xff] }
  0x3b   :  { %v693_v42 = vsel %vm565_vm14, %v501_v26, %v629_v35  ;;  %v186_v46 = vadd.f32 %v843_v2, %v115_v37  ;;  %v117_v48 = vmul.f32 %v838_v1, %v46_v34  ;;  %vm566_vm15 = vcmp.gt.f32.partialorder %v502_v38, 0.0  ;;  %v446_v34 = vld [vmem:[%s1568_s1 + $0xf8] sm:$0xff] }
  0x3c   :  { %757 = vst [vmem:[%s1569_s4 + $0xb0] sm:$0xff] %v693_v42  ;;  %v630_v49 = vmul.f32 0.1, %v502_v38  ;;  %vm247_vm0 = vcmp.gt.f32.partialorder %v183_v39, 0.0  ;;  %v311_v50 = vmul.f32 0.1, %v183_v39  ;;  %v187_v60 = vadd.f32 %v843_v2, %v116_v47 }
  0x3d   :  { %vm248_vm1 = vcmp.gt.f32.partialorder %v184_v40, 0.0  ;;  %v312_v51 = vmul.f32 0.1, %v184_v40  ;;  %vm249_vm2 = vcmp.gt.f32.partialorder %v185_v41, 0.0  ;;  %v313_v52 = vmul.f32 0.1, %v185_v41 }
  0x3e   :  { %v694_v53 = vsel %vm566_vm15, %v502_v38, %v630_v49  ;;  %v375_v54 = vsel %vm247_vm0, %v183_v39, %v311_v50  ;;  %vm250_vm3 = vcmp.gt.f32.partialorder %v186_v46, 0.0  ;;  %v314_v55 = vmul.f32 0.1, %v186_v46  ;;  %v53_v42 = vld [vmem:[%s1565_s0 + $0x120] sm:$0xff]  ;;  %v448_v50 = vld [vmem:[%s1568_s1 + $0x108] sm:$0xff] }
  0x3f   :  { %758 = vst [vmem:[%s1569_s4 + $0xb8] sm:$0xff] %v694_v53  ;;  %v503_v57 = vadd.f32 %v439_v43, %v375_v54  ;;  %v376_v58 = vsel %vm248_vm1, %v184_v40, %v312_v51  ;;  %v377_v59 = vsel %vm249_vm2, %v185_v41, %v313_v52  ;;  %v188_v0 = vadd.f32 %v843_v2, %v117_v48  ;;  %v52_v41 = vld [vmem:[%s1565_s0 + $0x118] sm:$0xff] }
  0x40   :  { %v504_v61 = vadd.f32 %v440_v44, %v376_v58  ;;  %v505_v62 = vadd.f32 %v441_v45, %v377_v59  ;;  %v378_v63 = vsel %vm250_vm3, %v186_v46, %v314_v55  ;;  %vm251_vm5 = vcmp.gt.f32.partialorder %v187_v60, 0.0  ;;  %v447_v46 = vld [vmem:[%s1568_s1 + $0x100] sm:$0xff] }
  0x41   :  { %vm567_vm4 = vcmp.gt.f32.partialorder %v503_v57, 0.0  ;;  %v631_v4 = vmul.f32 0.1, %v503_v57  ;;  %v506_v5 = vadd.f32 %v442_v56, %v378_v63  ;;  %v315_v13 = vmul.f32 0.1, %v187_v60 }
  0x42   :  { %vm568_vm6 = vcmp.gt.f32.partialorder %v504_v61, 0.0  ;;  %v632_v9 = vmul.f32 0.1, %v504_v61  ;;  %vm569_vm7 = vcmp.gt.f32.partialorder %v505_v62, 0.0  ;;  %v633_v10 = vmul.f32 0.1, %v505_v62 }
  0x43   :  { %v695_v11 = vsel %vm567_vm4, %v503_v57, %v631_v4  ;;  %vm570_vm8 = vcmp.gt.f32.partialorder %v506_v5, 0.0  ;;  %v634_v12 = vmul.f32 0.1, %v506_v5  ;;  %vm252_vm9 = vcmp.gt.f32.partialorder %v188_v0, 0.0 }
  0x44   :  { %759 = vst [vmem:[%s1569_s4 + $0xc0] sm:$0xff] %v695_v11  ;;  %v696_v15 = vsel %vm568_vm6, %v504_v61, %v632_v9  ;;  %v697_v16 = vsel %vm569_vm7, %v505_v62, %v633_v10  ;;  %v316_v17 = vmul.f32 0.1, %v188_v0  ;;  %v379_v21 = vsel %vm251_vm5, %v187_v60, %v315_v13  ;;  %v54_v61 = vld [vmem:[%s1565_s0 + $0x128] sm:$0xff] }
  0x45   :  { %760 = vst [vmem:[%s1569_s4 + $0xc8] sm:$0xff] %v696_v15  ;;  %761 = vst [vmem:[%s1569_s4 + $0xd0] sm:$0xff] %v697_v16  ;;  %v698_v20 = vsel %vm570_vm8, %v506_v5, %v634_v12  ;;  %v118_v22 = vmul.f32 %v838_v1, %v47_v3  ;;  %v119_v23 = vmul.f32 %v838_v1, %v48_v7  ;;  %v449_v3 = vld [vmem:[%s1568_s1 + $0x110] sm:$0xff]  ;;  %v56_v12 = vld [vmem:[%s1565_s0 + $0x138] sm:$0xff] }
  0x46   :  { %762 = vst [vmem:[%s1569_s4 + $0xd8] sm:$0xff] %v698_v20  ;;  %v507_v24 = vadd.f32 %v443_v6, %v379_v21  ;;  %v380_v25 = vsel %vm252_vm9, %v188_v0, %v316_v17  ;;  %v120_v26 = vmul.f32 %v838_v1, %v49_v8  ;;  %v121_v27 = vmul.f32 %v838_v1, %v50_v14  ;;  %v55_v7 = vld [vmem:[%s1565_s0 + $0x130] sm:$0xff]  ;;  %v450_v16 = vld [vmem:[%s1568_s1 + $0x118] sm:$0xff] }
  0x47   :  { %v508_v28 = vadd.f32 %v444_v18, %v380_v25  ;;  %v189_v29 = vadd.f32 %v843_v2, %v118_v22  ;;  %v190_v30 = vadd.f32 %v843_v2, %v119_v23  ;;  %v122_v31 = vmul.f32 %v838_v1, %v51_v19  ;;  %v451_v18 = vld [vmem:[%s1568_s1 + $0x120] sm:$0xff] }
  0x48   :  { %vm571_vm10 = vcmp.gt.f32.partialorder %v507_v24, 0.0  ;;  %v635_v32 = vmul.f32 0.1, %v507_v24  ;;  %v191_v35 = vadd.f32 %v843_v2, %v120_v26  ;;  %v192_v36 = vadd.f32 %v843_v2, %v121_v27 }
  0x49   :  { %vm572_vm11 = vcmp.gt.f32.partialorder %v508_v28, 0.0  ;;  %v636_v37 = vmul.f32 0.1, %v508_v28  ;;  %vm253_vm12 = vcmp.gt.f32.partialorder %v189_v29, 0.0  ;;  %v317_v38 = vmul.f32 0.1, %v189_v29 }
  0x4a   :  { %v699_v39 = vsel %vm571_vm10, %v507_v24, %v635_v32  ;;  %vm254_vm13 = vcmp.gt.f32.partialorder %v190_v30, 0.0  ;;  %v318_v40 = vmul.f32 0.1, %v190_v30  ;;  %vm255_vm14 = vcmp.gt.f32.partialorder %v191_v35, 0.0  ;;  %v57_v24 = vld [vmem:[%s1565_s0 + $0x140] sm:$0xff] }
  0x4b   :  { %763 = vst [vmem:[%s1569_s4 + $0xe0] sm:$0xff] %v699_v39  ;;  %v700_v43 = vsel %vm572_vm11, %v508_v28, %v636_v37  ;;  %v381_v44 = vsel %vm253_vm12, %v189_v29, %v317_v38  ;;  %v319_v45 = vmul.f32 0.1, %v191_v35  ;;  %vm256_vm15 = vcmp.gt.f32.partialorder %v192_v36, 0.0  ;;  %v452_v28 = vld [vmem:[%s1568_s1 + $0x128] sm:$0xff] }
  0x4c   :  { %764 = vst [vmem:[%s1569_s4 + $0xe8] sm:$0xff] %v700_v43  ;;  %v509_v47 = vadd.f32 %v445_v33, %v381_v44  ;;  %v382_v48 = vsel %vm254_vm13, %v190_v30, %v318_v40  ;;  %v320_v49 = vmul.f32 0.1, %v192_v36  ;;  %v193_v51 = vadd.f32 %v843_v2, %v122_v31  ;;  %v58_v39 = vld [vmem:[%s1565_s0 + $0x148] sm:$0xff]  ;;  %v59_v40 = vld [vmem:[%s1565_s0 + $0x150] sm:$0xff]  ;;  %v454_v44 = vld [vmem:[%s1568_s1 + $0x138] sm:$0xff] }
  0x4d   :  { %v510_v52 = vadd.f32 %v446_v34, %v382_v48  ;;  %v383_v53 = vsel %vm255_vm14, %v191_v35, %v319_v45  ;;  %v123_v54 = vmul.f32 %v838_v1, %v52_v41  ;;  %v124_v55 = vmul.f32 %v838_v1, %v53_v42  ;;  %v453_v35 = vld [vmem:[%s1568_s1 + $0x130] sm:$0xff]  ;;  %v60_v48 = vld [vmem:[%s1565_s0 + $0x158] sm:$0xff] }
  0x4e   :  { %vm573_vm0 = vcmp.gt.f32.partialorder %v509_v47, 0.0  ;;  %v637_v56 = vmul.f32 0.1, %v509_v47  ;;  %v511_v57 = vadd.f32 %v447_v46, %v383_v53  ;;  %v384_v58 = vsel %vm256_vm15, %v192_v36, %v320_v49 }
  0x4f   :  { %vm574_vm1 = vcmp.gt.f32.partialorder %v510_v52, 0.0  ;;  %v638_v59 = vmul.f32 0.1, %v510_v52  ;;  %v512_v60 = vadd.f32 %v448_v50, %v384_v58  ;;  %vm257_vm2 = vcmp.gt.f32.partialorder %v193_v51, 0.0 }
  0x50   :  { %v701_v62 = vsel %vm573_vm0, %v509_v47, %v637_v56  ;;  %vm575_vm3 = vcmp.gt.f32.partialorder %v511_v57, 0.0  ;;  %v639_v63 = vmul.f32 0.1, %v511_v57  ;;  %v321_v0 = vmul.f32 0.1, %v193_v51 }
  0x51   :  { %765 = vst [vmem:[%s1569_s4 + $0xf0] sm:$0xff] %v701_v62  ;;  %v702_v4 = vsel %vm574_vm1, %v510_v52, %v638_v59  ;;  %vm576_vm4 = vcmp.gt.f32.partialorder %v512_v60, 0.0  ;;  %v640_v5 = vmul.f32 0.1, %v512_v60  ;;  %v194_v6 = vadd.f32 %v843_v2, %v123_v54  ;;  %v62_v62 = vld [vmem:[%s1565_s0 + $0x168] sm:$0xff] }
  0x52   :  { %766 = vst [vmem:[%s1569_s4 + $0xf8] sm:$0xff] %v702_v4  ;;  %v703_v8 = vsel %vm575_vm3, %v511_v57, %v639_v63  ;;  %v385_v9 = vsel %vm257_vm2, %v193_v51, %v321_v0  ;;  %v195_v10 = vadd.f32 %v843_v2, %v124_v55  ;;  %v125_v11 = vmul.f32 %v838_v1, %v54_v61  ;;  %v455_v57 = vld [vmem:[%s1568_s1 + $0x140] sm:$0xff] }
  0x53   :  { %767 = vst [vmem:[%s1569_s4 + $0x100] sm:$0xff] %v703_v8  ;;  %v704_v13 = vsel %vm576_vm4, %v512_v60, %v640_v5  ;;  %v513_v14 = vadd.f32 %v449_v3, %v385_v9  ;;  %vm258_vm5 = vcmp.gt.f32.partialorder %v194_v6, 0.0  ;;  %v322_v15 = vmul.f32 0.1, %v194_v6  ;;  %v61_v61 = vld [vmem:[%s1565_s0 + $0x160] sm:$0xff]  ;;  %v456_v5 = vld [vmem:[%s1568_s1 + $0x148] sm:$0xff] }
  0x54   :  { %768 = vst [vmem:[%s1569_s4 + $0x108] sm:$0xff] %v704_v13  ;;  %vm259_vm6 = vcmp.gt.f32.partialorder %v195_v10, 0.0  ;;  %v323_v17 = vmul.f32 0.1, %v195_v10  ;;  %v196_v19 = vadd.f32 %v843_v2, %v125_v11  ;;  %v126_v20 = vmul.f32 %v838_v1, %v55_v7 }
  0x55   :  { %vm577_vm7 = vcmp.gt.f32.partialorder %v513_v14, 0.0  ;;  %v641_v21 = vmul.f32 0.1, %v513_v14  ;;  %v386_v22 = vsel %vm258_vm5, %v194_v6, %v322_v15  ;;  %v127_v23 = vmul.f32 %v838_v1, %v56_v12 }
  0x56   :  { %v514_v25 = vadd.f32 %v450_v16, %v386_v22  ;;  %v387_v26 = vsel %vm259_vm6, %v195_v10, %v323_v17  ;;  %vm260_vm8 = vcmp.gt.f32.partialorder %v196_v19, 0.0  ;;  %v324_v27 = vmul.f32 0.1, %v196_v19  ;;  %v457_v10 = vld [vmem:[%s1568_s1 + $0x150] sm:$0xff] }
  0x57   :  { %v705_v29 = vsel %vm577_vm7, %v513_v14, %v641_v21  ;;  %v515_v30 = vadd.f32 %v451_v18, %v387_v26  ;;  %v197_v31 = vadd.f32 %v843_v2, %v126_v20  ;;  %v198_v32 = vadd.f32 %v843_v2, %v127_v23  ;;  %v458_v20 = vld [vmem:[%s1568_s1 + $0x158] sm:$0xff]  ;;  %v1332_v21 = vld [vmem:[%s1567_s3] ss:$0 sm:$0xff] }
  0x58   :  { %769 = vst [vmem:[%s1569_s4 + $0x110] sm:$0xff] %v705_v29  ;;  %vm578_vm9 = vcmp.gt.f32.partialorder %v514_v25, 0.0  ;;  %v642_v33 = vmul.f32 0.1, %v514_v25  ;;  %v388_v34 = vsel %vm260_vm8, %v196_v19, %v324_v27  ;;  %v128_v36 = vmul.f32 %v838_v1, %v57_v24  ;;  %v63_v24 = vld [vmem:[%s1565_s0 + $0x170] sm:$0xff] }
  0x59   :  { %vm579_vm10 = vcmp.gt.f32.partialorder %v515_v30, 0.0  ;;  %v643_v37 = vmul.f32 0.1, %v515_v30  ;;  %v516_v38 = vadd.f32 %v452_v28, %v388_v34  ;;  %vm261_vm11 = vcmp.gt.f32.partialorder %v197_v31, 0.0  ;;  %v65_v28 = vld [vmem:[%s1565_s0 + $0x180] sm:$0xff] }
  0x5a   :  { %v706_v41 = vsel %vm578_vm9, %v514_v25, %v642_v33  ;;  %v325_v42 = vmul.f32 0.1, %v197_v31  ;;  %vm262_vm12 = vcmp.gt.f32.partialorder %v198_v32, 0.0  ;;  %v326_v43 = vmul.f32 0.1, %v198_v32  ;;  %v64_v25 = vld [vmem:[%s1565_s0 + $0x178] sm:$0xff] }
  0x5b   :  { %770 = vst [vmem:[%s1569_s4 + $0x118] sm:$0xff] %v706_v41  ;;  %v707_v45 = vsel %vm579_vm10, %v515_v30, %v643_v37  ;;  %vm580_vm13 = vcmp.gt.f32.partialorder %v516_v38, 0.0  ;;  %v644_v46 = vmul.f32 0.1, %v516_v38  ;;  %v199_v47 = vadd.f32 %v843_v2, %v128_v36  ;;  %v1360_v36 = vld [vmem:[%s1566_s2] ss:$0 sm:$0xff] }
  0x5c   :  { %771 = vst [vmem:[%s1569_s4 + $0x120] sm:$0xff] %v707_v45  ;;  %v389_v49 = vsel %vm261_vm11, %v197_v31, %v325_v42  ;;  %v390_v50 = vsel %vm262_vm12, %v198_v32, %v326_v43  ;;  %v129_v51 = vmul.f32 %v838_v1, %v58_v39  ;;  %v130_v52 = vmul.f32 %v838_v1, %v59_v40  ;;  %v459_v32 = vld [vmem:[%s1568_s1 + $0x160] sm:$0xff]  ;;  %v66_v39 = vld [vmem:[%s1565_s0 + $0x188] sm:$0xff] }
  0x5d   :  { %v708_v53 = vsel %vm580_vm13, %v516_v38, %v644_v46  ;;  %v517_v54 = vadd.f32 %v453_v35, %v389_v49  ;;  %v518_v55 = vadd.f32 %v454_v44, %v390_v50  ;;  %vm263_vm14 = vcmp.gt.f32.partialorder %v199_v47, 0.0  ;;  %v460_v35 = vld [vmem:[%s1568_s1 + $0x168] sm:$0xff]  ;;  %v461_v46 = vld [vmem:[%s1568_s1 + $0x170] sm:$0xff]  ;;  %v462_v50 = vld [vmem:[%s1568_s1 + $0x178] sm:$0xff] }
  0x5e   :  { %772 = vst [vmem:[%s1569_s4 + $0x128] sm:$0xff] %v708_v53  ;;  %v327_v56 = vmul.f32 0.1, %v199_v47  ;;  %v200_v58 = vadd.f32 %v843_v2, %v129_v51  ;;  %v201_v59 = vadd.f32 %v843_v2, %v130_v52  ;;  %v131_v60 = vmul.f32 %v838_v1, %v60_v48  ;;  %v67_v53 = vld [vmem:[%s1565_s0 + $0x190] sm:$0xff] }
  0x5f   :  { %vm581_vm15 = vcmp.gt.f32.partialorder %v517_v54, 0.0  ;;  %v645_v63 = vmul.f32 0.1, %v517_v54  ;;  %vm582_vm0 = vcmp.gt.f32.partialorder %v518_v55, 0.0  ;;  %v646_v0 = vmul.f32 0.1, %v518_v55 }
  0x60   :  { %v391_v3 = vsel %vm263_vm14, %v199_v47, %v327_v56  ;;  %vm264_vm1 = vcmp.gt.f32.partialorder %v200_v58, 0.0  ;;  %v328_v4 = vmul.f32 0.1, %v200_v58  ;;  %vm265_vm2 = vcmp.gt.f32.partialorder %v201_v59, 0.0 }
  0x61   :  { %v709_v6 = vsel %vm581_vm15, %v517_v54, %v645_v63  ;;  %v710_v7 = vsel %vm582_vm0, %v518_v55, %v646_v0  ;;  %v519_v8 = vadd.f32 %v455_v57, %v391_v3  ;;  %v329_v9 = vmul.f32 0.1, %v201_v59  ;;  %v68_v54 = vld [vmem:[%s1565_s0 + $0x198] sm:$0xff] }
  0x62   :  { %773 = vst [vmem:[%s1569_s4 + $0x130] sm:$0xff] %v709_v6  ;;  %774 = vst [vmem:[%s1569_s4 + $0x138] sm:$0xff] %v710_v7  ;;  %v392_v11 = vsel %vm264_vm1, %v200_v58, %v328_v4  ;;  %v202_v12 = vadd.f32 %v843_v2, %v131_v60  ;;  %v132_v13 = vmul.f32 %v838_v1, %v61_v61 }
  0x63   :  { %v133_v14 = vmul.f32 %v838_v1, %v62_v62  ;;  %vm583_vm3 = vcmp.gt.f32.partialorder %v519_v8, 0.0  ;;  %v647_v15 = vmul.f32 0.1, %v519_v8  ;;  %v520_v16 = vadd.f32 %v456_v5, %v392_v11  ;;  %v463_v62 = vld [vmem:[%s1568_s1 + $0x180] sm:$0xff] }
  0x64   :  { %v393_v17 = vsel %vm265_vm2, %v201_v59, %v329_v9  ;;  %vm266_vm4 = vcmp.gt.f32.partialorder %v202_v12, 0.0  ;;  %v330_v19 = vmul.f32 0.1, %v202_v12  ;;  %v203_v2 = vadd.f32 %v1332_v21, %v132_v13  ;;  %v464_v13 = vld [vmem:[%s1568_s1 + $0x188] sm:$0xff] }
  0x65   :  { %v521_v18 = vadd.f32 %v457_v10, %v393_v17  ;;  %v711_v22 = vsel %vm583_vm3, %v519_v8, %v647_v15  ;;  %vm584_vm5 = vcmp.gt.f32.partialorder %v520_v16, 0.0  ;;  %v648_v1 = vmul.f32 0.1, %v520_v16 }
  0x66   :  { %v204_v23 = vadd.f32 %v1332_v21, %v133_v14  ;;  %775 = vst [vmem:[%s1569_s4 + $0x140] sm:$0xff] %v711_v22  ;;  %v394_v27 = vsel %vm266_vm4, %v202_v12, %v330_v19  ;;  %vm267_vm7 = vcmp.gt.f32.partialorder %v203_v2, 0.0  ;;  %v331_v31 = vmul.f32 0.1, %v203_v2  ;;  %v70_v19 = vld [vmem:[%s1565_s0 + $0x1a8] sm:$0xff] }
  0x67   :  { %vm585_vm6 = vcmp.gt.f32.partialorder %v521_v18, 0.0  ;;  %v649_v26 = vmul.f32 0.1, %v521_v18  ;;  %v712_v29 = vsel %vm584_vm5, %v520_v16, %v648_v1  ;;  %v522_v30 = vadd.f32 %v458_v20, %v394_v27  ;;  %v71_v20 = vld [vmem:[%s1565_s0 + $0x1b0] sm:$0xff]  ;;  %v466_v27 = vld [vmem:[%s1568_s1 + $0x198] sm:$0xff] }
  0x68   :  { %vm268_vm8 = vcmp.gt.f32.partialorder %v204_v23, 0.0  ;;  %776 = vst [vmem:[%s1569_s4 + $0x148] sm:$0xff] %v712_v29  ;;  %v332_v34 = vmul.f32 0.1, %v204_v23  ;;  %v134_v37 = vmul.f32 %v1360_v36, %v63_v24  ;;  %v135_v38 = vmul.f32 %v1360_v36, %v64_v25 }
  0x69   :  { %v713_v33 = vsel %vm585_vm6, %v521_v18, %v649_v26  ;;  %vm586_vm9 = vcmp.gt.f32.partialorder %v522_v30, 0.0  ;;  %v650_v40 = vmul.f32 0.1, %v522_v30  ;;  %v395_v41 = vsel %vm267_vm7, %v203_v2, %v331_v31  ;;  %v69_v18 = vld [vmem:[%s1565_s0 + $0x1a0] sm:$0xff] }
  0x6a   :  { %777 = vst [vmem:[%s1569_s4 + $0x150] sm:$0xff] %v713_v33  ;;  %v136_v42 = vmul.f32 %v1360_v36, %v65_v28  ;;  %v523_v43 = vadd.f32 %v459_v32, %v395_v41  ;;  %v396_v44 = vsel %vm268_vm8, %v204_v23, %v332_v34  ;;  %v205_v45 = vadd.f32 %v1332_v21, %v134_v37  ;;  %v465_v23 = vld [vmem:[%s1568_s1 + $0x190] sm:$0xff]  ;;  %v72_v32 = vld [vmem:[%s1565_s0 + $0x1b8] sm:$0xff] }
  0x6b   :  { %v206_v47 = vadd.f32 %v1332_v21, %v135_v38  ;;  %v714_v48 = vsel %vm586_vm9, %v522_v30, %v650_v40  ;;  %v524_v49 = vadd.f32 %v460_v35, %v396_v44  ;;  %v137_v52 = vmul.f32 %v1360_v36, %v66_v39 }
  0x6c   :  { %v207_v51 = vadd.f32 %v1332_v21, %v136_v42  ;;  %778 = vst [vmem:[%s1569_s4 + $0x158] sm:$0xff] %v714_v48  ;;  %vm587_vm10 = vcmp.gt.f32.partialorder %v523_v43, 0.0  ;;  %v651_v55 = vmul.f32 0.1, %v523_v43  ;;  %vm269_vm11 = vcmp.gt.f32.partialorder %v205_v45, 0.0 }
  0x6d   :  { %v333_v56 = vmul.f32 0.1, %v205_v45  ;;  %vm588_vm12 = vcmp.gt.f32.partialorder %v524_v49, 0.0  ;;  %v652_v57 = vmul.f32 0.1, %v524_v49  ;;  %vm270_vm13 = vcmp.gt.f32.partialorder %v206_v47, 0.0 }
  0x6e   :  { %v334_v58 = vmul.f32 0.1, %v206_v47  ;;  %v715_v59 = vsel %vm587_vm10, %v523_v43, %v651_v55  ;;  %vm271_vm14 = vcmp.gt.f32.partialorder %v207_v51, 0.0  ;;  %v335_v61 = vmul.f32 0.1, %v207_v51  ;;  %v467_v43 = vld [vmem:[%s1568_s1 + $0x1a0] sm:$0xff] }
  0x6f   :  { %v397_v60 = vsel %vm269_vm11, %v205_v45, %v333_v56  ;;  %779 = vst [vmem:[%s1569_s4 + $0x160] sm:$0xff] %v715_v59  ;;  %v716_v63 = vsel %vm588_vm12, %v524_v49, %v652_v57  ;;  %v208_v4 = vadd.f32 %v1332_v21, %v137_v52  ;;  %v138_v7 = vmul.f32 %v1360_v36, %v67_v53  ;;  %v73_v45 = vld [vmem:[%s1565_s0 + $0x1c0] sm:$0xff]  ;;  %v469_v55 = vld [vmem:[%s1568_s1 + $0x1b0] sm:$0xff] }
  0x70   :  { %v525_v0 = vadd.f32 %v461_v46, %v397_v60  ;;  %v398_v3 = vsel %vm270_vm13, %v206_v47, %v334_v58  ;;  %780 = vst [vmem:[%s1569_s4 + $0x168] sm:$0xff] %v716_v63  ;;  %v399_v6 = vsel %vm271_vm14, %v207_v51, %v335_v61  ;;  %v139_v8 = vmul.f32 %v1360_v36, %v68_v54  ;;  %v74_v46 = vld [vmem:[%s1565_s0 + $0x1c8] sm:$0xff] }
  0x71   :  { %v526_v5 = vadd.f32 %v462_v50, %v398_v3  ;;  %v527_v10 = vadd.f32 %v463_v62, %v399_v6  ;;  %vm272_vm0 = vcmp.gt.f32.partialorder %v208_v4, 0.0  ;;  %v336_v12 = vmul.f32 0.1, %v208_v4  ;;  %v468_v51 = vld [vmem:[%s1568_s1 + $0x1a8] sm:$0xff] }
  0x72   :  { %vm589_vm15 = vcmp.gt.f32.partialorder %v525_v0, 0.0  ;;  %v653_v9 = vmul.f32 0.1, %v525_v0  ;;  %v209_v14 = vadd.f32 %v1332_v21, %v138_v7  ;;  %v210_v17 = vadd.f32 %v1332_v21, %v139_v8 }
  0x73   :  { %vm590_vm1 = vcmp.gt.f32.partialorder %v526_v5, 0.0  ;;  %v654_v11 = vmul.f32 0.1, %v526_v5  ;;  %vm591_vm2 = vcmp.gt.f32.partialorder %v527_v10, 0.0  ;;  %v655_v16 = vmul.f32 0.1, %v527_v10 }
  0x74   :  { %v717_v15 = vsel %vm589_vm15, %v525_v0, %v653_v9  ;;  %v400_v22 = vsel %vm272_vm0, %v208_v4, %v336_v12  ;;  %vm273_vm3 = vcmp.gt.f32.partialorder %v209_v14, 0.0  ;;  %v337_v1 = vmul.f32 0.1, %v209_v14  ;;  %v470_v0 = vld [vmem:[%s1568_s1 + $0x1b8] sm:$0xff]  ;;  %v75_v12 = vld [vmem:[%s1565_s0 + $0x1d0] sm:$0xff] }
  0x75   :  { %781 = vst [vmem:[%s1569_s4 + $0x170] sm:$0xff] %v717_v15  ;;  %v718_v2 = vsel %vm590_vm1, %v526_v5, %v654_v11  ;;  %v719_v24 = vsel %vm591_vm2, %v527_v10, %v655_v16  ;;  %v528_v25 = vadd.f32 %v464_v13, %v400_v22  ;;  %vm274_vm4 = vcmp.gt.f32.partialorder %v210_v17, 0.0  ;;  %v76_v13 = vld [vmem:[%s1565_s0 + $0x1d8] sm:$0xff]  ;;  %v472_v22 = vld [vmem:[%s1568_s1 + $0x1c8] sm:$0xff] }
  0x76   :  { %782 = vst [vmem:[%s1569_s4 + $0x178] sm:$0xff] %v718_v2  ;;  %v338_v26 = vmul.f32 0.1, %v210_v17  ;;  %783 = vst [vmem:[%s1569_s4 + $0x180] sm:$0xff] %v719_v24  ;;  %v401_v28 = vsel %vm273_vm3, %v209_v14, %v337_v1  ;;  %v140_v29 = vmul.f32 %v1360_v36, %v69_v18  ;;  %v141_v30 = vmul.f32 %v1360_v36, %v70_v19  ;;  %v77_v14 = vld [vmem:[%s1565_s0 + $0x1e0] sm:$0xff]  ;;  %v78_v18 = vld [vmem:[%s1565_s0 + $0x1e8] sm:$0xff] }
  0x77   :  { %v142_v31 = vmul.f32 %v1360_v36, %v71_v20  ;;  %vm592_vm5 = vcmp.gt.f32.partialorder %v528_v25, 0.0  ;;  %v656_v33 = vmul.f32 0.1, %v528_v25  ;;  %v529_v34 = vadd.f32 %v465_v23, %v401_v28 }
  0x78   :  { %v402_v35 = vsel %vm274_vm4, %v210_v17, %v338_v26  ;;  %v211_v38 = vadd.f32 %v1332_v21, %v140_v29  ;;  %v212_v39 = vadd.f32 %v1332_v21, %v141_v30  ;;  %v143_v44 = vmul.f32 %v1360_v36, %v72_v32  ;;  %v471_v17 = vld [vmem:[%s1568_s1 + $0x1c0] sm:$0xff]  ;;  %v79_v26 = vld [vmem:[%s1565_s0 + $0x1f0] sm:$0xff] }
  0x79   :  { %v530_v37 = vadd.f32 %v466_v27, %v402_v35  ;;  %v213_v40 = vadd.f32 %v1332_v21, %v142_v31  ;;  %v720_v41 = vsel %vm592_vm5, %v528_v25, %v656_v33  ;;  %vm593_vm6 = vcmp.gt.f32.partialorder %v529_v34, 0.0 }
  0x7a   :  { %v657_v42 = vmul.f32 0.1, %v529_v34  ;;  %784 = vst [vmem:[%s1569_s4 + $0x188] sm:$0xff] %v720_v41  ;;  %vm275_vm8 = vcmp.gt.f32.partialorder %v211_v38, 0.0  ;;  %v339_v48 = vmul.f32 0.1, %v211_v38  ;;  %v214_v56 = vadd.f32 %v1332_v21, %v143_v44 }
  0x7b   :  { %vm594_vm7 = vcmp.gt.f32.partialorder %v530_v37, 0.0  ;;  %v658_v47 = vmul.f32 0.1, %v530_v37  ;;  %vm276_vm9 = vcmp.gt.f32.partialorder %v212_v39, 0.0  ;;  %v340_v50 = vmul.f32 0.1, %v212_v39 }
  0x7c   :  { %v721_v49 = vsel %vm593_vm6, %v529_v34, %v657_v42  ;;  %vm277_vm10 = vcmp.gt.f32.partialorder %v213_v40, 0.0  ;;  %v403_v53 = vsel %vm275_vm8, %v211_v38, %v339_v48  ;;  %v341_v54 = vmul.f32 0.1, %v213_v40  ;;  %v474_v44 = vld [vmem:[%s1568_s1 + $0x1d8] sm:$0xff] }
  0x7d   :  { %785 = vst [vmem:[%s1569_s4 + $0x190] sm:$0xff] %v721_v49  ;;  %v722_v52 = vsel %vm594_vm7, %v530_v37, %v658_v47  ;;  %v531_v57 = vadd.f32 %v467_v43, %v403_v53  ;;  %v404_v58 = vsel %vm276_vm9, %v212_v39, %v340_v50  ;;  %v144_v59 = vmul.f32 %v1360_v36, %v73_v45  ;;  %v473_v37 = vld [vmem:[%s1568_s1 + $0x1d0] sm:$0xff]  ;;  %v80_v45 = vld [vmem:[%s1565_s0 + $0x1f8] sm:$0xff]  ;;  %v475_v49 = vld [vmem:[%s1568_s1 + $0x1e0] sm:$0xff] }
  0x7e   :  { %786 = vst [vmem:[%s1569_s4 + $0x198] sm:$0xff] %v722_v52  ;;  %v145_v60 = vmul.f32 %v1360_v36, %v74_v46  ;;  %v532_v61 = vadd.f32 %v468_v51, %v404_v58  ;;  %v405_v62 = vsel %vm277_vm10, %v213_v40, %v341_v54  ;;  %vm278_vm11 = vcmp.gt.f32.partialorder %v214_v56, 0.0  ;;  %v476_v53 = vld [vmem:[%s1568_s1 + $0x1e8] sm:$0xff] }
  0x7f   :  { %v342_v63 = vmul.f32 0.1, %v214_v56  ;;  %vm595_vm12 = vcmp.gt.f32.partialorder %v531_v57, 0.0  ;;  %v659_v3 = vmul.f32 0.1, %v531_v57  ;;  %v533_v4 = vadd.f32 %v469_v55, %v405_v62 }
  0x80   :  { %v215_v5 = vadd.f32 %v1332_v21, %v144_v59  ;;  %vm596_vm13 = vcmp.gt.f32.partialorder %v532_v61, 0.0  ;;  %v660_v6 = vmul.f32 0.1, %v532_v61  ;;  %v216_v8 = vadd.f32 %v1332_v21, %v145_v60 }
  0x81   :  { %v406_v7 = vsel %vm278_vm11, %v214_v56, %v342_v63  ;;  %v723_v9 = vsel %vm595_vm12, %v531_v57, %v659_v3  ;;  %vm597_vm14 = vcmp.gt.f32.partialorder %v533_v4, 0.0  ;;  %v661_v10 = vmul.f32 0.1, %v533_v4 }
  0x82   :  { %v534_v11 = vadd.f32 %v470_v0, %v406_v7  ;;  %787 = vst [vmem:[%s1569_s4 + $0x1a0] sm:$0xff] %v723_v9  ;;  %v724_v15 = vsel %vm596_vm13, %v532_v61, %v660_v6  ;;  %vm279_vm15 = vcmp.gt.f32.partialorder %v215_v5, 0.0  ;;  %v343_v16 = vmul.f32 0.1, %v215_v5 }
  0x83   :  { %vm280_vm0 = vcmp.gt.f32.partialorder %v216_v8, 0.0  ;;  %788 = vst [vmem:[%s1569_s4 + $0x1a8] sm:$0xff] %v724_v15  ;;  %v725_v19 = vsel %vm597_vm14, %v533_v4, %v661_v10  ;;  %v344_v2 = vmul.f32 0.1, %v216_v8  ;;  %v146_v23 = vmul.f32 %v1360_v36, %v75_v12  ;;  %v477_v4 = vld [vmem:[%s1568_s1 + $0x1f0] sm:$0xff]  ;;  %v478_v12 = vld [vmem:[%s1568_s1 + $0x1f8] sm:$0xff] }
  0x84   :  { %vm598_vm1 = vcmp.gt.f32.partialorder %v534_v11, 0.0  ;;  %v662_v20 = vmul.f32 0.1, %v534_v11  ;;  %789 = vst [vmem:[%s1569_s4 + $0x1b0] sm:$0xff] %v725_v19  ;;  %v407_v1 = vsel %vm279_vm15, %v215_v5, %v343_v16  ;;  %v147_v24 = vmul.f32 %v1360_v36, %v76_v13 }
  0x85   :  { %v148_v25 = vmul.f32 %v1360_v36, %v77_v14  ;;  %v535_v28 = vadd.f32 %v471_v17, %v407_v1  ;;  %v408_v29 = vsel %vm280_vm0, %v216_v8, %v344_v2  ;;  %v149_v30 = vmul.f32 %v1360_v36, %v78_v18 }
  0x86   :  { %v726_v27 = vsel %vm598_vm1, %v534_v11, %v662_v20  ;;  %v536_v31 = vadd.f32 %v472_v22, %v408_v29  ;;  %v217_v32 = vadd.f32 %v1332_v21, %v146_v23  ;;  %v218_v33 = vadd.f32 %v1332_v21, %v147_v24 }
  0x87   :  { %790 = vst [vmem:[%s1569_s4 + $0x1b8] sm:$0xff] %v726_v27  ;;  %v219_v34 = vadd.f32 %v1332_v21, %v148_v25  ;;  %vm599_vm2 = vcmp.gt.f32.partialorder %v535_v28, 0.0  ;;  %v663_v35 = vmul.f32 0.1, %v535_v28  ;;  %v220_v38 = vadd.f32 %v1332_v21, %v149_v30 }
  0x88   :  { %v150_v39 = vmul.f32 %v1360_v36, %v79_v26  ;;  %vm600_vm3 = vcmp.gt.f32.partialorder %v536_v31, 0.0  ;;  %v664_v40 = vmul.f32 0.1, %v536_v31  ;;  %vm281_vm4 = vcmp.gt.f32.partialorder %v217_v32, 0.0 }
  0x89   :  { %v345_v41 = vmul.f32 0.1, %v217_v32  ;;  %v727_v42 = vsel %vm599_vm2, %v535_v28, %v663_v35  ;;  %vm282_vm5 = vcmp.gt.f32.partialorder %v218_v33, 0.0  ;;  %v346_v43 = vmul.f32 0.1, %v218_v33 }
  0x8a   :  { %vm283_vm6 = vcmp.gt.f32.partialorder %v219_v34, 0.0  ;;  %791 = vst [vmem:[%s1569_s4 + $0x1c0] sm:$0xff] %v727_v42  ;;  %v728_v46 = vsel %vm600_vm3, %v536_v31, %v664_v40  ;;  %v347_v48 = vmul.f32 0.1, %v219_v34  ;;  %vm284_vm7 = vcmp.gt.f32.partialorder %v220_v38, 0.0 }
  0x8b   :  { %v409_v47 = vsel %vm281_vm4, %v217_v32, %v345_v41  ;;  %792 = vst [vmem:[%s1569_s4 + $0x1c8] sm:$0xff] %v728_v46  ;;  %v410_v51 = vsel %vm282_vm5, %v218_v33, %v346_v43  ;;  %v348_v52 = vmul.f32 0.1, %v220_v38  ;;  %v221_v54 = vadd.f32 %v1332_v21, %v150_v39 }
  0x8c   :  { %v537_v50 = vadd.f32 %v473_v37, %v409_v47  ;;  %v538_v55 = vadd.f32 %v474_v44, %v410_v51  ;;  %v411_v56 = vsel %vm283_vm6, %v219_v34, %v347_v48  ;;  %v151_v57 = vmul.f32 %v1360_v36, %v80_v45 }
  0x8d   :  { %v539_v59 = vadd.f32 %v475_v49, %v411_v56  ;;  %v412_v60 = vsel %vm284_vm7, %v220_v38, %v348_v52  ;;  %vm285_vm10 = vcmp.gt.f32.partialorder %v221_v54, 0.0  ;;  %v349_v3 = vmul.f32 0.1, %v221_v54 }
  0x8e   :  { %vm601_vm8 = vcmp.gt.f32.partialorder %v537_v50, 0.0  ;;  %v665_v58 = vmul.f32 0.1, %v537_v50  ;;  %vm602_vm9 = vcmp.gt.f32.partialorder %v538_v55, 0.0  ;;  %v666_v61 = vmul.f32 0.1, %v538_v55 }
  0x8f   :  { %v540_v62 = vadd.f32 %v476_v53, %v412_v60  ;;  %vm603_vm11 = vcmp.gt.f32.partialorder %v539_v59, 0.0  ;;  %v667_v0 = vmul.f32 0.1, %v539_v59  ;;  %v222_v6 = vadd.f32 %v1332_v21, %v151_v57 }
  0x90   :  { %v729_v63 = vsel %vm601_vm8, %v537_v50, %v665_v58  ;;  %v730_v36 = vsel %vm602_vm9, %v538_v55, %v666_v61  ;;  %v413_v8 = vsel %vm285_vm10, %v221_v54, %v349_v3 }
  0x91   :  { %793 = vst [vmem:[%s1569_s4 + $0x1d0] sm:$0xff] %v729_v63  ;;  %vm604_vm12 = vcmp.gt.f32.partialorder %v540_v62, 0.0  ;;  %v668_v5 = vmul.f32 0.1, %v540_v62  ;;  %794 = vst [vmem:[%s1569_s4 + $0x1d8] sm:$0xff] %v730_v36  ;;  %v731_v7 = vsel %vm603_vm11, %v539_v59, %v667_v0  ;;  %v541_v10 = vadd.f32 %v477_v4, %v413_v8 }
  0x92   :  { %795 = vst [vmem:[%s1569_s4 + $0x1e0] sm:$0xff] %v731_v7  ;;  %vm286_vm13 = vcmp.gt.f32.partialorder %v222_v6, 0.0  ;;  %v350_v11 = vmul.f32 0.1, %v222_v6 }
  0x93   :  { %v732_v9 = vsel %vm604_vm12, %v540_v62, %v668_v5  ;;  %vm605_vm14 = vcmp.gt.f32.partialorder %v541_v10, 0.0  ;;  %v669_v21 = vmul.f32 0.1, %v541_v10 }
  0x94   :  { %796 = vst [vmem:[%s1569_s4 + $0x1e8] sm:$0xff] %v732_v9  ;;  %v414_v13 = vsel %vm286_vm13, %v222_v6, %v350_v11 }
  0x95   :  { %v542_v14 = vadd.f32 %v478_v12, %v414_v13  ;;  %v733_v15 = vsel %vm605_vm14, %v541_v10, %v669_v21 }
  0x96   :  { %797 = vst [vmem:[%s1569_s4 + $0x1f0] sm:$0xff] %v733_v15 }
  0x97   :  { %vm606_vm15 = vcmp.gt.f32.partialorder %v542_v14, 0.0  ;;  %v670_v16 = vmul.f32 0.1, %v542_v14 }
  0x99   :  { %v734_v17 = vsel %vm606_vm15, %v542_v14, %v670_v16 }
  0x9a   :  { %798 = vst [vmem:[%s1569_s4 + $0x1f8] sm:$0xff] %v734_v17 }

</bundles_post_ra>
